<compile_context>
chip_gen: v5e
topology: v5e:2x2
jax: 0.10.0
libtpu: 0.0.40
codegen_flags: <defaults>
</compile_context>

<pallas_src>
import numpy as np
import jax
import jax.numpy as jnp
from jax.experimental import pallas as pl
from jax.experimental.pallas import tpu as pltpu


# ----------------------------------------------------------------------------
# Generation-aware tile defaults (v5e has a 128x128 MXU; v6e/v7x are 256-wide)
# ----------------------------------------------------------------------------
def _default_mxu_tile():
    try:
        kind = jax.devices()[0].device_kind.lower()
    except Exception:
        return 256
    if "v5 lite" in kind or "v5e" in kind or "v5lite" in kind:
        return 128
    return 256


_MXU_TILE = _default_mxu_tile()


def _round_up(x, m):
    return ((x + m - 1) // m) * m


# ----------------------------------------------------------------------------
# Pallas GEMM kernels (bf16 MXU inputs, f32 VMEM accumulator, fused epilogues)
# ----------------------------------------------------------------------------
def _gemm_bias_kernel(a_ref, b_ref, bias_ref, o_ref, acc_ref):
    k = pl.program_id(2)

    @pl.when(k == 0)
    def _init():
        acc_ref[...] = jnp.zeros_like(acc_ref)

    acc_ref[...] += jnp.dot(a_ref[...], b_ref[...],
                            preferred_element_type=jnp.float32)

    @pl.when(k == pl.num_programs(2) - 1)
    def _store():
        o_ref[...] = (acc_ref[...] + bias_ref[...]).astype(o_ref.dtype)


def _gemm_bias_relu_kernel(a_ref, b_ref, bias_ref, o_ref, acc_ref):
    k = pl.program_id(2)

    @pl.when(k == 0)
    def _init():
        acc_ref[...] = jnp.zeros_like(acc_ref)

    acc_ref[...] += jnp.dot(a_ref[...], b_ref[...],
                            preferred_element_type=jnp.float32)

    @pl.when(k == pl.num_programs(2) - 1)
    def _store():
        o_ref[...] = jnp.maximum(acc_ref[...] + bias_ref[...], 0.0).astype(o_ref.dtype)


def _gemm_bias_res_relu_kernel(a_ref, b_ref, bias_ref, res_ref, o_ref, acc_ref):
    # conv2 + folded BN + residual add + ReLU of a BasicBlock, fully fused.
    k = pl.program_id(2)

    @pl.when(k == 0)
    def _init():
        acc_ref[...] = jnp.zeros_like(acc_ref)

    acc_ref[...] += jnp.dot(a_ref[...], b_ref[...],
                            preferred_element_type=jnp.float32)

    @pl.when(k == pl.num_programs(2) - 1)
    def _store():
        pre = acc_ref[...] + bias_ref[...] + res_ref[...].astype(jnp.float32)
        o_ref[...] = jnp.maximum(pre, 0.0).astype(o_ref.dtype)


def pallas_matmul_bias(a, b, bias, *, apply_relu=False, residual=None,
                       out_dtype=jnp.float32):
    """o = epilogue(a @ b + bias).  a:(M,K)  b:(K,N) bf16  bias:(N,) f32.

    epilogue = identity / ReLU / (+residual, ReLU).  Tiled K-accumulating GEMM
    with bf16 MXU inputs, f32 VMEM accumulator, lane-dense padded N, configurable
    output dtype (bf16 for intermediate conv activations).
    """
    M, K = a.shape
    K2, N = b.shape
    assert K == K2
    if residual is not None:
        assert residual.shape == (M, N)

    tm = min(_MXU_TILE, _round_up(M, 16))       # bf16 packs 2 rows/sublane
    tn = min(_MXU_TILE, _round_up(N, 128))
    Mp = _round_up(M, tm)
    Np = _round_up(N, tn)

    # v7x megacore: make sure there are >=2 parallel output tiles when possible.
    if Mp // tm == 1 and Np // tn == 1:
        if Np >= 256 and (Np // 2) % 128 == 0:
            tn = Np // 2
        elif Mp >= 32 and (Mp // 2) % 16 == 0:
            tm = Mp // 2

    # Largest K tile (multiple of 128, <= 1024) that divides Kp; single step when
    # Kp <= 1024 — fewer grid steps, longer MXU runs, bigger DMA bursts.
    Kp = _round_up(K, 128)
    tk = 128
    for t in range(min(Kp, 1024), 127, -128):
        if Kp % t == 0:
            tk = t
            break

    a_p = a if a.dtype == jnp.bfloat16 else a.astype(jnp.bfloat16)
    if (Mp, Kp) != (M, K):
        a_p = jnp.pad(a_p, ((0, Mp - M), (0, Kp - K)))
    b_p = b if b.dtype == jnp.bfloat16 else b.astype(jnp.bfloat16)
    if (Kp, Np) != (K, N):
        b_p = jnp.pad(b_p, ((0, Kp - K), (0, Np - N)))
    bias_p = bias.reshape(1, N).astype(jnp.float32)
    if Np != N:
        bias_p = jnp.pad(bias_p, ((0, 0), (0, Np - N)))

    inputs = [a_p, b_p, bias_p]
    in_specs = [
        pl.BlockSpec((tm, tk), lambda i, j, k: (i, k)),
        pl.BlockSpec((tk, tn), lambda i, j, k: (k, j)),
        pl.BlockSpec((1, tn), lambda i, j, k: (0, j)),
    ]
    if residual is not None:
        res_p = residual if residual.dtype == jnp.bfloat16 else residual.astype(jnp.bfloat16)
        if (Mp, Np) != (M, N):
            res_p = jnp.pad(res_p, ((0, Mp - M), (0, Np - N)))
        inputs.append(res_p)
        in_specs.append(pl.BlockSpec((tm, tn), lambda i, j, k: (i, j)))
        kernel = _gemm_bias_res_relu_kernel
        res_bytes = int(res_p.size) * 2
    else:
        kernel = _gemm_bias_relu_kernel if apply_relu else _gemm_bias_kernel
        res_bytes = 0

    grid = (Mp // tm, Np // tn, Kp // tk)
    n_i, n_j = grid[0], grid[1]
    flops = 2 * M * N * K
    bytes_accessed = int(a_p.size) * 2 * n_j + int(b_p.size) * 2 * n_i \
        + Mp * Np * jnp.dtype(out_dtype).itemsize \
        + int(bias_p.size) * 4 * n_i + res_bytes

    out = pl.pallas_call(
        kernel,
        out_shape=jax.ShapeDtypeStruct((Mp, Np), out_dtype),
        grid=grid,
        in_specs=in_specs,
        out_specs=pl.BlockSpec((tm, tn), lambda i, j, k: (i, j)),
        scratch_shapes=[pltpu.VMEM((tm, tn), jnp.float32)],
        compiler_params=pltpu.CompilerParams(
            dimension_semantics=("parallel", "parallel", "arbitrary")),
        cost_estimate=pl.CostEstimate(flops=int(flops), transcendentals=0,
                                      bytes_accessed=int(bytes_accessed)),
    )(*inputs)

    if (Mp, Np) != (M, N):
        out = out[:M, :N]
    return out


# ----------------------------------------------------------------------------
# Fused relation head: Linear(2F,256) -> Linear(256,num_rels) -> Sigmoid
# ----------------------------------------------------------------------------
def _head_kernel(rel_ref, w1_ref, b1_ref, w2_ref, b2_ref,
                 h1_ref, logits_ref, probs_ref):
    rel_bf = rel_ref[...].astype(jnp.bfloat16)                 # bf16 MXU inputs
    h1 = jnp.dot(rel_bf, w1_ref[...],
                 preferred_element_type=jnp.float32) + b1_ref[...]
    h1_ref[...] = h1
    logits = jnp.dot(h1.astype(jnp.bfloat16), w2_ref[...],
                     preferred_element_type=jnp.float32) + b2_ref[...]
    logits_ref[...] = logits
    # Sigmoid via EUP exp + approximate reciprocal (clamped to stay in [0,1]).
    probs = pl.reciprocal(1.0 + jnp.exp(-logits), approx=True)
    probs_ref[...] = jnp.clip(probs, 0.0, 1.0)


def pallas_head(rel, head, num_rels):
    """Fused output head.  rel:(R, 2F) f32, head weights bf16 / padded."""
    R, D = rel.shape
    H = head["w1t"].shape[1]
    Op = head["w2t"].shape[1]              # num_rels padded to a multiple of 128
    Rp = _round_up(R, 8)
    rel_p = jnp.pad(rel, ((0, Rp - R), (0, 0))) if Rp != R else rel

    h1, logits, probs = pl.pallas_call(
        _head_kernel,
        out_shape=(
            jax.ShapeDtypeStruct((Rp, H), jnp.float32),
            jax.ShapeDtypeStruct((Rp, Op), jnp.float32),
            jax.ShapeDtypeStruct((Rp, Op), jnp.float32),
        ),
        grid=(1,),
        in_specs=[
            pl.BlockSpec((Rp, D), lambda i: (0, 0)),
            pl.BlockSpec((D, H), lambda i: (0, 0)),
            pl.BlockSpec((1, H), lambda i: (0, 0)),
            pl.BlockSpec((H, Op), lambda i: (0, 0)),
            pl.BlockSpec((1, Op), lambda i: (0, 0)),
        ],
        out_specs=(
            pl.BlockSpec((Rp, H), lambda i: (0, 0)),
            pl.BlockSpec((Rp, Op), lambda i: (0, 0)),
            pl.BlockSpec((Rp, Op), lambda i: (0, 0)),
        ),
        compiler_params=pltpu.CompilerParams(dimension_semantics=("arbitrary",)),
    )(rel_p, head["w1t"], head["b1"], head["w2t"], head["b2"])

    return h1[:R], logits[:R, :num_rels], probs[:R, :num_rels]


# ----------------------------------------------------------------------------
# Conv / pool glue (bf16 NHWC im2col in JAX, tiled GEMM in Pallas)
# ----------------------------------------------------------------------------
# TODO(synk): im2col patches are still materialized (in bf16) instead of folding
# the KH*KW taps into the GEMM grid, and conv1+conv2 of a block are two
# pallas_calls rather than one fused pipeline.
def conv2d_prepared(x, conv, *, fuse_relu=False, residual=None,
                    out_dtype=jnp.bfloat16):
    """x: (N,H,W,C) NHWC bf16.  conv: prepared dict with bf16 (KH*KW*C, OutC) weight.

    When `residual` (N,OH,OW,OutC) is given, the residual add + ReLU is fused
    into the GEMM epilogue.
    """
    N, H, W, C = x.shape
    KH, KW, stride, pad = conv["kh"], conv["kw"], conv["stride"], conv["pad"]
    OutC = conv["w"].shape[1]
    OH = (H + 2 * pad - KH) // stride + 1
    OW = (W + 2 * pad - KW) // stride + 1
    xp = jnp.pad(x, ((0, 0), (pad, pad), (pad, pad), (0, 0))) if pad else x
    cols = [xp[:, i:i + stride * OH:stride, j:j + stride * OW:stride, :]
            for i in range(KH) for j in range(KW)]
    patches = cols[0] if len(cols) == 1 else jnp.concatenate(cols, axis=-1)
    patches = patches.reshape(N * OH * OW, KH * KW * C)
    res2d = None
    if residual is not None:
        res2d = residual.reshape(N * OH * OW, residual.shape[-1])
    out = pallas_matmul_bias(patches, conv["w"], conv["b"],
                             apply_relu=fuse_relu, residual=res2d,
                             out_dtype=out_dtype)
    return out.reshape(N, OH, OW, OutC)


def maxpool2d_nhwc(x, ksize=3, stride=2, pad=1):
    N, H, W, C = x.shape
    xp = jnp.pad(x, ((0, 0), (pad, pad), (pad, pad), (0, 0)),
                 constant_values=-jnp.inf)
    OH = (H + 2 * pad - ksize) // stride + 1
    OW = (W + 2 * pad - ksize) // stride + 1
    out = None
    for i in range(ksize):          # pairwise max fold — no 9x stacked tensor
        for j in range(ksize):
            v = xp[:, i:i + stride * OH:stride, j:j + stride * OW:stride, :]
            out = v if out is None else jnp.maximum(out, v)
    return out


# ----------------------------------------------------------------------------
# One-time parameter preparation (fold BN, pad channels to 128 lanes, bf16-cast)
# ----------------------------------------------------------------------------
LAYER_CFG = [(64, 3, 1), (128, 4, 2), (256, 6, 2), (512, 3, 2)]   # resnet34


def _fold_bn(conv):
    """Fold eval-mode BatchNorm into the preceding (bias-free) conv."""
    bn = conv["bn"]
    scale = bn["gamma"] / jnp.sqrt(bn["var"] + 1e-5)
    w = conv["w"] * scale[:, None, None, None]
    b = bn["beta"] - bn["mean"] * scale
    return w, b


def _prepare_conv(conv, stride, pad, cin_pad_to=None, outc_pad_to=None):
    w, b = _fold_bn(conv)                                   # (OutC,Cin,KH,KW)
    OutC, Cin, KH, KW = w.shape
    if cin_pad_to is not None and cin_pad_to > Cin:         # consume 128-padded act
        w = jnp.pad(w, ((0, 0), (0, cin_pad_to - Cin), (0, 0), (0, 0)))
        Cin = cin_pad_to
    if outc_pad_to is not None and outc_pad_to > OutC:      # emit 128-padded act
        w = jnp.pad(w, ((0, outc_pad_to - OutC), (0, 0), (0, 0), (0, 0)))
        b = jnp.pad(b, (0, outc_pad_to - OutC))
        OutC = outc_pad_to
    w2d = jnp.transpose(w, (2, 3, 1, 0)).reshape(KH * KW * Cin, OutC)
    return dict(w=w2d.astype(jnp.bfloat16), b=b.astype(jnp.float32),
                kh=KH, kw=KW, stride=stride, pad=pad)


def prepare_params(params):
    # Carry a lane-dense (multiple of 128) channel dimension through the whole
    # conv stack: the 64-channel stage is zero-padded to 128 once, at prepare time.
    prepared = {"stem": _prepare_conv(params["stem"], stride=2, pad=3,
                                      outc_pad_to=_round_up(64, 128))}
    act_c = _round_up(64, 128)
    layers = []
    for blocks, (out_c, _, stride) in zip(params["layers"], LAYER_CFG):
        out_cp = _round_up(out_c, 128)
        pblocks = []
        for bi, blk in enumerate(blocks):
            s = stride if bi == 0 else 1
            pblk = dict(
                conv1=_prepare_conv(blk["conv1"], stride=s, pad=1,
                                    cin_pad_to=act_c, outc_pad_to=out_cp),
                conv2=_prepare_conv(blk["conv2"], stride=1, pad=1,
                                    cin_pad_to=out_cp, outc_pad_to=out_cp))
            if "down" in blk:
                pblk["down"] = _prepare_conv(blk["down"], stride=s, pad=0,
                                             cin_pad_to=act_c, outc_pad_to=out_cp)
            pblocks.append(pblk)
            act_c = out_cp
        layers.append(pblocks)
    prepared["layers"] = layers

    num_rels = params["w2"].shape[0]
    H = params["w1"].shape[0]
    Op = _round_up(num_rels, 128)
    w1t = jnp.transpose(params["w1"]).astype(jnp.bfloat16)         # (2F, 256)
    w2t = jnp.transpose(params["w2"]).astype(jnp.bfloat16)         # (256, num_rels)
    w2t = jnp.pad(w2t, ((0, 0), (0, Op - num_rels)))
    b2 = jnp.pad(params["b2"].astype(jnp.float32), (0, Op - num_rels))
    prepared["head"] = dict(w1t=w1t,
                            b1=params["b1"].astype(jnp.float32).reshape(1, H),
                            w2t=w2t,
                            b2=b2.reshape(1, Op))
    prepared["num_rels"] = num_rels
    return prepared


# ----------------------------------------------------------------------------
# ResNet-34 feature extractor + relation head
# ----------------------------------------------------------------------------
def basic_block(x, blk):
    identity = x
    out = conv2d_prepared(x, blk["conv1"], fuse_relu=True)
    if "down" in blk:
        identity = conv2d_prepared(x, blk["down"], fuse_relu=False)
    # conv2 + folded BN + residual add + ReLU fused into one GEMM epilogue.
    return conv2d_prepared(out, blk["conv2"], residual=identity)


def feature_extractor(objs_nchw, prepared):
    # [Conv2d(in,64,7,2,3,bias=False), bn1, relu, maxpool, layer1..4, avgpool]
    x = jnp.transpose(objs_nchw, (0, 2, 3, 1)).astype(jnp.bfloat16)   # NHWC bf16 once
    x = conv2d_prepared(x, prepared["stem"], fuse_relu=True)
    x = maxpool2d_nhwc(x, ksize=3, stride=2, pad=1)
    for blocks in prepared["layers"]:
        for blk in blocks:
            x = basic_block(x, blk)
    return jnp.mean(x.astype(jnp.float32), axis=(1, 2))   # AdaptiveAvgPool2d(1)+view


def rel_net_forward(prepared, objs, sources, targets):
    features = feature_extractor(objs, prepared)             # (N_obj, 512) f32
    relations = jnp.concatenate([features[sources], features[targets]], axis=1)

    # self.output = [Dropout(p), Linear(1024, 256), Linear(256, num_rels), Sigmoid()]
    # TODO(synk): nn.Dropout is stochastic in train mode; eval-mode identity is used here.
    dropped = relations
    h1, logits, probs = pallas_head(dropped, prepared["head"], prepared["num_rels"])
    all_neuron_values = [relations, dropped, h1, logits, probs]
    return features, all_neuron_values


# ----------------------------------------------------------------------------
# Deterministic parameter init (synthetic weights, NOT a checkpoint load)
# ----------------------------------------------------------------------------
class _KeyGen:
    def __init__(self, key):
        self.key = key

    def next(self):
        self.key, k = jax.random.split(self.key)
        return k


def init_params(key, num_rels, input_channels=4, num_features=512):
    kg = _KeyGen(key)

    def conv(out_c, in_c, k):
        w = jax.random.normal(kg.next(), (out_c, in_c, k, k), jnp.float32) * 0.05
        bn = dict(gamma=jnp.ones((out_c,), jnp.float32),
                  beta=jnp.zeros((out_c,), jnp.float32),
                  mean=jnp.zeros((out_c,), jnp.float32),
                  var=jnp.ones((out_c,), jnp.float32))
        return dict(w=w, bn=bn)

    params = {"stem": conv(64, input_channels, 7)}
    layers = []
    in_c = 64
    for out_c, n_blocks, stride in LAYER_CFG:
        blocks = []
        for bi in range(n_blocks):
            s = stride if bi == 0 else 1
            blk = dict(conv1=conv(out_c, in_c, 3), conv2=conv(out_c, out_c, 3))
            if s != 1 or in_c != out_c:
                blk["down"] = conv(out_c, in_c, 1)
            blocks.append(blk)
            in_c = out_c
        layers.append(blocks)
    params["layers"] = layers

    d_in = 2 * num_features
    lim1 = 1.0 / np.sqrt(d_in)
    params["w1"] = jax.random.uniform(kg.next(), (256, d_in), jnp.float32, -lim1, lim1)
    params["b1"] = jax.random.uniform(kg.next(), (256,), jnp.float32, -lim1, lim1)
    lim2 = 1.0 / np.sqrt(256.0)
    params["w2"] = jax.random.uniform(kg.next(), (num_rels, 256), jnp.float32, -lim2, lim2)
    params["b2"] = jax.random.uniform(kg.next(), (num_rels,), jnp.float32, -lim2, lim2)
    return params


# ----------------------------------------------------------------------------
if __name__ == "__main__":
    key = jax.random.PRNGKey(0)
    pkey, dkey = jax.random.split(key)

    num_rels = 8
    n_objs, in_ch, spatial = 4, 4, 16
    raw_params = init_params(pkey, num_rels=num_rels, input_channels=in_ch)
    prepared = prepare_params(raw_params)     # fold BN / pad channels / bf16 — once

    objs = jax.random.normal(dkey, (n_objs, in_ch, spatial, spatial), jnp.float32)
    sources = jnp.array([0, 1, 2, 3, 0, 2], dtype=jnp.int32)
    targets = jnp.array([1, 2, 3, 0, 3, 1], dtype=jnp.int32)

    fwd = jax.jit(lambda o, s, t: rel_net_forward(prepared, o, s, t))
    features, all_neuron_values = fwd(objs, sources, targets)
    features = jax.block_until_ready(features)
    all_neuron_values = [jax.block_until_ready(v) for v in all_neuron_values]

    n_rel_pairs = sources.shape[0]
    assert features.shape == (n_objs, 512)
    assert all_neuron_values[0].shape == (n_rel_pairs, 1024)      # relations (concat)
    assert all_neuron_values[1].shape == (n_rel_pairs, 1024)      # dropout output
    assert all_neuron_values[2].shape == (n_rel_pairs, 256)       # Linear(1024,256)
    assert all_neuron_values[3].shape == (n_rel_pairs, num_rels)  # Linear(256,num_rels)
    assert all_neuron_values[4].shape == (n_rel_pairs, num_rels)  # Sigmoid
    assert bool(jnp.all(jnp.isfinite(features)))
    assert bool(jnp.all((all_neuron_values[4] >= 0.0) & (all_neuron_values[4] <= 1.0)))

    print("KERNEL_OK")
</pallas_src>

<mosaic_0001>
module attributes {stable_mosaic.version = 11 : i64} {
  func.func @_gemm_bias_relu_kernel(%arg0: i32, %arg1: i32, %arg2: i32, %arg3: memref<128x256xbf16, #tpu.memory_space<vmem>>, %arg4: memref<256x128xbf16, #tpu.memory_space<vmem>>, %arg5: memref<1x128xf32, #tpu.memory_space<vmem>>, %arg6: memref<128x128xbf16, #tpu.memory_space<vmem>>, %arg7: memref<128x128xf32, #tpu.memory_space<vmem>>) attributes {dimension_semantics = [#tpu.dimension_semantics<parallel>, #tpu.dimension_semantics<parallel>, #tpu.dimension_semantics<arbitrary>], iteration_bounds = array<i64: 2, 1, 1>, scalar_prefetch = 0 : i64, scratch_operands = 1 : i64, tpu.core_type = #tpu.core_type<tc>, window_params = [{transform_indices = @transform_0, window_bounds = array<i64: 128, 256>}, {transform_indices = @transform_1, window_bounds = array<i64: 256, 128>}, {transform_indices = @transform_2, window_bounds = array<i64: 1, 128>}, {transform_indices = @transform_3, window_bounds = array<i64: 128, 128>}]} {
    %c0_i32 = arith.constant 0 : i32
    %0 = arith.cmpi eq, %arg2, %c0_i32 : i32
    %1 = arith.extui %0 : i1 to i32
    %c0_i32_0 = arith.constant 0 : i32
    %2 = arith.cmpi ne, %1, %c0_i32_0 : i32
    scf.if %2 {
      %cst_10 = arith.constant 0.000000e+00 : f32
      %12 = vector.broadcast %cst_10 : f32 to vector<128x128xf32>
      %c0_11 = arith.constant 0 : index
      %c0_12 = arith.constant 0 : index
      %13 = vector.load %arg7[%c0_11, %c0_12] : memref<128x128xf32, #tpu.memory_space<vmem>>, vector<128x128xf32>
      tpu.vector_store %arg7[%c0_11, %c0_12], %12 {strides = array<i32>} : memref<128x128xf32, #tpu.memory_space<vmem>>, vector<128x128xf32>,
    } else {
    }
    %c0 = arith.constant 0 : index
    %c0_1 = arith.constant 0 : index
    %3 = vector.load %arg7[%c0, %c0_1] : memref<128x128xf32, #tpu.memory_space<vmem>>, vector<128x128xf32>
    %c0_2 = arith.constant 0 : index
    %c0_3 = arith.constant 0 : index
    %4 = vector.load %arg3[%c0_2, %c0_3] : memref<128x256xbf16, #tpu.memory_space<vmem>>, vector<128x256xbf16>
    %c0_4 = arith.constant 0 : index
    %c0_5 = arith.constant 0 : index
    %5 = vector.load %arg4[%c0_4, %c0_5] : memref<256x128xbf16, #tpu.memory_space<vmem>>, vector<256x128xbf16>
    %cst = arith.constant dense<0.000000e+00> : vector<128x128xf32>
    %6 = tpu.matmul %4, %5, %cst {dimension_numbers = #tpu.dot_dimension_numbers<[1], [0], [0], [1], [0, 0, 1, 1], [], []>} : vector<128x256xbf16>, vector<256x128xbf16>, vector<128x128xf32> -> vector<128x128xf32>
    %7 = arith.addf %3, %6 : vector<128x128xf32>
    %c0_6 = arith.constant 0 : index
    %c0_7 = arith.constant 0 : index
    %8 = vector.load %arg7[%c0_6, %c0_7] : memref<128x128xf32, #tpu.memory_space<vmem>>, vector<128x128xf32>
    tpu.vector_store %arg7[%c0_6, %c0_7], %7 {strides = array<i32>} : memref<128x128xf32, #tpu.memory_space<vmem>>, vector<128x128xf32>,
    %c0_i32_8 = arith.constant 0 : i32
    %9 = arith.cmpi eq, %arg2, %c0_i32_8 : i32
    %10 = arith.extui %9 : i1 to i32
    %c0_i32_9 = arith.constant 0 : i32
    %11 = arith.cmpi ne, %10, %c0_i32_9 : i32
    scf.if %11 {
      %c0_10 = arith.constant 0 : index
      %c0_11 = arith.constant 0 : index
      %12 = vector.load %arg7[%c0_10, %c0_11] : memref<128x128xf32, #tpu.memory_space<vmem>>, vector<128x128xf32>
      %c0_12 = arith.constant 0 : index
      %c0_13 = arith.constant 0 : index
      %13 = vector.load %arg5[%c0_12, %c0_13] : memref<1x128xf32, #tpu.memory_space<vmem>>, vector<1x128xf32>
      %14 = vector.broadcast %13 : vector<1x128xf32> to vector<128x128xf32>
      %15 = arith.addf %12, %14 : vector<128x128xf32>
      %cst_14 = arith.constant 0.000000e+00 : f32
      %16 = vector.broadcast %cst_14 : f32 to vector<128x128xf32>
      %17 = arith.maximumf %15, %16 : vector<128x128xf32>
      %18 = arith.truncf %17 : vector<128x128xf32> to vector<128x128xbf16>
      %c0_15 = arith.constant 0 : index
      %c0_16 = arith.constant 0 : index
      %19 = vector.load %arg6[%c0_15, %c0_16] : memref<128x128xbf16, #tpu.memory_space<vmem>>, vector<128x128xbf16>
      tpu.vector_store %arg6[%c0_15, %c0_16], %18 {strides = array<i32>} : memref<128x128xbf16, #tpu.memory_space<vmem>>, vector<128x128xbf16>,
    } else {
    }
    return
  }
  func.func @transform_0(%arg0: i32, %arg1: i32, %arg2: i32) -> (i32, i32) {
    %c0_i32 = arith.constant 0 : i32
    return %arg0, %arg2 : i32, i32
  }
  func.func @transform_1(%arg0: i32, %arg1: i32, %arg2: i32) -> (i32, i32) {
    %c0_i32 = arith.constant 0 : i32
    return %arg2, %arg1 : i32, i32
  }
  func.func @transform_2(%arg0: i32, %arg1: i32, %arg2: i32) -> (i32, i32) {
    %c0_i32 = arith.constant 0 : i32
    %c0_i32_0 = arith.constant 0 : i32
    return %c0_i32, %arg1 : i32, i32
  }
  func.func @transform_3(%arg0: i32, %arg1: i32, %arg2: i32) -> (i32, i32) {
    %c0_i32 = arith.constant 0 : i32
    return %arg0, %arg1 : i32, i32
  }
}

module attributes {stable_mosaic.version = 11 : i64} {
  func.func @_gemm_bias_relu_kernel(%arg0: i32, %arg1: i32, %arg2: i32, %arg3: memref<32x384xbf16, #tpu.memory_space<vmem>>, %arg4: memref<384x128xbf16, #tpu.memory_space<vmem>>, %arg5: memref<1x128xf32, #tpu.memory_space<vmem>>, %arg6: memref<32x128xbf16, #tpu.memory_space<vmem>>, %arg7: memref<32x128xf32, #tpu.memory_space<vmem>>) attributes {dimension_semantics = [#tpu.dimension_semantics<parallel>, #tpu.dimension_semantics<parallel>, #tpu.dimension_semantics<arbitrary>], iteration_bounds = array<i64: 2, 1, 3>, scalar_prefetch = 0 : i64, scratch_operands = 1 : i64, tpu.core_type = #tpu.core_type<tc>, window_params = [{transform_indices = @transform_0, window_bounds = array<i64: 32, 384>}, {transform_indices = @transform_1, window_bounds = array<i64: 384, 128>}, {transform_indices = @transform_2, window_bounds = array<i64: 1, 128>}, {transform_indices = @transform_3, window_bounds = array<i64: 32, 128>}]} {
    %c0_i32 = arith.constant 0 : i32
    %0 = arith.cmpi eq, %arg2, %c0_i32 : i32
    %1 = arith.extui %0 : i1 to i32
    %c0_i32_0 = arith.constant 0 : i32
    %2 = arith.cmpi ne, %1, %c0_i32_0 : i32
    scf.if %2 {
      %cst_9 = arith.constant 0.000000e+00 : f32
      %12 = vector.broadcast %cst_9 : f32 to vector<32x128xf32>
      %c0_10 = arith.constant 0 : index
      %c0_11 = arith.constant 0 : index
      %13 = vector.load %arg7[%c0_10, %c0_11] : memref<32x128xf32, #tpu.memory_space<vmem>>, vector<32x128xf32>
      tpu.vector_store %arg7[%c0_10, %c0_11], %12 {strides = array<i32>} : memref<32x128xf32, #tpu.memory_space<vmem>>, vector<32x128xf32>,
    } else {
    }
    %c0 = arith.constant 0 : index
    %c0_1 = arith.constant 0 : index
    %3 = vector.load %arg7[%c0, %c0_1] : memref<32x128xf32, #tpu.memory_space<vmem>>, vector<32x128xf32>
    %c0_2 = arith.constant 0 : index
    %c0_3 = arith.constant 0 : index
    %4 = vector.load %arg3[%c0_2, %c0_3] : memref<32x384xbf16, #tpu.memory_space<vmem>>, vector<32x384xbf16>
    %c0_4 = arith.constant 0 : index
    %c0_5 = arith.constant 0 : index
    %5 = vector.load %arg4[%c0_4, %c0_5] : memref<384x128xbf16, #tpu.memory_space<vmem>>, vector<384x128xbf16>
    %cst = arith.constant dense<0.000000e+00> : vector<32x128xf32>
    %6 = tpu.matmul %4, %5, %cst {dimension_numbers = #tpu.dot_dimension_numbers<[1], [0], [0], [1], [0, 0, 1, 1], [], []>} : vector<32x384xbf16>, vector<384x128xbf16>, vector<32x128xf32> -> vector<32x128xf32>
    %7 = arith.addf %3, %6 : vector<32x128xf32>
    %c0_6 = arith.constant 0 : index
    %c0_7 = arith.constant 0 : index
    %8 = vector.load %arg7[%c0_6, %c0_7] : memref<32x128xf32, #tpu.memory_space<vmem>>, vector<32x128xf32>
    tpu.vector_store %arg7[%c0_6, %c0_7], %7 {strides = array<i32>} : memref<32x128xf32, #tpu.memory_space<vmem>>, vector<32x128xf32>,
    %c2_i32 = arith.constant 2 : i32
    %9 = arith.cmpi eq, %arg2, %c2_i32 : i32
    %10 = arith.extui %9 : i1 to i32
    %c0_i32_8 = arith.constant 0 : i32
    %11 = arith.cmpi ne, %10, %c0_i32_8 : i32
    scf.if %11 {
      %c0_9 = arith.constant 0 : index
      %c0_10 = arith.constant 0 : index
      %12 = vector.load %arg7[%c0_9, %c0_10] : memref<32x128xf32, #tpu.memory_space<vmem>>, vector<32x128xf32>
      %c0_11 = arith.constant 0 : index
      %c0_12 = arith.constant 0 : index
      %13 = vector.load %arg5[%c0_11, %c0_12] : memref<1x128xf32, #tpu.memory_space<vmem>>, vector<1x128xf32>
      %14 = vector.broadcast %13 : vector<1x128xf32> to vector<32x128xf32>
      %15 = arith.addf %12, %14 : vector<32x128xf32>
      %cst_13 = arith.constant 0.000000e+00 : f32
      %16 = vector.broadcast %cst_13 : f32 to vector<32x128xf32>
      %17 = arith.maximumf %15, %16 : vector<32x128xf32>
      %18 = arith.truncf %17 : vector<32x128xf32> to vector<32x128xbf16>
      %c0_14 = arith.constant 0 : index
      %c0_15 = arith.constant 0 : index
      %19 = vector.load %arg6[%c0_14, %c0_15] : memref<32x128xbf16, #tpu.memory_space<vmem>>, vector<32x128xbf16>
      tpu.vector_store %arg6[%c0_14, %c0_15], %18 {strides = array<i32>} : memref<32x128xbf16, #tpu.memory_space<vmem>>, vector<32x128xbf16>,
    } else {
    }
    return
  }
  func.func @transform_0(%arg0: i32, %arg1: i32, %arg2: i32) -> (i32, i32) {
    %c0_i32 = arith.constant 0 : i32
    return %arg0, %arg2 : i32, i32
  }
  func.func @transform_1(%arg0: i32, %arg1: i32, %arg2: i32) -> (i32, i32) {
    %c0_i32 = arith.constant 0 : i32
    return %arg2, %arg1 : i32, i32
  }
  func.func @transform_2(%arg0: i32, %arg1: i32, %arg2: i32) -> (i32, i32) {
    %c0_i32 = arith.constant 0 : i32
    %c0_i32_0 = arith.constant 0 : i32
    return %c0_i32, %arg1 : i32, i32
  }
  func.func @transform_3(%arg0: i32, %arg1: i32, %arg2: i32) -> (i32, i32) {
    %c0_i32 = arith.constant 0 : i32
    return %arg0, %arg1 : i32, i32
  }
}

module attributes {stable_mosaic.version = 11 : i64} {
  func.func @_gemm_bias_res_relu_kernel(%arg0: i32, %arg1: i32, %arg2: i32, %arg3: memref<32x384xbf16, #tpu.memory_space<vmem>>, %arg4: memref<384x128xbf16, #tpu.memory_space<vmem>>, %arg5: memref<1x128xf32, #tpu.memory_space<vmem>>, %arg6: memref<32x128xbf16, #tpu.memory_space<vmem>>, %arg7: memref<32x128xbf16, #tpu.memory_space<vmem>>, %arg8: memref<32x128xf32, #tpu.memory_space<vmem>>) attributes {dimension_semantics = [#tpu.dimension_semantics<parallel>, #tpu.dimension_semantics<parallel>, #tpu.dimension_semantics<arbitrary>], iteration_bounds = array<i64: 2, 1, 3>, scalar_prefetch = 0 : i64, scratch_operands = 1 : i64, tpu.core_type = #tpu.core_type<tc>, window_params = [{transform_indices = @transform_0, window_bounds = array<i64: 32, 384>}, {transform_indices = @transform_1, window_bounds = array<i64: 384, 128>}, {transform_indices = @transform_2, window_bounds = array<i64: 1, 128>}, {transform_indices = @transform_3, window_bounds = array<i64: 32, 128>}, {transform_indices = @transform_4, window_bounds = array<i64: 32, 128>}]} {
    %c0_i32 = arith.constant 0 : i32
    %0 = arith.cmpi eq, %arg2, %c0_i32 : i32
    %1 = arith.extui %0 : i1 to i32
    %c0_i32_0 = arith.constant 0 : i32
    %2 = arith.cmpi ne, %1, %c0_i32_0 : i32
    scf.if %2 {
      %cst_9 = arith.constant 0.000000e+00 : f32
      %12 = vector.broadcast %cst_9 : f32 to vector<32x128xf32>
      %c0_10 = arith.constant 0 : index
      %c0_11 = arith.constant 0 : index
      %13 = vector.load %arg8[%c0_10, %c0_11] : memref<32x128xf32, #tpu.memory_space<vmem>>, vector<32x128xf32>
      tpu.vector_store %arg8[%c0_10, %c0_11], %12 {strides = array<i32>} : memref<32x128xf32, #tpu.memory_space<vmem>>, vector<32x128xf32>,
    } else {
    }
    %c0 = arith.constant 0 : index
    %c0_1 = arith.constant 0 : index
    %3 = vector.load %arg8[%c0, %c0_1] : memref<32x128xf32, #tpu.memory_space<vmem>>, vector<32x128xf32>
    %c0_2 = arith.constant 0 : index
    %c0_3 = arith.constant 0 : index
    %4 = vector.load %arg3[%c0_2, %c0_3] : memref<32x384xbf16, #tpu.memory_space<vmem>>, vector<32x384xbf16>
    %c0_4 = arith.constant 0 : index
    %c0_5 = arith.constant 0 : index
    %5 = vector.load %arg4[%c0_4, %c0_5] : memref<384x128xbf16, #tpu.memory_space<vmem>>, vector<384x128xbf16>
    %cst = arith.constant dense<0.000000e+00> : vector<32x128xf32>
    %6 = tpu.matmul %4, %5, %cst {dimension_numbers = #tpu.dot_dimension_numbers<[1], [0], [0], [1], [0, 0, 1, 1], [], []>} : vector<32x384xbf16>, vector<384x128xbf16>, vector<32x128xf32> -> vector<32x128xf32>
    %7 = arith.addf %3, %6 : vector<32x128xf32>
    %c0_6 = arith.constant 0 : index
    %c0_7 = arith.constant 0 : index
    %8 = vector.load %arg8[%c0_6, %c0_7] : memref<32x128xf32, #tpu.memory_space<vmem>>, vector<32x128xf32>
    tpu.vector_store %arg8[%c0_6, %c0_7], %7 {strides = array<i32>} : memref<32x128xf32, #tpu.memory_space<vmem>>, vector<32x128xf32>,
    %c2_i32 = arith.constant 2 : i32
    %9 = arith.cmpi eq, %arg2, %c2_i32 : i32
    %10 = arith.extui %9 : i1 to i32
    %c0_i32_8 = arith.constant 0 : i32
    %11 = arith.cmpi ne, %10, %c0_i32_8 : i32
    scf.if %11 {
      %c0_9 = arith.constant 0 : index
      %c0_10 = arith.constant 0 : index
      %12 = vector.load %arg8[%c0_9, %c0_10] : memref<32x128xf32, #tpu.memory_space<vmem>>, vector<32x128xf32>
      %c0_11 = arith.constant 0 : index
      %c0_12 = arith.constant 0 : index
      %13 = vector.load %arg5[%c0_11, %c0_12] : memref<1x128xf32, #tpu.memory_space<vmem>>, vector<1x128xf32>
      %14 = vector.broadcast %13 : vector<1x128xf32> to vector<32x128xf32>
      %15 = arith.addf %12, %14 : vector<32x128xf32>
      %c0_13 = arith.constant 0 : index
      %c0_14 = arith.constant 0 : index
      %16 = vector.load %arg6[%c0_13, %c0_14] : memref<32x128xbf16, #tpu.memory_space<vmem>>, vector<32x128xbf16>
      %17 = arith.extf %16 : vector<32x128xbf16> to vector<32x128xf32>
      %18 = arith.addf %15, %17 : vector<32x128xf32>
      %cst_15 = arith.constant 0.000000e+00 : f32
      %19 = vector.broadcast %cst_15 : f32 to vector<32x128xf32>
      %20 = arith.maximumf %18, %19 : vector<32x128xf32>
      %21 = arith.truncf %20 : vector<32x128xf32> to vector<32x128xbf16>
      %c0_16 = arith.constant 0 : index
      %c0_17 = arith.constant 0 : index
      %22 = vector.load %arg7[%c0_16, %c0_17] : memref<32x128xbf16, #tpu.memory_space<vmem>>, vector<32x128xbf16>
      tpu.vector_store %arg7[%c0_16, %c0_17], %21 {strides = array<i32>} : memref<32x128xbf16, #tpu.memory_space<vmem>>, vector<32x128xbf16>,
    } else {
    }
    return
  }
  func.func @transform_0(%arg0: i32, %arg1: i32, %arg2: i32) -> (i32, i32) {
    %c0_i32 = arith.constant 0 : i32
    return %arg0, %arg2 : i32, i32
  }
  func.func @transform_1(%arg0: i32, %arg1: i32, %arg2: i32) -> (i32, i32) {
    %c0_i32 = arith.constant 0 : i32
    return %arg2, %arg1 : i32, i32
  }
  func.func @transform_2(%arg0: i32, %arg1: i32, %arg2: i32) -> (i32, i32) {
    %c0_i32 = arith.constant 0 : i32
    %c0_i32_0 = arith.constant 0 : i32
    return %c0_i32, %arg1 : i32, i32
  }
  func.func @transform_3(%arg0: i32, %arg1: i32, %arg2: i32) -> (i32, i32) {
    %c0_i32 = arith.constant 0 : i32
    return %arg0, %arg1 : i32, i32
  }
  func.func @transform_4(%arg0: i32, %arg1: i32, %arg2: i32) -> (i32, i32) {
    %c0_i32 = arith.constant 0 : i32
    return %arg0, %arg1 : i32, i32
  }
}

module attributes {stable_mosaic.version = 11 : i64} {
  func.func @_gemm_bias_relu_kernel(%arg0: i32, %arg1: i32, %arg2: i32, %arg3: memref<16x384xbf16, #tpu.memory_space<vmem>>, %arg4: memref<384x128xbf16, #tpu.memory_space<vmem>>, %arg5: memref<1x128xf32, #tpu.memory_space<vmem>>, %arg6: memref<16x128xbf16, #tpu.memory_space<vmem>>, %arg7: memref<16x128xf32, #tpu.memory_space<vmem>>) attributes {dimension_semantics = [#tpu.dimension_semantics<parallel>, #tpu.dimension_semantics<parallel>, #tpu.dimension_semantics<arbitrary>], iteration_bounds = array<i64: 1, 1, 3>, scalar_prefetch = 0 : i64, scratch_operands = 1 : i64, tpu.core_type = #tpu.core_type<tc>, window_params = [{transform_indices = @transform_0, window_bounds = array<i64: 16, 384>}, {transform_indices = @transform_1, window_bounds = array<i64: 384, 128>}, {transform_indices = @transform_2, window_bounds = array<i64: 1, 128>}, {transform_indices = @transform_3, window_bounds = array<i64: 16, 128>}]} {
    %c0_i32 = arith.constant 0 : i32
    %0 = arith.cmpi eq, %arg2, %c0_i32 : i32
    %1 = arith.extui %0 : i1 to i32
    %c0_i32_0 = arith.constant 0 : i32
    %2 = arith.cmpi ne, %1, %c0_i32_0 : i32
    scf.if %2 {
      %cst_9 = arith.constant 0.000000e+00 : f32
      %12 = vector.broadcast %cst_9 : f32 to vector<16x128xf32>
      %c0_10 = arith.constant 0 : index
      %c0_11 = arith.constant 0 : index
      %13 = vector.load %arg7[%c0_10, %c0_11] : memref<16x128xf32, #tpu.memory_space<vmem>>, vector<16x128xf32>
      tpu.vector_store %arg7[%c0_10, %c0_11], %12 {strides = array<i32>} : memref<16x128xf32, #tpu.memory_space<vmem>>, vector<16x128xf32>,
    } else {
    }
    %c0 = arith.constant 0 : index
    %c0_1 = arith.constant 0 : index
    %3 = vector.load %arg7[%c0, %c0_1] : memref<16x128xf32, #tpu.memory_space<vmem>>, vector<16x128xf32>
    %c0_2 = arith.constant 0 : index
    %c0_3 = arith.constant 0 : index
    %4 = vector.load %arg3[%c0_2, %c0_3] : memref<16x384xbf16, #tpu.memory_space<vmem>>, vector<16x384xbf16>
    %c0_4 = arith.constant 0 : index
    %c0_5 = arith.constant 0 : index
    %5 = vector.load %arg4[%c0_4, %c0_5] : memref<384x128xbf16, #tpu.memory_space<vmem>>, vector<384x128xbf16>
    %cst = arith.constant dense<0.000000e+00> : vector<16x128xf32>
    %6 = tpu.matmul %4, %5, %cst {dimension_numbers = #tpu.dot_dimension_numbers<[1], [0], [0], [1], [0, 0, 1, 1], [], []>} : vector<16x384xbf16>, vector<384x128xbf16>, vector<16x128xf32> -> vector<16x128xf32>
    %7 = arith.addf %3, %6 : vector<16x128xf32>
    %c0_6 = arith.constant 0 : index
    %c0_7 = arith.constant 0 : index
    %8 = vector.load %arg7[%c0_6, %c0_7] : memref<16x128xf32, #tpu.memory_space<vmem>>, vector<16x128xf32>
    tpu.vector_store %arg7[%c0_6, %c0_7], %7 {strides = array<i32>} : memref<16x128xf32, #tpu.memory_space<vmem>>, vector<16x128xf32>,
    %c2_i32 = arith.constant 2 : i32
    %9 = arith.cmpi eq, %arg2, %c2_i32 : i32
    %10 = arith.extui %9 : i1 to i32
    %c0_i32_8 = arith.constant 0 : i32
    %11 = arith.cmpi ne, %10, %c0_i32_8 : i32
    scf.if %11 {
      %c0_9 = arith.constant 0 : index
      %c0_10 = arith.constant 0 : index
      %12 = vector.load %arg7[%c0_9, %c0_10] : memref<16x128xf32, #tpu.memory_space<vmem>>, vector<16x128xf32>
      %c0_11 = arith.constant 0 : index
      %c0_12 = arith.constant 0 : index
      %13 = vector.load %arg5[%c0_11, %c0_12] : memref<1x128xf32, #tpu.memory_space<vmem>>, vector<1x128xf32>
      %14 = vector.broadcast %13 : vector<1x128xf32> to vector<16x128xf32>
      %15 = arith.addf %12, %14 : vector<16x128xf32>
      %cst_13 = arith.constant 0.000000e+00 : f32
      %16 = vector.broadcast %cst_13 : f32 to vector<16x128xf32>
      %17 = arith.maximumf %15, %16 : vector<16x128xf32>
      %18 = arith.truncf %17 : vector<16x128xf32> to vector<16x128xbf16>
      %c0_14 = arith.constant 0 : index
      %c0_15 = arith.constant 0 : index
      %19 = vector.load %arg6[%c0_14, %c0_15] : memref<16x128xbf16, #tpu.memory_space<vmem>>, vector<16x128xbf16>
      tpu.vector_store %arg6[%c0_14, %c0_15], %18 {strides = array<i32>} : memref<16x128xbf16, #tpu.memory_space<vmem>>, vector<16x128xbf16>,
    } else {
    }
    return
  }
  func.func @transform_0(%arg0: i32, %arg1: i32, %arg2: i32) -> (i32, i32) {
    %c0_i32 = arith.constant 0 : i32
    return %arg0, %arg2 : i32, i32
  }
  func.func @transform_1(%arg0: i32, %arg1: i32, %arg2: i32) -> (i32, i32) {
    %c0_i32 = arith.constant 0 : i32
    return %arg2, %arg1 : i32, i32
  }
  func.func @transform_2(%arg0: i32, %arg1: i32, %arg2: i32) -> (i32, i32) {
    %c0_i32 = arith.constant 0 : i32
    %c0_i32_0 = arith.constant 0 : i32
    return %c0_i32, %arg1 : i32, i32
  }
  func.func @transform_3(%arg0: i32, %arg1: i32, %arg2: i32) -> (i32, i32) {
    %c0_i32 = arith.constant 0 : i32
    return %arg0, %arg1 : i32, i32
  }
}

module attributes {stable_mosaic.version = 11 : i64} {
  func.func @_gemm_bias_kernel(%arg0: i32, %arg1: i32, %arg2: i32, %arg3: memref<16x128xbf16, #tpu.memory_space<vmem>>, %arg4: memref<128x128xbf16, #tpu.memory_space<vmem>>, %arg5: memref<1x128xf32, #tpu.memory_space<vmem>>, %arg6: memref<16x128xbf16, #tpu.memory_space<vmem>>, %arg7: memref<16x128xf32, #tpu.memory_space<vmem>>) attributes {dimension_semantics = [#tpu.dimension_semantics<parallel>, #tpu.dimension_semantics<parallel>, #tpu.dimension_semantics<arbitrary>], iteration_bounds = array<i64: 1, 1, 1>, scalar_prefetch = 0 : i64, scratch_operands = 1 : i64, tpu.core_type = #tpu.core_type<tc>, window_params = [{transform_indices = @transform_0, window_bounds = array<i64: 16, 128>}, {transform_indices = @transform_1, window_bounds = array<i64: 128, 128>}, {transform_indices = @transform_2, window_bounds = array<i64: 1, 128>}, {transform_indices = @transform_3, window_bounds = array<i64: 16, 128>}]} {
    %c0_i32 = arith.constant 0 : i32
    %0 = arith.cmpi eq, %arg2, %c0_i32 : i32
    %1 = arith.extui %0 : i1 to i32
    %c0_i32_0 = arith.constant 0 : i32
    %2 = arith.cmpi ne, %1, %c0_i32_0 : i32
    scf.if %2 {
      %cst_10 = arith.constant 0.000000e+00 : f32
      %12 = vector.broadcast %cst_10 : f32 to vector<16x128xf32>
      %c0_11 = arith.constant 0 : index
      %c0_12 = arith.constant 0 : index
      %13 = vector.load %arg7[%c0_11, %c0_12] : memref<16x128xf32, #tpu.memory_space<vmem>>, vector<16x128xf32>
      tpu.vector_store %arg7[%c0_11, %c0_12], %12 {strides = array<i32>} : memref<16x128xf32, #tpu.memory_space<vmem>>, vector<16x128xf32>,
    } else {
    }
    %c0 = arith.constant 0 : index
    %c0_1 = arith.constant 0 : index
    %3 = vector.load %arg7[%c0, %c0_1] : memref<16x128xf32, #tpu.memory_space<vmem>>, vector<16x128xf32>
    %c0_2 = arith.constant 0 : index
    %c0_3 = arith.constant 0 : index
    %4 = vector.load %arg3[%c0_2, %c0_3] : memref<16x128xbf16, #tpu.memory_space<vmem>>, vector<16x128xbf16>
    %c0_4 = arith.constant 0 : index
    %c0_5 = arith.constant 0 : index
    %5 = vector.load %arg4[%c0_4, %c0_5] : memref<128x128xbf16, #tpu.memory_space<vmem>>, vector<128x128xbf16>
    %cst = arith.constant dense<0.000000e+00> : vector<16x128xf32>
    %6 = tpu.matmul %4, %5, %cst {dimension_numbers = #tpu.dot_dimension_numbers<[1], [0], [0], [1], [0, 0, 1, 1], [], []>} : vector<16x128xbf16>, vector<128x128xbf16>, vector<16x128xf32> -> vector<16x128xf32>
    %7 = arith.addf %3, %6 : vector<16x128xf32>
    %c0_6 = arith.constant 0 : index
    %c0_7 = arith.constant 0 : index
    %8 = vector.load %arg7[%c0_6, %c0_7] : memref<16x128xf32, #tpu.memory_space<vmem>>, vector<16x128xf32>
    tpu.vector_store %arg7[%c0_6, %c0_7], %7 {strides = array<i32>} : memref<16x128xf32, #tpu.memory_space<vmem>>, vector<16x128xf32>,
    %c0_i32_8 = arith.constant 0 : i32
    %9 = arith.cmpi eq, %arg2, %c0_i32_8 : i32
    %10 = arith.extui %9 : i1 to i32
    %c0_i32_9 = arith.constant 0 : i32
    %11 = arith.cmpi ne, %10, %c0_i32_9 : i32
    scf.if %11 {
      %c0_10 = arith.constant 0 : index
      %c0_11 = arith.constant 0 : index
      %12 = vector.load %arg7[%c0_10, %c0_11] : memref<16x128xf32, #tpu.memory_space<vmem>>, vector<16x128xf32>
      %c0_12 = arith.constant 0 : index
      %c0_13 = arith.constant 0 : index
      %13 = vector.load %arg5[%c0_12, %c0_13] : memref<1x128xf32, #tpu.memory_space<vmem>>, vector<1x128xf32>
      %14 = vector.broadcast %13 : vector<1x128xf32> to vector<16x128xf32>
      %15 = arith.addf %12, %14 : vector<16x128xf32>
      %16 = arith.truncf %15 : vector<16x128xf32> to vector<16x128xbf16>
      %c0_14 = arith.constant 0 : index
      %c0_15 = arith.constant 0 : index
      %17 = vector.load %arg6[%c0_14, %c0_15] : memref<16x128xbf16, #tpu.memory_space<vmem>>, vector<16x128xbf16>
      tpu.vector_store %arg6[%c0_14, %c0_15], %16 {strides = array<i32>} : memref<16x128xbf16, #tpu.memory_space<vmem>>, vector<16x128xbf16>,
    } else {
    }
    return
  }
  func.func @transform_0(%arg0: i32, %arg1: i32, %arg2: i32) -> (i32, i32) {
    %c0_i32 = arith.constant 0 : i32
    return %arg0, %arg2 : i32, i32
  }
  func.func @transform_1(%arg0: i32, %arg1: i32, %arg2: i32) -> (i32, i32) {
    %c0_i32 = arith.constant 0 : i32
    return %arg2, %arg1 : i32, i32
  }
  func.func @transform_2(%arg0: i32, %arg1: i32, %arg2: i32) -> (i32, i32) {
    %c0_i32 = arith.constant 0 : i32
    %c0_i32_0 = arith.constant 0 : i32
    return %c0_i32, %arg1 : i32, i32
  }
  func.func @transform_3(%arg0: i32, %arg1: i32, %arg2: i32) -> (i32, i32) {
    %c0_i32 = arith.constant 0 : i32
    return %arg0, %arg1 : i32, i32
  }
}

module attributes {stable_mosaic.version = 11 : i64} {
  func.func @_gemm_bias_res_relu_kernel(%arg0: i32, %arg1: i32, %arg2: i32, %arg3: memref<16x384xbf16, #tpu.memory_space<vmem>>, %arg4: memref<384x128xbf16, #tpu.memory_space<vmem>>, %arg5: memref<1x128xf32, #tpu.memory_space<vmem>>, %arg6: memref<16x128xbf16, #tpu.memory_space<vmem>>, %arg7: memref<16x128xbf16, #tpu.memory_space<vmem>>, %arg8: memref<16x128xf32, #tpu.memory_space<vmem>>) attributes {dimension_semantics = [#tpu.dimension_semantics<parallel>, #tpu.dimension_semantics<parallel>, #tpu.dimension_semantics<arbitrary>], iteration_bounds = array<i64: 1, 1, 3>, scalar_prefetch = 0 : i64, scratch_operands = 1 : i64, tpu.core_type = #tpu.core_type<tc>, window_params = [{transform_indices = @transform_0, window_bounds = array<i64: 16, 384>}, {transform_indices = @transform_1, window_bounds = array<i64: 384, 128>}, {transform_indices = @transform_2, window_bounds = array<i64: 1, 128>}, {transform_indices = @transform_3, window_bounds = array<i64: 16, 128>}, {transform_indices = @transform_4, window_bounds = array<i64: 16, 128>}]} {
    %c0_i32 = arith.constant 0 : i32
    %0 = arith.cmpi eq, %arg2, %c0_i32 : i32
    %1 = arith.extui %0 : i1 to i32
    %c0_i32_0 = arith.constant 0 : i32
    %2 = arith.cmpi ne, %1, %c0_i32_0 : i32
    scf.if %2 {
      %cst_9 = arith.constant 0.000000e+00 : f32
      %12 = vector.broadcast %cst_9 : f32 to vector<16x128xf32>
      %c0_10 = arith.constant 0 : index
      %c0_11 = arith.constant 0 : index
      %13 = vector.load %arg8[%c0_10, %c0_11] : memref<16x128xf32, #tpu.memory_space<vmem>>, vector<16x128xf32>
      tpu.vector_store %arg8[%c0_10, %c0_11], %12 {strides = array<i32>} : memref<16x128xf32, #tpu.memory_space<vmem>>, vector<16x128xf32>,
    } else {
    }
    %c0 = arith.constant 0 : index
    %c0_1 = arith.constant 0 : index
    %3 = vector.load %arg8[%c0, %c0_1] : memref<16x128xf32, #tpu.memory_space<vmem>>, vector<16x128xf32>
    %c0_2 = arith.constant 0 : index
    %c0_3 = arith.constant 0 : index
    %4 = vector.load %arg3[%c0_2, %c0_3] : memref<16x384xbf16, #tpu.memory_space<vmem>>, vector<16x384xbf16>
    %c0_4 = arith.constant 0 : index
    %c0_5 = arith.constant 0 : index
    %5 = vector.load %arg4[%c0_4, %c0_5] : memref<384x128xbf16, #tpu.memory_space<vmem>>, vector<384x128xbf16>
    %cst = arith.constant dense<0.000000e+00> : vector<16x128xf32>
    %6 = tpu.matmul %4, %5, %cst {dimension_numbers = #tpu.dot_dimension_numbers<[1], [0], [0], [1], [0, 0, 1, 1], [], []>} : vector<16x384xbf16>, vector<384x128xbf16>, vector<16x128xf32> -> vector<16x128xf32>
    %7 = arith.addf %3, %6 : vector<16x128xf32>
    %c0_6 = arith.constant 0 : index
    %c0_7 = arith.constant 0 : index
    %8 = vector.load %arg8[%c0_6, %c0_7] : memref<16x128xf32, #tpu.memory_space<vmem>>, vector<16x128xf32>
    tpu.vector_store %arg8[%c0_6, %c0_7], %7 {strides = array<i32>} : memref<16x128xf32, #tpu.memory_space<vmem>>, vector<16x128xf32>,
    %c2_i32 = arith.constant 2 : i32
    %9 = arith.cmpi eq, %arg2, %c2_i32 : i32
    %10 = arith.extui %9 : i1 to i32
    %c0_i32_8 = arith.constant 0 : i32
    %11 = arith.cmpi ne, %10, %c0_i32_8 : i32
    scf.if %11 {
      %c0_9 = arith.constant 0 : index
      %c0_10 = arith.constant 0 : index
      %12 = vector.load %arg8[%c0_9, %c0_10] : memref<16x128xf32, #tpu.memory_space<vmem>>, vector<16x128xf32>
      %c0_11 = arith.constant 0 : index
      %c0_12 = arith.constant 0 : index
      %13 = vector.load %arg5[%c0_11, %c0_12] : memref<1x128xf32, #tpu.memory_space<vmem>>, vector<1x128xf32>
      %14 = vector.broadcast %13 : vector<1x128xf32> to vector<16x128xf32>
      %15 = arith.addf %12, %14 : vector<16x128xf32>
      %c0_13 = arith.constant 0 : index
      %c0_14 = arith.constant 0 : index
      %16 = vector.load %arg6[%c0_13, %c0_14] : memref<16x128xbf16, #tpu.memory_space<vmem>>, vector<16x128xbf16>
      %17 = arith.extf %16 : vector<16x128xbf16> to vector<16x128xf32>
      %18 = arith.addf %15, %17 : vector<16x128xf32>
      %cst_15 = arith.constant 0.000000e+00 : f32
      %19 = vector.broadcast %cst_15 : f32 to vector<16x128xf32>
      %20 = arith.maximumf %18, %19 : vector<16x128xf32>
      %21 = arith.truncf %20 : vector<16x128xf32> to vector<16x128xbf16>
      %c0_16 = arith.constant 0 : index
      %c0_17 = arith.constant 0 : index
      %22 = vector.load %arg7[%c0_16, %c0_17] : memref<16x128xbf16, #tpu.memory_space<vmem>>, vector<16x128xbf16>
      tpu.vector_store %arg7[%c0_16, %c0_17], %21 {strides = array<i32>} : memref<16x128xbf16, #tpu.memory_space<vmem>>, vector<16x128xbf16>,
    } else {
    }
    return
  }
  func.func @transform_0(%arg0: i32, %arg1: i32, %arg2: i32) -> (i32, i32) {
    %c0_i32 = arith.constant 0 : i32
    return %arg0, %arg2 : i32, i32
  }
  func.func @transform_1(%arg0: i32, %arg1: i32, %arg2: i32) -> (i32, i32) {
    %c0_i32 = arith.constant 0 : i32
    return %arg2, %arg1 : i32, i32
  }
  func.func @transform_2(%arg0: i32, %arg1: i32, %arg2: i32) -> (i32, i32) {
    %c0_i32 = arith.constant 0 : i32
    %c0_i32_0 = arith.constant 0 : i32
    return %c0_i32, %arg1 : i32, i32
  }
  func.func @transform_3(%arg0: i32, %arg1: i32, %arg2: i32) -> (i32, i32) {
    %c0_i32 = arith.constant 0 : i32
    return %arg0, %arg1 : i32, i32
  }
  func.func @transform_4(%arg0: i32, %arg1: i32, %arg2: i32) -> (i32, i32) {
    %c0_i32 = arith.constant 0 : i32
    return %arg0, %arg1 : i32, i32
  }
}

module attributes {stable_mosaic.version = 11 : i64} {
  func.func @_gemm_bias_relu_kernel(%arg0: i32, %arg1: i32, %arg2: i32, %arg3: memref<16x384xbf16, #tpu.memory_space<vmem>>, %arg4: memref<384x128xbf16, #tpu.memory_space<vmem>>, %arg5: memref<1x128xf32, #tpu.memory_space<vmem>>, %arg6: memref<16x128xbf16, #tpu.memory_space<vmem>>, %arg7: memref<16x128xf32, #tpu.memory_space<vmem>>) attributes {dimension_semantics = [#tpu.dimension_semantics<parallel>, #tpu.dimension_semantics<parallel>, #tpu.dimension_semantics<arbitrary>], iteration_bounds = array<i64: 1, 2, 3>, scalar_prefetch = 0 : i64, scratch_operands = 1 : i64, tpu.core_type = #tpu.core_type<tc>, window_params = [{transform_indices = @transform_0, window_bounds = array<i64: 16, 384>}, {transform_indices = @transform_1, window_bounds = array<i64: 384, 128>}, {transform_indices = @transform_2, window_bounds = array<i64: 1, 128>}, {transform_indices = @transform_3, window_bounds = array<i64: 16, 128>}]} {
    %c0_i32 = arith.constant 0 : i32
    %0 = arith.cmpi eq, %arg2, %c0_i32 : i32
    %1 = arith.extui %0 : i1 to i32
    %c0_i32_0 = arith.constant 0 : i32
    %2 = arith.cmpi ne, %1, %c0_i32_0 : i32
    scf.if %2 {
      %cst_9 = arith.constant 0.000000e+00 : f32
      %12 = vector.broadcast %cst_9 : f32 to vector<16x128xf32>
      %c0_10 = arith.constant 0 : index
      %c0_11 = arith.constant 0 : index
      %13 = vector.load %arg7[%c0_10, %c0_11] : memref<16x128xf32, #tpu.memory_space<vmem>>, vector<16x128xf32>
      tpu.vector_store %arg7[%c0_10, %c0_11], %12 {strides = array<i32>} : memref<16x128xf32, #tpu.memory_space<vmem>>, vector<16x128xf32>,
    } else {
    }
    %c0 = arith.constant 0 : index
    %c0_1 = arith.constant 0 : index
    %3 = vector.load %arg7[%c0, %c0_1] : memref<16x128xf32, #tpu.memory_space<vmem>>, vector<16x128xf32>
    %c0_2 = arith.constant 0 : index
    %c0_3 = arith.constant 0 : index
    %4 = vector.load %arg3[%c0_2, %c0_3] : memref<16x384xbf16, #tpu.memory_space<vmem>>, vector<16x384xbf16>
    %c0_4 = arith.constant 0 : index
    %c0_5 = arith.constant 0 : index
    %5 = vector.load %arg4[%c0_4, %c0_5] : memref<384x128xbf16, #tpu.memory_space<vmem>>, vector<384x128xbf16>
    %cst = arith.constant dense<0.000000e+00> : vector<16x128xf32>
    %6 = tpu.matmul %4, %5, %cst {dimension_numbers = #tpu.dot_dimension_numbers<[1], [0], [0], [1], [0, 0, 1, 1], [], []>} : vector<16x384xbf16>, vector<384x128xbf16>, vector<16x128xf32> -> vector<16x128xf32>
    %7 = arith.addf %3, %6 : vector<16x128xf32>
    %c0_6 = arith.constant 0 : index
    %c0_7 = arith.constant 0 : index
    %8 = vector.load %arg7[%c0_6, %c0_7] : memref<16x128xf32, #tpu.memory_space<vmem>>, vector<16x128xf32>
    tpu.vector_store %arg7[%c0_6, %c0_7], %7 {strides = array<i32>} : memref<16x128xf32, #tpu.memory_space<vmem>>, vector<16x128xf32>,
    %c2_i32 = arith.constant 2 : i32
    %9 = arith.cmpi eq, %arg2, %c2_i32 : i32
    %10 = arith.extui %9 : i1 to i32
    %c0_i32_8 = arith.constant 0 : i32
    %11 = arith.cmpi ne, %10, %c0_i32_8 : i32
    scf.if %11 {
      %c0_9 = arith.constant 0 : index
      %c0_10 = arith.constant 0 : index
      %12 = vector.load %arg7[%c0_9, %c0_10] : memref<16x128xf32, #tpu.memory_space<vmem>>, vector<16x128xf32>
      %c0_11 = arith.constant 0 : index
      %c0_12 = arith.constant 0 : index
      %13 = vector.load %arg5[%c0_11, %c0_12] : memref<1x128xf32, #tpu.memory_space<vmem>>, vector<1x128xf32>
      %14 = vector.broadcast %13 : vector<1x128xf32> to vector<16x128xf32>
      %15 = arith.addf %12, %14 : vector<16x128xf32>
      %cst_13 = arith.constant 0.000000e+00 : f32
      %16 = vector.broadcast %cst_13 : f32 to vector<16x128xf32>
      %17 = arith.maximumf %15, %16 : vector<16x128xf32>
      %18 = arith.truncf %17 : vector<16x128xf32> to vector<16x128xbf16>
      %c0_14 = arith.constant 0 : index
      %c0_15 = arith.constant 0 : index
      %19 = vector.load %arg6[%c0_14, %c0_15] : memref<16x128xbf16, #tpu.memory_space<vmem>>, vector<16x128xbf16>
      tpu.vector_store %arg6[%c0_14, %c0_15], %18 {strides = array<i32>} : memref<16x128xbf16, #tpu.memory_space<vmem>>, vector<16x128xbf16>,
    } else {
    }
    return
  }
  func.func @transform_0(%arg0: i32, %arg1: i32, %arg2: i32) -> (i32, i32) {
    %c0_i32 = arith.constant 0 : i32
    return %arg0, %arg2 : i32, i32
  }
  func.func @transform_1(%arg0: i32, %arg1: i32, %arg2: i32) -> (i32, i32) {
    %c0_i32 = arith.constant 0 : i32
    return %arg2, %arg1 : i32, i32
  }
  func.func @transform_2(%arg0: i32, %arg1: i32, %arg2: i32) -> (i32, i32) {
    %c0_i32 = arith.constant 0 : i32
    %c0_i32_0 = arith.constant 0 : i32
    return %c0_i32, %arg1 : i32, i32
  }
  func.func @transform_3(%arg0: i32, %arg1: i32, %arg2: i32) -> (i32, i32) {
    %c0_i32 = arith.constant 0 : i32
    return %arg0, %arg1 : i32, i32
  }
}

module attributes {stable_mosaic.version = 11 : i64} {
  func.func @_gemm_bias_kernel(%arg0: i32, %arg1: i32, %arg2: i32, %arg3: memref<16x128xbf16, #tpu.memory_space<vmem>>, %arg4: memref<128x128xbf16, #tpu.memory_space<vmem>>, %arg5: memref<1x128xf32, #tpu.memory_space<vmem>>, %arg6: memref<16x128xbf16, #tpu.memory_space<vmem>>, %arg7: memref<16x128xf32, #tpu.memory_space<vmem>>) attributes {dimension_semantics = [#tpu.dimension_semantics<parallel>, #tpu.dimension_semantics<parallel>, #tpu.dimension_semantics<arbitrary>], iteration_bounds = array<i64: 1, 2, 1>, scalar_prefetch = 0 : i64, scratch_operands = 1 : i64, tpu.core_type = #tpu.core_type<tc>, window_params = [{transform_indices = @transform_0, window_bounds = array<i64: 16, 128>}, {transform_indices = @transform_1, window_bounds = array<i64: 128, 128>}, {transform_indices = @transform_2, window_bounds = array<i64: 1, 128>}, {transform_indices = @transform_3, window_bounds = array<i64: 16, 128>}]} {
    %c0_i32 = arith.constant 0 : i32
    %0 = arith.cmpi eq, %arg2, %c0_i32 : i32
    %1 = arith.extui %0 : i1 to i32
    %c0_i32_0 = arith.constant 0 : i32
    %2 = arith.cmpi ne, %1, %c0_i32_0 : i32
    scf.if %2 {
      %cst_10 = arith.constant 0.000000e+00 : f32
      %12 = vector.broadcast %cst_10 : f32 to vector<16x128xf32>
      %c0_11 = arith.constant 0 : index
      %c0_12 = arith.constant 0 : index
      %13 = vector.load %arg7[%c0_11, %c0_12] : memref<16x128xf32, #tpu.memory_space<vmem>>, vector<16x128xf32>
      tpu.vector_store %arg7[%c0_11, %c0_12], %12 {strides = array<i32>} : memref<16x128xf32, #tpu.memory_space<vmem>>, vector<16x128xf32>,
    } else {
    }
    %c0 = arith.constant 0 : index
    %c0_1 = arith.constant 0 : index
    %3 = vector.load %arg7[%c0, %c0_1] : memref<16x128xf32, #tpu.memory_space<vmem>>, vector<16x128xf32>
    %c0_2 = arith.constant 0 : index
    %c0_3 = arith.constant 0 : index
    %4 = vector.load %arg3[%c0_2, %c0_3] : memref<16x128xbf16, #tpu.memory_space<vmem>>, vector<16x128xbf16>
    %c0_4 = arith.constant 0 : index
    %c0_5 = arith.constant 0 : index
    %5 = vector.load %arg4[%c0_4, %c0_5] : memref<128x128xbf16, #tpu.memory_space<vmem>>, vector<128x128xbf16>
    %cst = arith.constant dense<0.000000e+00> : vector<16x128xf32>
    %6 = tpu.matmul %4, %5, %cst {dimension_numbers = #tpu.dot_dimension_numbers<[1], [0], [0], [1], [0, 0, 1, 1], [], []>} : vector<16x128xbf16>, vector<128x128xbf16>, vector<16x128xf32> -> vector<16x128xf32>
    %7 = arith.addf %3, %6 : vector<16x128xf32>
    %c0_6 = arith.constant 0 : index
    %c0_7 = arith.constant 0 : index
    %8 = vector.load %arg7[%c0_6, %c0_7] : memref<16x128xf32, #tpu.memory_space<vmem>>, vector<16x128xf32>
    tpu.vector_store %arg7[%c0_6, %c0_7], %7 {strides = array<i32>} : memref<16x128xf32, #tpu.memory_space<vmem>>, vector<16x128xf32>,
    %c0_i32_8 = arith.constant 0 : i32
    %9 = arith.cmpi eq, %arg2, %c0_i32_8 : i32
    %10 = arith.extui %9 : i1 to i32
    %c0_i32_9 = arith.constant 0 : i32
    %11 = arith.cmpi ne, %10, %c0_i32_9 : i32
    scf.if %11 {
      %c0_10 = arith.constant 0 : index
      %c0_11 = arith.constant 0 : index
      %12 = vector.load %arg7[%c0_10, %c0_11] : memref<16x128xf32, #tpu.memory_space<vmem>>, vector<16x128xf32>
      %c0_12 = arith.constant 0 : index
      %c0_13 = arith.constant 0 : index
      %13 = vector.load %arg5[%c0_12, %c0_13] : memref<1x128xf32, #tpu.memory_space<vmem>>, vector<1x128xf32>
      %14 = vector.broadcast %13 : vector<1x128xf32> to vector<16x128xf32>
      %15 = arith.addf %12, %14 : vector<16x128xf32>
      %16 = arith.truncf %15 : vector<16x128xf32> to vector<16x128xbf16>
      %c0_14 = arith.constant 0 : index
      %c0_15 = arith.constant 0 : index
      %17 = vector.load %arg6[%c0_14, %c0_15] : memref<16x128xbf16, #tpu.memory_space<vmem>>, vector<16x128xbf16>
      tpu.vector_store %arg6[%c0_14, %c0_15], %16 {strides = array<i32>} : memref<16x128xbf16, #tpu.memory_space<vmem>>, vector<16x128xbf16>,
    } else {
    }
    return
  }
  func.func @transform_0(%arg0: i32, %arg1: i32, %arg2: i32) -> (i32, i32) {
    %c0_i32 = arith.constant 0 : i32
    return %arg0, %arg2 : i32, i32
  }
  func.func @transform_1(%arg0: i32, %arg1: i32, %arg2: i32) -> (i32, i32) {
    %c0_i32 = arith.constant 0 : i32
    return %arg2, %arg1 : i32, i32
  }
  func.func @transform_2(%arg0: i32, %arg1: i32, %arg2: i32) -> (i32, i32) {
    %c0_i32 = arith.constant 0 : i32
    %c0_i32_0 = arith.constant 0 : i32
    return %c0_i32, %arg1 : i32, i32
  }
  func.func @transform_3(%arg0: i32, %arg1: i32, %arg2: i32) -> (i32, i32) {
    %c0_i32 = arith.constant 0 : i32
    return %arg0, %arg1 : i32, i32
  }
}

module attributes {stable_mosaic.version = 11 : i64} {
  func.func @_gemm_bias_res_relu_kernel(%arg0: i32, %arg1: i32, %arg2: i32, %arg3: memref<16x768xbf16, #tpu.memory_space<vmem>>, %arg4: memref<768x128xbf16, #tpu.memory_space<vmem>>, %arg5: memref<1x128xf32, #tpu.memory_space<vmem>>, %arg6: memref<16x128xbf16, #tpu.memory_space<vmem>>, %arg7: memref<16x128xbf16, #tpu.memory_space<vmem>>, %arg8: memref<16x128xf32, #tpu.memory_space<vmem>>) attributes {dimension_semantics = [#tpu.dimension_semantics<parallel>, #tpu.dimension_semantics<parallel>, #tpu.dimension_semantics<arbitrary>], iteration_bounds = array<i64: 1, 2, 3>, scalar_prefetch = 0 : i64, scratch_operands = 1 : i64, tpu.core_type = #tpu.core_type<tc>, window_params = [{transform_indices = @transform_0, window_bounds = array<i64: 16, 768>}, {transform_indices = @transform_1, window_bounds = array<i64: 768, 128>}, {transform_indices = @transform_2, window_bounds = array<i64: 1, 128>}, {transform_indices = @transform_3, window_bounds = array<i64: 16, 128>}, {transform_indices = @transform_4, window_bounds = array<i64: 16, 128>}]} {
    %c0_i32 = arith.constant 0 : i32
    %0 = arith.cmpi eq, %arg2, %c0_i32 : i32
    %1 = arith.extui %0 : i1 to i32
    %c0_i32_0 = arith.constant 0 : i32
    %2 = arith.cmpi ne, %1, %c0_i32_0 : i32
    scf.if %2 {
      %cst_9 = arith.constant 0.000000e+00 : f32
      %12 = vector.broadcast %cst_9 : f32 to vector<16x128xf32>
      %c0_10 = arith.constant 0 : index
      %c0_11 = arith.constant 0 : index
      %13 = vector.load %arg8[%c0_10, %c0_11] : memref<16x128xf32, #tpu.memory_space<vmem>>, vector<16x128xf32>
      tpu.vector_store %arg8[%c0_10, %c0_11], %12 {strides = array<i32>} : memref<16x128xf32, #tpu.memory_space<vmem>>, vector<16x128xf32>,
    } else {
    }
    %c0 = arith.constant 0 : index
    %c0_1 = arith.constant 0 : index
    %3 = vector.load %arg8[%c0, %c0_1] : memref<16x128xf32, #tpu.memory_space<vmem>>, vector<16x128xf32>
    %c0_2 = arith.constant 0 : index
    %c0_3 = arith.constant 0 : index
    %4 = vector.load %arg3[%c0_2, %c0_3] : memref<16x768xbf16, #tpu.memory_space<vmem>>, vector<16x768xbf16>
    %c0_4 = arith.constant 0 : index
    %c0_5 = arith.constant 0 : index
    %5 = vector.load %arg4[%c0_4, %c0_5] : memref<768x128xbf16, #tpu.memory_space<vmem>>, vector<768x128xbf16>
    %cst = arith.constant dense<0.000000e+00> : vector<16x128xf32>
    %6 = tpu.matmul %4, %5, %cst {dimension_numbers = #tpu.dot_dimension_numbers<[1], [0], [0], [1], [0, 0, 1, 1], [], []>} : vector<16x768xbf16>, vector<768x128xbf16>, vector<16x128xf32> -> vector<16x128xf32>
    %7 = arith.addf %3, %6 : vector<16x128xf32>
    %c0_6 = arith.constant 0 : index
    %c0_7 = arith.constant 0 : index
    %8 = vector.load %arg8[%c0_6, %c0_7] : memref<16x128xf32, #tpu.memory_space<vmem>>, vector<16x128xf32>
    tpu.vector_store %arg8[%c0_6, %c0_7], %7 {strides = array<i32>} : memref<16x128xf32, #tpu.memory_space<vmem>>, vector<16x128xf32>,
    %c2_i32 = arith.constant 2 : i32
    %9 = arith.cmpi eq, %arg2, %c2_i32 : i32
    %10 = arith.extui %9 : i1 to i32
    %c0_i32_8 = arith.constant 0 : i32
    %11 = arith.cmpi ne, %10, %c0_i32_8 : i32
    scf.if %11 {
      %c0_9 = arith.constant 0 : index
      %c0_10 = arith.constant 0 : index
      %12 = vector.load %arg8[%c0_9, %c0_10] : memref<16x128xf32, #tpu.memory_space<vmem>>, vector<16x128xf32>
      %c0_11 = arith.constant 0 : index
      %c0_12 = arith.constant 0 : index
      %13 = vector.load %arg5[%c0_11, %c0_12] : memref<1x128xf32, #tpu.memory_space<vmem>>, vector<1x128xf32>
      %14 = vector.broadcast %13 : vector<1x128xf32> to vector<16x128xf32>
      %15 = arith.addf %12, %14 : vector<16x128xf32>
      %c0_13 = arith.constant 0 : index
      %c0_14 = arith.constant 0 : index
      %16 = vector.load %arg6[%c0_13, %c0_14] : memref<16x128xbf16, #tpu.memory_space<vmem>>, vector<16x128xbf16>
      %17 = arith.extf %16 : vector<16x128xbf16> to vector<16x128xf32>
      %18 = arith.addf %15, %17 : vector<16x128xf32>
      %cst_15 = arith.constant 0.000000e+00 : f32
      %19 = vector.broadcast %cst_15 : f32 to vector<16x128xf32>
      %20 = arith.maximumf %18, %19 : vector<16x128xf32>
      %21 = arith.truncf %20 : vector<16x128xf32> to vector<16x128xbf16>
      %c0_16 = arith.constant 0 : index
      %c0_17 = arith.constant 0 : index
      %22 = vector.load %arg7[%c0_16, %c0_17] : memref<16x128xbf16, #tpu.memory_space<vmem>>, vector<16x128xbf16>
      tpu.vector_store %arg7[%c0_16, %c0_17], %21 {strides = array<i32>} : memref<16x128xbf16, #tpu.memory_space<vmem>>, vector<16x128xbf16>,
    } else {
    }
    return
  }
  func.func @transform_0(%arg0: i32, %arg1: i32, %arg2: i32) -> (i32, i32) {
    %c0_i32 = arith.constant 0 : i32
    return %arg0, %arg2 : i32, i32
  }
  func.func @transform_1(%arg0: i32, %arg1: i32, %arg2: i32) -> (i32, i32) {
    %c0_i32 = arith.constant 0 : i32
    return %arg2, %arg1 : i32, i32
  }
  func.func @transform_2(%arg0: i32, %arg1: i32, %arg2: i32) -> (i32, i32) {
    %c0_i32 = arith.constant 0 : i32
    %c0_i32_0 = arith.constant 0 : i32
    return %c0_i32, %arg1 : i32, i32
  }
  func.func @transform_3(%arg0: i32, %arg1: i32, %arg2: i32) -> (i32, i32) {
    %c0_i32 = arith.constant 0 : i32
    return %arg0, %arg1 : i32, i32
  }
  func.func @transform_4(%arg0: i32, %arg1: i32, %arg2: i32) -> (i32, i32) {
    %c0_i32 = arith.constant 0 : i32
    return %arg0, %arg1 : i32, i32
  }
}

module attributes {stable_mosaic.version = 11 : i64} {
  func.func @_gemm_bias_relu_kernel(%arg0: i32, %arg1: i32, %arg2: i32, %arg3: memref<16x768xbf16, #tpu.memory_space<vmem>>, %arg4: memref<768x128xbf16, #tpu.memory_space<vmem>>, %arg5: memref<1x128xf32, #tpu.memory_space<vmem>>, %arg6: memref<16x128xbf16, #tpu.memory_space<vmem>>, %arg7: memref<16x128xf32, #tpu.memory_space<vmem>>) attributes {dimension_semantics = [#tpu.dimension_semantics<parallel>, #tpu.dimension_semantics<parallel>, #tpu.dimension_semantics<arbitrary>], iteration_bounds = array<i64: 1, 2, 3>, scalar_prefetch = 0 : i64, scratch_operands = 1 : i64, tpu.core_type = #tpu.core_type<tc>, window_params = [{transform_indices = @transform_0, window_bounds = array<i64: 16, 768>}, {transform_indices = @transform_1, window_bounds = array<i64: 768, 128>}, {transform_indices = @transform_2, window_bounds = array<i64: 1, 128>}, {transform_indices = @transform_3, window_bounds = array<i64: 16, 128>}]} {
    %c0_i32 = arith.constant 0 : i32
    %0 = arith.cmpi eq, %arg2, %c0_i32 : i32
    %1 = arith.extui %0 : i1 to i32
    %c0_i32_0 = arith.constant 0 : i32
    %2 = arith.cmpi ne, %1, %c0_i32_0 : i32
    scf.if %2 {
      %cst_9 = arith.constant 0.000000e+00 : f32
      %12 = vector.broadcast %cst_9 : f32 to vector<16x128xf32>
      %c0_10 = arith.constant 0 : index
      %c0_11 = arith.constant 0 : index
      %13 = vector.load %arg7[%c0_10, %c0_11] : memref<16x128xf32, #tpu.memory_space<vmem>>, vector<16x128xf32>
      tpu.vector_store %arg7[%c0_10, %c0_11], %12 {strides = array<i32>} : memref<16x128xf32, #tpu.memory_space<vmem>>, vector<16x128xf32>,
    } else {
    }
    %c0 = arith.constant 0 : index
    %c0_1 = arith.constant 0 : index
    %3 = vector.load %arg7[%c0, %c0_1] : memref<16x128xf32, #tpu.memory_space<vmem>>, vector<16x128xf32>
    %c0_2 = arith.constant 0 : index
    %c0_3 = arith.constant 0 : index
    %4 = vector.load %arg3[%c0_2, %c0_3] : memref<16x768xbf16, #tpu.memory_space<vmem>>, vector<16x768xbf16>
    %c0_4 = arith.constant 0 : index
    %c0_5 = arith.constant 0 : index
    %5 = vector.load %arg4[%c0_4, %c0_5] : memref<768x128xbf16, #tpu.memory_space<vmem>>, vector<768x128xbf16>
    %cst = arith.constant dense<0.000000e+00> : vector<16x128xf32>
    %6 = tpu.matmul %4, %5, %cst {dimension_numbers = #tpu.dot_dimension_numbers<[1], [0], [0], [1], [0, 0, 1, 1], [], []>} : vector<16x768xbf16>, vector<768x128xbf16>, vector<16x128xf32> -> vector<16x128xf32>
    %7 = arith.addf %3, %6 : vector<16x128xf32>
    %c0_6 = arith.constant 0 : index
    %c0_7 = arith.constant 0 : index
    %8 = vector.load %arg7[%c0_6, %c0_7] : memref<16x128xf32, #tpu.memory_space<vmem>>, vector<16x128xf32>
    tpu.vector_store %arg7[%c0_6, %c0_7], %7 {strides = array<i32>} : memref<16x128xf32, #tpu.memory_space<vmem>>, vector<16x128xf32>,
    %c2_i32 = arith.constant 2 : i32
    %9 = arith.cmpi eq, %arg2, %c2_i32 : i32
    %10 = arith.extui %9 : i1 to i32
    %c0_i32_8 = arith.constant 0 : i32
    %11 = arith.cmpi ne, %10, %c0_i32_8 : i32
    scf.if %11 {
      %c0_9 = arith.constant 0 : index
      %c0_10 = arith.constant 0 : index
      %12 = vector.load %arg7[%c0_9, %c0_10] : memref<16x128xf32, #tpu.memory_space<vmem>>, vector<16x128xf32>
      %c0_11 = arith.constant 0 : index
      %c0_12 = arith.constant 0 : index
      %13 = vector.load %arg5[%c0_11, %c0_12] : memref<1x128xf32, #tpu.memory_space<vmem>>, vector<1x128xf32>
      %14 = vector.broadcast %13 : vector<1x128xf32> to vector<16x128xf32>
      %15 = arith.addf %12, %14 : vector<16x128xf32>
      %cst_13 = arith.constant 0.000000e+00 : f32
      %16 = vector.broadcast %cst_13 : f32 to vector<16x128xf32>
      %17 = arith.maximumf %15, %16 : vector<16x128xf32>
      %18 = arith.truncf %17 : vector<16x128xf32> to vector<16x128xbf16>
      %c0_14 = arith.constant 0 : index
      %c0_15 = arith.constant 0 : index
      %19 = vector.load %arg6[%c0_14, %c0_15] : memref<16x128xbf16, #tpu.memory_space<vmem>>, vector<16x128xbf16>
      tpu.vector_store %arg6[%c0_14, %c0_15], %18 {strides = array<i32>} : memref<16x128xbf16, #tpu.memory_space<vmem>>, vector<16x128xbf16>,
    } else {
    }
    return
  }
  func.func @transform_0(%arg0: i32, %arg1: i32, %arg2: i32) -> (i32, i32) {
    %c0_i32 = arith.constant 0 : i32
    return %arg0, %arg2 : i32, i32
  }
  func.func @transform_1(%arg0: i32, %arg1: i32, %arg2: i32) -> (i32, i32) {
    %c0_i32 = arith.constant 0 : i32
    return %arg2, %arg1 : i32, i32
  }
  func.func @transform_2(%arg0: i32, %arg1: i32, %arg2: i32) -> (i32, i32) {
    %c0_i32 = arith.constant 0 : i32
    %c0_i32_0 = arith.constant 0 : i32
    return %c0_i32, %arg1 : i32, i32
  }
  func.func @transform_3(%arg0: i32, %arg1: i32, %arg2: i32) -> (i32, i32) {
    %c0_i32 = arith.constant 0 : i32
    return %arg0, %arg1 : i32, i32
  }
}

module attributes {stable_mosaic.version = 11 : i64} {
  func.func @_gemm_bias_relu_kernel(%arg0: i32, %arg1: i32, %arg2: i32, %arg3: memref<16x768xbf16, #tpu.memory_space<vmem>>, %arg4: memref<768x256xbf16, #tpu.memory_space<vmem>>, %arg5: memref<1x256xf32, #tpu.memory_space<vmem>>, %arg6: memref<16x256xbf16, #tpu.memory_space<vmem>>, %arg7: memref<16x256xf32, #tpu.memory_space<vmem>>) attributes {dimension_semantics = [#tpu.dimension_semantics<parallel>, #tpu.dimension_semantics<parallel>, #tpu.dimension_semantics<arbitrary>], iteration_bounds = array<i64: 1, 2, 3>, scalar_prefetch = 0 : i64, scratch_operands = 1 : i64, tpu.core_type = #tpu.core_type<tc>, window_params = [{transform_indices = @transform_0, window_bounds = array<i64: 16, 768>}, {transform_indices = @transform_1, window_bounds = array<i64: 768, 256>}, {transform_indices = @transform_2, window_bounds = array<i64: 1, 256>}, {transform_indices = @transform_3, window_bounds = array<i64: 16, 256>}]} {
    %c0_i32 = arith.constant 0 : i32
    %0 = arith.cmpi eq, %arg2, %c0_i32 : i32
    %1 = arith.extui %0 : i1 to i32
    %c0_i32_0 = arith.constant 0 : i32
    %2 = arith.cmpi ne, %1, %c0_i32_0 : i32
    scf.if %2 {
      %cst_9 = arith.constant 0.000000e+00 : f32
      %12 = vector.broadcast %cst_9 : f32 to vector<16x256xf32>
      %c0_10 = arith.constant 0 : index
      %c0_11 = arith.constant 0 : index
      %13 = vector.load %arg7[%c0_10, %c0_11] : memref<16x256xf32, #tpu.memory_space<vmem>>, vector<16x256xf32>
      tpu.vector_store %arg7[%c0_10, %c0_11], %12 {strides = array<i32>} : memref<16x256xf32, #tpu.memory_space<vmem>>, vector<16x256xf32>,
    } else {
    }
    %c0 = arith.constant 0 : index
    %c0_1 = arith.constant 0 : index
    %3 = vector.load %arg7[%c0, %c0_1] : memref<16x256xf32, #tpu.memory_space<vmem>>, vector<16x256xf32>
    %c0_2 = arith.constant 0 : index
    %c0_3 = arith.constant 0 : index
    %4 = vector.load %arg3[%c0_2, %c0_3] : memref<16x768xbf16, #tpu.memory_space<vmem>>, vector<16x768xbf16>
    %c0_4 = arith.constant 0 : index
    %c0_5 = arith.constant 0 : index
    %5 = vector.load %arg4[%c0_4, %c0_5] : memref<768x256xbf16, #tpu.memory_space<vmem>>, vector<768x256xbf16>
    %cst = arith.constant dense<0.000000e+00> : vector<16x256xf32>
    %6 = tpu.matmul %4, %5, %cst {dimension_numbers = #tpu.dot_dimension_numbers<[1], [0], [0], [1], [0, 0, 1, 1], [], []>} : vector<16x768xbf16>, vector<768x256xbf16>, vector<16x256xf32> -> vector<16x256xf32>
    %7 = arith.addf %3, %6 : vector<16x256xf32>
    %c0_6 = arith.constant 0 : index
    %c0_7 = arith.constant 0 : index
    %8 = vector.load %arg7[%c0_6, %c0_7] : memref<16x256xf32, #tpu.memory_space<vmem>>, vector<16x256xf32>
    tpu.vector_store %arg7[%c0_6, %c0_7], %7 {strides = array<i32>} : memref<16x256xf32, #tpu.memory_space<vmem>>, vector<16x256xf32>,
    %c2_i32 = arith.constant 2 : i32
    %9 = arith.cmpi eq, %arg2, %c2_i32 : i32
    %10 = arith.extui %9 : i1 to i32
    %c0_i32_8 = arith.constant 0 : i32
    %11 = arith.cmpi ne, %10, %c0_i32_8 : i32
    scf.if %11 {
      %c0_9 = arith.constant 0 : index
      %c0_10 = arith.constant 0 : index
      %12 = vector.load %arg7[%c0_9, %c0_10] : memref<16x256xf32, #tpu.memory_space<vmem>>, vector<16x256xf32>
      %c0_11 = arith.constant 0 : index
      %c0_12 = arith.constant 0 : index
      %13 = vector.load %arg5[%c0_11, %c0_12] : memref<1x256xf32, #tpu.memory_space<vmem>>, vector<1x256xf32>
      %14 = vector.broadcast %13 : vector<1x256xf32> to vector<16x256xf32>
      %15 = arith.addf %12, %14 : vector<16x256xf32>
      %cst_13 = arith.constant 0.000000e+00 : f32
      %16 = vector.broadcast %cst_13 : f32 to vector<16x256xf32>
      %17 = arith.maximumf %15, %16 : vector<16x256xf32>
      %18 = arith.truncf %17 : vector<16x256xf32> to vector<16x256xbf16>
      %c0_14 = arith.constant 0 : index
      %c0_15 = arith.constant 0 : index
      %19 = vector.load %arg6[%c0_14, %c0_15] : memref<16x256xbf16, #tpu.memory_space<vmem>>, vector<16x256xbf16>
      tpu.vector_store %arg6[%c0_14, %c0_15], %18 {strides = array<i32>} : memref<16x256xbf16, #tpu.memory_space<vmem>>, vector<16x256xbf16>,
    } else {
    }
    return
  }
  func.func @transform_0(%arg0: i32, %arg1: i32, %arg2: i32) -> (i32, i32) {
    %c0_i32 = arith.constant 0 : i32
    return %arg0, %arg2 : i32, i32
  }
  func.func @transform_1(%arg0: i32, %arg1: i32, %arg2: i32) -> (i32, i32) {
    %c0_i32 = arith.constant 0 : i32
    return %arg2, %arg1 : i32, i32
  }
  func.func @transform_2(%arg0: i32, %arg1: i32, %arg2: i32) -> (i32, i32) {
    %c0_i32 = arith.constant 0 : i32
    %c0_i32_0 = arith.constant 0 : i32
    return %c0_i32, %arg1 : i32, i32
  }
  func.func @transform_3(%arg0: i32, %arg1: i32, %arg2: i32) -> (i32, i32) {
    %c0_i32 = arith.constant 0 : i32
    return %arg0, %arg1 : i32, i32
  }
}

module attributes {stable_mosaic.version = 11 : i64} {
  func.func @_gemm_bias_kernel(%arg0: i32, %arg1: i32, %arg2: i32, %arg3: memref<16x256xbf16, #tpu.memory_space<vmem>>, %arg4: memref<256x256xbf16, #tpu.memory_space<vmem>>, %arg5: memref<1x256xf32, #tpu.memory_space<vmem>>, %arg6: memref<16x256xbf16, #tpu.memory_space<vmem>>, %arg7: memref<16x256xf32, #tpu.memory_space<vmem>>) attributes {dimension_semantics = [#tpu.dimension_semantics<parallel>, #tpu.dimension_semantics<parallel>, #tpu.dimension_semantics<arbitrary>], iteration_bounds = array<i64: 1, 2, 1>, scalar_prefetch = 0 : i64, scratch_operands = 1 : i64, tpu.core_type = #tpu.core_type<tc>, window_params = [{transform_indices = @transform_0, window_bounds = array<i64: 16, 256>}, {transform_indices = @transform_1, window_bounds = array<i64: 256, 256>}, {transform_indices = @transform_2, window_bounds = array<i64: 1, 256>}, {transform_indices = @transform_3, window_bounds = array<i64: 16, 256>}]} {
    %c0_i32 = arith.constant 0 : i32
    %0 = arith.cmpi eq, %arg2, %c0_i32 : i32
    %1 = arith.extui %0 : i1 to i32
    %c0_i32_0 = arith.constant 0 : i32
    %2 = arith.cmpi ne, %1, %c0_i32_0 : i32
    scf.if %2 {
      %cst_10 = arith.constant 0.000000e+00 : f32
      %12 = vector.broadcast %cst_10 : f32 to vector<16x256xf32>
      %c0_11 = arith.constant 0 : index
      %c0_12 = arith.constant 0 : index
      %13 = vector.load %arg7[%c0_11, %c0_12] : memref<16x256xf32, #tpu.memory_space<vmem>>, vector<16x256xf32>
      tpu.vector_store %arg7[%c0_11, %c0_12], %12 {strides = array<i32>} : memref<16x256xf32, #tpu.memory_space<vmem>>, vector<16x256xf32>,
    } else {
    }
    %c0 = arith.constant 0 : index
    %c0_1 = arith.constant 0 : index
    %3 = vector.load %arg7[%c0, %c0_1] : memref<16x256xf32, #tpu.memory_space<vmem>>, vector<16x256xf32>
    %c0_2 = arith.constant 0 : index
    %c0_3 = arith.constant 0 : index
    %4 = vector.load %arg3[%c0_2, %c0_3] : memref<16x256xbf16, #tpu.memory_space<vmem>>, vector<16x256xbf16>
    %c0_4 = arith.constant 0 : index
    %c0_5 = arith.constant 0 : index
    %5 = vector.load %arg4[%c0_4, %c0_5] : memref<256x256xbf16, #tpu.memory_space<vmem>>, vector<256x256xbf16>
    %cst = arith.constant dense<0.000000e+00> : vector<16x256xf32>
    %6 = tpu.matmul %4, %5, %cst {dimension_numbers = #tpu.dot_dimension_numbers<[1], [0], [0], [1], [0, 0, 1, 1], [], []>} : vector<16x256xbf16>, vector<256x256xbf16>, vector<16x256xf32> -> vector<16x256xf32>
    %7 = arith.addf %3, %6 : vector<16x256xf32>
    %c0_6 = arith.constant 0 : index
    %c0_7 = arith.constant 0 : index
    %8 = vector.load %arg7[%c0_6, %c0_7] : memref<16x256xf32, #tpu.memory_space<vmem>>, vector<16x256xf32>
    tpu.vector_store %arg7[%c0_6, %c0_7], %7 {strides = array<i32>} : memref<16x256xf32, #tpu.memory_space<vmem>>, vector<16x256xf32>,
    %c0_i32_8 = arith.constant 0 : i32
    %9 = arith.cmpi eq, %arg2, %c0_i32_8 : i32
    %10 = arith.extui %9 : i1 to i32
    %c0_i32_9 = arith.constant 0 : i32
    %11 = arith.cmpi ne, %10, %c0_i32_9 : i32
    scf.if %11 {
      %c0_10 = arith.constant 0 : index
      %c0_11 = arith.constant 0 : index
      %12 = vector.load %arg7[%c0_10, %c0_11] : memref<16x256xf32, #tpu.memory_space<vmem>>, vector<16x256xf32>
      %c0_12 = arith.constant 0 : index
      %c0_13 = arith.constant 0 : index
      %13 = vector.load %arg5[%c0_12, %c0_13] : memref<1x256xf32, #tpu.memory_space<vmem>>, vector<1x256xf32>
      %14 = vector.broadcast %13 : vector<1x256xf32> to vector<16x256xf32>
      %15 = arith.addf %12, %14 : vector<16x256xf32>
      %16 = arith.truncf %15 : vector<16x256xf32> to vector<16x256xbf16>
      %c0_14 = arith.constant 0 : index
      %c0_15 = arith.constant 0 : index
      %17 = vector.load %arg6[%c0_14, %c0_15] : memref<16x256xbf16, #tpu.memory_space<vmem>>, vector<16x256xbf16>
      tpu.vector_store %arg6[%c0_14, %c0_15], %16 {strides = array<i32>} : memref<16x256xbf16, #tpu.memory_space<vmem>>, vector<16x256xbf16>,
    } else {
    }
    return
  }
  func.func @transform_0(%arg0: i32, %arg1: i32, %arg2: i32) -> (i32, i32) {
    %c0_i32 = arith.constant 0 : i32
    return %arg0, %arg2 : i32, i32
  }
  func.func @transform_1(%arg0: i32, %arg1: i32, %arg2: i32) -> (i32, i32) {
    %c0_i32 = arith.constant 0 : i32
    return %arg2, %arg1 : i32, i32
  }
  func.func @transform_2(%arg0: i32, %arg1: i32, %arg2: i32) -> (i32, i32) {
    %c0_i32 = arith.constant 0 : i32
    %c0_i32_0 = arith.constant 0 : i32
    return %c0_i32, %arg1 : i32, i32
  }
  func.func @transform_3(%arg0: i32, %arg1: i32, %arg2: i32) -> (i32, i32) {
    %c0_i32 = arith.constant 0 : i32
    return %arg0, %arg1 : i32, i32
  }
}

module attributes {stable_mosaic.version = 11 : i64} {
  func.func @_gemm_bias_res_relu_kernel(%arg0: i32, %arg1: i32, %arg2: i32, %arg3: memref<16x768xbf16, #tpu.memory_space<vmem>>, %arg4: memref<768x256xbf16, #tpu.memory_space<vmem>>, %arg5: memref<1x256xf32, #tpu.memory_space<vmem>>, %arg6: memref<16x256xbf16, #tpu.memory_space<vmem>>, %arg7: memref<16x256xbf16, #tpu.memory_space<vmem>>, %arg8: memref<16x256xf32, #tpu.memory_space<vmem>>) attributes {dimension_semantics = [#tpu.dimension_semantics<parallel>, #tpu.dimension_semantics<parallel>, #tpu.dimension_semantics<arbitrary>], iteration_bounds = array<i64: 1, 2, 6>, scalar_prefetch = 0 : i64, scratch_operands = 1 : i64, tpu.core_type = #tpu.core_type<tc>, window_params = [{transform_indices = @transform_0, window_bounds = array<i64: 16, 768>}, {transform_indices = @transform_1, window_bounds = array<i64: 768, 256>}, {transform_indices = @transform_2, window_bounds = array<i64: 1, 256>}, {transform_indices = @transform_3, window_bounds = array<i64: 16, 256>}, {transform_indices = @transform_4, window_bounds = array<i64: 16, 256>}]} {
    %c0_i32 = arith.constant 0 : i32
    %0 = arith.cmpi eq, %arg2, %c0_i32 : i32
    %1 = arith.extui %0 : i1 to i32
    %c0_i32_0 = arith.constant 0 : i32
    %2 = arith.cmpi ne, %1, %c0_i32_0 : i32
    scf.if %2 {
      %cst_9 = arith.constant 0.000000e+00 : f32
      %12 = vector.broadcast %cst_9 : f32 to vector<16x256xf32>
      %c0_10 = arith.constant 0 : index
      %c0_11 = arith.constant 0 : index
      %13 = vector.load %arg8[%c0_10, %c0_11] : memref<16x256xf32, #tpu.memory_space<vmem>>, vector<16x256xf32>
      tpu.vector_store %arg8[%c0_10, %c0_11], %12 {strides = array<i32>} : memref<16x256xf32, #tpu.memory_space<vmem>>, vector<16x256xf32>,
    } else {
    }
    %c0 = arith.constant 0 : index
    %c0_1 = arith.constant 0 : index
    %3 = vector.load %arg8[%c0, %c0_1] : memref<16x256xf32, #tpu.memory_space<vmem>>, vector<16x256xf32>
    %c0_2 = arith.constant 0 : index
    %c0_3 = arith.constant 0 : index
    %4 = vector.load %arg3[%c0_2, %c0_3] : memref<16x768xbf16, #tpu.memory_space<vmem>>, vector<16x768xbf16>
    %c0_4 = arith.constant 0 : index
    %c0_5 = arith.constant 0 : index
    %5 = vector.load %arg4[%c0_4, %c0_5] : memref<768x256xbf16, #tpu.memory_space<vmem>>, vector<768x256xbf16>
    %cst = arith.constant dense<0.000000e+00> : vector<16x256xf32>
    %6 = tpu.matmul %4, %5, %cst {dimension_numbers = #tpu.dot_dimension_numbers<[1], [0], [0], [1], [0, 0, 1, 1], [], []>} : vector<16x768xbf16>, vector<768x256xbf16>, vector<16x256xf32> -> vector<16x256xf32>
    %7 = arith.addf %3, %6 : vector<16x256xf32>
    %c0_6 = arith.constant 0 : index
    %c0_7 = arith.constant 0 : index
    %8 = vector.load %arg8[%c0_6, %c0_7] : memref<16x256xf32, #tpu.memory_space<vmem>>, vector<16x256xf32>
    tpu.vector_store %arg8[%c0_6, %c0_7], %7 {strides = array<i32>} : memref<16x256xf32, #tpu.memory_space<vmem>>, vector<16x256xf32>,
    %c5_i32 = arith.constant 5 : i32
    %9 = arith.cmpi eq, %arg2, %c5_i32 : i32
    %10 = arith.extui %9 : i1 to i32
    %c0_i32_8 = arith.constant 0 : i32
    %11 = arith.cmpi ne, %10, %c0_i32_8 : i32
    scf.if %11 {
      %c0_9 = arith.constant 0 : index
      %c0_10 = arith.constant 0 : index
      %12 = vector.load %arg8[%c0_9, %c0_10] : memref<16x256xf32, #tpu.memory_space<vmem>>, vector<16x256xf32>
      %c0_11 = arith.constant 0 : index
      %c0_12 = arith.constant 0 : index
      %13 = vector.load %arg5[%c0_11, %c0_12] : memref<1x256xf32, #tpu.memory_space<vmem>>, vector<1x256xf32>
      %14 = vector.broadcast %13 : vector<1x256xf32> to vector<16x256xf32>
      %15 = arith.addf %12, %14 : vector<16x256xf32>
      %c0_13 = arith.constant 0 : index
      %c0_14 = arith.constant 0 : index
      %16 = vector.load %arg6[%c0_13, %c0_14] : memref<16x256xbf16, #tpu.memory_space<vmem>>, vector<16x256xbf16>
      %17 = arith.extf %16 : vector<16x256xbf16> to vector<16x256xf32>
      %18 = arith.addf %15, %17 : vector<16x256xf32>
      %cst_15 = arith.constant 0.000000e+00 : f32
      %19 = vector.broadcast %cst_15 : f32 to vector<16x256xf32>
      %20 = arith.maximumf %18, %19 : vector<16x256xf32>
      %21 = arith.truncf %20 : vector<16x256xf32> to vector<16x256xbf16>
      %c0_16 = arith.constant 0 : index
      %c0_17 = arith.constant 0 : index
      %22 = vector.load %arg7[%c0_16, %c0_17] : memref<16x256xbf16, #tpu.memory_space<vmem>>, vector<16x256xbf16>
      tpu.vector_store %arg7[%c0_16, %c0_17], %21 {strides = array<i32>} : memref<16x256xbf16, #tpu.memory_space<vmem>>, vector<16x256xbf16>,
    } else {
    }
    return
  }
  func.func @transform_0(%arg0: i32, %arg1: i32, %arg2: i32) -> (i32, i32) {
    %c0_i32 = arith.constant 0 : i32
    return %arg0, %arg2 : i32, i32
  }
  func.func @transform_1(%arg0: i32, %arg1: i32, %arg2: i32) -> (i32, i32) {
    %c0_i32 = arith.constant 0 : i32
    return %arg2, %arg1 : i32, i32
  }
  func.func @transform_2(%arg0: i32, %arg1: i32, %arg2: i32) -> (i32, i32) {
    %c0_i32 = arith.constant 0 : i32
    %c0_i32_0 = arith.constant 0 : i32
    return %c0_i32, %arg1 : i32, i32
  }
  func.func @transform_3(%arg0: i32, %arg1: i32, %arg2: i32) -> (i32, i32) {
    %c0_i32 = arith.constant 0 : i32
    return %arg0, %arg1 : i32, i32
  }
  func.func @transform_4(%arg0: i32, %arg1: i32, %arg2: i32) -> (i32, i32) {
    %c0_i32 = arith.constant 0 : i32
    return %arg0, %arg1 : i32, i32
  }
}

module attributes {stable_mosaic.version = 11 : i64} {
  func.func @_gemm_bias_relu_kernel(%arg0: i32, %arg1: i32, %arg2: i32, %arg3: memref<16x768xbf16, #tpu.memory_space<vmem>>, %arg4: memref<768x256xbf16, #tpu.memory_space<vmem>>, %arg5: memref<1x256xf32, #tpu.memory_space<vmem>>, %arg6: memref<16x256xbf16, #tpu.memory_space<vmem>>, %arg7: memref<16x256xf32, #tpu.memory_space<vmem>>) attributes {dimension_semantics = [#tpu.dimension_semantics<parallel>, #tpu.dimension_semantics<parallel>, #tpu.dimension_semantics<arbitrary>], iteration_bounds = array<i64: 1, 2, 6>, scalar_prefetch = 0 : i64, scratch_operands = 1 : i64, tpu.core_type = #tpu.core_type<tc>, window_params = [{transform_indices = @transform_0, window_bounds = array<i64: 16, 768>}, {transform_indices = @transform_1, window_bounds = array<i64: 768, 256>}, {transform_indices = @transform_2, window_bounds = array<i64: 1, 256>}, {transform_indices = @transform_3, window_bounds = array<i64: 16, 256>}]} {
    %c0_i32 = arith.constant 0 : i32
    %0 = arith.cmpi eq, %arg2, %c0_i32 : i32
    %1 = arith.extui %0 : i1 to i32
    %c0_i32_0 = arith.constant 0 : i32
    %2 = arith.cmpi ne, %1, %c0_i32_0 : i32
    scf.if %2 {
      %cst_9 = arith.constant 0.000000e+00 : f32
      %12 = vector.broadcast %cst_9 : f32 to vector<16x256xf32>
      %c0_10 = arith.constant 0 : index
      %c0_11 = arith.constant 0 : index
      %13 = vector.load %arg7[%c0_10, %c0_11] : memref<16x256xf32, #tpu.memory_space<vmem>>, vector<16x256xf32>
      tpu.vector_store %arg7[%c0_10, %c0_11], %12 {strides = array<i32>} : memref<16x256xf32, #tpu.memory_space<vmem>>, vector<16x256xf32>,
    } else {
    }
    %c0 = arith.constant 0 : index
    %c0_1 = arith.constant 0 : index
    %3 = vector.load %arg7[%c0, %c0_1] : memref<16x256xf32, #tpu.memory_space<vmem>>, vector<16x256xf32>
    %c0_2 = arith.constant 0 : index
    %c0_3 = arith.constant 0 : index
    %4 = vector.load %arg3[%c0_2, %c0_3] : memref<16x768xbf16, #tpu.memory_space<vmem>>, vector<16x768xbf16>
    %c0_4 = arith.constant 0 : index
    %c0_5 = arith.constant 0 : index
    %5 = vector.load %arg4[%c0_4, %c0_5] : memref<768x256xbf16, #tpu.memory_space<vmem>>, vector<768x256xbf16>
    %cst = arith.constant dense<0.000000e+00> : vector<16x256xf32>
    %6 = tpu.matmul %4, %5, %cst {dimension_numbers = #tpu.dot_dimension_numbers<[1], [0], [0], [1], [0, 0, 1, 1], [], []>} : vector<16x768xbf16>, vector<768x256xbf16>, vector<16x256xf32> -> vector<16x256xf32>
    %7 = arith.addf %3, %6 : vector<16x256xf32>
    %c0_6 = arith.constant 0 : index
    %c0_7 = arith.constant 0 : index
    %8 = vector.load %arg7[%c0_6, %c0_7] : memref<16x256xf32, #tpu.memory_space<vmem>>, vector<16x256xf32>
    tpu.vector_store %arg7[%c0_6, %c0_7], %7 {strides = array<i32>} : memref<16x256xf32, #tpu.memory_space<vmem>>, vector<16x256xf32>,
    %c5_i32 = arith.constant 5 : i32
    %9 = arith.cmpi eq, %arg2, %c5_i32 : i32
    %10 = arith.extui %9 : i1 to i32
    %c0_i32_8 = arith.constant 0 : i32
    %11 = arith.cmpi ne, %10, %c0_i32_8 : i32
    scf.if %11 {
      %c0_9 = arith.constant 0 : index
      %c0_10 = arith.constant 0 : index
      %12 = vector.load %arg7[%c0_9, %c0_10] : memref<16x256xf32, #tpu.memory_space<vmem>>, vector<16x256xf32>
      %c0_11 = arith.constant 0 : index
      %c0_12 = arith.constant 0 : index
      %13 = vector.load %arg5[%c0_11, %c0_12] : memref<1x256xf32, #tpu.memory_space<vmem>>, vector<1x256xf32>
      %14 = vector.broadcast %13 : vector<1x256xf32> to vector<16x256xf32>
      %15 = arith.addf %12, %14 : vector<16x256xf32>
      %cst_13 = arith.constant 0.000000e+00 : f32
      %16 = vector.broadcast %cst_13 : f32 to vector<16x256xf32>
      %17 = arith.maximumf %15, %16 : vector<16x256xf32>
      %18 = arith.truncf %17 : vector<16x256xf32> to vector<16x256xbf16>
      %c0_14 = arith.constant 0 : index
      %c0_15 = arith.constant 0 : index
      %19 = vector.load %arg6[%c0_14, %c0_15] : memref<16x256xbf16, #tpu.memory_space<vmem>>, vector<16x256xbf16>
      tpu.vector_store %arg6[%c0_14, %c0_15], %18 {strides = array<i32>} : memref<16x256xbf16, #tpu.memory_space<vmem>>, vector<16x256xbf16>,
    } else {
    }
    return
  }
  func.func @transform_0(%arg0: i32, %arg1: i32, %arg2: i32) -> (i32, i32) {
    %c0_i32 = arith.constant 0 : i32
    return %arg0, %arg2 : i32, i32
  }
  func.func @transform_1(%arg0: i32, %arg1: i32, %arg2: i32) -> (i32, i32) {
    %c0_i32 = arith.constant 0 : i32
    return %arg2, %arg1 : i32, i32
  }
  func.func @transform_2(%arg0: i32, %arg1: i32, %arg2: i32) -> (i32, i32) {
    %c0_i32 = arith.constant 0 : i32
    %c0_i32_0 = arith.constant 0 : i32
    return %c0_i32, %arg1 : i32, i32
  }
  func.func @transform_3(%arg0: i32, %arg1: i32, %arg2: i32) -> (i32, i32) {
    %c0_i32 = arith.constant 0 : i32
    return %arg0, %arg1 : i32, i32
  }
}

module attributes {stable_mosaic.version = 11 : i64} {
  func.func @_head_kernel(%arg0: i32, %arg1: memref<8x1024xf32, #tpu.memory_space<vmem>>, %arg2: memref<1024x256xbf16, #tpu.memory_space<vmem>>, %arg3: memref<1x256xf32, #tpu.memory_space<vmem>>, %arg4: memref<256x128xbf16, #tpu.memory_space<vmem>>, %arg5: memref<1x128xf32, #tpu.memory_space<vmem>>, %arg6: memref<8x256xf32, #tpu.memory_space<vmem>>, %arg7: memref<8x128xf32, #tpu.memory_space<vmem>>, %arg8: memref<8x128xf32, #tpu.memory_space<vmem>>) attributes {dimension_semantics = [#tpu.dimension_semantics<arbitrary>], iteration_bounds = array<i64: 1>, scalar_prefetch = 0 : i64, scratch_operands = 0 : i64, tpu.core_type = #tpu.core_type<tc>, window_params = [{pipeline_mode = #tpu.pipeline_mode<synchronous>, transform_indices = @transform_0, window_bounds = array<i64: 8, 1024>}, {pipeline_mode = #tpu.pipeline_mode<synchronous>, transform_indices = @transform_1, window_bounds = array<i64: 1024, 256>}, {pipeline_mode = #tpu.pipeline_mode<synchronous>, transform_indices = @transform_2, window_bounds = array<i64: 1, 256>}, {pipeline_mode = #tpu.pipeline_mode<synchronous>, transform_indices = @transform_3, window_bounds = array<i64: 256, 128>}, {pipeline_mode = #tpu.pipeline_mode<synchronous>, transform_indices = @transform_4, window_bounds = array<i64: 1, 128>}, {pipeline_mode = #tpu.pipeline_mode<synchronous>, transform_indices = @transform_5, window_bounds = array<i64: 8, 256>}, {pipeline_mode = #tpu.pipeline_mode<synchronous>, transform_indices = @transform_6, window_bounds = array<i64: 8, 128>}, {pipeline_mode = #tpu.pipeline_mode<synchronous>, transform_indices = @transform_7, window_bounds = array<i64: 8, 128>}]} {
    %c0 = arith.constant 0 : index
    %c0_0 = arith.constant 0 : index
    %0 = vector.load %arg1[%c0, %c0_0] : memref<8x1024xf32, #tpu.memory_space<vmem>>, vector<8x1024xf32>
    %1 = arith.truncf %0 : vector<8x1024xf32> to vector<8x1024xbf16>
    %c0_1 = arith.constant 0 : index
    %c0_2 = arith.constant 0 : index
    %2 = vector.load %arg2[%c0_1, %c0_2] : memref<1024x256xbf16, #tpu.memory_space<vmem>>, vector<1024x256xbf16>
    %cst = arith.constant dense<0.000000e+00> : vector<8x256xf32>
    %3 = tpu.matmul %1, %2, %cst {dimension_numbers = #tpu.dot_dimension_numbers<[1], [0], [0], [1], [0, 0, 1, 1], [], []>} : vector<8x1024xbf16>, vector<1024x256xbf16>, vector<8x256xf32> -> vector<8x256xf32>
    %c0_3 = arith.constant 0 : index
    %c0_4 = arith.constant 0 : index
    %4 = vector.load %arg3[%c0_3, %c0_4] : memref<1x256xf32, #tpu.memory_space<vmem>>, vector<1x256xf32>
    %5 = vector.broadcast %4 : vector<1x256xf32> to vector<8x256xf32>
    %6 = arith.addf %3, %5 : vector<8x256xf32>
    %c0_5 = arith.constant 0 : index
    %c0_6 = arith.constant 0 : index
    %7 = vector.load %arg6[%c0_5, %c0_6] : memref<8x256xf32, #tpu.memory_space<vmem>>, vector<8x256xf32>
    tpu.vector_store %arg6[%c0_5, %c0_6], %6 {strides = array<i32>} : memref<8x256xf32, #tpu.memory_space<vmem>>, vector<8x256xf32>,
    %8 = arith.truncf %6 : vector<8x256xf32> to vector<8x256xbf16>
    %c0_7 = arith.constant 0 : index
    %c0_8 = arith.constant 0 : index
    %9 = vector.load %arg4[%c0_7, %c0_8] : memref<256x128xbf16, #tpu.memory_space<vmem>>, vector<256x128xbf16>
    %cst_9 = arith.constant dense<0.000000e+00> : vector<8x128xf32>
    %10 = tpu.matmul %8, %9, %cst_9 {dimension_numbers = #tpu.dot_dimension_numbers<[1], [0], [0], [1], [0, 0, 1, 1], [], []>} : vector<8x256xbf16>, vector<256x128xbf16>, vector<8x128xf32> -> vector<8x128xf32>
    %c0_10 = arith.constant 0 : index
    %c0_11 = arith.constant 0 : index
    %11 = vector.load %arg5[%c0_10, %c0_11] : memref<1x128xf32, #tpu.memory_space<vmem>>, vector<1x128xf32>
    %12 = vector.broadcast %11 : vector<1x128xf32> to vector<8x128xf32>
    %13 = arith.addf %10, %12 : vector<8x128xf32>
    %c0_12 = arith.constant 0 : index
    %c0_13 = arith.constant 0 : index
    %14 = vector.load %arg7[%c0_12, %c0_13] : memref<8x128xf32, #tpu.memory_space<vmem>>, vector<8x128xf32>
    tpu.vector_store %arg7[%c0_12, %c0_13], %13 {strides = array<i32>} : memref<8x128xf32, #tpu.memory_space<vmem>>, vector<8x128xf32>,
    %cst_14 = arith.constant 0.000000e+00 : f32
    %15 = vector.broadcast %cst_14 : f32 to vector<8x128xf32>
    %16 = arith.subf %15, %13 : vector<8x128xf32>
    %17 = math.exp %16 : vector<8x128xf32>
    %cst_15 = arith.constant 1.000000e+00 : f32
    %18 = vector.broadcast %cst_15 : f32 to vector<8x128xf32>
    %19 = arith.addf %18, %17 : vector<8x128xf32>
    %20 = tpu.reciprocal %19 {approx = true} : vector<8x128xf32> -> vector<8x128xf32>
    %cst_16 = arith.constant 0.000000e+00 : f32
    %cst_17 = arith.constant 1.000000e+00 : f32
    %21 = vector.broadcast %cst_16 : f32 to vector<8x128xf32>
    %22 = arith.maximumf %21, %20 : vector<8x128xf32>
    %23 = vector.broadcast %cst_17 : f32 to vector<8x128xf32>
    %24 = arith.minimumf %23, %22 : vector<8x128xf32>
    %c0_18 = arith.constant 0 : index
    %c0_19 = arith.constant 0 : index
    %25 = vector.load %arg8[%c0_18, %c0_19] : memref<8x128xf32, #tpu.memory_space<vmem>>, vector<8x128xf32>
    tpu.vector_store %arg8[%c0_18, %c0_19], %24 {strides = array<i32>} : memref<8x128xf32, #tpu.memory_space<vmem>>, vector<8x128xf32>,
    return
  }
  func.func @transform_0(%arg0: i32) -> (i32, i32) {
    %c0_i32 = arith.constant 0 : i32
    %c0_i32_0 = arith.constant 0 : i32
    %c0_i32_1 = arith.constant 0 : i32
    return %c0_i32, %c0_i32_0 : i32, i32
  }
  func.func @transform_1(%arg0: i32) -> (i32, i32) {
    %c0_i32 = arith.constant 0 : i32
    %c0_i32_0 = arith.constant 0 : i32
    %c0_i32_1 = arith.constant 0 : i32
    return %c0_i32, %c0_i32_0 : i32, i32
  }
  func.func @transform_2(%arg0: i32) -> (i32, i32) {
    %c0_i32 = arith.constant 0 : i32
    %c0_i32_0 = arith.constant 0 : i32
    %c0_i32_1 = arith.constant 0 : i32
    return %c0_i32, %c0_i32_0 : i32, i32
  }
  func.func @transform_3(%arg0: i32) -> (i32, i32) {
    %c0_i32 = arith.constant 0 : i32
    %c0_i32_0 = arith.constant 0 : i32
    %c0_i32_1 = arith.constant 0 : i32
    return %c0_i32, %c0_i32_0 : i32, i32
  }
  func.func @transform_4(%arg0: i32) -> (i32, i32) {
    %c0_i32 = arith.constant 0 : i32
    %c0_i32_0 = arith.constant 0 : i32
    %c0_i32_1 = arith.constant 0 : i32
    return %c0_i32, %c0_i32_0 : i32, i32
  }
  func.func @transform_5(%arg0: i32) -> (i32, i32) {
    %c0_i32 = arith.constant 0 : i32
    %c0_i32_0 = arith.constant 0 : i32
    %c0_i32_1 = arith.constant 0 : i32
    return %c0_i32, %c0_i32_0 : i32, i32
  }
  func.func @transform_6(%arg0: i32) -> (i32, i32) {
    %c0_i32 = arith.constant 0 : i32
    %c0_i32_0 = arith.constant 0 : i32
    %c0_i32_1 = arith.constant 0 : i32
    return %c0_i32, %c0_i32_0 : i32, i32
  }
  func.func @transform_7(%arg0: i32) -> (i32, i32) {
    %c0_i32 = arith.constant 0 : i32
    %c0_i32_0 = arith.constant 0 : i32
    %c0_i32_1 = arith.constant 0 : i32
    return %c0_i32, %c0_i32_0 : i32, i32
  }
}

</mosaic_0001>

<bundles_post_ra>
// kernel: _lambda_.37
= control target key start
LH: loop header
LB: loop body
LE: loop exit
PB: predicated region body
PF: predicated region fallthrough
CT: control target
= control target key end

     0   :  { %s1165_s12 = smov 0   ;;  %s1167_s13 = smov 0   ;;  %s1318_s0 = inlined_call_operand.vmem [shape: bf16[256,256], index: 0, kind: input, shape index: {}]   ;;  %s1319_s1 = inlined_call_operand.vmem [shape: bf16[256,128], index: 1, kind: input, shape index: {}]   ;;  %s1320_s2 = inlined_call_operand.vmem [shape: f32[1,128], index: 2, kind: input, shape index: {}]   ;;  %s1321_s3 = inlined_call_operand.vmem [shape: bf16[256,128], index: 3, kind: output, shape index: {}]  }
   0x1   :  { %s1169_s14 = smov 0  }
   0x2 LB: > { %s32_s15 = sadd.s32 1, %s1139_s13  ;;  %p864_p0 = scmp.ge.s32.totalorder %s1143_s14, 1  ;;  %s1143_s14 = sphi %s1169_s14, %s13_s14   ;;  %s1139_s13 = sphi %s1167_s13, %s1323_s13   ;;  %s1135_s12 = sphi %s1165_s12, %s1322_s12  }
   0x3   : > { %p34_p1 = scmp.ge.s32.totalorder %s32_s15, 2  ;;  %p191_p2 = scmp.lt.s32.totalorder %s1143_s14, 3 }
   0x5   : > { %s1325_s15 = smov (%p34_p1, %s32_s15), 0  ;;  %p192_p3 = pnand %p864_p0, %p191_p2 }
   0x6   : > { %s865_s28 = sshll.u32 (!%p192_p3), %s1135_s12, 4 }
   0x7   : > { %195 = sbr.rel (%p192_p3) target bundleno = 242 (0xf2), region = 32  ;;  %p236_p4 = scmp.lt.s32.totalorder (!%p192_p3), %s865_s28, 31 }
   0xc   : > { %v1024_v0 = vld [vmem:[%s1319_s1 + $0x38] sm:$0xff]  ;;  %v1023_v2 = vld [vmem:[%s1319_s1 + $0x30] sm:$0xff]  ;;  %v1022_v4 = vld [vmem:[%s1319_s1 + $0x28] sm:$0xff]  ;;  %s1327_s28 = smov (!%p236_p4, %s865_s28), 31 }
   0xd   : > { %v1032_v1 = vld [vmem:[%s1319_s1 + $0x78] sm:$0xff]  ;;  %527 = vmatpush.bf16.msra.mxu0 %v1024_v0  ;;  %1080 = vmatpush.bf16.msra.mxu2 %v1024_v0  ;;  %v1031_v3 = vld [vmem:[%s1319_s1 + $0x70] sm:$0xff]  ;;  %v1030_v5 = vld [vmem:[%s1319_s1 + $0x68] sm:$0xff]  ;;  %s1000_s17 = sshll.u32 %s1327_s28, 3  ;;  %s869_s5 = sshll.u32 %s1327_s28, 2 }
   0xe   : > { %576 = vmatpush.bf16.msra.mxu1 %v1032_v1  ;;  %1088 = vmatpush.bf16.msra.mxu3 %v1032_v1  ;;  %v1021_v6 = vld [vmem:[%s1319_s1 + $0x20] sm:$0xff]  ;;  %v1020_v8 = vld [vmem:[%s1319_s1 + $0x18] sm:$0xff]  ;;  %v1019_v10 = vld [vmem:[%s1319_s1 + $0x10] sm:$0xff]  ;;  %s1231_s22 = scalar_lea.vmem %s1318_s0, %s1000_s17  ;;  %s1285_s8 = scalar_lea.vmem %s1321_s3, %s869_s5 }
   0xf   : > { %v1029_v7 = vld [vmem:[%s1319_s1 + $0x60] sm:$0xff]  ;;  %v1028_v9 = vld [vmem:[%s1319_s1 + $0x58] sm:$0xff]  ;;  %v1027_v11 = vld [vmem:[%s1319_s1 + $0x50] sm:$0xff] }
  0x10   : > { %v1018_v12 = vld [vmem:[%s1319_s1 + $0x8] sm:$0xff]  ;;  %v1017_v14 = vld [vmem:[%s1319_s1] sm:$0xff]  ;;  %v880_v28 = vld [vmem:[%s1231_s22 + $0x10] sm:$0xf] }
  0x11   : > { %528 = vmatpush.bf16.msra.mxu0 %v1023_v2  ;;  %1081 = vmatpush.bf16.msra.mxu2 %v1023_v2  ;;  %v1026_v13 = vld [vmem:[%s1319_s1 + $0x48] sm:$0xff]  ;;  %v1025_v15 = vld [vmem:[%s1319_s1 + $0x40] sm:$0xff]  ;;  %v1004_v29 = vld [vmem:[%s1231_s22 + $0x14] sm:$0xf0] }
  0x12   : > { %577 = vmatpush.bf16.msra.mxu1 %v1031_v3  ;;  %1089 = vmatpush.bf16.msra.mxu3 %v1031_v3  ;;  %v872_v16 = vld [vmem:[%s1231_s22] sm:$0xf]  ;;  %v1002_v17 = vld [vmem:[%s1231_s22 + $0x4] sm:$0xf0]  ;;  %v1001_v20 = vld [vmem:[%s1231_s22 + $0x4] sm:$0xf]  ;;  %v881_v36 = vor.u32 %v1004_v29, %v880_v28 }
  0x13   : > { %v904_v18 = vld [vmem:[%s1231_s22 + $0x40] sm:$0xf]  ;;  %v1010_v19 = vld [vmem:[%s1231_s22 + $0x44] sm:$0xf0]  ;;  %v874_v21 = vld [vmem:[%s1231_s22 + $0x8] sm:$0xf0]  ;;  %v873_v24 = vor.u32 %v1002_v17, %v872_v16 }
  0x14   : > { %v1009_v22 = vld [vmem:[%s1231_s22 + $0x44] sm:$0xf]  ;;  %v906_v23 = vld [vmem:[%s1231_s22 + $0x48] sm:$0xf0]  ;;  %v905_v25 = vor.u32 %v1010_v19, %v904_v18  ;;  %v877_v26 = vor.u32 %v1001_v20, %v874_v21  ;;  %v912_v30 = vld [vmem:[%s1231_s22 + $0x50] sm:$0xf] }
  0x15   : > { %529 = vmatpush.bf16.msra.mxu0 %v1022_v4  ;;  %1082 = vmatpush.bf16.msra.mxu2 %v1022_v4  ;;  %v909_v27 = vor.u32 %v1009_v22, %v906_v23  ;;  %v1012_v31 = vld [vmem:[%s1231_s22 + $0x54] sm:$0xf0]  ;;  %v1003_v32 = vld [vmem:[%s1231_s22 + $0x14] sm:$0xf]  ;;  %v882_v33 = vld [vmem:[%s1231_s22 + $0x18] sm:$0xf0] }
  0x16   : > { %578 = vmatpush.bf16.msra.mxu1 %v1030_v5  ;;  %1090 = vmatpush.bf16.msra.mxu3 %v1030_v5  ;;  %v1011_v34 = vld [vmem:[%s1231_s22 + $0x54] sm:$0xf]  ;;  %v914_v35 = vld [vmem:[%s1231_s22 + $0x58] sm:$0xf0]  ;;  %v913_v37 = vor.u32 %v1012_v31, %v912_v30  ;;  %v885_v38 = vor.u32 %v1003_v32, %v882_v33  ;;  %v888_v40 = vld [vmem:[%s1231_s22 + $0x20] sm:$0xf] }
  0x17   : > { %v917_v39 = vor.u32 %v1011_v34, %v914_v35  ;;  %v1006_v41 = vld [vmem:[%s1231_s22 + $0x24] sm:$0xf0]  ;;  %v920_v42 = vld [vmem:[%s1231_s22 + $0x60] sm:$0xf]  ;;  %v1005_v44 = vld [vmem:[%s1231_s22 + $0x24] sm:$0xf] }
  0x18   : > { %v1014_v43 = vld [vmem:[%s1231_s22 + $0x64] sm:$0xf0]  ;;  %v890_v45 = vld [vmem:[%s1231_s22 + $0x28] sm:$0xf0]  ;;  %v1013_v46 = vld [vmem:[%s1231_s22 + $0x64] sm:$0xf]  ;;  %v889_v48 = vor.u32 %v1006_v41, %v888_v40 }
  0x19   : > { %530 = vmatpush.bf16.msra.mxu0 %v1021_v6  ;;  %1083 = vmatpush.bf16.msra.mxu2 %v1021_v6  ;;  %v922_v47 = vld [vmem:[%s1231_s22 + $0x68] sm:$0xf0]  ;;  %v921_v49 = vor.u32 %v1014_v43, %v920_v42  ;;  %v893_v50 = vor.u32 %v1005_v44, %v890_v45  ;;  %v896_v52 = vld [vmem:[%s1231_s22 + $0x30] sm:$0xf]  ;;  %v1008_v53 = vld [vmem:[%s1231_s22 + $0x34] sm:$0xf0] }
  0x1a   : > { %579 = vmatpush.bf16.msra.mxu1 %v1029_v7  ;;  %1091 = vmatpush.bf16.msra.mxu3 %v1029_v7  ;;  %v925_v51 = vor.u32 %v1013_v46, %v922_v47  ;;  %v928_v54 = vld [vmem:[%s1231_s22 + $0x70] sm:$0xf]  ;;  %v1016_v55 = vld [vmem:[%s1231_s22 + $0x74] sm:$0xf0]  ;;  %v1007_v56 = vld [vmem:[%s1231_s22 + $0x34] sm:$0xf]  ;;  %v897_v60 = vor.u32 %v1008_v53, %v896_v52 }
  0x1b   : > { %v898_v57 = vld [vmem:[%s1231_s22 + $0x38] sm:$0xf0]  ;;  %v1015_v58 = vld [vmem:[%s1231_s22 + $0x74] sm:$0xf]  ;;  %v929_v61 = vor.u32 %v1016_v55, %v928_v54  ;;  %v1277_v3 = vld [vmem:[%s1320_s2] ss:$0 sm:$0xff] }
  0x1c   : > { %v930_v59 = vld [vmem:[%s1231_s22 + $0x78] sm:$0xf0]  ;;  %v901_v62 = vor.u32 %v1007_v56, %v898_v57 }
  0x1d   : > { %531 = vmatpush.bf16.msra.mxu0 %v1020_v8  ;;  %1084 = vmatpush.bf16.msra.mxu2 %v1020_v8  ;;  %v933_v63 = vor.u32 %v1015_v58, %v930_v59 }
  0x1e   : > { %580 = vmatpush.bf16.msra.mxu1 %v1028_v9  ;;  %1092 = vmatpush.bf16.msra.mxu3 %v1028_v9 }
  0x21   : > { %532 = vmatpush.bf16.msra.mxu0 %v1019_v10  ;;  %1085 = vmatpush.bf16.msra.mxu2 %v1019_v10 }
  0x22   : > { %581 = vmatpush.bf16.msra.mxu1 %v1027_v11  ;;  %1093 = vmatpush.bf16.msra.mxu3 %v1027_v11 }
  0x25   : > { %533 = vmatpush.bf16.msra.mxu0 %v1018_v12  ;;  %1086 = vmatpush.bf16.msra.mxu2 %v1018_v12 }
  0x26   : > { %582 = vmatpush.bf16.msra.mxu1 %v1026_v13  ;;  %1094 = vmatpush.bf16.msra.mxu3 %v1026_v13 }
  0x29   : > { %534 = vmatpush.bf16.msra.mxu0 %v1017_v14  ;;  %1087 = vmatpush.bf16.msra.mxu2 %v1017_v14 }
  0x2a   : > { %583 = vmatpush.bf16.msra.mxu1 %v1025_v15  ;;  %1095 = vmatpush.bf16.msra.mxu3 %v1025_v15 }
  0x2c   : > { %535 = vmatmul.bf16.vlgmr.msra.gmra.mxu0 %v873_v24  ;;  %555 = vmatmul.bf16.vlgmr.msra.gmra.mxu2 %v905_v25 }
  0x2d   : > { %584 = vmatmul.bf16.vlgmr.msra.gmra.mxu1 %v877_v26  ;;  %604 = vmatmul.bf16.vlgmr.msra.gmra.mxu3 %v909_v27 }
  0x3c   : > { %540 = vmatmul.bf16.gmra.mxu0 %v881_v36  ;;  %560 = vmatmul.bf16.gmra.mxu2 %v913_v37 }
  0x3d   : > { %589 = vmatmul.bf16.gmra.mxu1 %v885_v38  ;;  %609 = vmatmul.bf16.gmra.mxu3 %v917_v39 }
  0x4c   : > { %545 = vmatmul.bf16.gmra.mxu0 %v889_v48  ;;  %565 = vmatmul.bf16.gmra.mxu2 %v921_v49 }
  0x4d   : > { %594 = vmatmul.bf16.gmra.mxu1 %v893_v50  ;;  %614 = vmatmul.bf16.gmra.mxu3 %v925_v51 }
  0x5c   : > { %550 = vmatmul.bf16.gmra.mxu0 %v897_v60  ;;  %570 = vmatmul.bf16.gmra.mxu2 %v929_v61 }
  0x5d   : > { %599 = vmatmul.bf16.gmra.mxu1 %v901_v62  ;;  %619 = vmatmul.bf16.gmra.mxu3 %v933_v63 }
  0xa9   : > { %v536_v0 = vpop.f32.mrf.mxu0 }
  0xaa   : > { %v585_v1 = vpop.f32.mrf.mxu1 }
  0xab   : > { %v586_v2 = vadd.f32 %v585_v1, %v536_v0 }
  0xad   : > { %v680_v8 = vadd.f32 %v1277_v3, %v586_v2 }
  0xaf   : > { %v556_v4 = vpop.f32.mrf.mxu2  ;;  %v696_v12 = vmax.f32 %v680_v8, 0.0 }
  0xb0   : > { %v605_v5 = vpop.f32.mrf.mxu3 }
  0xb1   : > { %v538_v6 = vpop.f32.mrf.mxu0  ;;  %v606_v10 = vadd.f32 %v605_v5, %v556_v4 }
  0xb2   : > { %v587_v7 = vpop.f32.mrf.mxu1 }
  0xb3   : > { %v588_v9 = vadd.f32 %v587_v7, %v538_v6  ;;  %v688_v16 = vadd.f32 %v1277_v3, %v606_v10 }
  0xb5   : > { %v681_v11 = vadd.f32 %v1277_v3, %v588_v9  ;;  %v704_v22 = vmax.f32 %v688_v16, 0.0 }
  0xb7   : > { %v697_v13 = vmax.f32 %v681_v11, 0.0  ;;  %v558_v14 = vpop.f32.mrf.mxu2 }
  0xb8   : > { %v607_v15 = vpop.f32.mrf.mxu3 }
  0xb9   : > { %v1036_v17 = vpack.c.bf16 %v697_v13, %v696_v12  ;;  %v608_v18 = vadd.f32 %v607_v15, %v558_v14  ;;  %v541_v19 = vpop.f32.mrf.mxu0 }
  0xba   : > { %v590_v20 = vpop.f32.mrf.mxu1 }
  0xbb   : > { %1037 = vst [vmem:[%s1285_s8] sm:$0xff] %v1036_v17   ;;  %v689_v21 = vadd.f32 %v1277_v3, %v608_v18  ;;  %v591_v25 = vadd.f32 %v590_v20, %v541_v19 }
  0xbd   : > { %v705_v23 = vmax.f32 %v689_v21, 0.0  ;;  %v682_v30 = vadd.f32 %v1277_v3, %v591_v25 }
  0xbf   : > { %v1056_v24 = vpack.c.bf16 %v705_v23, %v704_v22  ;;  %v561_v26 = vpop.f32.mrf.mxu2  ;;  %v698_v34 = vmax.f32 %v682_v30, 0.0 }
  0xc0   : > { %v610_v27 = vpop.f32.mrf.mxu3 }
  0xc1   : > { %1076 = vst [vmem:[%s1285_s8 + $0x20] sm:$0xff] %v1056_v24   ;;  %v543_v28 = vpop.f32.mrf.mxu0  ;;  %v611_v32 = vadd.f32 %v610_v27, %v561_v26 }
  0xc2   : > { %v592_v29 = vpop.f32.mrf.mxu1 }
  0xc3   : > { %v593_v31 = vadd.f32 %v592_v29, %v543_v28  ;;  %v690_v38 = vadd.f32 %v1277_v3, %v611_v32 }
  0xc5   : > { %v683_v33 = vadd.f32 %v1277_v3, %v593_v31  ;;  %v706_v44 = vmax.f32 %v690_v38, 0.0 }
  0xc7   : > { %v699_v35 = vmax.f32 %v683_v33, 0.0  ;;  %v563_v36 = vpop.f32.mrf.mxu2 }
  0xc8   : > { %v612_v37 = vpop.f32.mrf.mxu3 }
  0xc9   : > { %v1041_v39 = vpack.c.bf16 %v699_v35, %v698_v34  ;;  %v613_v40 = vadd.f32 %v612_v37, %v563_v36  ;;  %v546_v41 = vpop.f32.mrf.mxu0 }
  0xca   : > { %v595_v42 = vpop.f32.mrf.mxu1 }
  0xcb   : > { %1073 = vst [vmem:[%s1285_s8 + $0x8] sm:$0xff] %v1041_v39   ;;  %v691_v43 = vadd.f32 %v1277_v3, %v613_v40  ;;  %v596_v47 = vadd.f32 %v595_v42, %v546_v41 }
  0xcd   : > { %v707_v45 = vmax.f32 %v691_v43, 0.0  ;;  %v684_v52 = vadd.f32 %v1277_v3, %v596_v47 }
  0xcf   : > { %v1061_v46 = vpack.c.bf16 %v707_v45, %v706_v44  ;;  %v566_v48 = vpop.f32.mrf.mxu2  ;;  %v700_v56 = vmax.f32 %v684_v52, 0.0 }
  0xd0   : > { %v615_v49 = vpop.f32.mrf.mxu3 }
  0xd1   : > { %1077 = vst [vmem:[%s1285_s8 + $0x28] sm:$0xff] %v1061_v46   ;;  %v548_v50 = vpop.f32.mrf.mxu0  ;;  %v616_v54 = vadd.f32 %v615_v49, %v566_v48 }
  0xd2   : > { %v597_v51 = vpop.f32.mrf.mxu1 }
  0xd3   : > { %v598_v53 = vadd.f32 %v597_v51, %v548_v50  ;;  %v692_v60 = vadd.f32 %v1277_v3, %v616_v54 }
  0xd5   : > { %v685_v55 = vadd.f32 %v1277_v3, %v598_v53  ;;  %v708_v2 = vmax.f32 %v692_v60, 0.0 }
  0xd7   : > { %v701_v57 = vmax.f32 %v685_v55, 0.0  ;;  %v568_v58 = vpop.f32.mrf.mxu2 }
  0xd8   : > { %v617_v59 = vpop.f32.mrf.mxu3 }
  0xd9   : > { %v1046_v61 = vpack.c.bf16 %v701_v57, %v700_v56  ;;  %v618_v62 = vadd.f32 %v617_v59, %v568_v58  ;;  %v551_v63 = vpop.f32.mrf.mxu0 }
  0xda   : > { %v600_v0 = vpop.f32.mrf.mxu1 }
  0xdb   : > { %1074 = vst [vmem:[%s1285_s8 + $0x10] sm:$0xff] %v1046_v61   ;;  %v693_v1 = vadd.f32 %v1277_v3, %v618_v62  ;;  %v601_v6 = vadd.f32 %v600_v0, %v551_v63 }
  0xdd   : > { %v709_v4 = vmax.f32 %v693_v1, 0.0  ;;  %v686_v11 = vadd.f32 %v1277_v3, %v601_v6 }
  0xdf   : > { %v1066_v5 = vpack.c.bf16 %v709_v4, %v708_v2  ;;  %v571_v7 = vpop.f32.mrf.mxu2  ;;  %v702_v15 = vmax.f32 %v686_v11, 0.0 }
  0xe0   : > { %v620_v8 = vpop.f32.mrf.mxu3 }
  0xe1   : > { %1078 = vst [vmem:[%s1285_s8 + $0x30] sm:$0xff] %v1066_v5   ;;  %v553_v9 = vpop.f32.mrf.mxu0  ;;  %v621_v13 = vadd.f32 %v620_v8, %v571_v7 }
  0xe2   : > { %v602_v10 = vpop.f32.mrf.mxu1 }
  0xe3   : > { %v603_v12 = vadd.f32 %v602_v10, %v553_v9  ;;  %v694_v19 = vadd.f32 %v1277_v3, %v621_v13 }
  0xe5   : > { %v687_v14 = vadd.f32 %v1277_v3, %v603_v12  ;;  %v710_v23 = vmax.f32 %v694_v19, 0.0 }
  0xe7   : > { %v703_v16 = vmax.f32 %v687_v14, 0.0  ;;  %v573_v17 = vpop.f32.mrf.mxu2 }
  0xe8   : > { %v622_v18 = vpop.f32.mrf.mxu3 }
  0xe9   : > { %v1051_v20 = vpack.c.bf16 %v703_v16, %v702_v15  ;;  %v623_v21 = vadd.f32 %v622_v18, %v573_v17 }
  0xeb   : > { %1075 = vst [vmem:[%s1285_s8 + $0x18] sm:$0xff] %v1051_v20   ;;  %v695_v22 = vadd.f32 %v1277_v3, %v623_v21 }
  0xed   : > { %v711_v24 = vmax.f32 %v695_v22, 0.0 }
  0xef   : > { %v1071_v25 = vpack.c.bf16 %v711_v24, %v710_v23 }
  0xf1   : > { %1079 = vst [vmem:[%s1285_s8 + $0x38] sm:$0xff] %v1071_v25  }
  0xf2 PF: > { %s13_s14 = sadd.s32 1, %s1143_s14   ;;  %s1322_s12 = smov %s1139_s13 }
  0xf3   : > { %p10_p5 = scmp.ge.s32.totalorder %s13_s14, 4   ;;  %s1323_s13 = smov %s1325_s15 }
  0xf5   :  { %12 = sbr.rel (!%p10_p5) target bundleno = 2 (0x2), region = 76 }

// kernel: _lambda_.38
= control target key start
LH: loop header
LB: loop body
LE: loop exit
PB: predicated region body
PF: predicated region fallthrough
CT: control target
= control target key end

     0   :  { %s1086_s12 = smov 0   ;;  %s1088_s13 = smov 0   ;;  %s1227_s0 = inlined_call_operand.vmem [shape: bf16[64,1152], index: 0, kind: input, shape index: {}]   ;;  %s1228_s1 = inlined_call_operand.vmem [shape: bf16[1152,128], index: 1, kind: input, shape index: {}]   ;;  %s1229_s2 = inlined_call_operand.vmem [shape: f32[1,128], index: 2, kind: input, shape index: {}]   ;;  %s1230_s3 = inlined_call_operand.vmem [shape: bf16[64,128], index: 3, kind: output, shape index: {}]  }
   0x1   :  { %s1090_s14 = smov 0   ;;  %s1092_s15 = smov 0  }
   0x2   :  { %s1094_s16 = smov 0   ;;  %s1096_s17 = smov 0  }
   0x3   :  { %s1098_s18 = smov 0  }
   0x4 LB: > { %s25_s19 = sadd.s32 1, %s1055_s16  ;;  %s32_s20 = sadd.s32 1, %s1059_s17  ;;  %s1063_s18 = sphi %s1098_s18, %s13_s18   ;;  %s1059_s17 = sphi %s1096_s17, %s1236_s17   ;;  %s1055_s16 = sphi %s1094_s16, %s1235_s16   ;;  %s1051_s15 = sphi %s1092_s15, %s1234_s15   ;;  %s1047_s14 = sphi %s1090_s14, %s1233_s14   ;;  %s1043_s13 = sphi %s1088_s13, %s1232_s13   ;;  %s1039_s12 = sphi %s1086_s12, %s1231_s12  }
   0x5   : > { %p26_p0 = scmp.ge.s32.totalorder %s25_s19, 3  ;;  %p48_p1 = scmp.ne.s32.totalorder %s1043_s13, %s1039_s12 }
   0x6   : > { %p49_p2 = scmp.eq.s32.totalorder %s1063_s18, 0  ;;  %s41_s24 = sadd.s32 1, %s1043_s13 }
   0x7   : > { %s1238_s19 = smov (%p26_p0, %s25_s19), 0  ;;  %s1240_s20 = smov (!%p26_p0, %s32_s20), %s1059_s17 }
   0x8   : > { %p50_p3 = por %p49_p2, %p48_p1  ;;  %p34_p4 = scmp.ge.s32.totalorder %s1240_s20, 2 }
   0x9   : > { %s37_s21 = ssub.s32 %s1055_s16, %s1238_s19  ;;  %p759_p6 = scmp.ge.s32.totalorder %s1063_s18, 6 }
   0xa   : > { %s1242_s20 = smov (%p34_p4, %s1240_s20), 0 }
   0xb   : > { %s36_s22 = ssub.s32 %s1059_s17, %s1242_s20  ;;  %162 = sbr.rel (%p759_p6) target bundleno = 33 (0x21), region = 20 }
   0xc   : > { %s38_s23 = sor.u32 %s37_s21, %s36_s22 }
   0xd   : > { %p39_p5 = scmp.eq.s32.totalorder %s38_s23, 0 }
   0xf   : > { %s1137_s25 = scalar_select %p39_p5, %s1043_s13, %s41_s24  }
  0x10   : > { %165 = sbr.rel (!%p50_p3) target bundleno = 33 (0x21), region = 24  ;;  %s167_s26 = sand.u32 (%p50_p3), 1, %s1043_s13  }
  0x11   : > { %s171_s27 = smul.u32 (%p50_p3), 3, %s1055_s16 }
  0x12   : > { %s948_s28 = smul.u32 (%p50_p3), 48, %s167_s26 }
  0x13   : > { %s949_s29 = smul.u32 (%p50_p3), 36, %s1059_s17 }
  0x14   : > { %s169_s8 = scalar_lea.vmem (%p50_p3), [#allocation3], %s948_s28 }
  0x15   : > { %s173_s30 = sadd.s32 %s949_s29, %s171_s27 }
  0x16   : > { %s762_s4 = sshll.u32 %s173_s30, 2 }
  0x17   : > { %s175_s7 = scalar_lea.vmem %s1227_s0, %s762_s4 }
  0x18   : > { %v190_v0 = vld [vmem:[%s175_s7] sm:$0xff]  ;;  %v194_v2 = vld [vmem:[%s175_s7 + $0x48] sm:$0xff]  ;;  %v767_v6 = vld [vmem:[%s175_s7 + $0x50] sm:$0xf] }
  0x19   : > { %v192_v1 = vld [vmem:[%s175_s7 + $0x24] sm:$0xff]  ;;  %191 = vst [vmem:[%s169_s8] sm:$0xff] %v190_v0  ;;  %v196_v3 = vld [vmem:[%s175_s7 + $0x6c] sm:$0xff]  ;;  %v769_v7 = vld [vmem:[%s175_s7 + $0x74] sm:$0xf] }
  0x1a   : > { %193 = vst [vmem:[%s169_s8 + $0xc] sm:$0xff] %v192_v1  ;;  %v763_v4 = vld [vmem:[%s175_s7 + $0x8] sm:$0xf]  ;;  %v765_v5 = vld [vmem:[%s175_s7 + $0x2c] sm:$0xf] }
  0x1b   : > { %195 = vst [vmem:[%s169_s8 + $0x18] sm:$0xff] %v194_v2 }
  0x1c   : > { %197 = vst [vmem:[%s169_s8 + $0x24] sm:$0xff] %v196_v3 }
  0x1d   : > { %764 = vst [vmem:[%s169_s8 + $0x8] sm:$0xf] %v763_v4 }
  0x1e   : > { %766 = vst [vmem:[%s169_s8 + $0x14] sm:$0xf] %v765_v5 }
  0x1f   : > { %768 = vst [vmem:[%s169_s8 + $0x20] sm:$0xf] %v767_v6 }
  0x20   : > { %770 = vst [vmem:[%s169_s8 + $0x2c] sm:$0xf] %v769_v7 }
  0x21 PF: > { %p771_p7 = scmp.ge.s32.totalorder %s1063_s18, 1  ;;  %p230_p8 = scmp.lt.s32.totalorder %s1063_s18, 7 }
  0x23   : > { %p231_p9 = pnand %p771_p7, %p230_p8 }
  0x24   : > { %s237_s9 = sand.u32 (!%p231_p9), 1, %s1039_s12   ;;  %s276_s10 = smul.u32 (!%p231_p9), 48, %s1047_s14 }
  0x25   : > { %234 = sbr.rel (%p231_p9) target bundleno = 264 (0x108), region = 54  ;;  %s773_s21 = sshll.u32 (!%p231_p9), %s1051_s15, 2 }
  0x26   : > { %s950_s11 = smul.u32 (!%p231_p9), 48, %s237_s9  ;;  %p277_p10 = scmp.lt.s32.totalorder (!%p231_p9), %s276_s10, 143 }
  0x27   : > { %p289_p11 = scmp.lt.s32.totalorder (!%p231_p9), %s773_s21, 7  ;;  %p775_p12 = scmp.ne.s32.totalorder (!%p231_p9), %s1047_s14, 0 }
  0x28   : > { %s1161_s12 = scalar_lea.vmem (!%p231_p9), [#allocation3], %s950_s11 }
  0x2a   : > { %s1244_s10 = smov (!%p277_p10, %s276_s10), 143  ;;  %s1246_s21 = smov (!%p289_p11, %s773_s21), 7 }
  0x2b   : > { %s772_s22 = sshll.u32 %s1244_s10, 2  ;;  %s774_s27 = sshll.u32 %s1246_s21, 2 }
  0x2c   : > { %s1154_s26 = scalar_lea.vmem %s1228_s1, %s772_s22  ;;  %s1159_s30 = scalar_lea.vmem %s1230_s3, %s774_s27 }
  0x2d   : > { %300 = sbr.rel (%p775_p12) target bundleno = 55 (0x37), region = 62 }
  0x32   : > { %v1065_v8 = vmov 0.0  }
  0x33   : > { %301 = vst [vmem:[#allocation2 + $0x10] sm:$0xff] %v1065_v8 }
  0x34   : > { %302 = vst [vmem:[#allocation2] sm:$0xff] %v1065_v8 }
  0x35   : > { %303 = vst [vmem:[#allocation2 + $0x18] sm:$0xff] %v1065_v8 }
  0x36   : > { %304 = vst [vmem:[#allocation2 + $0x8] sm:$0xff] %v1065_v8 }
  0x37 PF: > { %v912_v9 = vld [vmem:[%s1154_s26 + $0x38] sm:$0xff]  ;;  %v911_v12 = vld [vmem:[%s1154_s26 + $0x30] sm:$0xff]  ;;  %v910_v15 = vld [vmem:[%s1154_s26 + $0x28] sm:$0xff]  ;;  %p896_p13 = scmp.ne.s32.totalorder %s1047_s14, 2 }
  0x38   : > { %v920_v10 = vld [vmem:[%s1154_s26 + $0x78] sm:$0xff]  ;;  %541 = vmatpush.bf16.msra.mxu0 %v912_v9  ;;  %v919_v13 = vld [vmem:[%s1154_s26 + $0x70] sm:$0xff]  ;;  %940 = vmatpush.bf16.msra.mxu3 %v912_v9  ;;  %v918_v16 = vld [vmem:[%s1154_s26 + $0x68] sm:$0xff] }
  0x39   : > { %v928_v11 = vld [vmem:[%s1154_s26 + $0xb8] sm:$0xff]  ;;  %560 = vmatpush.bf16.msra.mxu1 %v920_v10  ;;  %v927_v14 = vld [vmem:[%s1154_s26 + $0xb0] sm:$0xff]  ;;  %v926_v17 = vld [vmem:[%s1154_s26 + $0xa8] sm:$0xff] }
  0x3a   : > { %579 = vmatpush.bf16.msra.mxu2 %v928_v11  ;;  %v909_v18 = vld [vmem:[%s1154_s26 + $0x20] sm:$0xff]  ;;  %v908_v21 = vld [vmem:[%s1154_s26 + $0x18] sm:$0xff]  ;;  %v907_v24 = vld [vmem:[%s1154_s26 + $0x10] sm:$0xff] }
  0x3b   : > { %v917_v19 = vld [vmem:[%s1154_s26 + $0x60] sm:$0xff]  ;;  %v916_v22 = vld [vmem:[%s1154_s26 + $0x58] sm:$0xff]  ;;  %v915_v25 = vld [vmem:[%s1154_s26 + $0x50] sm:$0xff] }
  0x3c   : > { %542 = vmatpush.bf16.msra.mxu0 %v911_v12  ;;  %941 = vmatpush.bf16.msra.mxu3 %v911_v12  ;;  %v925_v20 = vld [vmem:[%s1154_s26 + $0xa0] sm:$0xff]  ;;  %v924_v23 = vld [vmem:[%s1154_s26 + $0x98] sm:$0xff]  ;;  %v923_v26 = vld [vmem:[%s1154_s26 + $0x90] sm:$0xff] }
  0x3d   : > { %561 = vmatpush.bf16.msra.mxu1 %v919_v13  ;;  %v906_v27 = vld [vmem:[%s1154_s26 + $0x8] sm:$0xff]  ;;  %v905_v30 = vld [vmem:[%s1154_s26] sm:$0xff]  ;;  %v305_v54 = vld [vmem:[#allocation2 + $0x10] sm:$0xff] }
  0x3e   : > { %580 = vmatpush.bf16.msra.mxu2 %v927_v14  ;;  %v914_v28 = vld [vmem:[%s1154_s26 + $0x48] sm:$0xff]  ;;  %v913_v31 = vld [vmem:[%s1154_s26 + $0x40] sm:$0xff]  ;;  %v307_v4 = vld [vmem:[#allocation2 + $0x18] sm:$0xff] }
  0x3f   : > { %v922_v29 = vld [vmem:[%s1154_s26 + $0x88] sm:$0xff]  ;;  %v921_v32 = vld [vmem:[%s1154_s26 + $0x80] sm:$0xff] }
  0x40   : > { %543 = vmatpush.bf16.msra.mxu0 %v910_v15  ;;  %942 = vmatpush.bf16.msra.mxu3 %v910_v15  ;;  %v778_v33 = vld [vmem:[%s1161_s12] sm:$0xf]  ;;  %v900_v34 = vld [vmem:[%s1161_s12 + $0x8] sm:$0xf0]  ;;  %v899_v35 = vld [vmem:[%s1161_s12 + $0x4] sm:$0xf] }
  0x41   : > { %562 = vmatpush.bf16.msra.mxu1 %v918_v16  ;;  %v780_v36 = vld [vmem:[%s1161_s12 + $0xc] sm:$0xf0]  ;;  %v786_v37 = vld [vmem:[%s1161_s12 + $0x8] sm:$0xf]  ;;  %v901_v38 = vld [vmem:[%s1161_s12 + $0x10] sm:$0xf0]  ;;  %v779_v41 = vor.u32 %v900_v34, %v778_v33 }
  0x42   : > { %581 = vmatpush.bf16.msra.mxu2 %v926_v17  ;;  %v790_v39 = vld [vmem:[%s1161_s12 + $0x18] sm:$0xf]  ;;  %v903_v40 = vld [vmem:[%s1161_s12 + $0x20] sm:$0xf0]  ;;  %v783_v42 = vor.u32 %v899_v35, %v780_v36  ;;  %v787_v43 = vor.u32 %v901_v38, %v786_v37  ;;  %v902_v45 = vld [vmem:[%s1161_s12 + $0x1c] sm:$0xf] }
  0x43   : > { %v791_v44 = vor.u32 %v903_v40, %v790_v39  ;;  %v792_v46 = vld [vmem:[%s1161_s12 + $0x24] sm:$0xf0]  ;;  %v798_v47 = vld [vmem:[%s1161_s12 + $0x20] sm:$0xf]  ;;  %v904_v48 = vld [vmem:[%s1161_s12 + $0x28] sm:$0xf0] }
  0x44   : > { %544 = vmatpush.bf16.msra.mxu0 %v909_v18  ;;  %943 = vmatpush.bf16.msra.mxu3 %v909_v18  ;;  %v795_v49 = vor.u32 %v902_v45, %v792_v46  ;;  %v799_v50 = vor.u32 %v904_v48, %v798_v47  ;;  %v306_v61 = vld [vmem:[#allocation2] sm:$0xff]  ;;  %v308_v11 = vld [vmem:[#allocation2 + $0x8] sm:$0xff] }
  0x45   : > { %563 = vmatpush.bf16.msra.mxu1 %v917_v19 }
  0x46   : > { %582 = vmatpush.bf16.msra.mxu2 %v925_v20 }
  0x48   : > { %545 = vmatpush.bf16.msra.mxu0 %v908_v21  ;;  %944 = vmatpush.bf16.msra.mxu3 %v908_v21 }
  0x49   : > { %564 = vmatpush.bf16.msra.mxu1 %v916_v22 }
  0x4a   : > { %583 = vmatpush.bf16.msra.mxu2 %v924_v23 }
  0x4c   : > { %546 = vmatpush.bf16.msra.mxu0 %v907_v24  ;;  %945 = vmatpush.bf16.msra.mxu3 %v907_v24 }
  0x4d   : > { %565 = vmatpush.bf16.msra.mxu1 %v915_v25 }
  0x4e   : > { %584 = vmatpush.bf16.msra.mxu2 %v923_v26 }
  0x50   : > { %547 = vmatpush.bf16.msra.mxu0 %v906_v27  ;;  %946 = vmatpush.bf16.msra.mxu3 %v906_v27 }
  0x51   : > { %566 = vmatpush.bf16.msra.mxu1 %v914_v28 }
  0x52   : > { %585 = vmatpush.bf16.msra.mxu2 %v922_v29 }
  0x54   : > { %548 = vmatpush.bf16.msra.mxu0 %v905_v30  ;;  %947 = vmatpush.bf16.msra.mxu3 %v905_v30 }
  0x55   : > { %567 = vmatpush.bf16.msra.mxu1 %v913_v31 }
  0x56   : > { %586 = vmatpush.bf16.msra.mxu2 %v921_v32 }
  0x57   : > { %549 = vmatmul.bf16.vlgmr.msra.gmra.mxu0 %v779_v41  ;;  %554 = vmatmul.bf16.vlgmr.msra.gmra.mxu3 %v791_v44 }
  0x58   : > { %568 = vmatmul.bf16.vlgmr.msra.gmra.mxu1 %v783_v42 }
  0x59   : > { %587 = vmatmul.bf16.vlgmr.msra.gmra.mxu2 %v787_v43 }
  0x68   : > { %573 = vmatmul.bf16.gmra.mxu1 %v795_v49 }
  0x69   : > { %592 = vmatmul.bf16.gmra.mxu2 %v799_v50 }
  0xd4   : > { %v550_v52 = vpop.f32.mrf.mxu0 }
  0xd5   : > { %v569_v51 = vpop.f32.mrf.mxu1 }
  0xd6   : > { %v570_v53 = vadd.f32 %v569_v51, %v550_v52 }
  0xda   : > { %v555_v2 = vpop.f32.mrf.mxu3 }
  0xdc   : > { %v588_v55 = vpop.f32.mrf.mxu2  ;;  %v552_v59 = vpop.f32.mrf.mxu0 }
  0xdd   : > { %v589_v56 = vadd.f32 %v588_v55, %v570_v53  ;;  %v571_v57 = vpop.f32.mrf.mxu1 }
  0xde   : > { %v572_v60 = vadd.f32 %v571_v57, %v552_v59 }
  0xdf   : > { %v598_v58 = vadd.f32 %v589_v56, %v305_v54 }
  0xe1   : > { %602 = vst [vmem:[#allocation2 + $0x10] sm:$0xff] %v598_v58 }
  0xe2   : > { %v557_v9 = vpop.f32.mrf.mxu3 }
  0xe4   : > { %v590_v62 = vpop.f32.mrf.mxu2 }
  0xe5   : > { %v591_v63 = vadd.f32 %v590_v62, %v572_v60  ;;  %v574_v0 = vpop.f32.mrf.mxu1 }
  0xe6   : > { %v575_v3 = vadd.f32 %v574_v0, %v555_v2 }
  0xe7   : > { %v599_v1 = vadd.f32 %v591_v63, %v306_v61 }
  0xe9   : > { %603 = vst [vmem:[#allocation2] sm:$0xff] %v599_v1 }
  0xec   : > { %v593_v5 = vpop.f32.mrf.mxu2 }
  0xed   : > { %v594_v6 = vadd.f32 %v593_v5, %v575_v3  ;;  %v576_v8 = vpop.f32.mrf.mxu1 }
  0xee   : > { %v577_v10 = vadd.f32 %v576_v8, %v557_v9 }
  0xef   : > { %v600_v7 = vadd.f32 %v594_v6, %v307_v4 }
  0xf1   : > { %604 = vst [vmem:[#allocation2 + $0x18] sm:$0xff] %v600_v7 }
  0xf4   : > { %v595_v12 = vpop.f32.mrf.mxu2 }
  0xf5   : > { %v596_v13 = vadd.f32 %v595_v12, %v577_v10  ;;  %609 = sbr.rel (%p896_p13) target bundleno = 264 (0x108), region = 66 }
  0xf7   : > { %v601_v14 = vadd.f32 %v596_v13, %v308_v11 }
  0xf9   : > { %605 = vst [vmem:[#allocation2 + $0x8] sm:$0xff] %v601_v14 }
  0xfa   : > { %v610_v15 = vld [vmem:[#allocation2 + $0x10] sm:$0xff]  ;;  %v611_v16 = vld [vmem:[#allocation2] sm:$0xff]  ;;  %v612_v18 = vld [vmem:[#allocation2 + $0x18] sm:$0xff] }
  0xfb   : > { %v1008_v17 = vld [vmem:[%s1229_s2] ss:$0 sm:$0xff] }
  0xfc   : > { %v618_v20 = vadd.f32 %v1008_v17, %v610_v15  ;;  %v619_v21 = vadd.f32 %v1008_v17, %v611_v16  ;;  %v620_v22 = vadd.f32 %v1008_v17, %v612_v18 }
  0xfe   : > { %v622_v24 = vmax.f32 %v618_v20, 0.0  ;;  %v623_v25 = vmax.f32 %v619_v21, 0.0  ;;  %v624_v26 = vmax.f32 %v620_v22, 0.0 }
 0x100   : > { %v613_v19 = vld [vmem:[#allocation2 + $0x8] sm:$0xff]  ;;  %v932_v28 = vpack.c.bf16 %v623_v25, %v622_v24 }
 0x101   : > { %v621_v23 = vadd.f32 %v1008_v17, %v613_v19 }
 0x102   : > { %933 = vst [vmem:[%s1159_s30] sm:$0xff] %v932_v28  }
 0x103   : > { %v625_v27 = vmax.f32 %v621_v23, 0.0 }
 0x105   : > { %v937_v29 = vpack.c.bf16 %v625_v27, %v624_v26 }
 0x107   : > { %939 = vst [vmem:[%s1159_s30 + $0x8] sm:$0xff] %v937_v29  }
 0x108 PF: > { %s13_s18 = sadd.s32 1, %s1063_s18   ;;  %s1231_s12 = smov %s1043_s13 }
 0x109   : > { %p10_p0 = scmp.ge.s32.totalorder %s13_s18, 8   ;;  %s1232_s13 = smov %s1137_s25 }
 0x10a   : > { %s1233_s14 = smov %s1055_s16  ;;  %s1234_s15 = smov %s1059_s17 }
 0x10b   : > { %s1235_s16 = smov %s1238_s19  ;;  %s1236_s17 = smov %s1242_s20 }
 0x10c   :  { %12 = sbr.rel (!%p10_p0) target bundleno = 4 (0x4), region = 113 }

// kernel: _lambda_.39
= control target key start
LH: loop header
LB: loop body
LE: loop exit
PB: predicated region body
PF: predicated region fallthrough
CT: control target
= control target key end

     0   :  { %s1189_s15 = smov 0   ;;  %s1191_s16 = smov 0   ;;  %s1337_s0 = inlined_call_operand.vmem [shape: bf16[64,1152], index: 0, kind: input, shape index: {}]   ;;  %s1338_s1 = inlined_call_operand.vmem [shape: bf16[1152,128], index: 1, kind: input, shape index: {}]   ;;  %s1339_s2 = inlined_call_operand.vmem [shape: f32[1,128], index: 2, kind: input, shape index: {}]   ;;  %s1340_s3 = inlined_call_operand.vmem [shape: bf16[64,128], index: 3, kind: input, shape index: {}]   ;;  %s1341_s4 = inlined_call_operand.vmem [shape: bf16[64,128], index: 4, kind: output, shape index: {}]  }
   0x1   :  { %s1193_s17 = smov 0   ;;  %s1195_s18 = smov 0  }
   0x2   :  { %s1197_s19 = smov 0   ;;  %s1199_s20 = smov 0  }
   0x3   :  { %s1201_s21 = smov 0  }
   0x4 LB: > { %s26_s22 = sadd.s32 1, %s1153_s19  ;;  %s33_s23 = sadd.s32 1, %s1157_s20  ;;  %s1161_s21 = sphi %s1201_s21, %s14_s21   ;;  %s1157_s20 = sphi %s1199_s20, %s1347_s20   ;;  %s1153_s19 = sphi %s1197_s19, %s1346_s19   ;;  %s1149_s18 = sphi %s1195_s18, %s1345_s18   ;;  %s1145_s17 = sphi %s1193_s17, %s1344_s17   ;;  %s1141_s16 = sphi %s1191_s16, %s1343_s16   ;;  %s1137_s15 = sphi %s1189_s15, %s1342_s15  }
   0x5   : > { %p27_p0 = scmp.ge.s32.totalorder %s26_s22, 3  ;;  %p49_p1 = scmp.ne.s32.totalorder %s1141_s16, %s1137_s15 }
   0x6   : > { %p50_p2 = scmp.eq.s32.totalorder %s1161_s21, 0  ;;  %s42_s27 = sadd.s32 1, %s1141_s16 }
   0x7   : > { %s1349_s22 = smov (%p27_p0, %s26_s22), 0  ;;  %s1351_s23 = smov (!%p27_p0, %s33_s23), %s1157_s20 }
   0x8   : > { %p51_p3 = por %p50_p2, %p49_p1  ;;  %p35_p4 = scmp.ge.s32.totalorder %s1351_s23, 2 }
   0x9   : > { %s38_s24 = ssub.s32 %s1153_s19, %s1349_s22  ;;  %p846_p6 = scmp.ge.s32.totalorder %s1161_s21, 6 }
   0xa   : > { %s1353_s23 = smov (%p35_p4, %s1351_s23), 0 }
   0xb   : > { %s37_s25 = ssub.s32 %s1157_s20, %s1353_s23  ;;  %191 = sbr.rel (%p846_p6) target bundleno = 33 (0x21), region = 20 }
   0xc   : > { %s39_s26 = sor.u32 %s38_s24, %s37_s25 }
   0xd   : > { %p40_p5 = scmp.eq.s32.totalorder %s39_s26, 0 }
   0xf   : > { %s1240_s28 = scalar_select %p40_p5, %s1141_s16, %s42_s27  }
  0x10   : > { %194 = sbr.rel (!%p51_p3) target bundleno = 33 (0x21), region = 24  ;;  %s196_s29 = sand.u32 (%p51_p3), 1, %s1141_s16  }
  0x11   : > { %s200_s30 = smul.u32 (%p51_p3), 3, %s1153_s19 }
  0x12   : > { %s1046_s5 = smul.u32 (%p51_p3), 48, %s196_s29 }
  0x13   : > { %s1047_s6 = smul.u32 (%p51_p3), 36, %s1157_s20 }
  0x14   : > { %s198_s12 = scalar_lea.vmem (%p51_p3), [#allocation3], %s1046_s5 }
  0x15   : > { %s202_s7 = sadd.s32 %s1047_s6, %s200_s30 }
  0x16   : > { %s849_s8 = sshll.u32 %s202_s7, 2 }
  0x17   : > { %s204_s11 = scalar_lea.vmem %s1337_s0, %s849_s8 }
  0x18   : > { %v219_v0 = vld [vmem:[%s204_s11] sm:$0xff]  ;;  %v223_v2 = vld [vmem:[%s204_s11 + $0x48] sm:$0xff]  ;;  %v854_v6 = vld [vmem:[%s204_s11 + $0x50] sm:$0xf] }
  0x19   : > { %v221_v1 = vld [vmem:[%s204_s11 + $0x24] sm:$0xff]  ;;  %220 = vst [vmem:[%s198_s12] sm:$0xff] %v219_v0  ;;  %v225_v3 = vld [vmem:[%s204_s11 + $0x6c] sm:$0xff]  ;;  %v856_v7 = vld [vmem:[%s204_s11 + $0x74] sm:$0xf] }
  0x1a   : > { %222 = vst [vmem:[%s198_s12 + $0xc] sm:$0xff] %v221_v1  ;;  %v850_v4 = vld [vmem:[%s204_s11 + $0x8] sm:$0xf]  ;;  %v852_v5 = vld [vmem:[%s204_s11 + $0x2c] sm:$0xf] }
  0x1b   : > { %224 = vst [vmem:[%s198_s12 + $0x18] sm:$0xff] %v223_v2 }
  0x1c   : > { %226 = vst [vmem:[%s198_s12 + $0x24] sm:$0xff] %v225_v3 }
  0x1d   : > { %851 = vst [vmem:[%s198_s12 + $0x8] sm:$0xf] %v850_v4 }
  0x1e   : > { %853 = vst [vmem:[%s198_s12 + $0x14] sm:$0xf] %v852_v5 }
  0x1f   : > { %855 = vst [vmem:[%s198_s12 + $0x20] sm:$0xf] %v854_v6 }
  0x20   : > { %857 = vst [vmem:[%s198_s12 + $0x2c] sm:$0xf] %v856_v7 }
  0x21 PF: > { %p858_p7 = scmp.ge.s32.totalorder %s1161_s21, 1  ;;  %p271_p8 = scmp.lt.s32.totalorder %s1161_s21, 7 }
  0x23   : > { %p272_p9 = pnand %p858_p7, %p271_p8 }
  0x24   : > { %s278_s13 = sand.u32 (!%p272_p9), 1, %s1137_s15   ;;  %s327_s14 = smul.u32 (!%p272_p9), 48, %s1145_s17 }
  0x25   : > { %275 = sbr.rel (%p272_p9) target bundleno = 266 (0x10a), region = 58  ;;  %s860_s25 = sshll.u32 (!%p272_p9), %s1149_s18, 2 }
  0x26   : > { %s1048_s24 = smul.u32 (!%p272_p9), 48, %s278_s13  ;;  %p328_p10 = scmp.lt.s32.totalorder (!%p272_p9), %s327_s14, 143 }
  0x27   : > { %p340_p11 = scmp.lt.s32.totalorder (!%p272_p9), %s860_s25, 7  ;;  %p864_p12 = scmp.ne.s32.totalorder (!%p272_p9), %s1145_s17, 0 }
  0x28   : > { %s1269_s10 = scalar_lea.vmem (!%p272_p9), [#allocation3], %s1048_s24 }
  0x2a   : > { %s1355_s14 = smov (!%p328_p10, %s327_s14), 143  ;;  %s1357_s25 = smov (!%p340_p11, %s860_s25), 7 }
  0x2b   : > { %s859_s26 = sshll.u32 %s1355_s14, 2  ;;  %s861_s5 = sshll.u32 %s1357_s25, 2 }
  0x2c   : > { %s1257_s30 = scalar_lea.vmem %s1338_s1, %s859_s26  ;;  %s1262_s8 = scalar_lea.vmem %s1340_s3, %s861_s5 }
  0x2d   : > { %s1267_s18 = scalar_lea.vmem %s1341_s4, %s861_s5  ;;  %360 = sbr.rel (%p864_p12) target bundleno = 55 (0x37), region = 66 }
  0x32   : > { %v1163_v8 = vmov 0.0  }
  0x33   : > { %361 = vst [vmem:[#allocation2 + $0x10] sm:$0xff] %v1163_v8 }
  0x34   : > { %362 = vst [vmem:[#allocation2] sm:$0xff] %v1163_v8 }
  0x35   : > { %363 = vst [vmem:[#allocation2 + $0x18] sm:$0xff] %v1163_v8 }
  0x36   : > { %364 = vst [vmem:[#allocation2 + $0x8] sm:$0xff] %v1163_v8 }
  0x37 PF: > { %v1001_v9 = vld [vmem:[%s1257_s30 + $0x38] sm:$0xff]  ;;  %v1000_v12 = vld [vmem:[%s1257_s30 + $0x30] sm:$0xff]  ;;  %v999_v15 = vld [vmem:[%s1257_s30 + $0x28] sm:$0xff]  ;;  %p985_p13 = scmp.ne.s32.totalorder %s1145_s17, 2 }
  0x38   : > { %v1009_v10 = vld [vmem:[%s1257_s30 + $0x78] sm:$0xff]  ;;  %601 = vmatpush.bf16.msra.mxu0 %v1001_v9  ;;  %v1008_v13 = vld [vmem:[%s1257_s30 + $0x70] sm:$0xff]  ;;  %1038 = vmatpush.bf16.msra.mxu3 %v1001_v9  ;;  %v1007_v16 = vld [vmem:[%s1257_s30 + $0x68] sm:$0xff] }
  0x39   : > { %v1017_v11 = vld [vmem:[%s1257_s30 + $0xb8] sm:$0xff]  ;;  %620 = vmatpush.bf16.msra.mxu1 %v1009_v10  ;;  %v1016_v14 = vld [vmem:[%s1257_s30 + $0xb0] sm:$0xff]  ;;  %v1015_v17 = vld [vmem:[%s1257_s30 + $0xa8] sm:$0xff] }
  0x3a   : > { %639 = vmatpush.bf16.msra.mxu2 %v1017_v11  ;;  %v998_v18 = vld [vmem:[%s1257_s30 + $0x20] sm:$0xff]  ;;  %v997_v21 = vld [vmem:[%s1257_s30 + $0x18] sm:$0xff]  ;;  %v996_v24 = vld [vmem:[%s1257_s30 + $0x10] sm:$0xff] }
  0x3b   : > { %v1006_v19 = vld [vmem:[%s1257_s30 + $0x60] sm:$0xff]  ;;  %v1005_v22 = vld [vmem:[%s1257_s30 + $0x58] sm:$0xff]  ;;  %v1004_v25 = vld [vmem:[%s1257_s30 + $0x50] sm:$0xff] }
  0x3c   : > { %602 = vmatpush.bf16.msra.mxu0 %v1000_v12  ;;  %1039 = vmatpush.bf16.msra.mxu3 %v1000_v12  ;;  %v1014_v20 = vld [vmem:[%s1257_s30 + $0xa0] sm:$0xff]  ;;  %v1013_v23 = vld [vmem:[%s1257_s30 + $0x98] sm:$0xff]  ;;  %v1012_v26 = vld [vmem:[%s1257_s30 + $0x90] sm:$0xff] }
  0x3d   : > { %621 = vmatpush.bf16.msra.mxu1 %v1008_v13  ;;  %v995_v27 = vld [vmem:[%s1257_s30 + $0x8] sm:$0xff]  ;;  %v994_v30 = vld [vmem:[%s1257_s30] sm:$0xff]  ;;  %v365_v54 = vld [vmem:[#allocation2 + $0x10] sm:$0xff] }
  0x3e   : > { %640 = vmatpush.bf16.msra.mxu2 %v1016_v14  ;;  %v1003_v28 = vld [vmem:[%s1257_s30 + $0x48] sm:$0xff]  ;;  %v1002_v31 = vld [vmem:[%s1257_s30 + $0x40] sm:$0xff]  ;;  %v367_v4 = vld [vmem:[#allocation2 + $0x18] sm:$0xff] }
  0x3f   : > { %v1011_v29 = vld [vmem:[%s1257_s30 + $0x88] sm:$0xff]  ;;  %v1010_v32 = vld [vmem:[%s1257_s30 + $0x80] sm:$0xff] }
  0x40   : > { %603 = vmatpush.bf16.msra.mxu0 %v999_v15  ;;  %1040 = vmatpush.bf16.msra.mxu3 %v999_v15  ;;  %v867_v33 = vld [vmem:[%s1269_s10] sm:$0xf]  ;;  %v989_v34 = vld [vmem:[%s1269_s10 + $0x8] sm:$0xf0]  ;;  %v988_v35 = vld [vmem:[%s1269_s10 + $0x4] sm:$0xf] }
  0x41   : > { %622 = vmatpush.bf16.msra.mxu1 %v1007_v16  ;;  %v869_v36 = vld [vmem:[%s1269_s10 + $0xc] sm:$0xf0]  ;;  %v875_v37 = vld [vmem:[%s1269_s10 + $0x8] sm:$0xf]  ;;  %v990_v38 = vld [vmem:[%s1269_s10 + $0x10] sm:$0xf0]  ;;  %v868_v41 = vor.u32 %v989_v34, %v867_v33 }
  0x42   : > { %641 = vmatpush.bf16.msra.mxu2 %v1015_v17  ;;  %v879_v39 = vld [vmem:[%s1269_s10 + $0x18] sm:$0xf]  ;;  %v992_v40 = vld [vmem:[%s1269_s10 + $0x20] sm:$0xf0]  ;;  %v872_v42 = vor.u32 %v988_v35, %v869_v36  ;;  %v876_v43 = vor.u32 %v990_v38, %v875_v37  ;;  %v991_v45 = vld [vmem:[%s1269_s10 + $0x1c] sm:$0xf] }
  0x43   : > { %v880_v44 = vor.u32 %v992_v40, %v879_v39  ;;  %v881_v46 = vld [vmem:[%s1269_s10 + $0x24] sm:$0xf0]  ;;  %v887_v47 = vld [vmem:[%s1269_s10 + $0x20] sm:$0xf]  ;;  %v993_v48 = vld [vmem:[%s1269_s10 + $0x28] sm:$0xf0] }
  0x44   : > { %604 = vmatpush.bf16.msra.mxu0 %v998_v18  ;;  %1041 = vmatpush.bf16.msra.mxu3 %v998_v18  ;;  %v884_v49 = vor.u32 %v991_v45, %v881_v46  ;;  %v888_v50 = vor.u32 %v993_v48, %v887_v47  ;;  %v366_v61 = vld [vmem:[#allocation2] sm:$0xff]  ;;  %v368_v11 = vld [vmem:[#allocation2 + $0x8] sm:$0xff] }
  0x45   : > { %623 = vmatpush.bf16.msra.mxu1 %v1006_v19 }
  0x46   : > { %642 = vmatpush.bf16.msra.mxu2 %v1014_v20 }
  0x48   : > { %605 = vmatpush.bf16.msra.mxu0 %v997_v21  ;;  %1042 = vmatpush.bf16.msra.mxu3 %v997_v21 }
  0x49   : > { %624 = vmatpush.bf16.msra.mxu1 %v1005_v22 }
  0x4a   : > { %643 = vmatpush.bf16.msra.mxu2 %v1013_v23 }
  0x4c   : > { %606 = vmatpush.bf16.msra.mxu0 %v996_v24  ;;  %1043 = vmatpush.bf16.msra.mxu3 %v996_v24 }
  0x4d   : > { %625 = vmatpush.bf16.msra.mxu1 %v1004_v25 }
  0x4e   : > { %644 = vmatpush.bf16.msra.mxu2 %v1012_v26 }
  0x50   : > { %607 = vmatpush.bf16.msra.mxu0 %v995_v27  ;;  %1044 = vmatpush.bf16.msra.mxu3 %v995_v27 }
  0x51   : > { %626 = vmatpush.bf16.msra.mxu1 %v1003_v28 }
  0x52   : > { %645 = vmatpush.bf16.msra.mxu2 %v1011_v29 }
  0x54   : > { %608 = vmatpush.bf16.msra.mxu0 %v994_v30  ;;  %1045 = vmatpush.bf16.msra.mxu3 %v994_v30 }
  0x55   : > { %627 = vmatpush.bf16.msra.mxu1 %v1002_v31 }
  0x56   : > { %646 = vmatpush.bf16.msra.mxu2 %v1010_v32 }
  0x57   : > { %609 = vmatmul.bf16.vlgmr.msra.gmra.mxu0 %v868_v41  ;;  %614 = vmatmul.bf16.vlgmr.msra.gmra.mxu3 %v880_v44 }
  0x58   : > { %628 = vmatmul.bf16.vlgmr.msra.gmra.mxu1 %v872_v42 }
  0x59   : > { %647 = vmatmul.bf16.vlgmr.msra.gmra.mxu2 %v876_v43 }
  0x68   : > { %633 = vmatmul.bf16.gmra.mxu1 %v884_v49 }
  0x69   : > { %652 = vmatmul.bf16.gmra.mxu2 %v888_v50 }
  0xd4   : > { %v610_v52 = vpop.f32.mrf.mxu0 }
  0xd5   : > { %v629_v51 = vpop.f32.mrf.mxu1 }
  0xd6   : > { %v630_v53 = vadd.f32 %v629_v51, %v610_v52 }
  0xda   : > { %v615_v2 = vpop.f32.mrf.mxu3 }
  0xdc   : > { %v648_v55 = vpop.f32.mrf.mxu2  ;;  %v612_v59 = vpop.f32.mrf.mxu0 }
  0xdd   : > { %v649_v56 = vadd.f32 %v648_v55, %v630_v53  ;;  %v631_v57 = vpop.f32.mrf.mxu1 }
  0xde   : > { %v632_v60 = vadd.f32 %v631_v57, %v612_v59 }
  0xdf   : > { %v658_v58 = vadd.f32 %v649_v56, %v365_v54 }
  0xe1   : > { %662 = vst [vmem:[#allocation2 + $0x10] sm:$0xff] %v658_v58 }
  0xe2   : > { %v617_v9 = vpop.f32.mrf.mxu3 }
  0xe4   : > { %v650_v62 = vpop.f32.mrf.mxu2 }
  0xe5   : > { %v651_v63 = vadd.f32 %v650_v62, %v632_v60  ;;  %v634_v0 = vpop.f32.mrf.mxu1 }
  0xe6   : > { %v635_v3 = vadd.f32 %v634_v0, %v615_v2 }
  0xe7   : > { %v659_v1 = vadd.f32 %v651_v63, %v366_v61 }
  0xe9   : > { %663 = vst [vmem:[#allocation2] sm:$0xff] %v659_v1 }
  0xec   : > { %v653_v5 = vpop.f32.mrf.mxu2 }
  0xed   : > { %v654_v6 = vadd.f32 %v653_v5, %v635_v3  ;;  %v636_v8 = vpop.f32.mrf.mxu1 }
  0xee   : > { %v637_v10 = vadd.f32 %v636_v8, %v617_v9 }
  0xef   : > { %v660_v7 = vadd.f32 %v654_v6, %v367_v4 }
  0xf1   : > { %664 = vst [vmem:[#allocation2 + $0x18] sm:$0xff] %v660_v7 }
  0xf4   : > { %v655_v12 = vpop.f32.mrf.mxu2 }
  0xf5   : > { %v656_v13 = vadd.f32 %v655_v12, %v637_v10  ;;  %669 = sbr.rel (%p985_p13) target bundleno = 266 (0x10a), region = 70 }
  0xf7   : > { %v661_v14 = vadd.f32 %v656_v13, %v368_v11 }
  0xf9   : > { %665 = vst [vmem:[#allocation2 + $0x8] sm:$0xff] %v661_v14 }
  0xfa   : > { %v670_v15 = vld [vmem:[#allocation2 + $0x10] sm:$0xff]  ;;  %v671_v16 = vld [vmem:[#allocation2] sm:$0xff]  ;;  %v672_v19 = vld [vmem:[#allocation2 + $0x18] sm:$0xff] }
  0xfb   : > { %v1106_v17 = vld [vmem:[%s1339_s2] ss:$0 sm:$0xff]  ;;  %v1036_v23 = vld [vmem:[%s1262_s8 + $0x8] sm:$0xff]  }
  0xfc   : > { %v1019_v18 = vld [vmem:[%s1262_s8] sm:$0xff]   ;;  %v678_v24 = vadd.f32 %v1106_v17, %v670_v15  ;;  %v679_v25 = vadd.f32 %v1106_v17, %v671_v16  ;;  %v680_v26 = vadd.f32 %v1106_v17, %v672_v19  ;;  %v1024_v28 = vunpack.c.l.bf16 %v1036_v23 }
  0xfd   : > { %v1020_v20 = vunpack.c.l.bf16 %v1019_v18  ;;  %v1021_v21 = vunpack.c.h.bf16 %v1019_v18  ;;  %v1025_v29 = vunpack.c.h.bf16 %v1036_v23 }
  0xfe   : > { %v692_v32 = vadd.f32 %v1024_v28, %v680_v26 }
  0xff   : > { %v690_v30 = vadd.f32 %v1020_v20, %v678_v24  ;;  %v691_v31 = vadd.f32 %v1021_v21, %v679_v25 }
 0x100   : > { %v673_v22 = vld [vmem:[#allocation2 + $0x8] sm:$0xff]  ;;  %v696_v36 = vmax.f32 %v692_v32, 0.0 }
 0x101   : > { %v681_v27 = vadd.f32 %v1106_v17, %v673_v22  ;;  %v694_v34 = vmax.f32 %v690_v30, 0.0  ;;  %v695_v35 = vmax.f32 %v691_v31, 0.0 }
 0x103   : > { %v693_v33 = vadd.f32 %v1025_v29, %v681_v27  ;;  %v1029_v38 = vpack.c.bf16 %v695_v35, %v694_v34 }
 0x105   : > { %v697_v37 = vmax.f32 %v693_v33, 0.0  ;;  %1030 = vst [vmem:[%s1267_s18] sm:$0xff] %v1029_v38  }
 0x107   : > { %v1034_v39 = vpack.c.bf16 %v697_v37, %v696_v36 }
 0x109   : > { %1037 = vst [vmem:[%s1267_s18 + $0x8] sm:$0xff] %v1034_v39  }
 0x10a PF: > { %s14_s21 = sadd.s32 1, %s1161_s21   ;;  %s1342_s15 = smov %s1141_s16 }
 0x10b   : > { %p11_p0 = scmp.ge.s32.totalorder %s14_s21, 8   ;;  %s1343_s16 = smov %s1240_s28 }
 0x10c   : > { %s1344_s17 = smov %s1153_s19  ;;  %s1345_s18 = smov %s1157_s20 }
 0x10d   : > { %s1346_s19 = smov %s1349_s22  ;;  %s1347_s20 = smov %s1353_s23 }
 0x10e   :  { %13 = sbr.rel (!%p11_p0) target bundleno = 4 (0x4), region = 120 }

// kernel: _lambda_.44
= control target key start
LH: loop header
LB: loop body
LE: loop exit
PB: predicated region body
PF: predicated region fallthrough
CT: control target
= control target key end

     0   :  { %s951_s12 = smov 0   ;;  %s953_s13 = smov 0   ;;  %s1058_s0 = inlined_call_operand.vmem [shape: bf16[16,1152], index: 0, kind: input, shape index: {}]   ;;  %s1059_s1 = inlined_call_operand.vmem [shape: bf16[1152,128], index: 1, kind: input, shape index: {}]   ;;  %s1060_s2 = inlined_call_operand.vmem [shape: f32[1,128], index: 2, kind: input, shape index: {}]   ;;  %s1061_s3 = inlined_call_operand.vmem [shape: bf16[16,128], index: 3, kind: output, shape index: {}]  }
   0x1   :  { %s955_s14 = smov 0   ;;  %s957_s15 = smov 0  }
   0x2   :  { %s959_s16 = smov 0  }
   0x3 LB: > { %s25_s17 = sadd.s32 1, %s924_s15  ;;  %p48_p1 = scmp.ne.s32.totalorder %s916_s13, %s912_s12  ;;  %s928_s16 = sphi %s959_s16, %s13_s16   ;;  %s924_s15 = sphi %s957_s15, %s1065_s15   ;;  %s920_s14 = sphi %s955_s14, %s1064_s14   ;;  %s916_s13 = sphi %s953_s13, %s1063_s13   ;;  %s912_s12 = sphi %s951_s12, %s1062_s12  }
   0x4   : > { %p26_p0 = scmp.ge.s32.totalorder %s25_s17, 3  ;;  %p49_p2 = scmp.eq.s32.totalorder %s928_s16, 0 }
   0x5   : > { %s41_s19 = sadd.s32 1, %s916_s13  ;;  %p691_p5 = scmp.ge.s32.totalorder %s928_s16, 3 }
   0x6   : > { %s1067_s17 = smov (%p26_p0, %s25_s17), 0  ;;  %p50_p3 = por %p49_p2, %p48_p1 }
   0x7   : > { %s37_s18 = ssub.s32 %s924_s15, %s1067_s17  ;;  %162 = sbr.rel (%p691_p5) target bundleno = 21 (0x15), region = 20 }
   0x8   : > { %p39_p4 = scmp.eq.s32.totalorder %s37_s18, 0 }
   0xa   : > { %s986_s20 = scalar_select %p39_p4, %s916_s13, %s41_s19  }
   0xc   : > { %165 = sbr.rel (!%p50_p3) target bundleno = 21 (0x15), region = 24  ;;  %s167_s21 = sand.u32 (%p50_p3), 1, %s916_s13  }
   0xd   : > { %s813_s22 = smul.u32 (%p50_p3), 12, %s924_s15 }
   0xe   : > { %s846_s23 = smul.u32 (%p50_p3), 24, %s167_s21 }
   0xf   : > { %s175_s26 = scalar_lea.vmem (%p50_p3), %s1058_s0, %s813_s22 }
  0x10   : > { %v190_v0 = vld [vmem:[%s175_s26] sm:$0xff] (%p50_p3)  ;;  %v693_v2 = vld [vmem:[%s175_s26 + $0x8] sm:$0xf] (%p50_p3)  ;;  %s169_s27 = scalar_lea.vmem (%p50_p3), [#allocation3], %s846_s23  ;;  %v695_v3 = vld [vmem:[%s175_s26 + $0x2c] sm:$0xf] (%p50_p3) }
  0x11   : > { %v192_v1 = vld [vmem:[%s175_s26 + $0x24] sm:$0xff]  ;;  %191 = vst [vmem:[%s169_s27] sm:$0xff] %v190_v0 }
  0x12   : > { %193 = vst [vmem:[%s169_s27 + $0xc] sm:$0xff] %v192_v1 }
  0x13   : > { %694 = vst [vmem:[%s169_s27 + $0x8] sm:$0xf] %v693_v2 }
  0x14   : > { %696 = vst [vmem:[%s169_s27 + $0x14] sm:$0xf] %v695_v3 }
  0x15 PF: > { %p697_p6 = scmp.ge.s32.totalorder %s928_s16, 1  ;;  %p222_p7 = scmp.lt.s32.totalorder %s928_s16, 4 }
  0x17   : > { %p223_p8 = pnand %p697_p6, %p222_p7 }
  0x18   : > { %s229_s28 = sand.u32 (!%p223_p8), 1, %s912_s12   ;;  %s268_s29 = smul.u32 (!%p223_p8), 48, %s920_s14 }
  0x19   : > { %226 = sbr.rel (%p223_p8) target bundleno = 231 (0xe7), region = 54  ;;  %p699_p10 = scmp.ne.s32.totalorder (!%p223_p8), %s920_s14, 0 }
  0x1a   : > { %s847_s30 = smul.u32 (!%p223_p8), 24, %s229_s28  ;;  %p269_p9 = scmp.lt.s32.totalorder (!%p223_p8), %s268_s29, 143 }
  0x1c   : > { %s1003_s8 = scalar_lea.vmem (!%p223_p8), [#allocation3], %s847_s30 }
  0x1e   : > { %s1069_s29 = smov (!%p269_p9, %s268_s29), 143  ;;  %292 = sbr.rel (%p699_p10) target bundleno = 38 (0x26), region = 62 }
  0x1f   : > { %s698_s4 = sshll.u32 %s1069_s29, 2 }
  0x20   : > { %s1001_s7 = scalar_lea.vmem %s1059_s1, %s698_s4 }
  0x23   : > { %v930_v4 = vmov 0.0  }
  0x24   : > { %293 = vst [vmem:[#allocation2] sm:$0xff] %v930_v4 }
  0x25   : > { %294 = vst [vmem:[#allocation2 + $0x8] sm:$0xff] %v930_v4 }
  0x26 PF: > { %v824_v5 = vld [vmem:[%s1001_s7 + $0x38] sm:$0xff]  ;;  %v823_v8 = vld [vmem:[%s1001_s7 + $0x30] sm:$0xff]  ;;  %v822_v11 = vld [vmem:[%s1001_s7 + $0x28] sm:$0xff]  ;;  %p808_p11 = scmp.ne.s32.totalorder %s920_s14, 2 }
  0x27   : > { %v832_v6 = vld [vmem:[%s1001_s7 + $0x78] sm:$0xff]  ;;  %509 = vmatpush.bf16.msra.mxu0 %v824_v5  ;;  %v831_v9 = vld [vmem:[%s1001_s7 + $0x70] sm:$0xff]  ;;  %v830_v12 = vld [vmem:[%s1001_s7 + $0x68] sm:$0xff] }
  0x28   : > { %v840_v7 = vld [vmem:[%s1001_s7 + $0xb8] sm:$0xff]  ;;  %523 = vmatpush.bf16.msra.mxu1 %v832_v6  ;;  %v839_v10 = vld [vmem:[%s1001_s7 + $0xb0] sm:$0xff]  ;;  %v838_v13 = vld [vmem:[%s1001_s7 + $0xa8] sm:$0xff] }
  0x29   : > { %537 = vmatpush.bf16.msra.mxu2 %v840_v7  ;;  %v821_v14 = vld [vmem:[%s1001_s7 + $0x20] sm:$0xff]  ;;  %v820_v17 = vld [vmem:[%s1001_s7 + $0x18] sm:$0xff]  ;;  %v819_v20 = vld [vmem:[%s1001_s7 + $0x10] sm:$0xff] }
  0x2a   : > { %v829_v15 = vld [vmem:[%s1001_s7 + $0x60] sm:$0xff]  ;;  %v828_v18 = vld [vmem:[%s1001_s7 + $0x58] sm:$0xff]  ;;  %v827_v21 = vld [vmem:[%s1001_s7 + $0x50] sm:$0xff] }
  0x2b   : > { %510 = vmatpush.bf16.msra.mxu0 %v823_v8  ;;  %v837_v16 = vld [vmem:[%s1001_s7 + $0xa0] sm:$0xff]  ;;  %v836_v19 = vld [vmem:[%s1001_s7 + $0x98] sm:$0xff]  ;;  %v835_v22 = vld [vmem:[%s1001_s7 + $0x90] sm:$0xff] }
  0x2c   : > { %524 = vmatpush.bf16.msra.mxu1 %v831_v9  ;;  %v818_v23 = vld [vmem:[%s1001_s7 + $0x8] sm:$0xff]  ;;  %v817_v26 = vld [vmem:[%s1001_s7] sm:$0xff]  ;;  %v815_v29 = vld [vmem:[%s1003_s8 + $0x8] sm:$0xf0] }
  0x2d   : > { %538 = vmatpush.bf16.msra.mxu2 %v839_v10  ;;  %v826_v24 = vld [vmem:[%s1001_s7 + $0x48] sm:$0xff]  ;;  %v825_v27 = vld [vmem:[%s1001_s7 + $0x40] sm:$0xff]  ;;  %v710_v33 = vld [vmem:[%s1003_s8 + $0x8] sm:$0xf] }
  0x2e   : > { %v834_v25 = vld [vmem:[%s1001_s7 + $0x88] sm:$0xff]  ;;  %v704_v31 = vld [vmem:[%s1003_s8 + $0xc] sm:$0xf0]  ;;  %v816_v34 = vld [vmem:[%s1003_s8 + $0x10] sm:$0xf0] }
  0x2f   : > { %511 = vmatpush.bf16.msra.mxu0 %v822_v11  ;;  %v702_v28 = vld [vmem:[%s1003_s8] sm:$0xf]  ;;  %v814_v30 = vld [vmem:[%s1003_s8 + $0x4] sm:$0xf]  ;;  %v833_v32 = vld [vmem:[%s1001_s7 + $0x80] sm:$0xff]  ;;  %v711_v37 = vor.u32 %v816_v34, %v710_v33 }
  0x30   : > { %525 = vmatpush.bf16.msra.mxu1 %v830_v12  ;;  %v703_v35 = vor.u32 %v815_v29, %v702_v28  ;;  %v707_v36 = vor.u32 %v814_v30, %v704_v31  ;;  %v295_v41 = vld [vmem:[#allocation2] sm:$0xff]  ;;  %v296_v48 = vld [vmem:[#allocation2 + $0x8] sm:$0xff] }
  0x31   : > { %539 = vmatpush.bf16.msra.mxu2 %v838_v13 }
  0x33   : > { %512 = vmatpush.bf16.msra.mxu0 %v821_v14 }
  0x34   : > { %526 = vmatpush.bf16.msra.mxu1 %v829_v15 }
  0x35   : > { %540 = vmatpush.bf16.msra.mxu2 %v837_v16 }
  0x37   : > { %513 = vmatpush.bf16.msra.mxu0 %v820_v17 }
  0x38   : > { %527 = vmatpush.bf16.msra.mxu1 %v828_v18 }
  0x39   : > { %541 = vmatpush.bf16.msra.mxu2 %v836_v19 }
  0x3b   : > { %514 = vmatpush.bf16.msra.mxu0 %v819_v20 }
  0x3c   : > { %528 = vmatpush.bf16.msra.mxu1 %v827_v21 }
  0x3d   : > { %542 = vmatpush.bf16.msra.mxu2 %v835_v22 }
  0x3f   : > { %515 = vmatpush.bf16.msra.mxu0 %v818_v23 }
  0x40   : > { %529 = vmatpush.bf16.msra.mxu1 %v826_v24 }
  0x41   : > { %543 = vmatpush.bf16.msra.mxu2 %v834_v25 }
  0x43   : > { %516 = vmatpush.bf16.msra.mxu0 %v817_v26 }
  0x44   : > { %530 = vmatpush.bf16.msra.mxu1 %v825_v27 }
  0x45   : > { %544 = vmatpush.bf16.msra.mxu2 %v833_v32 }
  0x46   : > { %517 = vmatmul.bf16.vlgmr.msra.gmra.mxu0 %v703_v35 }
  0x47   : > { %531 = vmatmul.bf16.vlgmr.msra.gmra.mxu1 %v707_v36 }
  0x48   : > { %545 = vmatmul.bf16.vlgmr.msra.gmra.mxu2 %v711_v37 }
  0xc3   : > { %v518_v38 = vpop.f32.mrf.mxu0 }
  0xc4   : > { %v532_v39 = vpop.f32.mrf.mxu1 }
  0xc5   : > { %v533_v40 = vadd.f32 %v532_v39, %v518_v38 }
  0xcb   : > { %v546_v42 = vpop.f32.mrf.mxu2  ;;  %v520_v45 = vpop.f32.mrf.mxu0 }
  0xcc   : > { %v547_v43 = vadd.f32 %v546_v42, %v533_v40  ;;  %v534_v46 = vpop.f32.mrf.mxu1 }
  0xcd   : > { %v535_v47 = vadd.f32 %v534_v46, %v520_v45 }
  0xce   : > { %v551_v44 = vadd.f32 %v547_v43, %v295_v41 }
  0xd0   : > { %553 = vst [vmem:[#allocation2] sm:$0xff] %v551_v44 }
  0xd3   : > { %v548_v49 = vpop.f32.mrf.mxu2 }
  0xd4   : > { %v549_v50 = vadd.f32 %v548_v49, %v535_v47  ;;  %558 = sbr.rel (%p808_p11) target bundleno = 231 (0xe7), region = 66 }
  0xd6   : > { %v552_v51 = vadd.f32 %v549_v50, %v296_v48 }
  0xd8   : > { %554 = vst [vmem:[#allocation2 + $0x8] sm:$0xff] %v552_v51 }
  0xd9   : > { %v559_v52 = vld [vmem:[#allocation2] sm:$0xff] }
  0xda   : > { %v889_v54 = vld [vmem:[%s1060_s2] ss:$0 sm:$0xff] }
  0xdb   : > { %v565_v55 = vadd.f32 %v889_v54, %v559_v52 }
  0xdd   : > { %v567_v57 = vmax.f32 %v565_v55, 0.0 }
  0xdf   : > { %v560_v53 = vld [vmem:[#allocation2 + $0x8] sm:$0xff] }
  0xe0   : > { %v566_v56 = vadd.f32 %v889_v54, %v560_v53 }
  0xe2   : > { %v568_v58 = vmax.f32 %v566_v56, 0.0 }
  0xe4   : > { %v844_v59 = vpack.c.bf16 %v568_v58, %v567_v57 }
  0xe6   : > { %845 = vst [vmem:[%s1061_s3] sm:$0xff] %v844_v59  }
  0xe7 PF: > { %s13_s16 = sadd.s32 1, %s928_s16   ;;  %s1062_s12 = smov %s916_s13 }
  0xe8   : > { %p10_p12 = scmp.ge.s32.totalorder %s13_s16, 5   ;;  %s1063_s13 = smov %s986_s20 }
  0xe9   : > { %s1064_s14 = smov %s924_s15  ;;  %s1065_s15 = smov %s1067_s17 }
  0xea   :  { %12 = sbr.rel (!%p10_p12) target bundleno = 3 (0x3), region = 113 }

// kernel: _lambda_.45
= control target key start
LH: loop header
LB: loop body
LE: loop exit
PB: predicated region body
PF: predicated region fallthrough
CT: control target
= control target key end

     0   :  { %s235_s1 = inlined_call_operand.vmem [shape: bf16[128,128], index: 1, kind: input, shape index: {}]   ;;  %s236_s2 = inlined_call_operand.vmem [shape: f32[1,128], index: 2, kind: input, shape index: {}]   ;;  %s237_s0 = inlined_call_operand.vmem [shape: bf16[16,128], index: 0, kind: input, shape index: {}]   ;;  %s238_s3 = inlined_call_operand.vmem [shape: bf16[16,128], index: 3, kind: output, shape index: {}]  }
   0x1   :  { %v175_v0 = vld [vmem:[%s235_s1 + $0x38] sm:$0xff]  ;;  %v174_v1 = vld [vmem:[%s235_s1 + $0x30] sm:$0xff]  ;;  %v173_v2 = vld [vmem:[%s235_s1 + $0x28] sm:$0xff] }
   0x2   :  { %94 = vmatpush.bf16.msra.mxu0 %v175_v0  ;;  %v172_v3 = vld [vmem:[%s235_s1 + $0x20] sm:$0xff]  ;;  %v171_v4 = vld [vmem:[%s235_s1 + $0x18] sm:$0xff]  ;;  %v170_v5 = vld [vmem:[%s235_s1 + $0x10] sm:$0xff] }
   0x3   :  { %v169_v6 = vld [vmem:[%s235_s1 + $0x8] sm:$0xff]  ;;  %v168_v7 = vld [vmem:[%s235_s1] sm:$0xff] }
   0x4   :  { %v167_v8 = vld [vmem:[%s237_s0] sm:$0xff] }
   0x5   :  { %v181_v10 = vld [vmem:[%s236_s2] ss:$0 sm:$0xff] }
   0x6   :  { %95 = vmatpush.bf16.msra.mxu0 %v174_v1 }
   0xa   :  { %96 = vmatpush.bf16.msra.mxu0 %v173_v2 }
   0xe   :  { %97 = vmatpush.bf16.msra.mxu0 %v172_v3 }
  0x12   :  { %98 = vmatpush.bf16.msra.mxu0 %v171_v4 }
  0x16   :  { %99 = vmatpush.bf16.msra.mxu0 %v170_v5 }
  0x1a   :  { %100 = vmatpush.bf16.msra.mxu0 %v169_v6 }
  0x1e   :  { %101 = vmatpush.bf16.msra.mxu0 %v168_v7 }
  0x21   :  { %102 = vmatmul.bf16.vlgmr.msra.gmra.mxu0 %v167_v8 }
  0x9e   :  { %v103_v9 = vpop.f32.mrf.mxu0 }
  0x9f   :  { %v121_v12 = vadd.f32 %v181_v10, %v103_v9 }
  0xa6   :  { %v105_v11 = vpop.f32.mrf.mxu0 }
  0xa7   :  { %v122_v13 = vadd.f32 %v181_v10, %v105_v11 }
  0xa9   :  { %v179_v14 = vpack.c.bf16 %v122_v13, %v121_v12 }
  0xab   :  { %180 = vst [vmem:[%s238_s3] sm:$0xff] %v179_v14  }

// kernel: _lambda_.46
= control target key start
LH: loop header
LB: loop body
LE: loop exit
PB: predicated region body
PF: predicated region fallthrough
CT: control target
= control target key end

     0   :  { %s1045_s15 = smov 0   ;;  %s1047_s16 = smov 0   ;;  %s1155_s0 = inlined_call_operand.vmem [shape: bf16[16,1152], index: 0, kind: input, shape index: {}]   ;;  %s1156_s1 = inlined_call_operand.vmem [shape: bf16[1152,128], index: 1, kind: input, shape index: {}]   ;;  %s1157_s2 = inlined_call_operand.vmem [shape: f32[1,128], index: 2, kind: input, shape index: {}]   ;;  %s1158_s3 = inlined_call_operand.vmem [shape: bf16[16,128], index: 3, kind: input, shape index: {}]   ;;  %s1159_s4 = inlined_call_operand.vmem [shape: bf16[16,128], index: 4, kind: output, shape index: {}]  }
   0x1   :  { %s1049_s17 = smov 0   ;;  %s1051_s18 = smov 0  }
   0x2   :  { %s1053_s19 = smov 0  }
   0x3 LB: > { %s26_s20 = sadd.s32 1, %s1013_s18  ;;  %p49_p1 = scmp.ne.s32.totalorder %s1005_s16, %s1001_s15  ;;  %s1017_s19 = sphi %s1053_s19, %s14_s19   ;;  %s1013_s18 = sphi %s1051_s18, %s1163_s18   ;;  %s1009_s17 = sphi %s1049_s17, %s1162_s17   ;;  %s1005_s16 = sphi %s1047_s16, %s1161_s16   ;;  %s1001_s15 = sphi %s1045_s15, %s1160_s15  }
   0x4   : > { %p27_p0 = scmp.ge.s32.totalorder %s26_s20, 3  ;;  %p50_p2 = scmp.eq.s32.totalorder %s1017_s19, 0 }
   0x5   : > { %s42_s22 = sadd.s32 1, %s1005_s16  ;;  %p776_p5 = scmp.ge.s32.totalorder %s1017_s19, 3 }
   0x6   : > { %s1165_s20 = smov (%p27_p0, %s26_s20), 0  ;;  %p51_p3 = por %p50_p2, %p49_p1 }
   0x7   : > { %s38_s21 = ssub.s32 %s1013_s18, %s1165_s20  ;;  %203 = sbr.rel (%p776_p5) target bundleno = 21 (0x15), region = 24 }
   0x8   : > { %p40_p4 = scmp.eq.s32.totalorder %s38_s21, 0 }
   0xa   : > { %s1080_s23 = scalar_select %p40_p4, %s1005_s16, %s42_s22  }
   0xc   : > { %206 = sbr.rel (!%p51_p3) target bundleno = 21 (0x15), region = 28  ;;  %s208_s24 = sand.u32 (%p51_p3), 1, %s1005_s16  }
   0xd   : > { %s898_s25 = smul.u32 (%p51_p3), 12, %s1013_s18 }
   0xe   : > { %s935_s26 = smul.u32 (%p51_p3), 24, %s208_s24 }
   0xf   : > { %s216_s29 = scalar_lea.vmem (%p51_p3), %s1155_s0, %s898_s25 }
  0x10   : > { %v231_v0 = vld [vmem:[%s216_s29] sm:$0xff] (%p51_p3)  ;;  %v778_v2 = vld [vmem:[%s216_s29 + $0x8] sm:$0xf] (%p51_p3)  ;;  %s210_s30 = scalar_lea.vmem (%p51_p3), [#allocation3], %s935_s26  ;;  %v780_v3 = vld [vmem:[%s216_s29 + $0x2c] sm:$0xf] (%p51_p3) }
  0x11   : > { %v233_v1 = vld [vmem:[%s216_s29 + $0x24] sm:$0xff]  ;;  %232 = vst [vmem:[%s210_s30] sm:$0xff] %v231_v0 }
  0x12   : > { %234 = vst [vmem:[%s210_s30 + $0xc] sm:$0xff] %v233_v1 }
  0x13   : > { %779 = vst [vmem:[%s210_s30 + $0x8] sm:$0xf] %v778_v2 }
  0x14   : > { %781 = vst [vmem:[%s210_s30 + $0x14] sm:$0xf] %v780_v3 }
  0x15 PF: > { %p782_p6 = scmp.ge.s32.totalorder %s1017_s19, 1  ;;  %p263_p7 = scmp.lt.s32.totalorder %s1017_s19, 4 }
  0x17   : > { %p264_p8 = pnand %p782_p6, %p263_p7 }
  0x18   : > { %s270_s5 = sand.u32 (!%p264_p8), 1, %s1001_s15   ;;  %s319_s6 = smul.u32 (!%p264_p8), 48, %s1009_s17 }
  0x19   : > { %267 = sbr.rel (%p264_p8) target bundleno = 233 (0xe9), region = 58  ;;  %p784_p10 = scmp.ne.s32.totalorder (!%p264_p8), %s1009_s17, 0 }
  0x1a   : > { %s936_s7 = smul.u32 (!%p264_p8), 24, %s270_s5  ;;  %p320_p9 = scmp.lt.s32.totalorder (!%p264_p8), %s319_s6, 143 }
  0x1c   : > { %s1097_s12 = scalar_lea.vmem (!%p264_p8), [#allocation3], %s936_s7 }
  0x1e   : > { %s1167_s6 = smov (!%p320_p9, %s319_s6), 143  ;;  %352 = sbr.rel (%p784_p10) target bundleno = 38 (0x26), region = 66 }
  0x1f   : > { %s783_s8 = sshll.u32 %s1167_s6, 2 }
  0x20   : > { %s1095_s11 = scalar_lea.vmem %s1156_s1, %s783_s8 }
  0x23   : > { %v1019_v4 = vmov 0.0  }
  0x24   : > { %353 = vst [vmem:[#allocation2] sm:$0xff] %v1019_v4 }
  0x25   : > { %354 = vst [vmem:[#allocation2 + $0x8] sm:$0xff] %v1019_v4 }
  0x26 PF: > { %v909_v5 = vld [vmem:[%s1095_s11 + $0x38] sm:$0xff]  ;;  %v908_v8 = vld [vmem:[%s1095_s11 + $0x30] sm:$0xff]  ;;  %v907_v11 = vld [vmem:[%s1095_s11 + $0x28] sm:$0xff]  ;;  %p893_p11 = scmp.ne.s32.totalorder %s1009_s17, 2 }
  0x27   : > { %v917_v6 = vld [vmem:[%s1095_s11 + $0x78] sm:$0xff]  ;;  %569 = vmatpush.bf16.msra.mxu0 %v909_v5  ;;  %v916_v9 = vld [vmem:[%s1095_s11 + $0x70] sm:$0xff]  ;;  %v915_v12 = vld [vmem:[%s1095_s11 + $0x68] sm:$0xff] }
  0x28   : > { %v925_v7 = vld [vmem:[%s1095_s11 + $0xb8] sm:$0xff]  ;;  %583 = vmatpush.bf16.msra.mxu1 %v917_v6  ;;  %v924_v10 = vld [vmem:[%s1095_s11 + $0xb0] sm:$0xff]  ;;  %v923_v13 = vld [vmem:[%s1095_s11 + $0xa8] sm:$0xff] }
  0x29   : > { %597 = vmatpush.bf16.msra.mxu2 %v925_v7  ;;  %v906_v14 = vld [vmem:[%s1095_s11 + $0x20] sm:$0xff]  ;;  %v905_v17 = vld [vmem:[%s1095_s11 + $0x18] sm:$0xff]  ;;  %v904_v20 = vld [vmem:[%s1095_s11 + $0x10] sm:$0xff] }
  0x2a   : > { %v914_v15 = vld [vmem:[%s1095_s11 + $0x60] sm:$0xff]  ;;  %v913_v18 = vld [vmem:[%s1095_s11 + $0x58] sm:$0xff]  ;;  %v912_v21 = vld [vmem:[%s1095_s11 + $0x50] sm:$0xff] }
  0x2b   : > { %570 = vmatpush.bf16.msra.mxu0 %v908_v8  ;;  %v922_v16 = vld [vmem:[%s1095_s11 + $0xa0] sm:$0xff]  ;;  %v921_v19 = vld [vmem:[%s1095_s11 + $0x98] sm:$0xff]  ;;  %v920_v22 = vld [vmem:[%s1095_s11 + $0x90] sm:$0xff] }
  0x2c   : > { %584 = vmatpush.bf16.msra.mxu1 %v916_v9  ;;  %v903_v23 = vld [vmem:[%s1095_s11 + $0x8] sm:$0xff]  ;;  %v902_v26 = vld [vmem:[%s1095_s11] sm:$0xff]  ;;  %v900_v29 = vld [vmem:[%s1097_s12 + $0x8] sm:$0xf0] }
  0x2d   : > { %598 = vmatpush.bf16.msra.mxu2 %v924_v10  ;;  %v911_v24 = vld [vmem:[%s1095_s11 + $0x48] sm:$0xff]  ;;  %v910_v27 = vld [vmem:[%s1095_s11 + $0x40] sm:$0xff]  ;;  %v795_v33 = vld [vmem:[%s1097_s12 + $0x8] sm:$0xf] }
  0x2e   : > { %v919_v25 = vld [vmem:[%s1095_s11 + $0x88] sm:$0xff]  ;;  %v789_v31 = vld [vmem:[%s1097_s12 + $0xc] sm:$0xf0]  ;;  %v901_v34 = vld [vmem:[%s1097_s12 + $0x10] sm:$0xf0] }
  0x2f   : > { %571 = vmatpush.bf16.msra.mxu0 %v907_v11  ;;  %v787_v28 = vld [vmem:[%s1097_s12] sm:$0xf]  ;;  %v899_v30 = vld [vmem:[%s1097_s12 + $0x4] sm:$0xf]  ;;  %v918_v32 = vld [vmem:[%s1095_s11 + $0x80] sm:$0xff]  ;;  %v796_v37 = vor.u32 %v901_v34, %v795_v33 }
  0x30   : > { %585 = vmatpush.bf16.msra.mxu1 %v915_v12  ;;  %v788_v35 = vor.u32 %v900_v29, %v787_v28  ;;  %v792_v36 = vor.u32 %v899_v30, %v789_v31  ;;  %v355_v41 = vld [vmem:[#allocation2] sm:$0xff]  ;;  %v356_v48 = vld [vmem:[#allocation2 + $0x8] sm:$0xff] }
  0x31   : > { %599 = vmatpush.bf16.msra.mxu2 %v923_v13 }
  0x33   : > { %572 = vmatpush.bf16.msra.mxu0 %v906_v14 }
  0x34   : > { %586 = vmatpush.bf16.msra.mxu1 %v914_v15 }
  0x35   : > { %600 = vmatpush.bf16.msra.mxu2 %v922_v16 }
  0x37   : > { %573 = vmatpush.bf16.msra.mxu0 %v905_v17 }
  0x38   : > { %587 = vmatpush.bf16.msra.mxu1 %v913_v18 }
  0x39   : > { %601 = vmatpush.bf16.msra.mxu2 %v921_v19 }
  0x3b   : > { %574 = vmatpush.bf16.msra.mxu0 %v904_v20 }
  0x3c   : > { %588 = vmatpush.bf16.msra.mxu1 %v912_v21 }
  0x3d   : > { %602 = vmatpush.bf16.msra.mxu2 %v920_v22 }
  0x3f   : > { %575 = vmatpush.bf16.msra.mxu0 %v903_v23 }
  0x40   : > { %589 = vmatpush.bf16.msra.mxu1 %v911_v24 }
  0x41   : > { %603 = vmatpush.bf16.msra.mxu2 %v919_v25 }
  0x43   : > { %576 = vmatpush.bf16.msra.mxu0 %v902_v26 }
  0x44   : > { %590 = vmatpush.bf16.msra.mxu1 %v910_v27 }
  0x45   : > { %604 = vmatpush.bf16.msra.mxu2 %v918_v32 }
  0x46   : > { %577 = vmatmul.bf16.vlgmr.msra.gmra.mxu0 %v788_v35 }
  0x47   : > { %591 = vmatmul.bf16.vlgmr.msra.gmra.mxu1 %v792_v36 }
  0x48   : > { %605 = vmatmul.bf16.vlgmr.msra.gmra.mxu2 %v796_v37 }
  0xc3   : > { %v578_v38 = vpop.f32.mrf.mxu0 }
  0xc4   : > { %v592_v39 = vpop.f32.mrf.mxu1 }
  0xc5   : > { %v593_v40 = vadd.f32 %v592_v39, %v578_v38 }
  0xcb   : > { %v606_v42 = vpop.f32.mrf.mxu2  ;;  %v580_v45 = vpop.f32.mrf.mxu0 }
  0xcc   : > { %v607_v43 = vadd.f32 %v606_v42, %v593_v40  ;;  %v594_v46 = vpop.f32.mrf.mxu1 }
  0xcd   : > { %v595_v47 = vadd.f32 %v594_v46, %v580_v45 }
  0xce   : > { %v611_v44 = vadd.f32 %v607_v43, %v355_v41 }
  0xd0   : > { %613 = vst [vmem:[#allocation2] sm:$0xff] %v611_v44 }
  0xd3   : > { %v608_v49 = vpop.f32.mrf.mxu2 }
  0xd4   : > { %v609_v50 = vadd.f32 %v608_v49, %v595_v47  ;;  %618 = sbr.rel (%p893_p11) target bundleno = 233 (0xe9), region = 70 }
  0xd6   : > { %v612_v51 = vadd.f32 %v609_v50, %v356_v48 }
  0xd8   : > { %614 = vst [vmem:[#allocation2 + $0x8] sm:$0xff] %v612_v51 }
  0xd9   : > { %v619_v52 = vld [vmem:[#allocation2] sm:$0xff] }
  0xda   : > { %v978_v54 = vld [vmem:[%s1157_s2] ss:$0 sm:$0xff] }
  0xdb   : > { %v927_v55 = vld [vmem:[%s1158_s3] sm:$0xff]   ;;  %v625_v58 = vadd.f32 %v978_v54, %v619_v52 }
  0xdc   : > { %v928_v56 = vunpack.c.l.bf16 %v927_v55  ;;  %v929_v57 = vunpack.c.h.bf16 %v927_v55 }
  0xde   : > { %v631_v60 = vadd.f32 %v928_v56, %v625_v58 }
  0xdf   : > { %v620_v53 = vld [vmem:[#allocation2 + $0x8] sm:$0xff] }
  0xe0   : > { %v626_v59 = vadd.f32 %v978_v54, %v620_v53  ;;  %v633_v62 = vmax.f32 %v631_v60, 0.0 }
  0xe2   : > { %v632_v61 = vadd.f32 %v929_v57, %v626_v59 }
  0xe4   : > { %v634_v63 = vmax.f32 %v632_v61, 0.0 }
  0xe6   : > { %v933_v0 = vpack.c.bf16 %v634_v63, %v633_v62 }
  0xe8   : > { %934 = vst [vmem:[%s1159_s4] sm:$0xff] %v933_v0  }
  0xe9 PF: > { %s14_s19 = sadd.s32 1, %s1017_s19   ;;  %s1160_s15 = smov %s1005_s16 }
  0xea   : > { %p11_p12 = scmp.ge.s32.totalorder %s14_s19, 5   ;;  %s1161_s16 = smov %s1080_s23 }
  0xeb   : > { %s1162_s17 = smov %s1013_s18  ;;  %s1163_s18 = smov %s1165_s20 }
  0xec   :  { %13 = sbr.rel (!%p11_p12) target bundleno = 3 (0x3), region = 120 }

// kernel: _lambda_.53
= control target key start
LH: loop header
LB: loop body
LE: loop exit
PB: predicated region body
PF: predicated region fallthrough
CT: control target
= control target key end

     0   :  { %s1627_s0 = inlined_call_operand.vmem [shape: bf16[16,1152], index: 0, kind: input, shape index: {}]   ;;  %s1628_s1 = inlined_call_operand.vmem [shape: bf16[1152,256], index: 1, kind: input, shape index: {}]   ;;  %s1629_s2 = inlined_call_operand.vmem [shape: f32[1,256], index: 2, kind: input, shape index: {}]   ;;  %s1630_s3 = inlined_call_operand.vmem [shape: bf16[16,256], index: 3, kind: output, shape index: {}]  }
   0x1   :  { %1632 = sst [smem:[#allocation7_spill]] %s1627_s0 }
   0x2   :  { %1633 = sst [smem:[#allocation8_spill]] %s1628_s1 }
   0x3   :  { %s1315_s12 = smov 0   ;;  %s1317_s13 = smov 0  }
   0x4   :  { %s1319_s14 = smov 0   ;;  %s1321_s15 = smov 0  }
   0x5   :  { %s1323_s16 = smov 0   ;;  %s1325_s17 = smov 0  }
   0x6   :  { %s1327_s18 = smov 0   ;;  %s1329_s19 = smov 0  }
   0x7   :  { %s1331_s20 = smov 0   ;;  %s1333_s21 = smov 0  }
   0x8   :  { %s1335_s22 = smov 0  }
   0x9 LB: > { %s951_s23 = sadd.s32 4294967295, %s1292_s22   ;;  %s25_s24 = sadd.s32 1, %s1284_s20  ;;  %s1292_s22 = sphi %s1335_s22, %s13_s22   ;;  %s1288_s21 = sphi %s1333_s21, %s1650_s21   ;;  %s1284_s20 = sphi %s1331_s20, %s1649_s20   ;;  %s1280_s19 = sphi %s1329_s19, %s1648_s19   ;;  %s1276_s18 = sphi %s1327_s18, %s1647_s18   ;;  %s1272_s17 = sphi %s1325_s17, %s1646_s17   ;;  %s1268_s16 = sphi %s1323_s16, %s1645_s16   ;;  %s1264_s15 = sphi %s1321_s15, %s1644_s15   ;;  %s1260_s14 = sphi %s1319_s14, %s1643_s14   ;;  %s1256_s13 = sphi %s1317_s13, %s1642_s13   ;;  %s1252_s12 = sphi %s1315_s12, %s1641_s12  }
   0xa   : > { %p26_p0 = scmp.ge.s32.totalorder %s25_s24, 3  ;;  %s28_s25 = sadd.s32 1, %s1288_s21 }
   0xb   : > { %s41_s26 = sadd.s32 1, %s1272_s17  ;;  %p48_p1 = scmp.ne.s32.totalorder %s1272_s17, %s1268_s16 }
   0xc   : > { %s1652_s24 = smov (%p26_p0, %s25_s24), 0  ;;  %s1654_s25 = smov (!%p26_p0, %s28_s25), %s1288_s21 }
   0xd   : > { %s37_s27 = ssub.s32 %s1284_s20, %s1652_s24  ;;  %p49_p2 = scmp.eq.s32.totalorder %s1292_s22, 0 }
   0xe   : > { %p30_p3 = scmp.ge.s32.totalorder %s1654_s25, 2  ;;  %p39_p4 = scmp.eq.s32.totalorder %s37_s27, 0 }
   0xf   : > { %p1382_p5 = por %p49_p2, %p48_p1  ;;  %s69_s29 = sadd.s32 1, %s1264_s15 }
  0x10   : > { %s1656_s25 = smov (%p30_p3, %s1654_s25), 0  ;;  %p76_p6 = scmp.ne.s32.totalorder %s1264_s15, %s1260_s14 }
  0x11   : > { %1635 = sst [smem:[#allocation6_spill]] %s1656_s25  ;;  %s65_s4 = ssub.s32 %s1288_s21, %s1656_s25 }
  0x12   : > { %s1390_s30 = scalar_select %p39_p4, %s1272_s17, %s41_s26  }
  0x13   : > { %s66_s5 = sor.u32 %s65_s4, %s37_s27  ;;  %p121_p7 = scmp.eq.s32.totalorder %s65_s4, 0 }
  0x14   : > { %p67_p8 = scmp.eq.s32.totalorder %s66_s5, 0  ;;  %p1396_p9 = por %p76_p6, %p49_p2 }
  0x15   : > { %s123_s7 = sadd.s32 1, %s1256_s13  ;;  %p133_p10 = scmp.ne.s32.totalorder %s1256_s13, %s1252_s12 }
  0x16   : > { %s1404_s8 = scalar_select %p67_p8, %s1264_s15, %s69_s29  }
  0x17   : > { %s1407_s9 = scalar_select %p121_p7, %s1256_s13, %s123_s7  }
  0x18   : > { %p134_p11 = scmp.eq.s32.totalorder %s951_s23, 5  ;;  %p954_p13 = scmp.ge.s32.totalorder %s1292_s22, 6 }
  0x1a   : > { %p1409_p12 = por %p134_p11, %p133_p10  ;;  %156 = sbr.rel (%p954_p13) target bundleno = 101 (0x65), region = 16 }
  0x1f   : > { %159 = sbr.rel (!%p1382_p5) target bundleno = 44 (0x2c), region = 20  ;;  %s161_s11 = sand.u32 (%p1382_p5), 1, %s1272_s17  }
  0x20   : > { %s1078_s26 = smul.u32 (%p1382_p5), 12, %s1284_s20  ;;  %s1638_s0 = sld [smem:[#allocation7_spill]] (%p1382_p5) }
  0x21   : > { %s1112_s27 = smul.u32 (%p1382_p5), 24, %s161_s11 }
  0x23   : > { %s163_s23 = scalar_lea.vmem (%p1382_p5), [#allocation3], %s1112_s27 }
  0x26   : > { %s169_s5 = scalar_lea.vmem %s1638_s0, %s1078_s26 }
  0x27   : > { %v184_v0 = vld [vmem:[%s169_s5] sm:$0xff]  ;;  %v956_v2 = vld [vmem:[%s169_s5 + $0x8] sm:$0xf]  ;;  %v958_v3 = vld [vmem:[%s169_s5 + $0x2c] sm:$0xf] }
  0x28   : > { %v186_v1 = vld [vmem:[%s169_s5 + $0x24] sm:$0xff]  ;;  %185 = vst [vmem:[%s163_s23] sm:$0xff] %v184_v0 }
  0x29   : > { %187 = vst [vmem:[%s163_s23 + $0xc] sm:$0xff] %v186_v1 }
  0x2a   : > { %957 = vst [vmem:[%s163_s23 + $0x8] sm:$0xf] %v956_v2 }
  0x2b   : > { %959 = vst [vmem:[%s163_s23 + $0x14] sm:$0xf] %v958_v3 }
  0x2c PF: > { %205 = sbr.rel (!%p1396_p9) target bundleno = 101 (0x65), region = 46  ;;  %s207_s28 = sand.u32 (%p1396_p9), 1, %s1264_s15  }
  0x2d   : > { %s1079_s7 = smul.u32 (%p1396_p9), 96, %s1284_s20  ;;  %s1639_s1 = sld [smem:[#allocation8_spill]] (%p1396_p9) }
  0x2e   : > { %s1113_s11 = smul.u32 (%p1396_p9), 192, %s207_s28 }
  0x2f   : > { %s212_s26 = sadd.s32 (%p1396_p9), %s1288_s21, %s1079_s7 }
  0x30   : > { %s961_s29 = sshll.u32 (%p1396_p9), %s212_s26, 2  ;;  %s1434_s6 = scalar_lea.vmem (%p1396_p9), [#allocation4], %s1113_s11 }
  0x33   : > { %s1429_s27 = scalar_lea.vmem %s1639_s1, %s961_s29 }
  0x34   : > { %v231_v4 = vld [vmem:[%s1429_s27] sm:$0xf]  ;;  %v233_v5 = vld [vmem:[%s1429_s27 + $0x8] sm:$0xf]  ;;  %v235_v6 = vld [vmem:[%s1429_s27 + $0x10] sm:$0xf] }
  0x35   : > { %232 = vst [vmem:[%s1434_s6] sm:$0xf] %v231_v4  ;;  %v237_v7 = vld [vmem:[%s1429_s27 + $0x18] sm:$0xf]  ;;  %v239_v8 = vld [vmem:[%s1429_s27 + $0x20] sm:$0xf] }
  0x36   : > { %234 = vst [vmem:[%s1434_s6 + $0x4] sm:$0xf] %v233_v5  ;;  %v241_v9 = vld [vmem:[%s1429_s27 + $0x28] sm:$0xf]  ;;  %v243_v10 = vld [vmem:[%s1429_s27 + $0x30] sm:$0xf] }
  0x37   : > { %236 = vst [vmem:[%s1434_s6 + $0x8] sm:$0xf] %v235_v6  ;;  %v245_v11 = vld [vmem:[%s1429_s27 + $0x38] sm:$0xf]  ;;  %v247_v12 = vld [vmem:[%s1429_s27 + $0x40] sm:$0xf] }
  0x38   : > { %238 = vst [vmem:[%s1434_s6 + $0xc] sm:$0xf] %v237_v7  ;;  %v249_v13 = vld [vmem:[%s1429_s27 + $0x48] sm:$0xf]  ;;  %v251_v14 = vld [vmem:[%s1429_s27 + $0x50] sm:$0xf] }
  0x39   : > { %240 = vst [vmem:[%s1434_s6 + $0x10] sm:$0xf] %v239_v8  ;;  %v253_v15 = vld [vmem:[%s1429_s27 + $0x58] sm:$0xf]  ;;  %v255_v16 = vld [vmem:[%s1429_s27 + $0x60] sm:$0xf] }
  0x3a   : > { %242 = vst [vmem:[%s1434_s6 + $0x14] sm:$0xf] %v241_v9  ;;  %v257_v17 = vld [vmem:[%s1429_s27 + $0x68] sm:$0xf]  ;;  %v259_v18 = vld [vmem:[%s1429_s27 + $0x70] sm:$0xf] }
  0x3b   : > { %244 = vst [vmem:[%s1434_s6 + $0x18] sm:$0xf] %v243_v10  ;;  %v261_v19 = vld [vmem:[%s1429_s27 + $0x78] sm:$0xf]  ;;  %v263_v20 = vld [vmem:[%s1429_s27 + $0x80] sm:$0xf] }
  0x3c   : > { %246 = vst [vmem:[%s1434_s6 + $0x1c] sm:$0xf] %v245_v11  ;;  %v265_v21 = vld [vmem:[%s1429_s27 + $0x88] sm:$0xf]  ;;  %v267_v22 = vld [vmem:[%s1429_s27 + $0x90] sm:$0xf] }
  0x3d   : > { %248 = vst [vmem:[%s1434_s6 + $0x20] sm:$0xf] %v247_v12  ;;  %v269_v23 = vld [vmem:[%s1429_s27 + $0x98] sm:$0xf]  ;;  %v271_v24 = vld [vmem:[%s1429_s27 + $0xa0] sm:$0xf] }
  0x3e   : > { %250 = vst [vmem:[%s1434_s6 + $0x24] sm:$0xf] %v249_v13  ;;  %v273_v25 = vld [vmem:[%s1429_s27 + $0xa8] sm:$0xf]  ;;  %v275_v26 = vld [vmem:[%s1429_s27 + $0xb0] sm:$0xf] }
  0x3f   : > { %252 = vst [vmem:[%s1434_s6 + $0x28] sm:$0xf] %v251_v14  ;;  %v277_v27 = vld [vmem:[%s1429_s27 + $0xb8] sm:$0xf]  ;;  %v279_v28 = vld [vmem:[%s1429_s27 + $0xc0] sm:$0xf] }
  0x40   : > { %254 = vst [vmem:[%s1434_s6 + $0x2c] sm:$0xf] %v253_v15  ;;  %v281_v29 = vld [vmem:[%s1429_s27 + $0xc8] sm:$0xf]  ;;  %v283_v30 = vld [vmem:[%s1429_s27 + $0xd0] sm:$0xf] }
  0x41   : > { %256 = vst [vmem:[%s1434_s6 + $0x30] sm:$0xf] %v255_v16  ;;  %v285_v31 = vld [vmem:[%s1429_s27 + $0xd8] sm:$0xf]  ;;  %v287_v32 = vld [vmem:[%s1429_s27 + $0xe0] sm:$0xf] }
  0x42   : > { %258 = vst [vmem:[%s1434_s6 + $0x34] sm:$0xf] %v257_v17  ;;  %v289_v33 = vld [vmem:[%s1429_s27 + $0xe8] sm:$0xf]  ;;  %v291_v34 = vld [vmem:[%s1429_s27 + $0xf0] sm:$0xf] }
  0x43   : > { %260 = vst [vmem:[%s1434_s6 + $0x38] sm:$0xf] %v259_v18  ;;  %v293_v35 = vld [vmem:[%s1429_s27 + $0xf8] sm:$0xf]  ;;  %v295_v36 = vld [vmem:[%s1429_s27 + $0x100] sm:$0xf] }
  0x44   : > { %262 = vst [vmem:[%s1434_s6 + $0x3c] sm:$0xf] %v261_v19  ;;  %v297_v37 = vld [vmem:[%s1429_s27 + $0x108] sm:$0xf]  ;;  %v299_v38 = vld [vmem:[%s1429_s27 + $0x110] sm:$0xf] }
  0x45   : > { %264 = vst [vmem:[%s1434_s6 + $0x40] sm:$0xf] %v263_v20  ;;  %v301_v39 = vld [vmem:[%s1429_s27 + $0x118] sm:$0xf]  ;;  %v303_v40 = vld [vmem:[%s1429_s27 + $0x120] sm:$0xf] }
  0x46   : > { %266 = vst [vmem:[%s1434_s6 + $0x44] sm:$0xf] %v265_v21  ;;  %v305_v41 = vld [vmem:[%s1429_s27 + $0x128] sm:$0xf]  ;;  %v307_v42 = vld [vmem:[%s1429_s27 + $0x130] sm:$0xf] }
  0x47   : > { %268 = vst [vmem:[%s1434_s6 + $0x48] sm:$0xf] %v267_v22  ;;  %v309_v43 = vld [vmem:[%s1429_s27 + $0x138] sm:$0xf]  ;;  %v311_v44 = vld [vmem:[%s1429_s27 + $0x140] sm:$0xf] }
  0x48   : > { %270 = vst [vmem:[%s1434_s6 + $0x4c] sm:$0xf] %v269_v23  ;;  %v313_v45 = vld [vmem:[%s1429_s27 + $0x148] sm:$0xf]  ;;  %v315_v46 = vld [vmem:[%s1429_s27 + $0x150] sm:$0xf] }
  0x49   : > { %272 = vst [vmem:[%s1434_s6 + $0x50] sm:$0xf] %v271_v24  ;;  %v317_v47 = vld [vmem:[%s1429_s27 + $0x158] sm:$0xf]  ;;  %v319_v48 = vld [vmem:[%s1429_s27 + $0x160] sm:$0xf] }
  0x4a   : > { %274 = vst [vmem:[%s1434_s6 + $0x54] sm:$0xf] %v273_v25  ;;  %v321_v49 = vld [vmem:[%s1429_s27 + $0x168] sm:$0xf]  ;;  %v323_v50 = vld [vmem:[%s1429_s27 + $0x170] sm:$0xf] }
  0x4b   : > { %276 = vst [vmem:[%s1434_s6 + $0x58] sm:$0xf] %v275_v26  ;;  %v325_v51 = vld [vmem:[%s1429_s27 + $0x178] sm:$0xf] }
  0x4c   : > { %278 = vst [vmem:[%s1434_s6 + $0x5c] sm:$0xf] %v277_v27 }
  0x4d   : > { %280 = vst [vmem:[%s1434_s6 + $0x60] sm:$0xf] %v279_v28 }
  0x4e   : > { %282 = vst [vmem:[%s1434_s6 + $0x64] sm:$0xf] %v281_v29 }
  0x4f   : > { %284 = vst [vmem:[%s1434_s6 + $0x68] sm:$0xf] %v283_v30 }
  0x50   : > { %286 = vst [vmem:[%s1434_s6 + $0x6c] sm:$0xf] %v285_v31 }
  0x51   : > { %288 = vst [vmem:[%s1434_s6 + $0x70] sm:$0xf] %v287_v32 }
  0x52   : > { %290 = vst [vmem:[%s1434_s6 + $0x74] sm:$0xf] %v289_v33 }
  0x53   : > { %292 = vst [vmem:[%s1434_s6 + $0x78] sm:$0xf] %v291_v34 }
  0x54   : > { %294 = vst [vmem:[%s1434_s6 + $0x7c] sm:$0xf] %v293_v35 }
  0x55   : > { %296 = vst [vmem:[%s1434_s6 + $0x80] sm:$0xf] %v295_v36 }
  0x56   : > { %298 = vst [vmem:[%s1434_s6 + $0x84] sm:$0xf] %v297_v37 }
  0x57   : > { %300 = vst [vmem:[%s1434_s6 + $0x88] sm:$0xf] %v299_v38 }
  0x58   : > { %302 = vst [vmem:[%s1434_s6 + $0x8c] sm:$0xf] %v301_v39 }
  0x59   : > { %304 = vst [vmem:[%s1434_s6 + $0x90] sm:$0xf] %v303_v40 }
  0x5a   : > { %306 = vst [vmem:[%s1434_s6 + $0x94] sm:$0xf] %v305_v41 }
  0x5b   : > { %308 = vst [vmem:[%s1434_s6 + $0x98] sm:$0xf] %v307_v42 }
  0x5c   : > { %310 = vst [vmem:[%s1434_s6 + $0x9c] sm:$0xf] %v309_v43 }
  0x5d   : > { %312 = vst [vmem:[%s1434_s6 + $0xa0] sm:$0xf] %v311_v44 }
  0x5e   : > { %314 = vst [vmem:[%s1434_s6 + $0xa4] sm:$0xf] %v313_v45 }
  0x5f   : > { %316 = vst [vmem:[%s1434_s6 + $0xa8] sm:$0xf] %v315_v46 }
  0x60   : > { %318 = vst [vmem:[%s1434_s6 + $0xac] sm:$0xf] %v317_v47 }
  0x61   : > { %320 = vst [vmem:[%s1434_s6 + $0xb0] sm:$0xf] %v319_v48 }
  0x62   : > { %322 = vst [vmem:[%s1434_s6 + $0xb4] sm:$0xf] %v321_v49 }
  0x63   : > { %324 = vst [vmem:[%s1434_s6 + $0xb8] sm:$0xf] %v323_v50 }
  0x64   : > { %326 = vst [vmem:[%s1434_s6 + $0xbc] sm:$0xf] %v325_v51 }
  0x65 PF: > { %p962_p0 = scmp.ge.s32.totalorder %s1292_s22, 1  ;;  %p451_p1 = scmp.lt.s32.totalorder %s1292_s22, 7 }
  0x67   : > { %p452_p2 = pnand %p962_p0, %p451_p1 }
  0x68   : > { %s458_s0 = sand.u32 (!%p452_p2), 1, %s1268_s16   ;;  %s465_s5 = sand.u32 (!%p452_p2), 1, %s1260_s14  }
  0x69   : > { %455 = sbr.rel (%p452_p2) target bundleno = 321 (0x141), region = 91  ;;  %s491_s28 = sand.u32 (!%p452_p2), 1, %s1252_s12  }
  0x6a   : > { %s1114_s23 = smul.u32 (!%p452_p2), 24, %s458_s0  ;;  %s963_s11 = sshll.u32 (!%p452_p2), %s491_s28, 3 }
  0x6b   : > { %s1115_s7 = smul.u32 (!%p452_p2), 192, %s465_s5  ;;  %p497_p3 = scmp.lt.s32.totalorder (!%p452_p2), %s1280_s19, 1 }
  0x6c   : > { %s1542_s6 = scalar_lea.vmem (!%p452_p2), [#allocation3], %s1114_s23  ;;  %s1546_s25 = scalar_lea.vmem (!%p452_p2), [#allocation5], %s963_s11 }
  0x6d   : > { %s1544_s1 = scalar_lea.vmem (!%p452_p2), [#allocation4], %s1115_s7  ;;  %p964_p4 = scmp.ne.s32.totalorder (!%p452_p2), %s1276_s18, 0 }
  0x6e   : > { %s1536_s26 = scalar_select %p497_p3, %s1280_s19, 1 }
  0x6f   : > { %504 = sbr.rel (%p964_p4) target bundleno = 119 (0x77), region = 103 }
  0x70   : > { %s499_s27 = scalar_lea.vmem %s1629_s2, %s1536_s26 }
  0x74   : > { %v1294_v52 = vmov 0.0  }
  0x75   : > { %505 = vst [vmem:[#allocation2] sm:$0xff] %v1294_v52 }
  0x76   : > { %506 = vst [vmem:[#allocation2 + $0x8] sm:$0xff] %v1294_v52 }
  0x77 PF: > { %v1090_v53 = vld [vmem:[%s1544_s1 + $0x38] sm:$0xff]  ;;  %v1089_v56 = vld [vmem:[%s1544_s1 + $0x30] sm:$0xff]  ;;  %v1088_v59 = vld [vmem:[%s1544_s1 + $0x28] sm:$0xff]  ;;  %p1073_p5 = scmp.ne.s32.totalorder %s1276_s18, 2 }
  0x78   : > { %v1098_v54 = vld [vmem:[%s1544_s1 + $0x78] sm:$0xff]  ;;  %721 = vmatpush.bf16.msra.mxu0 %v1090_v53  ;;  %v1097_v57 = vld [vmem:[%s1544_s1 + $0x70] sm:$0xff]  ;;  %v1096_v60 = vld [vmem:[%s1544_s1 + $0x68] sm:$0xff] }
  0x79   : > { %v1106_v55 = vld [vmem:[%s1544_s1 + $0xb8] sm:$0xff]  ;;  %735 = vmatpush.bf16.msra.mxu1 %v1098_v54  ;;  %v1105_v58 = vld [vmem:[%s1544_s1 + $0xb0] sm:$0xff]  ;;  %v1104_v61 = vld [vmem:[%s1544_s1 + $0xa8] sm:$0xff] }
  0x7a   : > { %749 = vmatpush.bf16.msra.mxu2 %v1106_v55  ;;  %v1087_v62 = vld [vmem:[%s1544_s1 + $0x20] sm:$0xff]  ;;  %v1086_v1 = vld [vmem:[%s1544_s1 + $0x18] sm:$0xff]  ;;  %v1085_v4 = vld [vmem:[%s1544_s1 + $0x10] sm:$0xff] }
  0x7b   : > { %v1095_v63 = vld [vmem:[%s1544_s1 + $0x60] sm:$0xff]  ;;  %v1094_v2 = vld [vmem:[%s1544_s1 + $0x58] sm:$0xff]  ;;  %v1093_v5 = vld [vmem:[%s1544_s1 + $0x50] sm:$0xff] }
  0x7c   : > { %722 = vmatpush.bf16.msra.mxu0 %v1089_v56  ;;  %v1103_v0 = vld [vmem:[%s1544_s1 + $0xa0] sm:$0xff]  ;;  %v1102_v3 = vld [vmem:[%s1544_s1 + $0x98] sm:$0xff]  ;;  %v1101_v6 = vld [vmem:[%s1544_s1 + $0x90] sm:$0xff] }
  0x7d   : > { %736 = vmatpush.bf16.msra.mxu1 %v1097_v57  ;;  %v1084_v7 = vld [vmem:[%s1544_s1 + $0x8] sm:$0xff]  ;;  %v1083_v10 = vld [vmem:[%s1544_s1] sm:$0xff]  ;;  %v1081_v13 = vld [vmem:[%s1542_s6 + $0x8] sm:$0xf0] }
  0x7e   : > { %750 = vmatpush.bf16.msra.mxu2 %v1105_v58  ;;  %v1092_v8 = vld [vmem:[%s1544_s1 + $0x48] sm:$0xff]  ;;  %v1091_v11 = vld [vmem:[%s1544_s1 + $0x40] sm:$0xff]  ;;  %v975_v17 = vld [vmem:[%s1542_s6 + $0x8] sm:$0xf] }
  0x7f   : > { %v1100_v9 = vld [vmem:[%s1544_s1 + $0x88] sm:$0xff]  ;;  %v969_v15 = vld [vmem:[%s1542_s6 + $0xc] sm:$0xf0]  ;;  %v1082_v18 = vld [vmem:[%s1542_s6 + $0x10] sm:$0xf0] }
  0x80   : > { %723 = vmatpush.bf16.msra.mxu0 %v1088_v59  ;;  %v967_v12 = vld [vmem:[%s1542_s6] sm:$0xf]  ;;  %v1080_v14 = vld [vmem:[%s1542_s6 + $0x4] sm:$0xf]  ;;  %v1099_v16 = vld [vmem:[%s1544_s1 + $0x80] sm:$0xff]  ;;  %v976_v21 = vor.u32 %v1082_v18, %v975_v17 }
  0x81   : > { %737 = vmatpush.bf16.msra.mxu1 %v1096_v60  ;;  %v968_v19 = vor.u32 %v1081_v13, %v967_v12  ;;  %v972_v20 = vor.u32 %v1080_v14, %v969_v15  ;;  %v507_v25 = vld [vmem:[#allocation2] sm:$0xff]  ;;  %v508_v32 = vld [vmem:[#allocation2 + $0x8] sm:$0xff] }
  0x82   : > { %751 = vmatpush.bf16.msra.mxu2 %v1104_v61 }
  0x84   : > { %724 = vmatpush.bf16.msra.mxu0 %v1087_v62 }
  0x85   : > { %738 = vmatpush.bf16.msra.mxu1 %v1095_v63 }
  0x86   : > { %752 = vmatpush.bf16.msra.mxu2 %v1103_v0 }
  0x88   : > { %725 = vmatpush.bf16.msra.mxu0 %v1086_v1 }
  0x89   : > { %739 = vmatpush.bf16.msra.mxu1 %v1094_v2 }
  0x8a   : > { %753 = vmatpush.bf16.msra.mxu2 %v1102_v3 }
  0x8c   : > { %726 = vmatpush.bf16.msra.mxu0 %v1085_v4 }
  0x8d   : > { %740 = vmatpush.bf16.msra.mxu1 %v1093_v5 }
  0x8e   : > { %754 = vmatpush.bf16.msra.mxu2 %v1101_v6 }
  0x90   : > { %727 = vmatpush.bf16.msra.mxu0 %v1084_v7 }
  0x91   : > { %741 = vmatpush.bf16.msra.mxu1 %v1092_v8 }
  0x92   : > { %755 = vmatpush.bf16.msra.mxu2 %v1100_v9 }
  0x94   : > { %728 = vmatpush.bf16.msra.mxu0 %v1083_v10 }
  0x95   : > { %742 = vmatpush.bf16.msra.mxu1 %v1091_v11 }
  0x96   : > { %756 = vmatpush.bf16.msra.mxu2 %v1099_v16 }
  0x97   : > { %729 = vmatmul.bf16.vlgmr.msra.gmra.mxu0 %v968_v19 }
  0x98   : > { %743 = vmatmul.bf16.vlgmr.msra.gmra.mxu1 %v972_v20 }
  0x99   : > { %757 = vmatmul.bf16.vlgmr.msra.gmra.mxu2 %v976_v21 }
 0x114   : > { %v730_v22 = vpop.f32.mrf.mxu0 }
 0x115   : > { %v744_v23 = vpop.f32.mrf.mxu1 }
 0x116   : > { %v745_v24 = vadd.f32 %v744_v23, %v730_v22 }
 0x11c   : > { %v758_v26 = vpop.f32.mrf.mxu2  ;;  %v732_v29 = vpop.f32.mrf.mxu0 }
 0x11d   : > { %v759_v27 = vadd.f32 %v758_v26, %v745_v24  ;;  %v746_v30 = vpop.f32.mrf.mxu1 }
 0x11e   : > { %v747_v31 = vadd.f32 %v746_v30, %v732_v29 }
 0x11f   : > { %v763_v28 = vadd.f32 %v759_v27, %v507_v25 }
 0x121   : > { %765 = vst [vmem:[#allocation2] sm:$0xff] %v763_v28 }
 0x124   : > { %v760_v33 = vpop.f32.mrf.mxu2 }
 0x125   : > { %v761_v34 = vadd.f32 %v760_v33, %v747_v31  ;;  %770 = sbr.rel (%p1073_p5) target bundleno = 312 (0x138), region = 107 }
 0x127   : > { %v764_v35 = vadd.f32 %v761_v34, %v508_v32 }
 0x129   : > { %766 = vst [vmem:[#allocation2 + $0x8] sm:$0xff] %v764_v35 }
 0x12a   : > { %v771_v36 = vld [vmem:[#allocation2] sm:$0xff] }
 0x12b   : > { %v1205_v38 = vld [vmem:[%s499_s27] ss:$0 sm:$0xff] }
 0x12c   : > { %v777_v39 = vadd.f32 %v1205_v38, %v771_v36 }
 0x12e   : > { %v779_v41 = vmax.f32 %v777_v39, 0.0 }
 0x130   : > { %v772_v37 = vld [vmem:[#allocation2 + $0x8] sm:$0xff] }
 0x131   : > { %v778_v40 = vadd.f32 %v1205_v38, %v772_v37 }
 0x133   : > { %v780_v42 = vmax.f32 %v778_v40, 0.0 }
 0x135   : > { %v1110_v43 = vpack.c.bf16 %v780_v42, %v779_v41 }
 0x137   : > { %1111 = vst [vmem:[%s1546_s25] sm:$0xff] %v1110_v43  }
 0x138 PF: > { %791 = sbr.rel (!%p1409_p12) target bundleno = 321 (0x141), region = 111  ;;  %s1075_s14 = sshll.u32 (%p1409_p12), %s1280_s19, 2 }
 0x139   : > { %s796_s0 = scalar_lea.vmem (%p1409_p12), %s1630_s3, %s1075_s14 }
 0x13e   : > { %v813_v44 = vld [vmem:[%s1546_s25] sm:$0xf]  ;;  %v815_v45 = vld [vmem:[%s1546_s25 + $0x4] sm:$0xf] }
 0x13f   : > { %814 = vst [vmem:[%s796_s0] sm:$0xf] %v813_v44 }
 0x140   : > { %816 = vst [vmem:[%s796_s0 + $0x8] sm:$0xf] %v815_v45 }
 0x141 PF: > { %s13_s22 = sadd.s32 1, %s1292_s22   ;;  %s1640_s25 = sld [smem:[#allocation6_spill]] }
 0x142   : > { %p10_p6 = scmp.ge.s32.totalorder %s13_s22, 8   ;;  %s1641_s12 = smov %s1256_s13 }
 0x143   : > { %s1642_s13 = smov %s1407_s9  ;;  %s1643_s14 = smov %s1264_s15 }
 0x144   : > { %s1644_s15 = smov %s1404_s8  ;;  %s1645_s16 = smov %s1272_s17 }
 0x145   : > { %s1646_s17 = smov %s1390_s30  ;;  %s1647_s18 = smov %s1284_s20 }
 0x146   : > { %s1648_s19 = smov %s1288_s21  ;;  %s1649_s20 = smov %s1652_s24 }
 0x147   : > { %s1650_s21 = smov %s1640_s25  ;;  %12 = sbr.rel (!%p10_p6) target bundleno = 9 (0x9), region = 200 }

// kernel: _lambda_.54
= control target key start
LH: loop header
LB: loop body
LE: loop exit
PB: predicated region body
PF: predicated region fallthrough
CT: control target
= control target key end

     0   :  { %s777_s12 = smov 0   ;;  %s779_s13 = smov 0   ;;  %s875_s0 = inlined_call_operand.vmem [shape: bf16[16,128], index: 0, kind: input, shape index: {}]   ;;  %s876_s1 = inlined_call_operand.vmem [shape: bf16[128,256], index: 1, kind: input, shape index: {}]   ;;  %s877_s2 = inlined_call_operand.vmem [shape: f32[1,256], index: 2, kind: input, shape index: {}]   ;;  %s878_s3 = inlined_call_operand.vmem [shape: bf16[16,256], index: 3, kind: output, shape index: {}]  }
   0x1   :  { %s781_s14 = smov 0   ;;  %s783_s15 = smov 0  }
   0x2   :  { %s785_s16 = smov 0  }
   0x3 LB: > { %s28_s17 = sadd.s32 1, %s751_s15  ;;  %s612_s18 = sadd.s32 4294967295, %s755_s16   ;;  %s755_s16 = sphi %s785_s16, %s13_s16   ;;  %s751_s15 = sphi %s783_s15, %s883_s15   ;;  %s747_s14 = sphi %s781_s14, %s882_s14   ;;  %s743_s13 = sphi %s779_s13, %s881_s13   ;;  %s739_s12 = sphi %s777_s12, %s880_s12  }
   0x4   : > { %p30_p0 = scmp.ge.s32.totalorder %s28_s17, 2  ;;  %p76_p1 = scmp.ne.s32.totalorder %s743_s13, %s739_s12 }
   0x5   : > { %p77_p2 = scmp.eq.s32.totalorder %s755_s16, 0  ;;  %p134_p4 = scmp.eq.s32.totalorder %s612_s18, 1 }
   0x6   : > { %s885_s17 = smov (%p30_p0, %s28_s17), 0  ;;  %s69_s20 = sadd.s32 1, %s743_s13 }
   0x7   : > { %p78_p3 = por %p77_p2, %p76_p1  ;;  %s65_s19 = ssub.s32 %s751_s15, %s885_s17 }
   0x8   : > { %p67_p5 = scmp.eq.s32.totalorder %s65_s19, 0  ;;  %p812_p6 = por %p134_p4, %p76_p1 }
   0x9   : > { %p616_p7 = scmp.ge.s32.totalorder %s755_s16, 2 }
   0xa   : > { %s817_s22 = scalar_select %p67_p5, %s743_s13, %s69_s20  }
   0xb   : > { %168 = sbr.rel (%p616_p7) target bundleno = 36 (0x24), region = 20 }
  0x10   : > { %171 = sbr.rel (!%p78_p3) target bundleno = 36 (0x24), region = 24  ;;  %s173_s23 = sand.u32 (%p78_p3), 1, %s743_s13  }
  0x11   : > { %s618_s24 = sshll.u32 (%p78_p3), %s751_s15, 2  ;;  %s617_s25 = sshll.u32 (%p78_p3), %s173_s23, 6 }
  0x12   : > { %s825_s28 = scalar_lea.vmem (%p78_p3), %s876_s1, %s618_s24  ;;  %s175_s29 = scalar_lea.vmem (%p78_p3), [#allocation3], %s617_s25 }
  0x13   : > { %v197_v0 = vld [vmem:[%s825_s28] sm:$0xf] (%p78_p3)  ;;  %v199_v1 = vld [vmem:[%s825_s28 + $0x8] sm:$0xf] (%p78_p3)  ;;  %v201_v2 = vld [vmem:[%s825_s28 + $0x10] sm:$0xf] (%p78_p3) }
  0x14   : > { %198 = vst [vmem:[%s175_s29] sm:$0xf] (%p78_p3), %v197_v0  ;;  %v203_v3 = vld [vmem:[%s825_s28 + $0x18] sm:$0xf] (%p78_p3)  ;;  %v205_v4 = vld [vmem:[%s825_s28 + $0x20] sm:$0xf] (%p78_p3) }
  0x15   : > { %200 = vst [vmem:[%s175_s29 + $0x4] sm:$0xf] %v199_v1  ;;  %v207_v5 = vld [vmem:[%s825_s28 + $0x28] sm:$0xf]  ;;  %v209_v6 = vld [vmem:[%s825_s28 + $0x30] sm:$0xf] }
  0x16   : > { %202 = vst [vmem:[%s175_s29 + $0x8] sm:$0xf] %v201_v2  ;;  %v211_v7 = vld [vmem:[%s825_s28 + $0x38] sm:$0xf]  ;;  %v213_v8 = vld [vmem:[%s825_s28 + $0x40] sm:$0xf] }
  0x17   : > { %204 = vst [vmem:[%s175_s29 + $0xc] sm:$0xf] %v203_v3  ;;  %v215_v9 = vld [vmem:[%s825_s28 + $0x48] sm:$0xf]  ;;  %v217_v10 = vld [vmem:[%s825_s28 + $0x50] sm:$0xf] }
  0x18   : > { %206 = vst [vmem:[%s175_s29 + $0x10] sm:$0xf] %v205_v4  ;;  %v219_v11 = vld [vmem:[%s825_s28 + $0x58] sm:$0xf]  ;;  %v221_v12 = vld [vmem:[%s825_s28 + $0x60] sm:$0xf] }
  0x19   : > { %208 = vst [vmem:[%s175_s29 + $0x14] sm:$0xf] %v207_v5  ;;  %v223_v13 = vld [vmem:[%s825_s28 + $0x68] sm:$0xf]  ;;  %v225_v14 = vld [vmem:[%s825_s28 + $0x70] sm:$0xf] }
  0x1a   : > { %210 = vst [vmem:[%s175_s29 + $0x18] sm:$0xf] %v209_v6  ;;  %v227_v15 = vld [vmem:[%s825_s28 + $0x78] sm:$0xf] }
  0x1b   : > { %212 = vst [vmem:[%s175_s29 + $0x1c] sm:$0xf] %v211_v7 }
  0x1c   : > { %214 = vst [vmem:[%s175_s29 + $0x20] sm:$0xf] %v213_v8 }
  0x1d   : > { %216 = vst [vmem:[%s175_s29 + $0x24] sm:$0xf] %v215_v9 }
  0x1e   : > { %218 = vst [vmem:[%s175_s29 + $0x28] sm:$0xf] %v217_v10 }
  0x1f   : > { %220 = vst [vmem:[%s175_s29 + $0x2c] sm:$0xf] %v219_v11 }
  0x20   : > { %222 = vst [vmem:[%s175_s29 + $0x30] sm:$0xf] %v221_v12 }
  0x21   : > { %224 = vst [vmem:[%s175_s29 + $0x34] sm:$0xf] %v223_v13 }
  0x22   : > { %226 = vst [vmem:[%s175_s29 + $0x38] sm:$0xf] %v225_v14 }
  0x23   : > { %228 = vst [vmem:[%s175_s29 + $0x3c] sm:$0xf] %v227_v15 }
  0x24 PF: > { %p619_p8 = scmp.ge.s32.totalorder %s755_s16, 1  ;;  %p289_p9 = scmp.lt.s32.totalorder %s755_s16, 3 }
  0x26   : > { %p290_p10 = pnand %p619_p8, %p289_p9 }
  0x27   : > { %s296_s30 = sand.u32 (!%p290_p10), 1, %s739_s12   ;;  %p339_p11 = scmp.lt.s32.totalorder (!%p290_p10), %s747_s14, 1 }
  0x28   : > { %293 = sbr.rel (%p290_p10) target bundleno = 225 (0xe1), region = 69  ;;  %s620_s4 = sshll.u32 (!%p290_p10), %s296_s30, 6 }
  0x29   : > { %s298_s5 = scalar_lea.vmem (!%p290_p10), [#allocation3], %s620_s4  ;;  %s621_s12 = sshll.u32 (!%p290_p10), %s296_s30, 3 }
  0x2a   : > { %s328_s18 = scalar_lea.vmem (!%p290_p10), [#allocation4], %s621_s12 }
  0x2d   : > { %v670_v16 = vld [vmem:[%s298_s5 + $0x38] sm:$0xff]  ;;  %s340_s6 = scalar_select %p339_p11, %s747_s14, 1  ;;  %v669_v17 = vld [vmem:[%s298_s5 + $0x30] sm:$0xff]  ;;  %v668_v18 = vld [vmem:[%s298_s5 + $0x28] sm:$0xff] }
  0x2e   : > { %423 = vmatpush.bf16.msra.mxu0 %v670_v16  ;;  %v667_v19 = vld [vmem:[%s298_s5 + $0x20] sm:$0xff]  ;;  %v666_v20 = vld [vmem:[%s298_s5 + $0x18] sm:$0xff]  ;;  %v665_v21 = vld [vmem:[%s298_s5 + $0x10] sm:$0xff]  ;;  %s659_s19 = sshll.u32 (%p812_p6), %s747_s14, 2 }
  0x2f   : > { %s341_s9 = scalar_lea.vmem %s877_s2, %s340_s6  ;;  %v664_v22 = vld [vmem:[%s298_s5 + $0x8] sm:$0xff]  ;;  %v663_v23 = vld [vmem:[%s298_s5] sm:$0xff]  ;;  %s467_s24 = scalar_lea.vmem (%p812_p6), %s878_s3, %s659_s19 }
  0x30   : > { %v662_v24 = vld [vmem:[%s875_s0] sm:$0xff] }
  0x31   : > { %v716_v26 = vld [vmem:[%s341_s9] ss:$0 sm:$0xff] }
  0x32   : > { %424 = vmatpush.bf16.msra.mxu0 %v669_v17 }
  0x36   : > { %425 = vmatpush.bf16.msra.mxu0 %v668_v18 }
  0x3a   : > { %426 = vmatpush.bf16.msra.mxu0 %v667_v19 }
  0x3e   : > { %427 = vmatpush.bf16.msra.mxu0 %v666_v20 }
  0x42   : > { %428 = vmatpush.bf16.msra.mxu0 %v665_v21 }
  0x46   : > { %429 = vmatpush.bf16.msra.mxu0 %v664_v22 }
  0x4a   : > { %430 = vmatpush.bf16.msra.mxu0 %v663_v23 }
  0x4d   : > { %431 = vmatmul.bf16.vlgmr.msra.gmra.mxu0 %v662_v24 }
  0xca   : > { %v432_v25 = vpop.f32.mrf.mxu0 }
  0xcb   : > { %v450_v28 = vadd.f32 %v716_v26, %v432_v25 }
  0xd2   : > { %v434_v27 = vpop.f32.mrf.mxu0 }
  0xd3   : > { %v451_v29 = vadd.f32 %v716_v26, %v434_v27  ;;  %462 = sbr.rel (!%p812_p6) target bundleno = 225 (0xe1), region = 85 }
  0xd5   : > { %v674_v30 = vpack.c.bf16 %v451_v29, %v450_v28 }
  0xd7   : > { %675 = vst [vmem:[%s328_s18] sm:$0xff] %v674_v30  }
  0xde   : > { %v484_v31 = vld [vmem:[%s328_s18] sm:$0xf]  ;;  %v486_v32 = vld [vmem:[%s328_s18 + $0x4] sm:$0xf] }
  0xdf   : > { %485 = vst [vmem:[%s467_s24] sm:$0xf] %v484_v31 }
  0xe0   : > { %487 = vst [vmem:[%s467_s24 + $0x8] sm:$0xf] %v486_v32 }
  0xe1 PF: > { %s13_s16 = sadd.s32 1, %s755_s16   ;;  %s880_s12 = smov %s743_s13 }
  0xe2   : > { %p10_p12 = scmp.ge.s32.totalorder %s13_s16, 4   ;;  %s881_s13 = smov %s817_s22 }
  0xe3   : > { %s882_s14 = smov %s751_s15  ;;  %s883_s15 = smov %s885_s17 }
  0xe4   :  { %12 = sbr.rel (!%p10_p12) target bundleno = 3 (0x3), region = 163 }

// kernel: _lambda_.55
= control target key start
LH: loop header
LB: loop body
LE: loop exit
PB: predicated region body
PF: predicated region fallthrough
CT: control target
= control target key end

     0   :  { %s2477_s0 = inlined_call_operand.vmem [shape: bf16[16,2304], index: 0, kind: input, shape index: {}]   ;;  %s2478_s1 = inlined_call_operand.vmem [shape: bf16[2304,256], index: 1, kind: input, shape index: {}]   ;;  %s2479_s2 = inlined_call_operand.vmem [shape: f32[1,256], index: 2, kind: input, shape index: {}]   ;;  %s2480_s3 = inlined_call_operand.vmem [shape: bf16[16,256], index: 3, kind: input, shape index: {}]   ;;  %s2481_s4 = inlined_call_operand.vmem [shape: bf16[16,256], index: 4, kind: output, shape index: {}]  }
   0x1   :  { %2484 = sst [smem:[#allocation9_spill]] %s2477_s0 }
   0x2   :  { %s2016_s15 = smov 0   ;;  %s2018_s16 = smov 0  }
   0x3   :  { %s2020_s17 = smov 0   ;;  %s2022_s18 = smov 0  }
   0x4   :  { %s2024_s19 = smov 0   ;;  %s2026_s20 = smov 0  }
   0x5   :  { %s2028_s21 = smov 0   ;;  %s2030_s22 = smov 0  }
   0x6   :  { %s2032_s23 = smov 0   ;;  %s2034_s24 = smov 0  }
   0x7   :  { %s2036_s25 = smov 0  }
   0x8 LB: > { %s1509_s26 = sadd.s32 4294967295, %s1988_s25   ;;  %s26_s27 = sadd.s32 1, %s1980_s23  ;;  %s1988_s25 = sphi %s2036_s25, %s14_s25   ;;  %s1984_s24 = sphi %s2034_s24, %s2503_s24   ;;  %s1980_s23 = sphi %s2032_s23, %s2502_s23   ;;  %s1976_s22 = sphi %s2030_s22, %s2501_s22   ;;  %s1972_s21 = sphi %s2028_s21, %s2500_s21   ;;  %s1968_s20 = sphi %s2026_s20, %s2499_s20   ;;  %s1964_s19 = sphi %s2024_s19, %s2498_s19   ;;  %s1960_s18 = sphi %s2022_s18, %s2497_s18   ;;  %s1956_s17 = sphi %s2020_s17, %s2496_s17   ;;  %s1952_s16 = sphi %s2018_s16, %s2495_s16   ;;  %s1948_s15 = sphi %s2016_s15, %s2494_s15  }
   0x9   : > { %p27_p0 = scmp.ge.s32.totalorder %s26_s27, 3  ;;  %s29_s28 = sadd.s32 1, %s1984_s24 }
   0xa   : > { %s42_s29 = sadd.s32 1, %s1968_s20  ;;  %p49_p1 = scmp.ne.s32.totalorder %s1968_s20, %s1964_s19 }
   0xb   : > { %s2505_s27 = smov (%p27_p0, %s26_s27), 0  ;;  %s2507_s28 = smov (!%p27_p0, %s29_s28), %s1984_s24 }
   0xc   : > { %2485 = sst [smem:[#allocation7_spill]] %s2505_s27  ;;  %s38_s30 = ssub.s32 %s1980_s23, %s2505_s27 }
   0xd   : > { %p50_p2 = scmp.eq.s32.totalorder %s1988_s25, 0  ;;  %p31_p3 = scmp.ge.s32.totalorder %s2507_s28, 2 }
   0xe   : > { %p40_p4 = scmp.eq.s32.totalorder %s38_s30, 0  ;;  %s70_s6 = sadd.s32 1, %s1960_s18 }
   0xf   : > { %p2085_p5 = por %p50_p2, %p49_p1  ;;  %s2509_s28 = smov (%p31_p3, %s2507_s28), 0 }
  0x10   : > { %2487 = sst [smem:[#allocation8_spill]] %s2509_s28  ;;  %s66_s8 = ssub.s32 %s1984_s24, %s2509_s28 }
  0x11   : > { %s2093_s7 = scalar_select %p40_p4, %s1968_s20, %s42_s29  }
  0x12   : > { %p77_p6 = scmp.ne.s32.totalorder %s1960_s18, %s1956_s17  ;;  %s67_s9 = sor.u32 %s66_s8, %s38_s30 }
  0x13   : > { %p122_p7 = scmp.eq.s32.totalorder %s66_s8, 0  ;;  %p68_p8 = scmp.eq.s32.totalorder %s67_s9, 0 }
  0x14   : > { %p2101_p9 = por %p77_p6, %p50_p2  ;;  %s124_s11 = sadd.s32 1, %s1952_s16 }
  0x15   : > { %p131_p10 = scmp.ne.s32.totalorder %s1952_s16, %s1948_s15  ;;  %p163_p12 = scmp.eq.s32.totalorder %s1509_s26, 5 }
  0x16   : > { %s2109_s12 = scalar_select %p68_p8, %s1960_s18, %s70_s6  }
  0x17   : > { %s2112_s13 = scalar_select %p122_p7, %s1952_s16, %s124_s11  }
  0x18   : > { %p2116_p11 = por %p131_p10, %p50_p2  ;;  %p2120_p13 = por %p163_p12, %p131_p10 }
  0x19   : > { %p1512_p0 = scmp.ge.s32.totalorder %s1988_s25, 6 }
  0x1b   : > { %185 = sbr.rel (%p1512_p0) target bundleno = 156 (0x9c), region = 16 }
  0x20   : > { %188 = sbr.rel (!%p2085_p5) target bundleno = 47 (0x2f), region = 20  ;;  %s190_s30 = sand.u32 (%p2085_p5), 1, %s1968_s20  }
  0x21   : > { %s1743_s6 = smul.u32 (%p2085_p5), 24, %s1980_s23  ;;  %s2491_s0 = sld [smem:[#allocation9_spill]] (%p2085_p5) }
  0x22   : > { %s1808_s8 = smul.u32 (%p2085_p5), 48, %s190_s30 }
  0x24   : > { %s192_s26 = scalar_lea.vmem (%p2085_p5), [#allocation3], %s1808_s8 }
  0x27   : > { %s198_s28 = scalar_lea.vmem %s2491_s0, %s1743_s6 }
  0x28   : > { %v211_v0 = vld [vmem:[%s198_s28] sm:$0xff]  ;;  %v213_v1 = vld [vmem:[%s198_s28 + $0x8] sm:$0xff]  ;;  %v215_v2 = vld [vmem:[%s198_s28 + $0x10] sm:$0xff] }
  0x29   : > { %212 = vst [vmem:[%s192_s26] sm:$0xff] %v211_v0  ;;  %v217_v3 = vld [vmem:[%s198_s28 + $0x48] sm:$0xff]  ;;  %v219_v4 = vld [vmem:[%s198_s28 + $0x50] sm:$0xff]  ;;  %v221_v5 = vld [vmem:[%s198_s28 + $0x58] sm:$0xff] }
  0x2a   : > { %214 = vst [vmem:[%s192_s26 + $0x8] sm:$0xff] %v213_v1 }
  0x2b   : > { %216 = vst [vmem:[%s192_s26 + $0x10] sm:$0xff] %v215_v2 }
  0x2c   : > { %218 = vst [vmem:[%s192_s26 + $0x18] sm:$0xff] %v217_v3 }
  0x2d   : > { %220 = vst [vmem:[%s192_s26 + $0x20] sm:$0xff] %v219_v4 }
  0x2e   : > { %222 = vst [vmem:[%s192_s26 + $0x28] sm:$0xff] %v221_v5 }
  0x2f PF: > { %228 = sbr.rel (!%p2101_p9) target bundleno = 150 (0x96), region = 43  ;;  %s230_s5 = sand.u32 (%p2101_p9), 1, %s1960_s18  }
  0x30   : > { %s1744_s30 = smul.u32 (%p2101_p9), 192, %s1980_s23 }
  0x31   : > { %s1809_s6 = smul.u32 (%p2101_p9), 384, %s230_s5 }
  0x32   : > { %s235_s8 = sadd.s32 (%p2101_p9), %s1984_s24, %s1744_s30 }
  0x33   : > { %s1515_s9 = sshll.u32 (%p2101_p9), %s235_s8, 2  ;;  %s2145_s28 = scalar_lea.vmem (%p2101_p9), [#allocation4], %s1809_s6 }
  0x34   : > { %s2140_s27 = scalar_lea.vmem %s2478_s1, %s1515_s9 }
  0x35   : > { %v254_v6 = vld [vmem:[%s2140_s27] sm:$0xf]  ;;  %v256_v7 = vld [vmem:[%s2140_s27 + $0x8] sm:$0xf]  ;;  %v258_v8 = vld [vmem:[%s2140_s27 + $0x10] sm:$0xf] }
  0x36   : > { %255 = vst [vmem:[%s2145_s28] sm:$0xf] %v254_v6  ;;  %v260_v9 = vld [vmem:[%s2140_s27 + $0x18] sm:$0xf]  ;;  %v262_v10 = vld [vmem:[%s2140_s27 + $0x20] sm:$0xf] }
  0x37   : > { %257 = vst [vmem:[%s2145_s28 + $0x4] sm:$0xf] %v256_v7  ;;  %v264_v11 = vld [vmem:[%s2140_s27 + $0x28] sm:$0xf]  ;;  %v266_v12 = vld [vmem:[%s2140_s27 + $0x30] sm:$0xf] }
  0x38   : > { %259 = vst [vmem:[%s2145_s28 + $0x8] sm:$0xf] %v258_v8  ;;  %v268_v13 = vld [vmem:[%s2140_s27 + $0x38] sm:$0xf]  ;;  %v270_v14 = vld [vmem:[%s2140_s27 + $0x40] sm:$0xf] }
  0x39   : > { %261 = vst [vmem:[%s2145_s28 + $0xc] sm:$0xf] %v260_v9  ;;  %v272_v15 = vld [vmem:[%s2140_s27 + $0x48] sm:$0xf]  ;;  %v274_v16 = vld [vmem:[%s2140_s27 + $0x50] sm:$0xf] }
  0x3a   : > { %263 = vst [vmem:[%s2145_s28 + $0x10] sm:$0xf] %v262_v10  ;;  %v276_v17 = vld [vmem:[%s2140_s27 + $0x58] sm:$0xf]  ;;  %v278_v18 = vld [vmem:[%s2140_s27 + $0x60] sm:$0xf] }
  0x3b   : > { %265 = vst [vmem:[%s2145_s28 + $0x14] sm:$0xf] %v264_v11  ;;  %v280_v19 = vld [vmem:[%s2140_s27 + $0x68] sm:$0xf]  ;;  %v282_v20 = vld [vmem:[%s2140_s27 + $0x70] sm:$0xf] }
  0x3c   : > { %267 = vst [vmem:[%s2145_s28 + $0x18] sm:$0xf] %v266_v12  ;;  %v284_v21 = vld [vmem:[%s2140_s27 + $0x78] sm:$0xf]  ;;  %v286_v22 = vld [vmem:[%s2140_s27 + $0x80] sm:$0xf] }
  0x3d   : > { %269 = vst [vmem:[%s2145_s28 + $0x1c] sm:$0xf] %v268_v13  ;;  %v288_v23 = vld [vmem:[%s2140_s27 + $0x88] sm:$0xf]  ;;  %v290_v24 = vld [vmem:[%s2140_s27 + $0x90] sm:$0xf] }
  0x3e   : > { %271 = vst [vmem:[%s2145_s28 + $0x20] sm:$0xf] %v270_v14  ;;  %v292_v25 = vld [vmem:[%s2140_s27 + $0x98] sm:$0xf]  ;;  %v294_v26 = vld [vmem:[%s2140_s27 + $0xa0] sm:$0xf] }
  0x3f   : > { %273 = vst [vmem:[%s2145_s28 + $0x24] sm:$0xf] %v272_v15  ;;  %v296_v27 = vld [vmem:[%s2140_s27 + $0xa8] sm:$0xf]  ;;  %v298_v28 = vld [vmem:[%s2140_s27 + $0xb0] sm:$0xf] }
  0x40   : > { %275 = vst [vmem:[%s2145_s28 + $0x28] sm:$0xf] %v274_v16  ;;  %v300_v29 = vld [vmem:[%s2140_s27 + $0xb8] sm:$0xf]  ;;  %v302_v30 = vld [vmem:[%s2140_s27 + $0xc0] sm:$0xf] }
  0x41   : > { %277 = vst [vmem:[%s2145_s28 + $0x2c] sm:$0xf] %v276_v17  ;;  %v304_v31 = vld [vmem:[%s2140_s27 + $0xc8] sm:$0xf]  ;;  %v306_v32 = vld [vmem:[%s2140_s27 + $0xd0] sm:$0xf] }
  0x42   : > { %279 = vst [vmem:[%s2145_s28 + $0x30] sm:$0xf] %v278_v18  ;;  %v308_v33 = vld [vmem:[%s2140_s27 + $0xd8] sm:$0xf]  ;;  %v310_v34 = vld [vmem:[%s2140_s27 + $0xe0] sm:$0xf] }
  0x43   : > { %281 = vst [vmem:[%s2145_s28 + $0x34] sm:$0xf] %v280_v19  ;;  %v312_v35 = vld [vmem:[%s2140_s27 + $0xe8] sm:$0xf]  ;;  %v314_v36 = vld [vmem:[%s2140_s27 + $0xf0] sm:$0xf] }
  0x44   : > { %283 = vst [vmem:[%s2145_s28 + $0x38] sm:$0xf] %v282_v20  ;;  %v316_v37 = vld [vmem:[%s2140_s27 + $0xf8] sm:$0xf]  ;;  %v318_v38 = vld [vmem:[%s2140_s27 + $0x100] sm:$0xf] }
  0x45   : > { %285 = vst [vmem:[%s2145_s28 + $0x3c] sm:$0xf] %v284_v21  ;;  %v320_v39 = vld [vmem:[%s2140_s27 + $0x108] sm:$0xf]  ;;  %v322_v40 = vld [vmem:[%s2140_s27 + $0x110] sm:$0xf] }
  0x46   : > { %287 = vst [vmem:[%s2145_s28 + $0x40] sm:$0xf] %v286_v22  ;;  %v324_v41 = vld [vmem:[%s2140_s27 + $0x118] sm:$0xf]  ;;  %v326_v42 = vld [vmem:[%s2140_s27 + $0x120] sm:$0xf] }
  0x47   : > { %289 = vst [vmem:[%s2145_s28 + $0x44] sm:$0xf] %v288_v23  ;;  %v328_v43 = vld [vmem:[%s2140_s27 + $0x128] sm:$0xf]  ;;  %v330_v44 = vld [vmem:[%s2140_s27 + $0x130] sm:$0xf] }
  0x48   : > { %291 = vst [vmem:[%s2145_s28 + $0x48] sm:$0xf] %v290_v24  ;;  %v332_v45 = vld [vmem:[%s2140_s27 + $0x138] sm:$0xf]  ;;  %v334_v46 = vld [vmem:[%s2140_s27 + $0x140] sm:$0xf] }
  0x49   : > { %293 = vst [vmem:[%s2145_s28 + $0x4c] sm:$0xf] %v292_v25  ;;  %v336_v47 = vld [vmem:[%s2140_s27 + $0x148] sm:$0xf]  ;;  %v338_v48 = vld [vmem:[%s2140_s27 + $0x150] sm:$0xf] }
  0x4a   : > { %295 = vst [vmem:[%s2145_s28 + $0x50] sm:$0xf] %v294_v26  ;;  %v340_v49 = vld [vmem:[%s2140_s27 + $0x158] sm:$0xf]  ;;  %v342_v50 = vld [vmem:[%s2140_s27 + $0x160] sm:$0xf] }
  0x4b   : > { %297 = vst [vmem:[%s2145_s28 + $0x54] sm:$0xf] %v296_v27  ;;  %v344_v51 = vld [vmem:[%s2140_s27 + $0x168] sm:$0xf]  ;;  %v346_v52 = vld [vmem:[%s2140_s27 + $0x170] sm:$0xf] }
  0x4c   : > { %299 = vst [vmem:[%s2145_s28 + $0x58] sm:$0xf] %v298_v28  ;;  %v348_v53 = vld [vmem:[%s2140_s27 + $0x178] sm:$0xf]  ;;  %v350_v54 = vld [vmem:[%s2140_s27 + $0x180] sm:$0xf] }
  0x4d   : > { %301 = vst [vmem:[%s2145_s28 + $0x5c] sm:$0xf] %v300_v29  ;;  %v352_v55 = vld [vmem:[%s2140_s27 + $0x188] sm:$0xf]  ;;  %v354_v56 = vld [vmem:[%s2140_s27 + $0x190] sm:$0xf] }
  0x4e   : > { %303 = vst [vmem:[%s2145_s28 + $0x60] sm:$0xf] %v302_v30  ;;  %v356_v57 = vld [vmem:[%s2140_s27 + $0x198] sm:$0xf]  ;;  %v358_v58 = vld [vmem:[%s2140_s27 + $0x1a0] sm:$0xf] }
  0x4f   : > { %305 = vst [vmem:[%s2145_s28 + $0x64] sm:$0xf] %v304_v31  ;;  %v360_v59 = vld [vmem:[%s2140_s27 + $0x1a8] sm:$0xf]  ;;  %v362_v60 = vld [vmem:[%s2140_s27 + $0x1b0] sm:$0xf] }
  0x50   : > { %307 = vst [vmem:[%s2145_s28 + $0x68] sm:$0xf] %v306_v32  ;;  %v364_v61 = vld [vmem:[%s2140_s27 + $0x1b8] sm:$0xf]  ;;  %v366_v62 = vld [vmem:[%s2140_s27 + $0x1c0] sm:$0xf] }
  0x51   : > { %309 = vst [vmem:[%s2145_s28 + $0x6c] sm:$0xf] %v308_v33  ;;  %v368_v63 = vld [vmem:[%s2140_s27 + $0x1c8] sm:$0xf]  ;;  %v370_v0 = vld [vmem:[%s2140_s27 + $0x1d0] sm:$0xf] }
  0x52   : > { %311 = vst [vmem:[%s2145_s28 + $0x70] sm:$0xf] %v310_v34  ;;  %v372_v1 = vld [vmem:[%s2140_s27 + $0x1d8] sm:$0xf]  ;;  %v374_v2 = vld [vmem:[%s2140_s27 + $0x1e0] sm:$0xf] }
  0x53   : > { %313 = vst [vmem:[%s2145_s28 + $0x74] sm:$0xf] %v312_v35  ;;  %v376_v3 = vld [vmem:[%s2140_s27 + $0x1e8] sm:$0xf]  ;;  %v378_v4 = vld [vmem:[%s2140_s27 + $0x1f0] sm:$0xf] }
  0x54   : > { %315 = vst [vmem:[%s2145_s28 + $0x78] sm:$0xf] %v314_v36  ;;  %v380_v5 = vld [vmem:[%s2140_s27 + $0x1f8] sm:$0xf]  ;;  %v382_v6 = vld [vmem:[%s2140_s27 + $0x200] sm:$0xf] }
  0x55   : > { %317 = vst [vmem:[%s2145_s28 + $0x7c] sm:$0xf] %v316_v37  ;;  %v384_v7 = vld [vmem:[%s2140_s27 + $0x208] sm:$0xf]  ;;  %v386_v8 = vld [vmem:[%s2140_s27 + $0x210] sm:$0xf] }
  0x56   : > { %319 = vst [vmem:[%s2145_s28 + $0x80] sm:$0xf] %v318_v38  ;;  %v388_v9 = vld [vmem:[%s2140_s27 + $0x218] sm:$0xf]  ;;  %v390_v10 = vld [vmem:[%s2140_s27 + $0x220] sm:$0xf] }
  0x57   : > { %321 = vst [vmem:[%s2145_s28 + $0x84] sm:$0xf] %v320_v39  ;;  %v392_v11 = vld [vmem:[%s2140_s27 + $0x228] sm:$0xf]  ;;  %v394_v12 = vld [vmem:[%s2140_s27 + $0x230] sm:$0xf] }
  0x58   : > { %323 = vst [vmem:[%s2145_s28 + $0x88] sm:$0xf] %v322_v40  ;;  %v396_v13 = vld [vmem:[%s2140_s27 + $0x238] sm:$0xf]  ;;  %v398_v14 = vld [vmem:[%s2140_s27 + $0x240] sm:$0xf] }
  0x59   : > { %325 = vst [vmem:[%s2145_s28 + $0x8c] sm:$0xf] %v324_v41  ;;  %v400_v15 = vld [vmem:[%s2140_s27 + $0x248] sm:$0xf]  ;;  %v402_v16 = vld [vmem:[%s2140_s27 + $0x250] sm:$0xf] }
  0x5a   : > { %327 = vst [vmem:[%s2145_s28 + $0x90] sm:$0xf] %v326_v42  ;;  %v404_v17 = vld [vmem:[%s2140_s27 + $0x258] sm:$0xf]  ;;  %v406_v18 = vld [vmem:[%s2140_s27 + $0x260] sm:$0xf] }
  0x5b   : > { %329 = vst [vmem:[%s2145_s28 + $0x94] sm:$0xf] %v328_v43  ;;  %v408_v19 = vld [vmem:[%s2140_s27 + $0x268] sm:$0xf]  ;;  %v410_v20 = vld [vmem:[%s2140_s27 + $0x270] sm:$0xf] }
  0x5c   : > { %331 = vst [vmem:[%s2145_s28 + $0x98] sm:$0xf] %v330_v44  ;;  %v412_v21 = vld [vmem:[%s2140_s27 + $0x278] sm:$0xf]  ;;  %v414_v22 = vld [vmem:[%s2140_s27 + $0x280] sm:$0xf] }
  0x5d   : > { %333 = vst [vmem:[%s2145_s28 + $0x9c] sm:$0xf] %v332_v45  ;;  %v416_v23 = vld [vmem:[%s2140_s27 + $0x288] sm:$0xf]  ;;  %v418_v24 = vld [vmem:[%s2140_s27 + $0x290] sm:$0xf] }
  0x5e   : > { %335 = vst [vmem:[%s2145_s28 + $0xa0] sm:$0xf] %v334_v46  ;;  %v420_v25 = vld [vmem:[%s2140_s27 + $0x298] sm:$0xf]  ;;  %v422_v26 = vld [vmem:[%s2140_s27 + $0x2a0] sm:$0xf] }
  0x5f   : > { %337 = vst [vmem:[%s2145_s28 + $0xa4] sm:$0xf] %v336_v47  ;;  %v424_v27 = vld [vmem:[%s2140_s27 + $0x2a8] sm:$0xf]  ;;  %v426_v28 = vld [vmem:[%s2140_s27 + $0x2b0] sm:$0xf] }
  0x60   : > { %339 = vst [vmem:[%s2145_s28 + $0xa8] sm:$0xf] %v338_v48  ;;  %v428_v29 = vld [vmem:[%s2140_s27 + $0x2b8] sm:$0xf]  ;;  %v430_v30 = vld [vmem:[%s2140_s27 + $0x2c0] sm:$0xf] }
  0x61   : > { %341 = vst [vmem:[%s2145_s28 + $0xac] sm:$0xf] %v340_v49  ;;  %v432_v31 = vld [vmem:[%s2140_s27 + $0x2c8] sm:$0xf]  ;;  %v434_v32 = vld [vmem:[%s2140_s27 + $0x2d0] sm:$0xf] }
  0x62   : > { %343 = vst [vmem:[%s2145_s28 + $0xb0] sm:$0xf] %v342_v50  ;;  %v436_v33 = vld [vmem:[%s2140_s27 + $0x2d8] sm:$0xf]  ;;  %v438_v34 = vld [vmem:[%s2140_s27 + $0x2e0] sm:$0xf] }
  0x63   : > { %345 = vst [vmem:[%s2145_s28 + $0xb4] sm:$0xf] %v344_v51  ;;  %v440_v35 = vld [vmem:[%s2140_s27 + $0x2e8] sm:$0xf]  ;;  %v442_v36 = vld [vmem:[%s2140_s27 + $0x2f0] sm:$0xf] }
  0x64   : > { %347 = vst [vmem:[%s2145_s28 + $0xb8] sm:$0xf] %v346_v52  ;;  %v444_v37 = vld [vmem:[%s2140_s27 + $0x2f8] sm:$0xf] }
  0x65   : > { %349 = vst [vmem:[%s2145_s28 + $0xbc] sm:$0xf] %v348_v53 }
  0x66   : > { %351 = vst [vmem:[%s2145_s28 + $0xc0] sm:$0xf] %v350_v54 }
  0x67   : > { %353 = vst [vmem:[%s2145_s28 + $0xc4] sm:$0xf] %v352_v55 }
  0x68   : > { %355 = vst [vmem:[%s2145_s28 + $0xc8] sm:$0xf] %v354_v56 }
  0x69   : > { %357 = vst [vmem:[%s2145_s28 + $0xcc] sm:$0xf] %v356_v57 }
  0x6a   : > { %359 = vst [vmem:[%s2145_s28 + $0xd0] sm:$0xf] %v358_v58 }
  0x6b   : > { %361 = vst [vmem:[%s2145_s28 + $0xd4] sm:$0xf] %v360_v59 }
  0x6c   : > { %363 = vst [vmem:[%s2145_s28 + $0xd8] sm:$0xf] %v362_v60 }
  0x6d   : > { %365 = vst [vmem:[%s2145_s28 + $0xdc] sm:$0xf] %v364_v61 }
  0x6e   : > { %367 = vst [vmem:[%s2145_s28 + $0xe0] sm:$0xf] %v366_v62 }
  0x6f   : > { %369 = vst [vmem:[%s2145_s28 + $0xe4] sm:$0xf] %v368_v63 }
  0x70   : > { %371 = vst [vmem:[%s2145_s28 + $0xe8] sm:$0xf] %v370_v0 }
  0x71   : > { %373 = vst [vmem:[%s2145_s28 + $0xec] sm:$0xf] %v372_v1 }
  0x72   : > { %375 = vst [vmem:[%s2145_s28 + $0xf0] sm:$0xf] %v374_v2 }
  0x73   : > { %377 = vst [vmem:[%s2145_s28 + $0xf4] sm:$0xf] %v376_v3 }
  0x74   : > { %379 = vst [vmem:[%s2145_s28 + $0xf8] sm:$0xf] %v378_v4 }
  0x75   : > { %381 = vst [vmem:[%s2145_s28 + $0xfc] sm:$0xf] %v380_v5 }
  0x76   : > { %383 = vst [vmem:[%s2145_s28 + $0x100] sm:$0xf] %v382_v6 }
  0x77   : > { %385 = vst [vmem:[%s2145_s28 + $0x104] sm:$0xf] %v384_v7 }
  0x78   : > { %387 = vst [vmem:[%s2145_s28 + $0x108] sm:$0xf] %v386_v8 }
  0x79   : > { %389 = vst [vmem:[%s2145_s28 + $0x10c] sm:$0xf] %v388_v9 }
  0x7a   : > { %391 = vst [vmem:[%s2145_s28 + $0x110] sm:$0xf] %v390_v10 }
  0x7b   : > { %393 = vst [vmem:[%s2145_s28 + $0x114] sm:$0xf] %v392_v11 }
  0x7c   : > { %395 = vst [vmem:[%s2145_s28 + $0x118] sm:$0xf] %v394_v12 }
  0x7d   : > { %397 = vst [vmem:[%s2145_s28 + $0x11c] sm:$0xf] %v396_v13 }
  0x7e   : > { %399 = vst [vmem:[%s2145_s28 + $0x120] sm:$0xf] %v398_v14 }
  0x7f   : > { %401 = vst [vmem:[%s2145_s28 + $0x124] sm:$0xf] %v400_v15 }
  0x80   : > { %403 = vst [vmem:[%s2145_s28 + $0x128] sm:$0xf] %v402_v16 }
  0x81   : > { %405 = vst [vmem:[%s2145_s28 + $0x12c] sm:$0xf] %v404_v17 }
  0x82   : > { %407 = vst [vmem:[%s2145_s28 + $0x130] sm:$0xf] %v406_v18 }
  0x83   : > { %409 = vst [vmem:[%s2145_s28 + $0x134] sm:$0xf] %v408_v19 }
  0x84   : > { %411 = vst [vmem:[%s2145_s28 + $0x138] sm:$0xf] %v410_v20 }
  0x85   : > { %413 = vst [vmem:[%s2145_s28 + $0x13c] sm:$0xf] %v412_v21 }
  0x86   : > { %415 = vst [vmem:[%s2145_s28 + $0x140] sm:$0xf] %v414_v22 }
  0x87   : > { %417 = vst [vmem:[%s2145_s28 + $0x144] sm:$0xf] %v416_v23 }
  0x88   : > { %419 = vst [vmem:[%s2145_s28 + $0x148] sm:$0xf] %v418_v24 }
  0x89   : > { %421 = vst [vmem:[%s2145_s28 + $0x14c] sm:$0xf] %v420_v25 }
  0x8a   : > { %423 = vst [vmem:[%s2145_s28 + $0x150] sm:$0xf] %v422_v26 }
  0x8b   : > { %425 = vst [vmem:[%s2145_s28 + $0x154] sm:$0xf] %v424_v27 }
  0x8c   : > { %427 = vst [vmem:[%s2145_s28 + $0x158] sm:$0xf] %v426_v28 }
  0x8d   : > { %429 = vst [vmem:[%s2145_s28 + $0x15c] sm:$0xf] %v428_v29 }
  0x8e   : > { %431 = vst [vmem:[%s2145_s28 + $0x160] sm:$0xf] %v430_v30 }
  0x8f   : > { %433 = vst [vmem:[%s2145_s28 + $0x164] sm:$0xf] %v432_v31 }
  0x90   : > { %435 = vst [vmem:[%s2145_s28 + $0x168] sm:$0xf] %v434_v32 }
  0x91   : > { %437 = vst [vmem:[%s2145_s28 + $0x16c] sm:$0xf] %v436_v33 }
  0x92   : > { %439 = vst [vmem:[%s2145_s28 + $0x170] sm:$0xf] %v438_v34 }
  0x93   : > { %441 = vst [vmem:[%s2145_s28 + $0x174] sm:$0xf] %v440_v35 }
  0x94   : > { %443 = vst [vmem:[%s2145_s28 + $0x178] sm:$0xf] %v442_v36 }
  0x95   : > { %445 = vst [vmem:[%s2145_s28 + $0x17c] sm:$0xf] %v444_v37 }
  0x96 PF: > { %667 = sbr.rel (!%p2116_p11) target bundleno = 156 (0x9c), region = 88  ;;  %s669_s0 = sand.u32 (%p2116_p11), 1, %s1952_s16  }
  0x97   : > { %s1517_s10 = sshll.u32 (%p2116_p11), %s1984_s24, 2  ;;  %s1516_s26 = sshll.u32 (%p2116_p11), %s669_s0, 3 }
  0x98   : > { %s676_s6 = scalar_lea.vmem (%p2116_p11), %s2480_s3, %s1517_s10  ;;  %s671_s8 = scalar_lea.vmem (%p2116_p11), [#allocation5], %s1516_s26 }
  0x99   : > { %v693_v38 = vld [vmem:[%s676_s6] sm:$0xf] (%p2116_p11)  ;;  %v695_v39 = vld [vmem:[%s676_s6 + $0x8] sm:$0xf] (%p2116_p11) }
  0x9a   : > { %694 = vst [vmem:[%s671_s8] sm:$0xf] (%p2116_p11), %v693_v38 }
  0x9b   : > { %696 = vst [vmem:[%s671_s8 + $0x4] sm:$0xf] %v695_v39 }
  0x9c PF: > { %p1518_p1 = scmp.ge.s32.totalorder %s1988_s25, 1  ;;  %p723_p2 = scmp.lt.s32.totalorder %s1988_s25, 7 }
  0x9e   : > { %p724_p3 = pnand %p1518_p1, %p723_p2 }
  0x9f   : > { %s730_s27 = sand.u32 (!%p724_p3), 1, %s1964_s19   ;;  %s737_s14 = sand.u32 (!%p724_p3), 1, %s1956_s17  }
  0xa0   : > { %727 = sbr.rel (%p724_p3) target bundleno = 406 (0x196), region = 129  ;;  %s744_s11 = sand.u32 (!%p724_p3), 1, %s1948_s15  }
  0xa1   : > { %s1810_s9 = smul.u32 (!%p724_p3), 48, %s730_s27  ;;  %s2348_s0 = sshll.u32 (!%p724_p3), %s744_s11, 3 }
  0xa2   : > { %s1811_s28 = smul.u32 (!%p724_p3), 384, %s737_s14  ;;  %p782_p4 = scmp.lt.s32.totalorder (!%p724_p3), %s1976_s22, 1 }
  0xa3   : > { %s2358_s6 = scalar_lea.vmem (!%p724_p3), [#allocation3], %s1810_s9  ;;  %s746_s17 = scalar_lea.vmem (!%p724_p3), [#allocation5], %s2348_s0 }
  0xa4   : > { %s2360_s8 = scalar_lea.vmem (!%p724_p3), [#allocation4], %s1811_s28  ;;  %s2364_s19 = scalar_lea.vmem (!%p724_p3), [#allocation6], %s2348_s0 }
  0xa5   : > { %s2352_s10 = scalar_select %p782_p4, %s1976_s22, 1 }
  0xa6   : > { %p1521_p5 = scmp.ne.s32.totalorder %s1972_s21, 0 }
  0xa7   : > { %s784_s30 = scalar_lea.vmem %s2479_s2, %s2352_s10 }
  0xa8   : > { %790 = sbr.rel (%p1521_p5) target bundleno = 176 (0xb0), region = 145 }
  0xad   : > { %v1990_v40 = vmov 0.0  }
  0xae   : > { %791 = vst [vmem:[#allocation2] sm:$0xff] %v1990_v40 }
  0xaf   : > { %792 = vst [vmem:[#allocation2 + $0x8] sm:$0xff] %v1990_v40 }
  0xb0 PF: > { %v1758_v41 = vld [vmem:[%s2360_s8 + $0x38] sm:$0xff]  ;;  %v1757_v45 = vld [vmem:[%s2360_s8 + $0x30] sm:$0xff]  ;;  %v1756_v49 = vld [vmem:[%s2360_s8 + $0x28] sm:$0xff]  ;;  %p1738_p6 = scmp.ne.s32.totalorder %s1972_s21, 2 }
  0xb1   : > { %v1766_v42 = vld [vmem:[%s2360_s8 + $0x78] sm:$0xff]  ;;  %1215 = vmatpush.bf16.msra.mxu0 %v1758_v41  ;;  %v1765_v46 = vld [vmem:[%s2360_s8 + $0x70] sm:$0xff]  ;;  %v1764_v50 = vld [vmem:[%s2360_s8 + $0x68] sm:$0xff] }
  0xb2   : > { %v1774_v43 = vld [vmem:[%s2360_s8 + $0xb8] sm:$0xff]  ;;  %1229 = vmatpush.bf16.msra.mxu1 %v1766_v42  ;;  %v1773_v47 = vld [vmem:[%s2360_s8 + $0xb0] sm:$0xff]  ;;  %v1772_v51 = vld [vmem:[%s2360_s8 + $0xa8] sm:$0xff] }
  0xb3   : > { %v1782_v44 = vld [vmem:[%s2360_s8 + $0xf8] sm:$0xff]  ;;  %1243 = vmatpush.bf16.msra.mxu2 %v1774_v43  ;;  %v1781_v48 = vld [vmem:[%s2360_s8 + $0xf0] sm:$0xff]  ;;  %v1780_v52 = vld [vmem:[%s2360_s8 + $0xe8] sm:$0xff] }
  0xb4   : > { %1257 = vmatpush.bf16.msra.mxu3 %v1782_v44  ;;  %v1755_v53 = vld [vmem:[%s2360_s8 + $0x20] sm:$0xff]  ;;  %v1754_v57 = vld [vmem:[%s2360_s8 + $0x18] sm:$0xff]  ;;  %v1753_v61 = vld [vmem:[%s2360_s8 + $0x10] sm:$0xff] }
  0xb5   : > { %1216 = vmatpush.bf16.msra.mxu0 %v1757_v45  ;;  %v1763_v54 = vld [vmem:[%s2360_s8 + $0x60] sm:$0xff]  ;;  %v1762_v58 = vld [vmem:[%s2360_s8 + $0x58] sm:$0xff]  ;;  %v1761_v62 = vld [vmem:[%s2360_s8 + $0x50] sm:$0xff] }
  0xb6   : > { %1230 = vmatpush.bf16.msra.mxu1 %v1765_v46  ;;  %v1771_v55 = vld [vmem:[%s2360_s8 + $0xa0] sm:$0xff]  ;;  %v1770_v59 = vld [vmem:[%s2360_s8 + $0x98] sm:$0xff]  ;;  %v1769_v63 = vld [vmem:[%s2360_s8 + $0x90] sm:$0xff] }
  0xb7   : > { %1244 = vmatpush.bf16.msra.mxu2 %v1773_v47  ;;  %v1779_v56 = vld [vmem:[%s2360_s8 + $0xe0] sm:$0xff]  ;;  %v1778_v60 = vld [vmem:[%s2360_s8 + $0xd8] sm:$0xff]  ;;  %v1777_v0 = vld [vmem:[%s2360_s8 + $0xd0] sm:$0xff] }
  0xb8   : > { %1258 = vmatpush.bf16.msra.mxu3 %v1781_v48  ;;  %v1752_v1 = vld [vmem:[%s2360_s8 + $0x8] sm:$0xff]  ;;  %v1751_v5 = vld [vmem:[%s2360_s8] sm:$0xff]  ;;  %v1790_v8 = vld [vmem:[%s2360_s8 + $0x138] sm:$0xff] }
  0xb9   : > { %1217 = vmatpush.bf16.msra.mxu0 %v1756_v49  ;;  %v1760_v2 = vld [vmem:[%s2360_s8 + $0x48] sm:$0xff]  ;;  %v1759_v6 = vld [vmem:[%s2360_s8 + $0x40] sm:$0xff]  ;;  %v1798_v13 = vld [vmem:[%s2360_s8 + $0x178] sm:$0xff] }
  0xba   : > { %1231 = vmatpush.bf16.msra.mxu1 %v1764_v50  ;;  %v1768_v3 = vld [vmem:[%s2360_s8 + $0x88] sm:$0xff]  ;;  %v1767_v7 = vld [vmem:[%s2360_s8 + $0x80] sm:$0xff]  ;;  %v1789_v22 = vld [vmem:[%s2360_s8 + $0x130] sm:$0xff] }
  0xbb   : > { %1245 = vmatpush.bf16.msra.mxu2 %v1772_v51  ;;  %v1776_v4 = vld [vmem:[%s2360_s8 + $0xc8] sm:$0xff]  ;;  %v1524_v9 = vld [vmem:[%s2358_s6] sm:$0xf]  ;;  %v1745_v11 = vld [vmem:[%s2358_s6 + $0x4] sm:$0xf] }
  0xbc   : > { %1259 = vmatpush.bf16.msra.mxu3 %v1780_v52  ;;  %v1748_v10 = vld [vmem:[%s2358_s6 + $0x14] sm:$0xf0]  ;;  %v1526_v12 = vld [vmem:[%s2358_s6 + $0x18] sm:$0xf0]  ;;  %v1532_v14 = vld [vmem:[%s2358_s6 + $0x8] sm:$0xf] }
  0xbd   : > { %1218 = vmatpush.bf16.msra.mxu0 %v1755_v53  ;;  %v1749_v15 = vld [vmem:[%s2358_s6 + $0x1c] sm:$0xf0]  ;;  %v1746_v17 = vld [vmem:[%s2358_s6 + $0xc] sm:$0xf]  ;;  %v1534_v18 = vld [vmem:[%s2358_s6 + $0x20] sm:$0xf0]  ;;  %v1525_v19 = vor.u32 %v1748_v10, %v1524_v9  ;;  %v1529_v20 = vor.u32 %v1745_v11, %v1526_v12 }
  0xbe   : > { %1232 = vmatpush.bf16.msra.mxu1 %v1763_v54  ;;  %v1775_v16 = vld [vmem:[%s2360_s8 + $0xc0] sm:$0xff]  ;;  %v1533_v21 = vor.u32 %v1749_v15, %v1532_v14  ;;  %v1537_v23 = vor.u32 %v1746_v17, %v1534_v18  ;;  %v1797_v24 = vld [vmem:[%s2360_s8 + $0x170] sm:$0xff]  ;;  %v1788_v25 = vld [vmem:[%s2360_s8 + $0x128] sm:$0xff] }
  0xbf   : > { %1246 = vmatpush.bf16.msra.mxu2 %v1771_v55  ;;  %v1796_v26 = vld [vmem:[%s2360_s8 + $0x168] sm:$0xff]  ;;  %v1787_v27 = vld [vmem:[%s2360_s8 + $0x120] sm:$0xff]  ;;  %v1786_v29 = vld [vmem:[%s2360_s8 + $0x118] sm:$0xff] }
  0xc0   : > { %1260 = vmatpush.bf16.msra.mxu3 %v1779_v56  ;;  %v1795_v28 = vld [vmem:[%s2360_s8 + $0x160] sm:$0xff]  ;;  %v1794_v30 = vld [vmem:[%s2360_s8 + $0x158] sm:$0xff]  ;;  %v1785_v31 = vld [vmem:[%s2360_s8 + $0x110] sm:$0xff] }
  0xc1   : > { %1219 = vmatpush.bf16.msra.mxu0 %v1754_v57  ;;  %v1793_v32 = vld [vmem:[%s2360_s8 + $0x150] sm:$0xff]  ;;  %v1784_v33 = vld [vmem:[%s2360_s8 + $0x108] sm:$0xff]  ;;  %v1783_v35 = vld [vmem:[%s2360_s8 + $0x100] sm:$0xff] }
  0xc2   : > { %1233 = vmatpush.bf16.msra.mxu1 %v1762_v58  ;;  %v1792_v34 = vld [vmem:[%s2360_s8 + $0x148] sm:$0xff]  ;;  %v1540_v36 = vld [vmem:[%s2358_s6 + $0x10] sm:$0xf]  ;;  %v1747_v39 = vld [vmem:[%s2358_s6 + $0x14] sm:$0xf] }
  0xc3   : > { %1247 = vmatpush.bf16.msra.mxu2 %v1770_v59  ;;  %v1750_v37 = vld [vmem:[%s2358_s6 + $0x24] sm:$0xf0]  ;;  %v1791_v38 = vld [vmem:[%s2360_s8 + $0x140] sm:$0xff]  ;;  %v1542_v40 = vld [vmem:[%s2358_s6 + $0x28] sm:$0xf0] }
  0xc4   : > { %1261 = vmatpush.bf16.msra.mxu3 %v1778_v60  ;;  %v1541_v41 = vor.u32 %v1750_v37, %v1540_v36  ;;  %v1545_v42 = vor.u32 %v1747_v39, %v1542_v40  ;;  %v793_v57 = vld [vmem:[#allocation2] sm:$0xff] }
  0xc5   : > { %1220 = vmatpush.bf16.msra.mxu0 %v1753_v61 }
  0xc6   : > { %1234 = vmatpush.bf16.msra.mxu1 %v1761_v62 }
  0xc7   : > { %1248 = vmatpush.bf16.msra.mxu2 %v1769_v63 }
  0xc8   : > { %1262 = vmatpush.bf16.msra.mxu3 %v1777_v0 }
  0xc9   : > { %1221 = vmatpush.bf16.msra.mxu0 %v1752_v1  ;;  %v794_v1 = vld [vmem:[#allocation2 + $0x8] sm:$0xff] }
  0xca   : > { %1235 = vmatpush.bf16.msra.mxu1 %v1760_v2 }
  0xcb   : > { %1249 = vmatpush.bf16.msra.mxu2 %v1768_v3 }
  0xcc   : > { %1263 = vmatpush.bf16.msra.mxu3 %v1776_v4 }
  0xcd   : > { %1222 = vmatpush.bf16.msra.mxu0 %v1751_v5 }
  0xce   : > { %1236 = vmatpush.bf16.msra.mxu1 %v1759_v6 }
  0xcf   : > { %1250 = vmatpush.bf16.msra.mxu2 %v1767_v7 }
  0xd0   : > { %1264 = vmatpush.bf16.msra.mxu3 %v1775_v16  ;;  %1223 = vmatmul.bf16.vlgmr.msra.gmra.mxu0 %v1525_v19 }
  0xd1   : > { %1271 = vmatpush.bf16.msrb.mxu0 %v1790_v8  ;;  %1237 = vmatmul.bf16.vlgmr.msra.gmra.mxu1 %v1529_v20 }
  0xd2   : > { %1285 = vmatpush.bf16.msrb.mxu1 %v1798_v13  ;;  %1251 = vmatmul.bf16.vlgmr.msra.gmra.mxu2 %v1533_v21 }
  0xd3   : > { %1265 = vmatmul.bf16.vlgmr.msra.gmra.mxu3 %v1537_v23 }
  0xd5   : > { %1272 = vmatpush.bf16.msrb.mxu0 %v1789_v22 }
  0xd6   : > { %1286 = vmatpush.bf16.msrb.mxu1 %v1797_v24 }
  0xd9   : > { %1273 = vmatpush.bf16.msrb.mxu0 %v1788_v25 }
  0xda   : > { %1287 = vmatpush.bf16.msrb.mxu1 %v1796_v26 }
  0xdd   : > { %1274 = vmatpush.bf16.msrb.mxu0 %v1787_v27 }
  0xde   : > { %1288 = vmatpush.bf16.msrb.mxu1 %v1795_v28 }
  0xe1   : > { %1275 = vmatpush.bf16.msrb.mxu0 %v1786_v29 }
  0xe2   : > { %1289 = vmatpush.bf16.msrb.mxu1 %v1794_v30 }
  0xe5   : > { %1276 = vmatpush.bf16.msrb.mxu0 %v1785_v31 }
  0xe6   : > { %1290 = vmatpush.bf16.msrb.mxu1 %v1793_v32 }
  0xe9   : > { %1277 = vmatpush.bf16.msrb.mxu0 %v1784_v33 }
  0xea   : > { %1291 = vmatpush.bf16.msrb.mxu1 %v1792_v34 }
  0xed   : > { %1278 = vmatpush.bf16.msrb.mxu0 %v1783_v35 }
  0xee   : > { %1292 = vmatpush.bf16.msrb.mxu1 %v1791_v38 }
  0xf0   : > { %1279 = vmatmul.bf16.vlgmr.msrb.gmra.mxu0 %v1541_v41 }
  0xf1   : > { %1293 = vmatmul.bf16.vlgmr.msrb.gmra.mxu1 %v1545_v42 }
 0x14d   : > { %v1224_v43 = vpop.f32.mrf.mxu0 }
 0x14e   : > { %v1238_v44 = vpop.f32.mrf.mxu1 }
 0x14f   : > { %v1239_v46 = vadd.f32 %v1238_v44, %v1224_v43 }
 0x155   : > { %v1252_v45 = vpop.f32.mrf.mxu2  ;;  %v1226_v47 = vpop.f32.mrf.mxu0 }
 0x156   : > { %v1240_v48 = vpop.f32.mrf.mxu1  ;;  %v1266_v49 = vpop.f32.mrf.mxu3  ;;  %v1253_v50 = vadd.f32 %v1252_v45, %v1239_v46 }
 0x157   : > { %v1241_v52 = vadd.f32 %v1240_v48, %v1226_v47 }
 0x158   : > { %v1267_v51 = vadd.f32 %v1266_v49, %v1253_v50 }
 0x15d   : > { %v1254_v53 = vpop.f32.mrf.mxu2 }
 0x15e   : > { %v1255_v58 = vadd.f32 %v1254_v53, %v1241_v52  ;;  %v1268_v60 = vpop.f32.mrf.mxu3 }
 0x160   : > { %v1269_v62 = vadd.f32 %v1268_v60, %v1255_v58 }
 0x16d   : > { %v1280_v54 = vpop.f32.mrf.mxu0 }
 0x16e   : > { %v1281_v55 = vadd.f32 %v1280_v54, %v1267_v51  ;;  %v1294_v56 = vpop.f32.mrf.mxu1 }
 0x170   : > { %v1295_v59 = vadd.f32 %v1294_v56, %v1281_v55 }
 0x172   : > { %v1299_v61 = vadd.f32 %v1295_v59, %v793_v57 }
 0x174   : > { %1301 = vst [vmem:[#allocation2] sm:$0xff] %v1299_v61 }
 0x175   : > { %v1282_v63 = vpop.f32.mrf.mxu0 }
 0x176   : > { %v1283_v0 = vadd.f32 %v1282_v63, %v1269_v62  ;;  %v1296_v2 = vpop.f32.mrf.mxu1 }
 0x178   : > { %v1297_v3 = vadd.f32 %v1296_v2, %v1283_v0  ;;  %1306 = sbr.rel (%p1738_p6) target bundleno = 397 (0x18d), region = 149 }
 0x17a   : > { %v1300_v4 = vadd.f32 %v1297_v3, %v794_v1 }
 0x17c   : > { %1302 = vst [vmem:[#allocation2 + $0x8] sm:$0xff] %v1300_v4 }
 0x17d   : > { %v1307_v5 = vld [vmem:[#allocation2] sm:$0xff]  ;;  %v1800_v8 = vld [vmem:[%s746_s17] sm:$0xff]  }
 0x17e   : > { %v1901_v7 = vld [vmem:[%s784_s30] ss:$0 sm:$0xff]  ;;  %v1801_v9 = vunpack.c.l.bf16 %v1800_v8  ;;  %v1802_v10 = vunpack.c.h.bf16 %v1800_v8 }
 0x17f   : > { %v1313_v11 = vadd.f32 %v1901_v7, %v1307_v5 }
 0x181   : > { %v1319_v13 = vadd.f32 %v1801_v9, %v1313_v11 }
 0x183   : > { %v1308_v6 = vld [vmem:[#allocation2 + $0x8] sm:$0xff]  ;;  %v1321_v15 = vmax.f32 %v1319_v13, 0.0 }
 0x184   : > { %v1314_v12 = vadd.f32 %v1901_v7, %v1308_v6 }
 0x186   : > { %v1320_v14 = vadd.f32 %v1802_v10, %v1314_v12 }
 0x188   : > { %v1322_v16 = vmax.f32 %v1320_v14, 0.0 }
 0x18a   : > { %v1806_v17 = vpack.c.bf16 %v1322_v16, %v1321_v15 }
 0x18c   : > { %1807 = vst [vmem:[%s2364_s19] sm:$0xff] %v1806_v17  }
 0x18d PF: > { %1333 = sbr.rel (!%p2120_p13) target bundleno = 406 (0x196), region = 153  ;;  %s1740_s21 = sshll.u32 (%p2120_p13), %s1976_s22, 2 }
 0x18e   : > { %s1338_s11 = scalar_lea.vmem (%p2120_p13), %s2481_s4, %s1740_s21 }
 0x193   : > { %v1355_v18 = vld [vmem:[%s2364_s19] sm:$0xf]  ;;  %v1357_v19 = vld [vmem:[%s2364_s19 + $0x4] sm:$0xf] }
 0x194   : > { %1356 = vst [vmem:[%s1338_s11] sm:$0xf] %v1355_v18 }
 0x195   : > { %1358 = vst [vmem:[%s1338_s11 + $0x8] sm:$0xf] %v1357_v19 }
 0x196 PF: > { %s14_s25 = sadd.s32 1, %s1988_s25   ;;  %s2492_s29 = sld [smem:[#allocation7_spill]] }
 0x197   : > { %p11_p7 = scmp.ge.s32.totalorder %s14_s25, 8   ;;  %s2493_s28 = sld [smem:[#allocation8_spill]] }
 0x198   : > { %s2494_s15 = smov %s1952_s16  ;;  %s2495_s16 = smov %s2112_s13 }
 0x199   : > { %s2496_s17 = smov %s1960_s18  ;;  %s2497_s18 = smov %s2109_s12 }
 0x19a   : > { %s2498_s19 = smov %s1968_s20  ;;  %s2499_s20 = smov %s2093_s7 }
 0x19b   : > { %s2500_s21 = smov %s1980_s23  ;;  %s2501_s22 = smov %s1984_s24 }
 0x19c   : > { %s2502_s23 = smov %s2492_s29  ;;  %13 = sbr.rel (!%p11_p7) target bundleno = 8 (0x8), region = 244 }
 0x19d   : > { %s2503_s24 = smov %s2493_s28 }

// kernel: _lambda_.56
= control target key start
LH: loop header
LB: loop body
LE: loop exit
PB: predicated region body
PF: predicated region fallthrough
CT: control target
= control target key end

     0   :  { %s2316_s0 = inlined_call_operand.vmem [shape: bf16[16,2304], index: 0, kind: input, shape index: {}]   ;;  %s2317_s1 = inlined_call_operand.vmem [shape: bf16[2304,256], index: 1, kind: input, shape index: {}]   ;;  %s2318_s2 = inlined_call_operand.vmem [shape: f32[1,256], index: 2, kind: input, shape index: {}]   ;;  %s2319_s3 = inlined_call_operand.vmem [shape: bf16[16,256], index: 3, kind: output, shape index: {}]  }
   0x1   :  { %2321 = sst [smem:[#allocation7_spill]] %s2316_s0 }
   0x2   :  { %2322 = sst [smem:[#allocation8_spill]] %s2317_s1 }
   0x3   :  { %s1878_s12 = smov 0   ;;  %s1880_s13 = smov 0  }
   0x4   :  { %s1882_s14 = smov 0   ;;  %s1884_s15 = smov 0  }
   0x5   :  { %s1886_s16 = smov 0   ;;  %s1888_s17 = smov 0  }
   0x6   :  { %s1890_s18 = smov 0   ;;  %s1892_s19 = smov 0  }
   0x7   :  { %s1894_s20 = smov 0   ;;  %s1896_s21 = smov 0  }
   0x8   :  { %s1898_s22 = smov 0  }
   0x9 LB: > { %s1383_s23 = sadd.s32 4294967295, %s1855_s22   ;;  %s25_s24 = sadd.s32 1, %s1847_s20  ;;  %s1855_s22 = sphi %s1898_s22, %s13_s22   ;;  %s1851_s21 = sphi %s1896_s21, %s2339_s21   ;;  %s1847_s20 = sphi %s1894_s20, %s2338_s20   ;;  %s1843_s19 = sphi %s1892_s19, %s2337_s19   ;;  %s1839_s18 = sphi %s1890_s18, %s2336_s18   ;;  %s1835_s17 = sphi %s1888_s17, %s2335_s17   ;;  %s1831_s16 = sphi %s1886_s16, %s2334_s16   ;;  %s1827_s15 = sphi %s1884_s15, %s2333_s15   ;;  %s1823_s14 = sphi %s1882_s14, %s2332_s14   ;;  %s1819_s13 = sphi %s1880_s13, %s2331_s13   ;;  %s1815_s12 = sphi %s1878_s12, %s2330_s12  }
   0xa   : > { %p26_p0 = scmp.ge.s32.totalorder %s25_s24, 3  ;;  %s28_s25 = sadd.s32 1, %s1851_s21 }
   0xb   : > { %s41_s26 = sadd.s32 1, %s1835_s17  ;;  %p48_p1 = scmp.ne.s32.totalorder %s1835_s17, %s1831_s16 }
   0xc   : > { %s2341_s24 = smov (%p26_p0, %s25_s24), 0  ;;  %s2343_s25 = smov (!%p26_p0, %s28_s25), %s1851_s21 }
   0xd   : > { %s37_s27 = ssub.s32 %s1847_s20, %s2341_s24  ;;  %p49_p2 = scmp.eq.s32.totalorder %s1855_s22, 0 }
   0xe   : > { %p30_p3 = scmp.ge.s32.totalorder %s2343_s25, 2  ;;  %p39_p4 = scmp.eq.s32.totalorder %s37_s27, 0 }
   0xf   : > { %p1945_p5 = por %p49_p2, %p48_p1  ;;  %s69_s29 = sadd.s32 1, %s1827_s15 }
  0x10   : > { %s2345_s25 = smov (%p30_p3, %s2343_s25), 0  ;;  %p76_p6 = scmp.ne.s32.totalorder %s1827_s15, %s1823_s14 }
  0x11   : > { %2324 = sst [smem:[#allocation6_spill]] %s2345_s25  ;;  %s65_s4 = ssub.s32 %s1851_s21, %s2345_s25 }
  0x12   : > { %s1953_s30 = scalar_select %p39_p4, %s1835_s17, %s41_s26  }
  0x13   : > { %s66_s5 = sor.u32 %s65_s4, %s37_s27  ;;  %p121_p7 = scmp.eq.s32.totalorder %s65_s4, 0 }
  0x14   : > { %p67_p8 = scmp.eq.s32.totalorder %s66_s5, 0  ;;  %p1959_p9 = por %p76_p6, %p49_p2 }
  0x15   : > { %s123_s7 = sadd.s32 1, %s1819_s13  ;;  %p133_p10 = scmp.ne.s32.totalorder %s1819_s13, %s1815_s12 }
  0x16   : > { %s1967_s8 = scalar_select %p67_p8, %s1827_s15, %s69_s29  }
  0x17   : > { %s1970_s9 = scalar_select %p121_p7, %s1819_s13, %s123_s7  }
  0x18   : > { %p134_p11 = scmp.eq.s32.totalorder %s1383_s23, 5  ;;  %p1386_p13 = scmp.ge.s32.totalorder %s1855_s22, 6 }
  0x1a   : > { %p1972_p12 = por %p134_p11, %p133_p10  ;;  %156 = sbr.rel (%p1386_p13) target bundleno = 151 (0x97), region = 16 }
  0x1f   : > { %159 = sbr.rel (!%p1945_p5) target bundleno = 46 (0x2e), region = 20  ;;  %s161_s11 = sand.u32 (%p1945_p5), 1, %s1835_s17  }
  0x20   : > { %s1614_s26 = smul.u32 (%p1945_p5), 24, %s1847_s20  ;;  %s2327_s0 = sld [smem:[#allocation7_spill]] (%p1945_p5) }
  0x21   : > { %s1675_s27 = smul.u32 (%p1945_p5), 48, %s161_s11 }
  0x23   : > { %s163_s23 = scalar_lea.vmem (%p1945_p5), [#allocation3], %s1675_s27 }
  0x26   : > { %s169_s5 = scalar_lea.vmem %s2327_s0, %s1614_s26 }
  0x27   : > { %v182_v0 = vld [vmem:[%s169_s5] sm:$0xff]  ;;  %v184_v1 = vld [vmem:[%s169_s5 + $0x8] sm:$0xff]  ;;  %v186_v2 = vld [vmem:[%s169_s5 + $0x10] sm:$0xff] }
  0x28   : > { %183 = vst [vmem:[%s163_s23] sm:$0xff] %v182_v0  ;;  %v188_v3 = vld [vmem:[%s169_s5 + $0x48] sm:$0xff]  ;;  %v190_v4 = vld [vmem:[%s169_s5 + $0x50] sm:$0xff]  ;;  %v192_v5 = vld [vmem:[%s169_s5 + $0x58] sm:$0xff] }
  0x29   : > { %185 = vst [vmem:[%s163_s23 + $0x8] sm:$0xff] %v184_v1 }
  0x2a   : > { %187 = vst [vmem:[%s163_s23 + $0x10] sm:$0xff] %v186_v2 }
  0x2b   : > { %189 = vst [vmem:[%s163_s23 + $0x18] sm:$0xff] %v188_v3 }
  0x2c   : > { %191 = vst [vmem:[%s163_s23 + $0x20] sm:$0xff] %v190_v4 }
  0x2d   : > { %193 = vst [vmem:[%s163_s23 + $0x28] sm:$0xff] %v192_v5 }
  0x2e PF: > { %199 = sbr.rel (!%p1959_p9) target bundleno = 151 (0x97), region = 43  ;;  %s201_s28 = sand.u32 (%p1959_p9), 1, %s1827_s15  }
  0x2f   : > { %s1615_s7 = smul.u32 (%p1959_p9), 192, %s1847_s20  ;;  %s2328_s1 = sld [smem:[#allocation8_spill]] (%p1959_p9) }
  0x30   : > { %s1676_s11 = smul.u32 (%p1959_p9), 384, %s201_s28 }
  0x31   : > { %s206_s26 = sadd.s32 (%p1959_p9), %s1851_s21, %s1615_s7 }
  0x32   : > { %s1389_s27 = sshll.u32 (%p1959_p9), %s206_s26, 2  ;;  %s1997_s6 = scalar_lea.vmem (%p1959_p9), [#allocation4], %s1676_s11 }
  0x35   : > { %s1992_s0 = scalar_lea.vmem %s2328_s1, %s1389_s27 }
  0x36   : > { %v225_v6 = vld [vmem:[%s1992_s0] sm:$0xf]  ;;  %v227_v7 = vld [vmem:[%s1992_s0 + $0x8] sm:$0xf]  ;;  %v229_v8 = vld [vmem:[%s1992_s0 + $0x10] sm:$0xf] }
  0x37   : > { %226 = vst [vmem:[%s1997_s6] sm:$0xf] %v225_v6  ;;  %v231_v9 = vld [vmem:[%s1992_s0 + $0x18] sm:$0xf]  ;;  %v233_v10 = vld [vmem:[%s1992_s0 + $0x20] sm:$0xf] }
  0x38   : > { %228 = vst [vmem:[%s1997_s6 + $0x4] sm:$0xf] %v227_v7  ;;  %v235_v11 = vld [vmem:[%s1992_s0 + $0x28] sm:$0xf]  ;;  %v237_v12 = vld [vmem:[%s1992_s0 + $0x30] sm:$0xf] }
  0x39   : > { %230 = vst [vmem:[%s1997_s6 + $0x8] sm:$0xf] %v229_v8  ;;  %v239_v13 = vld [vmem:[%s1992_s0 + $0x38] sm:$0xf]  ;;  %v241_v14 = vld [vmem:[%s1992_s0 + $0x40] sm:$0xf] }
  0x3a   : > { %232 = vst [vmem:[%s1997_s6 + $0xc] sm:$0xf] %v231_v9  ;;  %v243_v15 = vld [vmem:[%s1992_s0 + $0x48] sm:$0xf]  ;;  %v245_v16 = vld [vmem:[%s1992_s0 + $0x50] sm:$0xf] }
  0x3b   : > { %234 = vst [vmem:[%s1997_s6 + $0x10] sm:$0xf] %v233_v10  ;;  %v247_v17 = vld [vmem:[%s1992_s0 + $0x58] sm:$0xf]  ;;  %v249_v18 = vld [vmem:[%s1992_s0 + $0x60] sm:$0xf] }
  0x3c   : > { %236 = vst [vmem:[%s1997_s6 + $0x14] sm:$0xf] %v235_v11  ;;  %v251_v19 = vld [vmem:[%s1992_s0 + $0x68] sm:$0xf]  ;;  %v253_v20 = vld [vmem:[%s1992_s0 + $0x70] sm:$0xf] }
  0x3d   : > { %238 = vst [vmem:[%s1997_s6 + $0x18] sm:$0xf] %v237_v12  ;;  %v255_v21 = vld [vmem:[%s1992_s0 + $0x78] sm:$0xf]  ;;  %v257_v22 = vld [vmem:[%s1992_s0 + $0x80] sm:$0xf] }
  0x3e   : > { %240 = vst [vmem:[%s1997_s6 + $0x1c] sm:$0xf] %v239_v13  ;;  %v259_v23 = vld [vmem:[%s1992_s0 + $0x88] sm:$0xf]  ;;  %v261_v24 = vld [vmem:[%s1992_s0 + $0x90] sm:$0xf] }
  0x3f   : > { %242 = vst [vmem:[%s1997_s6 + $0x20] sm:$0xf] %v241_v14  ;;  %v263_v25 = vld [vmem:[%s1992_s0 + $0x98] sm:$0xf]  ;;  %v265_v26 = vld [vmem:[%s1992_s0 + $0xa0] sm:$0xf] }
  0x40   : > { %244 = vst [vmem:[%s1997_s6 + $0x24] sm:$0xf] %v243_v15  ;;  %v267_v27 = vld [vmem:[%s1992_s0 + $0xa8] sm:$0xf]  ;;  %v269_v28 = vld [vmem:[%s1992_s0 + $0xb0] sm:$0xf] }
  0x41   : > { %246 = vst [vmem:[%s1997_s6 + $0x28] sm:$0xf] %v245_v16  ;;  %v271_v29 = vld [vmem:[%s1992_s0 + $0xb8] sm:$0xf]  ;;  %v273_v30 = vld [vmem:[%s1992_s0 + $0xc0] sm:$0xf] }
  0x42   : > { %248 = vst [vmem:[%s1997_s6 + $0x2c] sm:$0xf] %v247_v17  ;;  %v275_v31 = vld [vmem:[%s1992_s0 + $0xc8] sm:$0xf]  ;;  %v277_v32 = vld [vmem:[%s1992_s0 + $0xd0] sm:$0xf] }
  0x43   : > { %250 = vst [vmem:[%s1997_s6 + $0x30] sm:$0xf] %v249_v18  ;;  %v279_v33 = vld [vmem:[%s1992_s0 + $0xd8] sm:$0xf]  ;;  %v281_v34 = vld [vmem:[%s1992_s0 + $0xe0] sm:$0xf] }
  0x44   : > { %252 = vst [vmem:[%s1997_s6 + $0x34] sm:$0xf] %v251_v19  ;;  %v283_v35 = vld [vmem:[%s1992_s0 + $0xe8] sm:$0xf]  ;;  %v285_v36 = vld [vmem:[%s1992_s0 + $0xf0] sm:$0xf] }
  0x45   : > { %254 = vst [vmem:[%s1997_s6 + $0x38] sm:$0xf] %v253_v20  ;;  %v287_v37 = vld [vmem:[%s1992_s0 + $0xf8] sm:$0xf]  ;;  %v289_v38 = vld [vmem:[%s1992_s0 + $0x100] sm:$0xf] }
  0x46   : > { %256 = vst [vmem:[%s1997_s6 + $0x3c] sm:$0xf] %v255_v21  ;;  %v291_v39 = vld [vmem:[%s1992_s0 + $0x108] sm:$0xf]  ;;  %v293_v40 = vld [vmem:[%s1992_s0 + $0x110] sm:$0xf] }
  0x47   : > { %258 = vst [vmem:[%s1997_s6 + $0x40] sm:$0xf] %v257_v22  ;;  %v295_v41 = vld [vmem:[%s1992_s0 + $0x118] sm:$0xf]  ;;  %v297_v42 = vld [vmem:[%s1992_s0 + $0x120] sm:$0xf] }
  0x48   : > { %260 = vst [vmem:[%s1997_s6 + $0x44] sm:$0xf] %v259_v23  ;;  %v299_v43 = vld [vmem:[%s1992_s0 + $0x128] sm:$0xf]  ;;  %v301_v44 = vld [vmem:[%s1992_s0 + $0x130] sm:$0xf] }
  0x49   : > { %262 = vst [vmem:[%s1997_s6 + $0x48] sm:$0xf] %v261_v24  ;;  %v303_v45 = vld [vmem:[%s1992_s0 + $0x138] sm:$0xf]  ;;  %v305_v46 = vld [vmem:[%s1992_s0 + $0x140] sm:$0xf] }
  0x4a   : > { %264 = vst [vmem:[%s1997_s6 + $0x4c] sm:$0xf] %v263_v25  ;;  %v307_v47 = vld [vmem:[%s1992_s0 + $0x148] sm:$0xf]  ;;  %v309_v48 = vld [vmem:[%s1992_s0 + $0x150] sm:$0xf] }
  0x4b   : > { %266 = vst [vmem:[%s1997_s6 + $0x50] sm:$0xf] %v265_v26  ;;  %v311_v49 = vld [vmem:[%s1992_s0 + $0x158] sm:$0xf]  ;;  %v313_v50 = vld [vmem:[%s1992_s0 + $0x160] sm:$0xf] }
  0x4c   : > { %268 = vst [vmem:[%s1997_s6 + $0x54] sm:$0xf] %v267_v27  ;;  %v315_v51 = vld [vmem:[%s1992_s0 + $0x168] sm:$0xf]  ;;  %v317_v52 = vld [vmem:[%s1992_s0 + $0x170] sm:$0xf] }
  0x4d   : > { %270 = vst [vmem:[%s1997_s6 + $0x58] sm:$0xf] %v269_v28  ;;  %v319_v53 = vld [vmem:[%s1992_s0 + $0x178] sm:$0xf]  ;;  %v321_v54 = vld [vmem:[%s1992_s0 + $0x180] sm:$0xf] }
  0x4e   : > { %272 = vst [vmem:[%s1997_s6 + $0x5c] sm:$0xf] %v271_v29  ;;  %v323_v55 = vld [vmem:[%s1992_s0 + $0x188] sm:$0xf]  ;;  %v325_v56 = vld [vmem:[%s1992_s0 + $0x190] sm:$0xf] }
  0x4f   : > { %274 = vst [vmem:[%s1997_s6 + $0x60] sm:$0xf] %v273_v30  ;;  %v327_v57 = vld [vmem:[%s1992_s0 + $0x198] sm:$0xf]  ;;  %v329_v58 = vld [vmem:[%s1992_s0 + $0x1a0] sm:$0xf] }
  0x50   : > { %276 = vst [vmem:[%s1997_s6 + $0x64] sm:$0xf] %v275_v31  ;;  %v331_v59 = vld [vmem:[%s1992_s0 + $0x1a8] sm:$0xf]  ;;  %v333_v60 = vld [vmem:[%s1992_s0 + $0x1b0] sm:$0xf] }
  0x51   : > { %278 = vst [vmem:[%s1997_s6 + $0x68] sm:$0xf] %v277_v32  ;;  %v335_v61 = vld [vmem:[%s1992_s0 + $0x1b8] sm:$0xf]  ;;  %v337_v62 = vld [vmem:[%s1992_s0 + $0x1c0] sm:$0xf] }
  0x52   : > { %280 = vst [vmem:[%s1997_s6 + $0x6c] sm:$0xf] %v279_v33  ;;  %v339_v63 = vld [vmem:[%s1992_s0 + $0x1c8] sm:$0xf]  ;;  %v341_v0 = vld [vmem:[%s1992_s0 + $0x1d0] sm:$0xf] }
  0x53   : > { %282 = vst [vmem:[%s1997_s6 + $0x70] sm:$0xf] %v281_v34  ;;  %v343_v1 = vld [vmem:[%s1992_s0 + $0x1d8] sm:$0xf]  ;;  %v345_v2 = vld [vmem:[%s1992_s0 + $0x1e0] sm:$0xf] }
  0x54   : > { %284 = vst [vmem:[%s1997_s6 + $0x74] sm:$0xf] %v283_v35  ;;  %v347_v3 = vld [vmem:[%s1992_s0 + $0x1e8] sm:$0xf]  ;;  %v349_v4 = vld [vmem:[%s1992_s0 + $0x1f0] sm:$0xf] }
  0x55   : > { %286 = vst [vmem:[%s1997_s6 + $0x78] sm:$0xf] %v285_v36  ;;  %v351_v5 = vld [vmem:[%s1992_s0 + $0x1f8] sm:$0xf]  ;;  %v353_v6 = vld [vmem:[%s1992_s0 + $0x200] sm:$0xf] }
  0x56   : > { %288 = vst [vmem:[%s1997_s6 + $0x7c] sm:$0xf] %v287_v37  ;;  %v355_v7 = vld [vmem:[%s1992_s0 + $0x208] sm:$0xf]  ;;  %v357_v8 = vld [vmem:[%s1992_s0 + $0x210] sm:$0xf] }
  0x57   : > { %290 = vst [vmem:[%s1997_s6 + $0x80] sm:$0xf] %v289_v38  ;;  %v359_v9 = vld [vmem:[%s1992_s0 + $0x218] sm:$0xf]  ;;  %v361_v10 = vld [vmem:[%s1992_s0 + $0x220] sm:$0xf] }
  0x58   : > { %292 = vst [vmem:[%s1997_s6 + $0x84] sm:$0xf] %v291_v39  ;;  %v363_v11 = vld [vmem:[%s1992_s0 + $0x228] sm:$0xf]  ;;  %v365_v12 = vld [vmem:[%s1992_s0 + $0x230] sm:$0xf] }
  0x59   : > { %294 = vst [vmem:[%s1997_s6 + $0x88] sm:$0xf] %v293_v40  ;;  %v367_v13 = vld [vmem:[%s1992_s0 + $0x238] sm:$0xf]  ;;  %v369_v14 = vld [vmem:[%s1992_s0 + $0x240] sm:$0xf] }
  0x5a   : > { %296 = vst [vmem:[%s1997_s6 + $0x8c] sm:$0xf] %v295_v41  ;;  %v371_v15 = vld [vmem:[%s1992_s0 + $0x248] sm:$0xf]  ;;  %v373_v16 = vld [vmem:[%s1992_s0 + $0x250] sm:$0xf] }
  0x5b   : > { %298 = vst [vmem:[%s1997_s6 + $0x90] sm:$0xf] %v297_v42  ;;  %v375_v17 = vld [vmem:[%s1992_s0 + $0x258] sm:$0xf]  ;;  %v377_v18 = vld [vmem:[%s1992_s0 + $0x260] sm:$0xf] }
  0x5c   : > { %300 = vst [vmem:[%s1997_s6 + $0x94] sm:$0xf] %v299_v43  ;;  %v379_v19 = vld [vmem:[%s1992_s0 + $0x268] sm:$0xf]  ;;  %v381_v20 = vld [vmem:[%s1992_s0 + $0x270] sm:$0xf] }
  0x5d   : > { %302 = vst [vmem:[%s1997_s6 + $0x98] sm:$0xf] %v301_v44  ;;  %v383_v21 = vld [vmem:[%s1992_s0 + $0x278] sm:$0xf]  ;;  %v385_v22 = vld [vmem:[%s1992_s0 + $0x280] sm:$0xf] }
  0x5e   : > { %304 = vst [vmem:[%s1997_s6 + $0x9c] sm:$0xf] %v303_v45  ;;  %v387_v23 = vld [vmem:[%s1992_s0 + $0x288] sm:$0xf]  ;;  %v389_v24 = vld [vmem:[%s1992_s0 + $0x290] sm:$0xf] }
  0x5f   : > { %306 = vst [vmem:[%s1997_s6 + $0xa0] sm:$0xf] %v305_v46  ;;  %v391_v25 = vld [vmem:[%s1992_s0 + $0x298] sm:$0xf]  ;;  %v393_v26 = vld [vmem:[%s1992_s0 + $0x2a0] sm:$0xf] }
  0x60   : > { %308 = vst [vmem:[%s1997_s6 + $0xa4] sm:$0xf] %v307_v47  ;;  %v395_v27 = vld [vmem:[%s1992_s0 + $0x2a8] sm:$0xf]  ;;  %v397_v28 = vld [vmem:[%s1992_s0 + $0x2b0] sm:$0xf] }
  0x61   : > { %310 = vst [vmem:[%s1997_s6 + $0xa8] sm:$0xf] %v309_v48  ;;  %v399_v29 = vld [vmem:[%s1992_s0 + $0x2b8] sm:$0xf]  ;;  %v401_v30 = vld [vmem:[%s1992_s0 + $0x2c0] sm:$0xf] }
  0x62   : > { %312 = vst [vmem:[%s1997_s6 + $0xac] sm:$0xf] %v311_v49  ;;  %v403_v31 = vld [vmem:[%s1992_s0 + $0x2c8] sm:$0xf]  ;;  %v405_v32 = vld [vmem:[%s1992_s0 + $0x2d0] sm:$0xf] }
  0x63   : > { %314 = vst [vmem:[%s1997_s6 + $0xb0] sm:$0xf] %v313_v50  ;;  %v407_v33 = vld [vmem:[%s1992_s0 + $0x2d8] sm:$0xf]  ;;  %v409_v34 = vld [vmem:[%s1992_s0 + $0x2e0] sm:$0xf] }
  0x64   : > { %316 = vst [vmem:[%s1997_s6 + $0xb4] sm:$0xf] %v315_v51  ;;  %v411_v35 = vld [vmem:[%s1992_s0 + $0x2e8] sm:$0xf]  ;;  %v413_v36 = vld [vmem:[%s1992_s0 + $0x2f0] sm:$0xf] }
  0x65   : > { %318 = vst [vmem:[%s1997_s6 + $0xb8] sm:$0xf] %v317_v52  ;;  %v415_v37 = vld [vmem:[%s1992_s0 + $0x2f8] sm:$0xf] }
  0x66   : > { %320 = vst [vmem:[%s1997_s6 + $0xbc] sm:$0xf] %v319_v53 }
  0x67   : > { %322 = vst [vmem:[%s1997_s6 + $0xc0] sm:$0xf] %v321_v54 }
  0x68   : > { %324 = vst [vmem:[%s1997_s6 + $0xc4] sm:$0xf] %v323_v55 }
  0x69   : > { %326 = vst [vmem:[%s1997_s6 + $0xc8] sm:$0xf] %v325_v56 }
  0x6a   : > { %328 = vst [vmem:[%s1997_s6 + $0xcc] sm:$0xf] %v327_v57 }
  0x6b   : > { %330 = vst [vmem:[%s1997_s6 + $0xd0] sm:$0xf] %v329_v58 }
  0x6c   : > { %332 = vst [vmem:[%s1997_s6 + $0xd4] sm:$0xf] %v331_v59 }
  0x6d   : > { %334 = vst [vmem:[%s1997_s6 + $0xd8] sm:$0xf] %v333_v60 }
  0x6e   : > { %336 = vst [vmem:[%s1997_s6 + $0xdc] sm:$0xf] %v335_v61 }
  0x6f   : > { %338 = vst [vmem:[%s1997_s6 + $0xe0] sm:$0xf] %v337_v62 }
  0x70   : > { %340 = vst [vmem:[%s1997_s6 + $0xe4] sm:$0xf] %v339_v63 }
  0x71   : > { %342 = vst [vmem:[%s1997_s6 + $0xe8] sm:$0xf] %v341_v0 }
  0x72   : > { %344 = vst [vmem:[%s1997_s6 + $0xec] sm:$0xf] %v343_v1 }
  0x73   : > { %346 = vst [vmem:[%s1997_s6 + $0xf0] sm:$0xf] %v345_v2 }
  0x74   : > { %348 = vst [vmem:[%s1997_s6 + $0xf4] sm:$0xf] %v347_v3 }
  0x75   : > { %350 = vst [vmem:[%s1997_s6 + $0xf8] sm:$0xf] %v349_v4 }
  0x76   : > { %352 = vst [vmem:[%s1997_s6 + $0xfc] sm:$0xf] %v351_v5 }
  0x77   : > { %354 = vst [vmem:[%s1997_s6 + $0x100] sm:$0xf] %v353_v6 }
  0x78   : > { %356 = vst [vmem:[%s1997_s6 + $0x104] sm:$0xf] %v355_v7 }
  0x79   : > { %358 = vst [vmem:[%s1997_s6 + $0x108] sm:$0xf] %v357_v8 }
  0x7a   : > { %360 = vst [vmem:[%s1997_s6 + $0x10c] sm:$0xf] %v359_v9 }
  0x7b   : > { %362 = vst [vmem:[%s1997_s6 + $0x110] sm:$0xf] %v361_v10 }
  0x7c   : > { %364 = vst [vmem:[%s1997_s6 + $0x114] sm:$0xf] %v363_v11 }
  0x7d   : > { %366 = vst [vmem:[%s1997_s6 + $0x118] sm:$0xf] %v365_v12 }
  0x7e   : > { %368 = vst [vmem:[%s1997_s6 + $0x11c] sm:$0xf] %v367_v13 }
  0x7f   : > { %370 = vst [vmem:[%s1997_s6 + $0x120] sm:$0xf] %v369_v14 }
  0x80   : > { %372 = vst [vmem:[%s1997_s6 + $0x124] sm:$0xf] %v371_v15 }
  0x81   : > { %374 = vst [vmem:[%s1997_s6 + $0x128] sm:$0xf] %v373_v16 }
  0x82   : > { %376 = vst [vmem:[%s1997_s6 + $0x12c] sm:$0xf] %v375_v17 }
  0x83   : > { %378 = vst [vmem:[%s1997_s6 + $0x130] sm:$0xf] %v377_v18 }
  0x84   : > { %380 = vst [vmem:[%s1997_s6 + $0x134] sm:$0xf] %v379_v19 }
  0x85   : > { %382 = vst [vmem:[%s1997_s6 + $0x138] sm:$0xf] %v381_v20 }
  0x86   : > { %384 = vst [vmem:[%s1997_s6 + $0x13c] sm:$0xf] %v383_v21 }
  0x87   : > { %386 = vst [vmem:[%s1997_s6 + $0x140] sm:$0xf] %v385_v22 }
  0x88   : > { %388 = vst [vmem:[%s1997_s6 + $0x144] sm:$0xf] %v387_v23 }
  0x89   : > { %390 = vst [vmem:[%s1997_s6 + $0x148] sm:$0xf] %v389_v24 }
  0x8a   : > { %392 = vst [vmem:[%s1997_s6 + $0x14c] sm:$0xf] %v391_v25 }
  0x8b   : > { %394 = vst [vmem:[%s1997_s6 + $0x150] sm:$0xf] %v393_v26 }
  0x8c   : > { %396 = vst [vmem:[%s1997_s6 + $0x154] sm:$0xf] %v395_v27 }
  0x8d   : > { %398 = vst [vmem:[%s1997_s6 + $0x158] sm:$0xf] %v397_v28 }
  0x8e   : > { %400 = vst [vmem:[%s1997_s6 + $0x15c] sm:$0xf] %v399_v29 }
  0x8f   : > { %402 = vst [vmem:[%s1997_s6 + $0x160] sm:$0xf] %v401_v30 }
  0x90   : > { %404 = vst [vmem:[%s1997_s6 + $0x164] sm:$0xf] %v403_v31 }
  0x91   : > { %406 = vst [vmem:[%s1997_s6 + $0x168] sm:$0xf] %v405_v32 }
  0x92   : > { %408 = vst [vmem:[%s1997_s6 + $0x16c] sm:$0xf] %v407_v33 }
  0x93   : > { %410 = vst [vmem:[%s1997_s6 + $0x170] sm:$0xf] %v409_v34 }
  0x94   : > { %412 = vst [vmem:[%s1997_s6 + $0x174] sm:$0xf] %v411_v35 }
  0x95   : > { %414 = vst [vmem:[%s1997_s6 + $0x178] sm:$0xf] %v413_v36 }
  0x96   : > { %416 = vst [vmem:[%s1997_s6 + $0x17c] sm:$0xf] %v415_v37 }
  0x97 PF: > { %p1390_p0 = scmp.ge.s32.totalorder %s1855_s22, 1  ;;  %p637_p1 = scmp.lt.s32.totalorder %s1855_s22, 7 }
  0x99   : > { %p638_p2 = pnand %p1390_p0, %p637_p1 }
  0x9a   : > { %s644_s5 = sand.u32 (!%p638_p2), 1, %s1831_s16   ;;  %s651_s23 = sand.u32 (!%p638_p2), 1, %s1823_s14  }
  0x9b   : > { %641 = sbr.rel (%p638_p2) target bundleno = 397 (0x18d), region = 88  ;;  %s677_s0 = sand.u32 (!%p638_p2), 1, %s1815_s12  }
  0x9c   : > { %s1677_s28 = smul.u32 (!%p638_p2), 48, %s644_s5  ;;  %s1391_s11 = sshll.u32 (!%p638_p2), %s677_s0, 3 }
  0x9d   : > { %s1678_s7 = smul.u32 (!%p638_p2), 384, %s651_s23  ;;  %p683_p3 = scmp.lt.s32.totalorder (!%p638_p2), %s1843_s19, 1 }
  0x9e   : > { %s2201_s6 = scalar_lea.vmem (!%p638_p2), [#allocation3], %s1677_s28  ;;  %s2205_s25 = scalar_lea.vmem (!%p638_p2), [#allocation5], %s1391_s11 }
  0x9f   : > { %s2203_s1 = scalar_lea.vmem (!%p638_p2), [#allocation4], %s1678_s7  ;;  %p1392_p4 = scmp.ne.s32.totalorder (!%p638_p2), %s1839_s18, 0 }
  0xa0   : > { %s2195_s26 = scalar_select %p683_p3, %s1843_s19, 1 }
  0xa1   : > { %690 = sbr.rel (%p1392_p4) target bundleno = 169 (0xa9), region = 100 }
  0xa2   : > { %s685_s4 = scalar_lea.vmem %s2318_s2, %s2195_s26 }
  0xa6   : > { %v1857_v38 = vmov 0.0  }
  0xa7   : > { %691 = vst [vmem:[#allocation2] sm:$0xff] %v1857_v38 }
  0xa8   : > { %692 = vst [vmem:[#allocation2 + $0x8] sm:$0xff] %v1857_v38 }
  0xa9 PF: > { %v1629_v39 = vld [vmem:[%s2203_s1 + $0x38] sm:$0xff]  ;;  %v1628_v43 = vld [vmem:[%s2203_s1 + $0x30] sm:$0xff]  ;;  %v1627_v47 = vld [vmem:[%s2203_s1 + $0x28] sm:$0xff]  ;;  %p1609_p5 = scmp.ne.s32.totalorder %s1839_s18, 2 }
  0xaa   : > { %v1637_v40 = vld [vmem:[%s2203_s1 + $0x78] sm:$0xff]  ;;  %1115 = vmatpush.bf16.msra.mxu0 %v1629_v39  ;;  %v1636_v44 = vld [vmem:[%s2203_s1 + $0x70] sm:$0xff]  ;;  %v1635_v48 = vld [vmem:[%s2203_s1 + $0x68] sm:$0xff] }
  0xab   : > { %v1645_v41 = vld [vmem:[%s2203_s1 + $0xb8] sm:$0xff]  ;;  %1129 = vmatpush.bf16.msra.mxu1 %v1637_v40  ;;  %v1644_v45 = vld [vmem:[%s2203_s1 + $0xb0] sm:$0xff]  ;;  %v1643_v49 = vld [vmem:[%s2203_s1 + $0xa8] sm:$0xff] }
  0xac   : > { %v1653_v42 = vld [vmem:[%s2203_s1 + $0xf8] sm:$0xff]  ;;  %1143 = vmatpush.bf16.msra.mxu2 %v1645_v41  ;;  %v1652_v46 = vld [vmem:[%s2203_s1 + $0xf0] sm:$0xff]  ;;  %v1651_v50 = vld [vmem:[%s2203_s1 + $0xe8] sm:$0xff] }
  0xad   : > { %1157 = vmatpush.bf16.msra.mxu3 %v1653_v42  ;;  %v1626_v51 = vld [vmem:[%s2203_s1 + $0x20] sm:$0xff]  ;;  %v1625_v55 = vld [vmem:[%s2203_s1 + $0x18] sm:$0xff]  ;;  %v1624_v59 = vld [vmem:[%s2203_s1 + $0x10] sm:$0xff] }
  0xae   : > { %1116 = vmatpush.bf16.msra.mxu0 %v1628_v43  ;;  %v1634_v52 = vld [vmem:[%s2203_s1 + $0x60] sm:$0xff]  ;;  %v1633_v56 = vld [vmem:[%s2203_s1 + $0x58] sm:$0xff]  ;;  %v1632_v60 = vld [vmem:[%s2203_s1 + $0x50] sm:$0xff] }
  0xaf   : > { %1130 = vmatpush.bf16.msra.mxu1 %v1636_v44  ;;  %v1642_v53 = vld [vmem:[%s2203_s1 + $0xa0] sm:$0xff]  ;;  %v1641_v57 = vld [vmem:[%s2203_s1 + $0x98] sm:$0xff]  ;;  %v1640_v61 = vld [vmem:[%s2203_s1 + $0x90] sm:$0xff] }
  0xb0   : > { %1144 = vmatpush.bf16.msra.mxu2 %v1644_v45  ;;  %v1650_v54 = vld [vmem:[%s2203_s1 + $0xe0] sm:$0xff]  ;;  %v1649_v58 = vld [vmem:[%s2203_s1 + $0xd8] sm:$0xff]  ;;  %v1648_v62 = vld [vmem:[%s2203_s1 + $0xd0] sm:$0xff] }
  0xb1   : > { %1158 = vmatpush.bf16.msra.mxu3 %v1652_v46  ;;  %v1623_v63 = vld [vmem:[%s2203_s1 + $0x8] sm:$0xff]  ;;  %v1622_v3 = vld [vmem:[%s2203_s1] sm:$0xff]  ;;  %v1661_v6 = vld [vmem:[%s2203_s1 + $0x138] sm:$0xff] }
  0xb2   : > { %1117 = vmatpush.bf16.msra.mxu0 %v1627_v47  ;;  %v1631_v0 = vld [vmem:[%s2203_s1 + $0x48] sm:$0xff]  ;;  %v1630_v4 = vld [vmem:[%s2203_s1 + $0x40] sm:$0xff]  ;;  %v1669_v11 = vld [vmem:[%s2203_s1 + $0x178] sm:$0xff] }
  0xb3   : > { %1131 = vmatpush.bf16.msra.mxu1 %v1635_v48  ;;  %v1639_v1 = vld [vmem:[%s2203_s1 + $0x88] sm:$0xff]  ;;  %v1638_v5 = vld [vmem:[%s2203_s1 + $0x80] sm:$0xff]  ;;  %v1660_v20 = vld [vmem:[%s2203_s1 + $0x130] sm:$0xff] }
  0xb4   : > { %1145 = vmatpush.bf16.msra.mxu2 %v1643_v49  ;;  %v1647_v2 = vld [vmem:[%s2203_s1 + $0xc8] sm:$0xff]  ;;  %v1395_v7 = vld [vmem:[%s2201_s6] sm:$0xf]  ;;  %v1616_v9 = vld [vmem:[%s2201_s6 + $0x4] sm:$0xf] }
  0xb5   : > { %1159 = vmatpush.bf16.msra.mxu3 %v1651_v50  ;;  %v1619_v8 = vld [vmem:[%s2201_s6 + $0x14] sm:$0xf0]  ;;  %v1397_v10 = vld [vmem:[%s2201_s6 + $0x18] sm:$0xf0]  ;;  %v1403_v12 = vld [vmem:[%s2201_s6 + $0x8] sm:$0xf] }
  0xb6   : > { %1118 = vmatpush.bf16.msra.mxu0 %v1626_v51  ;;  %v1620_v13 = vld [vmem:[%s2201_s6 + $0x1c] sm:$0xf0]  ;;  %v1617_v15 = vld [vmem:[%s2201_s6 + $0xc] sm:$0xf]  ;;  %v1405_v16 = vld [vmem:[%s2201_s6 + $0x20] sm:$0xf0]  ;;  %v1396_v17 = vor.u32 %v1619_v8, %v1395_v7  ;;  %v1400_v18 = vor.u32 %v1616_v9, %v1397_v10 }
  0xb7   : > { %1132 = vmatpush.bf16.msra.mxu1 %v1634_v52  ;;  %v1646_v14 = vld [vmem:[%s2203_s1 + $0xc0] sm:$0xff]  ;;  %v1404_v19 = vor.u32 %v1620_v13, %v1403_v12  ;;  %v1408_v21 = vor.u32 %v1617_v15, %v1405_v16  ;;  %v1668_v22 = vld [vmem:[%s2203_s1 + $0x170] sm:$0xff]  ;;  %v1659_v23 = vld [vmem:[%s2203_s1 + $0x128] sm:$0xff] }
  0xb8   : > { %1146 = vmatpush.bf16.msra.mxu2 %v1642_v53  ;;  %v1667_v24 = vld [vmem:[%s2203_s1 + $0x168] sm:$0xff]  ;;  %v1658_v25 = vld [vmem:[%s2203_s1 + $0x120] sm:$0xff]  ;;  %v1657_v27 = vld [vmem:[%s2203_s1 + $0x118] sm:$0xff] }
  0xb9   : > { %1160 = vmatpush.bf16.msra.mxu3 %v1650_v54  ;;  %v1666_v26 = vld [vmem:[%s2203_s1 + $0x160] sm:$0xff]  ;;  %v1665_v28 = vld [vmem:[%s2203_s1 + $0x158] sm:$0xff]  ;;  %v1656_v29 = vld [vmem:[%s2203_s1 + $0x110] sm:$0xff] }
  0xba   : > { %1119 = vmatpush.bf16.msra.mxu0 %v1625_v55  ;;  %v1664_v30 = vld [vmem:[%s2203_s1 + $0x150] sm:$0xff]  ;;  %v1655_v31 = vld [vmem:[%s2203_s1 + $0x108] sm:$0xff]  ;;  %v1654_v33 = vld [vmem:[%s2203_s1 + $0x100] sm:$0xff] }
  0xbb   : > { %1133 = vmatpush.bf16.msra.mxu1 %v1633_v56  ;;  %v1663_v32 = vld [vmem:[%s2203_s1 + $0x148] sm:$0xff]  ;;  %v1411_v34 = vld [vmem:[%s2201_s6 + $0x10] sm:$0xf]  ;;  %v1618_v37 = vld [vmem:[%s2201_s6 + $0x14] sm:$0xf] }
  0xbc   : > { %1147 = vmatpush.bf16.msra.mxu2 %v1641_v57  ;;  %v1621_v35 = vld [vmem:[%s2201_s6 + $0x24] sm:$0xf0]  ;;  %v1662_v36 = vld [vmem:[%s2203_s1 + $0x140] sm:$0xff]  ;;  %v1413_v38 = vld [vmem:[%s2201_s6 + $0x28] sm:$0xf0] }
  0xbd   : > { %1161 = vmatpush.bf16.msra.mxu3 %v1649_v58  ;;  %v1412_v39 = vor.u32 %v1621_v35, %v1411_v34  ;;  %v1416_v40 = vor.u32 %v1618_v37, %v1413_v38  ;;  %v693_v55 = vld [vmem:[#allocation2] sm:$0xff] }
  0xbe   : > { %1120 = vmatpush.bf16.msra.mxu0 %v1624_v59 }
  0xbf   : > { %1134 = vmatpush.bf16.msra.mxu1 %v1632_v60 }
  0xc0   : > { %1148 = vmatpush.bf16.msra.mxu2 %v1640_v61 }
  0xc1   : > { %1162 = vmatpush.bf16.msra.mxu3 %v1648_v62 }
  0xc2   : > { %1121 = vmatpush.bf16.msra.mxu0 %v1623_v63  ;;  %v694_v63 = vld [vmem:[#allocation2 + $0x8] sm:$0xff] }
  0xc3   : > { %1135 = vmatpush.bf16.msra.mxu1 %v1631_v0 }
  0xc4   : > { %1149 = vmatpush.bf16.msra.mxu2 %v1639_v1 }
  0xc5   : > { %1163 = vmatpush.bf16.msra.mxu3 %v1647_v2 }
  0xc6   : > { %1122 = vmatpush.bf16.msra.mxu0 %v1622_v3 }
  0xc7   : > { %1136 = vmatpush.bf16.msra.mxu1 %v1630_v4 }
  0xc8   : > { %1150 = vmatpush.bf16.msra.mxu2 %v1638_v5 }
  0xc9   : > { %1164 = vmatpush.bf16.msra.mxu3 %v1646_v14  ;;  %1123 = vmatmul.bf16.vlgmr.msra.gmra.mxu0 %v1396_v17 }
  0xca   : > { %1171 = vmatpush.bf16.msrb.mxu0 %v1661_v6  ;;  %1137 = vmatmul.bf16.vlgmr.msra.gmra.mxu1 %v1400_v18 }
  0xcb   : > { %1185 = vmatpush.bf16.msrb.mxu1 %v1669_v11  ;;  %1151 = vmatmul.bf16.vlgmr.msra.gmra.mxu2 %v1404_v19 }
  0xcc   : > { %1165 = vmatmul.bf16.vlgmr.msra.gmra.mxu3 %v1408_v21 }
  0xce   : > { %1172 = vmatpush.bf16.msrb.mxu0 %v1660_v20 }
  0xcf   : > { %1186 = vmatpush.bf16.msrb.mxu1 %v1668_v22 }
  0xd2   : > { %1173 = vmatpush.bf16.msrb.mxu0 %v1659_v23 }
  0xd3   : > { %1187 = vmatpush.bf16.msrb.mxu1 %v1667_v24 }
  0xd6   : > { %1174 = vmatpush.bf16.msrb.mxu0 %v1658_v25 }
  0xd7   : > { %1188 = vmatpush.bf16.msrb.mxu1 %v1666_v26 }
  0xda   : > { %1175 = vmatpush.bf16.msrb.mxu0 %v1657_v27 }
  0xdb   : > { %1189 = vmatpush.bf16.msrb.mxu1 %v1665_v28 }
  0xde   : > { %1176 = vmatpush.bf16.msrb.mxu0 %v1656_v29 }
  0xdf   : > { %1190 = vmatpush.bf16.msrb.mxu1 %v1664_v30 }
  0xe2   : > { %1177 = vmatpush.bf16.msrb.mxu0 %v1655_v31 }
  0xe3   : > { %1191 = vmatpush.bf16.msrb.mxu1 %v1663_v32 }
  0xe6   : > { %1178 = vmatpush.bf16.msrb.mxu0 %v1654_v33 }
  0xe7   : > { %1192 = vmatpush.bf16.msrb.mxu1 %v1662_v36 }
  0xe9   : > { %1179 = vmatmul.bf16.vlgmr.msrb.gmra.mxu0 %v1412_v39 }
  0xea   : > { %1193 = vmatmul.bf16.vlgmr.msrb.gmra.mxu1 %v1416_v40 }
 0x146   : > { %v1124_v41 = vpop.f32.mrf.mxu0 }
 0x147   : > { %v1138_v42 = vpop.f32.mrf.mxu1 }
 0x148   : > { %v1139_v44 = vadd.f32 %v1138_v42, %v1124_v41 }
 0x14e   : > { %v1152_v43 = vpop.f32.mrf.mxu2  ;;  %v1126_v45 = vpop.f32.mrf.mxu0 }
 0x14f   : > { %v1140_v46 = vpop.f32.mrf.mxu1  ;;  %v1166_v47 = vpop.f32.mrf.mxu3  ;;  %v1153_v48 = vadd.f32 %v1152_v43, %v1139_v44 }
 0x150   : > { %v1141_v50 = vadd.f32 %v1140_v46, %v1126_v45 }
 0x151   : > { %v1167_v49 = vadd.f32 %v1166_v47, %v1153_v48 }
 0x156   : > { %v1154_v51 = vpop.f32.mrf.mxu2 }
 0x157   : > { %v1155_v56 = vadd.f32 %v1154_v51, %v1141_v50  ;;  %v1168_v58 = vpop.f32.mrf.mxu3 }
 0x159   : > { %v1169_v60 = vadd.f32 %v1168_v58, %v1155_v56 }
 0x166   : > { %v1180_v52 = vpop.f32.mrf.mxu0 }
 0x167   : > { %v1181_v53 = vadd.f32 %v1180_v52, %v1167_v49  ;;  %v1194_v54 = vpop.f32.mrf.mxu1 }
 0x169   : > { %v1195_v57 = vadd.f32 %v1194_v54, %v1181_v53 }
 0x16b   : > { %v1199_v59 = vadd.f32 %v1195_v57, %v693_v55 }
 0x16d   : > { %1201 = vst [vmem:[#allocation2] sm:$0xff] %v1199_v59 }
 0x16e   : > { %v1182_v61 = vpop.f32.mrf.mxu0 }
 0x16f   : > { %v1183_v62 = vadd.f32 %v1182_v61, %v1169_v60  ;;  %v1196_v0 = vpop.f32.mrf.mxu1 }
 0x171   : > { %v1197_v1 = vadd.f32 %v1196_v0, %v1183_v62  ;;  %1206 = sbr.rel (%p1609_p5) target bundleno = 388 (0x184), region = 104 }
 0x173   : > { %v1200_v2 = vadd.f32 %v1197_v1, %v694_v63 }
 0x175   : > { %1202 = vst [vmem:[#allocation2 + $0x8] sm:$0xff] %v1200_v2 }
 0x176   : > { %v1207_v3 = vld [vmem:[#allocation2] sm:$0xff] }
 0x177   : > { %v1768_v5 = vld [vmem:[%s685_s4] ss:$0 sm:$0xff] }
 0x178   : > { %v1213_v6 = vadd.f32 %v1768_v5, %v1207_v3 }
 0x17a   : > { %v1215_v8 = vmax.f32 %v1213_v6, 0.0 }
 0x17c   : > { %v1208_v4 = vld [vmem:[#allocation2 + $0x8] sm:$0xff] }
 0x17d   : > { %v1214_v7 = vadd.f32 %v1768_v5, %v1208_v4 }
 0x17f   : > { %v1216_v9 = vmax.f32 %v1214_v7, 0.0 }
 0x181   : > { %v1673_v10 = vpack.c.bf16 %v1216_v9, %v1215_v8 }
 0x183   : > { %1674 = vst [vmem:[%s2205_s25] sm:$0xff] %v1673_v10  }
 0x184 PF: > { %1227 = sbr.rel (!%p1972_p12) target bundleno = 397 (0x18d), region = 108  ;;  %s1611_s14 = sshll.u32 (%p1972_p12), %s1843_s19, 2 }
 0x185   : > { %s1232_s5 = scalar_lea.vmem (%p1972_p12), %s2319_s3, %s1611_s14 }
 0x18a   : > { %v1249_v11 = vld [vmem:[%s2205_s25] sm:$0xf]  ;;  %v1251_v12 = vld [vmem:[%s2205_s25 + $0x4] sm:$0xf] }
 0x18b   : > { %1250 = vst [vmem:[%s1232_s5] sm:$0xf] %v1249_v11 }
 0x18c   : > { %1252 = vst [vmem:[%s1232_s5 + $0x8] sm:$0xf] %v1251_v12 }
 0x18d PF: > { %s13_s22 = sadd.s32 1, %s1855_s22   ;;  %s2329_s25 = sld [smem:[#allocation6_spill]] }
 0x18e   : > { %p10_p6 = scmp.ge.s32.totalorder %s13_s22, 8   ;;  %s2330_s12 = smov %s1819_s13 }
 0x18f   : > { %s2331_s13 = smov %s1970_s9  ;;  %s2332_s14 = smov %s1827_s15 }
 0x190   : > { %s2333_s15 = smov %s1967_s8  ;;  %s2334_s16 = smov %s1835_s17 }
 0x191   : > { %s2335_s17 = smov %s1953_s30  ;;  %s2336_s18 = smov %s1847_s20 }
 0x192   : > { %s2337_s19 = smov %s1851_s21  ;;  %s2338_s20 = smov %s2341_s24 }
 0x193   : > { %s2339_s21 = smov %s2329_s25  ;;  %12 = sbr.rel (!%p10_p6) target bundleno = 9 (0x9), region = 191 }

// kernel: _lambda_.66
= control target key start
LH: loop header
LB: loop body
LE: loop exit
PB: predicated region body
PF: predicated region fallthrough
CT: control target
= control target key end

     0   :  { %s3009_s0 = inlined_call_operand.vmem [shape: bf16[16,2304], index: 0, kind: input, shape index: {}]   ;;  %s3010_s1 = inlined_call_operand.vmem [shape: bf16[2304,512], index: 1, kind: input, shape index: {}]   ;;  %s3011_s2 = inlined_call_operand.vmem [shape: f32[1,512], index: 2, kind: input, shape index: {}]   ;;  %s3012_s3 = inlined_call_operand.vmem [shape: bf16[16,512], index: 3, kind: output, shape index: {}]  }
   0x1   :  { %3014 = sst [smem:[#allocation7_spill]] %s3009_s0 }
   0x2   :  { %3015 = sst [smem:[#allocation8_spill]] %s3010_s1 }
   0x3   :  { %s2403_s12 = smov 0   ;;  %s2405_s13 = smov 0  }
   0x4   :  { %s2407_s14 = smov 0   ;;  %s2409_s15 = smov 0  }
   0x5   :  { %s2411_s16 = smov 0   ;;  %s2413_s17 = smov 0  }
   0x6   :  { %s2415_s18 = smov 0   ;;  %s2417_s19 = smov 0  }
   0x7   :  { %s2419_s20 = smov 0   ;;  %s2421_s21 = smov 0  }
   0x8   :  { %s2423_s22 = smov 0  }
   0x9 LB: > { %s1670_s23 = sadd.s32 4294967295, %s2380_s22   ;;  %s25_s24 = sadd.s32 1, %s2372_s20  ;;  %s2380_s22 = sphi %s2423_s22, %s13_s22   ;;  %s2376_s21 = sphi %s2421_s21, %s3032_s21   ;;  %s2372_s20 = sphi %s2419_s20, %s3031_s20   ;;  %s2368_s19 = sphi %s2417_s19, %s3030_s19   ;;  %s2364_s18 = sphi %s2415_s18, %s3029_s18   ;;  %s2360_s17 = sphi %s2413_s17, %s3028_s17   ;;  %s2356_s16 = sphi %s2411_s16, %s3027_s16   ;;  %s2352_s15 = sphi %s2409_s15, %s3026_s15   ;;  %s2348_s14 = sphi %s2407_s14, %s3025_s14   ;;  %s2344_s13 = sphi %s2405_s13, %s3024_s13   ;;  %s2340_s12 = sphi %s2403_s12, %s3023_s12  }
   0xa   : > { %p26_p0 = scmp.ge.s32.totalorder %s25_s24, 3  ;;  %s28_s25 = sadd.s32 1, %s2376_s21 }
   0xb   : > { %s41_s26 = sadd.s32 1, %s2360_s17  ;;  %p48_p1 = scmp.ne.s32.totalorder %s2360_s17, %s2356_s16 }
   0xc   : > { %s3034_s24 = smov (%p26_p0, %s25_s24), 0  ;;  %s3036_s25 = smov (!%p26_p0, %s28_s25), %s2376_s21 }
   0xd   : > { %s37_s27 = ssub.s32 %s2372_s20, %s3034_s24  ;;  %p49_p2 = scmp.eq.s32.totalorder %s2380_s22, 0 }
   0xe   : > { %p30_p3 = scmp.ge.s32.totalorder %s3036_s25, 2  ;;  %p39_p4 = scmp.eq.s32.totalorder %s37_s27, 0 }
   0xf   : > { %p2470_p5 = por %p49_p2, %p48_p1  ;;  %s69_s29 = sadd.s32 1, %s2352_s15 }
  0x10   : > { %s3038_s25 = smov (%p30_p3, %s3036_s25), 0  ;;  %p76_p6 = scmp.ne.s32.totalorder %s2352_s15, %s2348_s14 }
  0x11   : > { %3017 = sst [smem:[#allocation6_spill]] %s3038_s25  ;;  %s65_s4 = ssub.s32 %s2376_s21, %s3038_s25 }
  0x12   : > { %s2478_s30 = scalar_select %p39_p4, %s2360_s17, %s41_s26  }
  0x13   : > { %s66_s5 = sor.u32 %s65_s4, %s37_s27  ;;  %p121_p7 = scmp.eq.s32.totalorder %s65_s4, 0 }
  0x14   : > { %p67_p8 = scmp.eq.s32.totalorder %s66_s5, 0  ;;  %p2484_p9 = por %p76_p6, %p49_p2 }
  0x15   : > { %s123_s7 = sadd.s32 1, %s2344_s13  ;;  %p133_p10 = scmp.ne.s32.totalorder %s2344_s13, %s2340_s12 }
  0x16   : > { %s2492_s8 = scalar_select %p67_p8, %s2352_s15, %s69_s29  }
  0x17   : > { %s2495_s9 = scalar_select %p121_p7, %s2344_s13, %s123_s7  }
  0x18   : > { %p134_p11 = scmp.eq.s32.totalorder %s1670_s23, 5  ;;  %p1673_p13 = scmp.ge.s32.totalorder %s2380_s22, 6 }
  0x1a   : > { %p2497_p12 = por %p134_p11, %p133_p10  ;;  %156 = sbr.rel (%p1673_p13) target bundleno = 152 (0x98), region = 16 }
  0x1f   : > { %159 = sbr.rel (!%p2470_p5) target bundleno = 46 (0x2e), region = 20  ;;  %s161_s11 = sand.u32 (%p2470_p5), 1, %s2360_s17  }
  0x20   : > { %s2096_s26 = smul.u32 (%p2470_p5), 24, %s2372_s20  ;;  %s3020_s0 = sld [smem:[#allocation7_spill]] (%p2470_p5) }
  0x21   : > { %s2201_s27 = smul.u32 (%p2470_p5), 48, %s161_s11 }
  0x23   : > { %s163_s23 = scalar_lea.vmem (%p2470_p5), [#allocation3], %s2201_s27 }
  0x26   : > { %s169_s5 = scalar_lea.vmem %s3020_s0, %s2096_s26 }
  0x27   : > { %v182_v0 = vld [vmem:[%s169_s5] sm:$0xff]  ;;  %v184_v1 = vld [vmem:[%s169_s5 + $0x8] sm:$0xff]  ;;  %v186_v2 = vld [vmem:[%s169_s5 + $0x10] sm:$0xff] }
  0x28   : > { %183 = vst [vmem:[%s163_s23] sm:$0xff] %v182_v0  ;;  %v188_v3 = vld [vmem:[%s169_s5 + $0x48] sm:$0xff]  ;;  %v190_v4 = vld [vmem:[%s169_s5 + $0x50] sm:$0xff]  ;;  %v192_v5 = vld [vmem:[%s169_s5 + $0x58] sm:$0xff] }
  0x29   : > { %185 = vst [vmem:[%s163_s23 + $0x8] sm:$0xff] %v184_v1 }
  0x2a   : > { %187 = vst [vmem:[%s163_s23 + $0x10] sm:$0xff] %v186_v2 }
  0x2b   : > { %189 = vst [vmem:[%s163_s23 + $0x18] sm:$0xff] %v188_v3 }
  0x2c   : > { %191 = vst [vmem:[%s163_s23 + $0x20] sm:$0xff] %v190_v4 }
  0x2d   : > { %193 = vst [vmem:[%s163_s23 + $0x28] sm:$0xff] %v192_v5 }
  0x2e PF: > { %199 = sbr.rel (!%p2484_p9) target bundleno = 152 (0x98), region = 43  ;;  %s201_s28 = sand.u32 (%p2484_p9), 1, %s2352_s15  }
  0x2f   : > { %s2202_s7 = smul.u32 (%p2484_p9), 768, %s201_s28  ;;  %s1675_s11 = sshll.u32 (%p2484_p9), %s2376_s21, 1 }
  0x30   : > { %s2097_s26 = smul.u32 (%p2484_p9), 384, %s2372_s20  ;;  %s3021_s1 = sld [smem:[#allocation8_spill]] (%p2484_p9) }
  0x31   : > { %s2522_s6 = scalar_lea.vmem (%p2484_p9), [#allocation4], %s2202_s7 }
  0x32   : > { %s207_s27 = sadd.s32 (%p2484_p9), %s2097_s26, %s1675_s11 }
  0x33   : > { %s1677_s29 = sshll.u32 %s207_s27, 2 }
  0x36   : > { %s2517_s5 = scalar_lea.vmem %s3021_s1, %s1677_s29 }
  0x37   : > { %v428_v6 = vld [vmem:[%s2517_s5] sm:$0xff]  ;;  %v430_v7 = vld [vmem:[%s2517_s5 + $0x10] sm:$0xff] }
  0x38   : > { %v432_v8 = vld [vmem:[%s2517_s5 + $0x20] sm:$0xff]  ;;  %429 = vst [vmem:[%s2522_s6] sm:$0xff] %v428_v6  ;;  %v434_v9 = vld [vmem:[%s2517_s5 + $0x30] sm:$0xff] }
  0x39   : > { %431 = vst [vmem:[%s2522_s6 + $0x8] sm:$0xff] %v430_v7  ;;  %v436_v10 = vld [vmem:[%s2517_s5 + $0x40] sm:$0xff]  ;;  %v438_v11 = vld [vmem:[%s2517_s5 + $0x50] sm:$0xff] }
  0x3a   : > { %433 = vst [vmem:[%s2522_s6 + $0x10] sm:$0xff] %v432_v8  ;;  %v440_v12 = vld [vmem:[%s2517_s5 + $0x60] sm:$0xff]  ;;  %v442_v13 = vld [vmem:[%s2517_s5 + $0x70] sm:$0xff] }
  0x3b   : > { %435 = vst [vmem:[%s2522_s6 + $0x18] sm:$0xff] %v434_v9  ;;  %v444_v14 = vld [vmem:[%s2517_s5 + $0x80] sm:$0xff]  ;;  %v446_v15 = vld [vmem:[%s2517_s5 + $0x90] sm:$0xff] }
  0x3c   : > { %437 = vst [vmem:[%s2522_s6 + $0x20] sm:$0xff] %v436_v10  ;;  %v448_v16 = vld [vmem:[%s2517_s5 + $0xa0] sm:$0xff]  ;;  %v450_v17 = vld [vmem:[%s2517_s5 + $0xb0] sm:$0xff] }
  0x3d   : > { %439 = vst [vmem:[%s2522_s6 + $0x28] sm:$0xff] %v438_v11  ;;  %v452_v18 = vld [vmem:[%s2517_s5 + $0xc0] sm:$0xff]  ;;  %v454_v19 = vld [vmem:[%s2517_s5 + $0xd0] sm:$0xff] }
  0x3e   : > { %441 = vst [vmem:[%s2522_s6 + $0x30] sm:$0xff] %v440_v12  ;;  %v456_v20 = vld [vmem:[%s2517_s5 + $0xe0] sm:$0xff]  ;;  %v458_v21 = vld [vmem:[%s2517_s5 + $0xf0] sm:$0xff] }
  0x3f   : > { %443 = vst [vmem:[%s2522_s6 + $0x38] sm:$0xff] %v442_v13  ;;  %v460_v22 = vld [vmem:[%s2517_s5 + $0x100] sm:$0xff]  ;;  %v462_v23 = vld [vmem:[%s2517_s5 + $0x110] sm:$0xff] }
  0x40   : > { %445 = vst [vmem:[%s2522_s6 + $0x40] sm:$0xff] %v444_v14  ;;  %v464_v24 = vld [vmem:[%s2517_s5 + $0x120] sm:$0xff]  ;;  %v466_v25 = vld [vmem:[%s2517_s5 + $0x130] sm:$0xff] }
  0x41   : > { %447 = vst [vmem:[%s2522_s6 + $0x48] sm:$0xff] %v446_v15  ;;  %v468_v26 = vld [vmem:[%s2517_s5 + $0x140] sm:$0xff]  ;;  %v470_v27 = vld [vmem:[%s2517_s5 + $0x150] sm:$0xff] }
  0x42   : > { %449 = vst [vmem:[%s2522_s6 + $0x50] sm:$0xff] %v448_v16  ;;  %v472_v28 = vld [vmem:[%s2517_s5 + $0x160] sm:$0xff]  ;;  %v474_v29 = vld [vmem:[%s2517_s5 + $0x170] sm:$0xff] }
  0x43   : > { %451 = vst [vmem:[%s2522_s6 + $0x58] sm:$0xff] %v450_v17  ;;  %v476_v30 = vld [vmem:[%s2517_s5 + $0x180] sm:$0xff]  ;;  %v478_v31 = vld [vmem:[%s2517_s5 + $0x190] sm:$0xff] }
  0x44   : > { %453 = vst [vmem:[%s2522_s6 + $0x60] sm:$0xff] %v452_v18  ;;  %v480_v32 = vld [vmem:[%s2517_s5 + $0x1a0] sm:$0xff]  ;;  %v482_v33 = vld [vmem:[%s2517_s5 + $0x1b0] sm:$0xff] }
  0x45   : > { %455 = vst [vmem:[%s2522_s6 + $0x68] sm:$0xff] %v454_v19  ;;  %v484_v34 = vld [vmem:[%s2517_s5 + $0x1c0] sm:$0xff]  ;;  %v486_v35 = vld [vmem:[%s2517_s5 + $0x1d0] sm:$0xff] }
  0x46   : > { %457 = vst [vmem:[%s2522_s6 + $0x70] sm:$0xff] %v456_v20  ;;  %v488_v36 = vld [vmem:[%s2517_s5 + $0x1e0] sm:$0xff]  ;;  %v490_v37 = vld [vmem:[%s2517_s5 + $0x1f0] sm:$0xff] }
  0x47   : > { %459 = vst [vmem:[%s2522_s6 + $0x78] sm:$0xff] %v458_v21  ;;  %v492_v38 = vld [vmem:[%s2517_s5 + $0x200] sm:$0xff]  ;;  %v494_v39 = vld [vmem:[%s2517_s5 + $0x210] sm:$0xff] }
  0x48   : > { %461 = vst [vmem:[%s2522_s6 + $0x80] sm:$0xff] %v460_v22  ;;  %v496_v40 = vld [vmem:[%s2517_s5 + $0x220] sm:$0xff]  ;;  %v498_v41 = vld [vmem:[%s2517_s5 + $0x230] sm:$0xff] }
  0x49   : > { %463 = vst [vmem:[%s2522_s6 + $0x88] sm:$0xff] %v462_v23  ;;  %v500_v42 = vld [vmem:[%s2517_s5 + $0x240] sm:$0xff]  ;;  %v502_v43 = vld [vmem:[%s2517_s5 + $0x250] sm:$0xff] }
  0x4a   : > { %465 = vst [vmem:[%s2522_s6 + $0x90] sm:$0xff] %v464_v24  ;;  %v504_v44 = vld [vmem:[%s2517_s5 + $0x260] sm:$0xff]  ;;  %v506_v45 = vld [vmem:[%s2517_s5 + $0x270] sm:$0xff] }
  0x4b   : > { %467 = vst [vmem:[%s2522_s6 + $0x98] sm:$0xff] %v466_v25  ;;  %v508_v46 = vld [vmem:[%s2517_s5 + $0x280] sm:$0xff]  ;;  %v510_v47 = vld [vmem:[%s2517_s5 + $0x290] sm:$0xff] }
  0x4c   : > { %469 = vst [vmem:[%s2522_s6 + $0xa0] sm:$0xff] %v468_v26  ;;  %v512_v48 = vld [vmem:[%s2517_s5 + $0x2a0] sm:$0xff]  ;;  %v514_v49 = vld [vmem:[%s2517_s5 + $0x2b0] sm:$0xff] }
  0x4d   : > { %471 = vst [vmem:[%s2522_s6 + $0xa8] sm:$0xff] %v470_v27  ;;  %v516_v50 = vld [vmem:[%s2517_s5 + $0x2c0] sm:$0xff]  ;;  %v518_v51 = vld [vmem:[%s2517_s5 + $0x2d0] sm:$0xff] }
  0x4e   : > { %473 = vst [vmem:[%s2522_s6 + $0xb0] sm:$0xff] %v472_v28  ;;  %v520_v52 = vld [vmem:[%s2517_s5 + $0x2e0] sm:$0xff]  ;;  %v522_v53 = vld [vmem:[%s2517_s5 + $0x2f0] sm:$0xff] }
  0x4f   : > { %475 = vst [vmem:[%s2522_s6 + $0xb8] sm:$0xff] %v474_v29  ;;  %v524_v54 = vld [vmem:[%s2517_s5 + $0x300] sm:$0xff]  ;;  %v526_v55 = vld [vmem:[%s2517_s5 + $0x310] sm:$0xff] }
  0x50   : > { %477 = vst [vmem:[%s2522_s6 + $0xc0] sm:$0xff] %v476_v30  ;;  %v528_v56 = vld [vmem:[%s2517_s5 + $0x320] sm:$0xff]  ;;  %v530_v57 = vld [vmem:[%s2517_s5 + $0x330] sm:$0xff] }
  0x51   : > { %479 = vst [vmem:[%s2522_s6 + $0xc8] sm:$0xff] %v478_v31  ;;  %v532_v58 = vld [vmem:[%s2517_s5 + $0x340] sm:$0xff]  ;;  %v534_v59 = vld [vmem:[%s2517_s5 + $0x350] sm:$0xff] }
  0x52   : > { %481 = vst [vmem:[%s2522_s6 + $0xd0] sm:$0xff] %v480_v32  ;;  %v536_v60 = vld [vmem:[%s2517_s5 + $0x360] sm:$0xff]  ;;  %v538_v61 = vld [vmem:[%s2517_s5 + $0x370] sm:$0xff] }
  0x53   : > { %483 = vst [vmem:[%s2522_s6 + $0xd8] sm:$0xff] %v482_v33  ;;  %v540_v62 = vld [vmem:[%s2517_s5 + $0x380] sm:$0xff]  ;;  %v542_v63 = vld [vmem:[%s2517_s5 + $0x390] sm:$0xff] }
  0x54   : > { %485 = vst [vmem:[%s2522_s6 + $0xe0] sm:$0xff] %v484_v34  ;;  %v544_v0 = vld [vmem:[%s2517_s5 + $0x3a0] sm:$0xff]  ;;  %v546_v1 = vld [vmem:[%s2517_s5 + $0x3b0] sm:$0xff] }
  0x55   : > { %487 = vst [vmem:[%s2522_s6 + $0xe8] sm:$0xff] %v486_v35  ;;  %v548_v2 = vld [vmem:[%s2517_s5 + $0x3c0] sm:$0xff]  ;;  %v550_v3 = vld [vmem:[%s2517_s5 + $0x3d0] sm:$0xff] }
  0x56   : > { %489 = vst [vmem:[%s2522_s6 + $0xf0] sm:$0xff] %v488_v36  ;;  %v552_v4 = vld [vmem:[%s2517_s5 + $0x3e0] sm:$0xff]  ;;  %v554_v5 = vld [vmem:[%s2517_s5 + $0x3f0] sm:$0xff] }
  0x57   : > { %491 = vst [vmem:[%s2522_s6 + $0xf8] sm:$0xff] %v490_v37  ;;  %v556_v6 = vld [vmem:[%s2517_s5 + $0x400] sm:$0xff]  ;;  %v558_v7 = vld [vmem:[%s2517_s5 + $0x410] sm:$0xff] }
  0x58   : > { %493 = vst [vmem:[%s2522_s6 + $0x100] sm:$0xff] %v492_v38  ;;  %v560_v8 = vld [vmem:[%s2517_s5 + $0x420] sm:$0xff]  ;;  %v562_v9 = vld [vmem:[%s2517_s5 + $0x430] sm:$0xff] }
  0x59   : > { %495 = vst [vmem:[%s2522_s6 + $0x108] sm:$0xff] %v494_v39  ;;  %v564_v10 = vld [vmem:[%s2517_s5 + $0x440] sm:$0xff]  ;;  %v566_v11 = vld [vmem:[%s2517_s5 + $0x450] sm:$0xff] }
  0x5a   : > { %497 = vst [vmem:[%s2522_s6 + $0x110] sm:$0xff] %v496_v40  ;;  %v568_v12 = vld [vmem:[%s2517_s5 + $0x460] sm:$0xff]  ;;  %v570_v13 = vld [vmem:[%s2517_s5 + $0x470] sm:$0xff] }
  0x5b   : > { %499 = vst [vmem:[%s2522_s6 + $0x118] sm:$0xff] %v498_v41  ;;  %v572_v14 = vld [vmem:[%s2517_s5 + $0x480] sm:$0xff]  ;;  %v574_v15 = vld [vmem:[%s2517_s5 + $0x490] sm:$0xff] }
  0x5c   : > { %501 = vst [vmem:[%s2522_s6 + $0x120] sm:$0xff] %v500_v42  ;;  %v576_v16 = vld [vmem:[%s2517_s5 + $0x4a0] sm:$0xff]  ;;  %v578_v17 = vld [vmem:[%s2517_s5 + $0x4b0] sm:$0xff] }
  0x5d   : > { %503 = vst [vmem:[%s2522_s6 + $0x128] sm:$0xff] %v502_v43  ;;  %v580_v18 = vld [vmem:[%s2517_s5 + $0x4c0] sm:$0xff]  ;;  %v582_v19 = vld [vmem:[%s2517_s5 + $0x4d0] sm:$0xff] }
  0x5e   : > { %505 = vst [vmem:[%s2522_s6 + $0x130] sm:$0xff] %v504_v44  ;;  %v584_v20 = vld [vmem:[%s2517_s5 + $0x4e0] sm:$0xff]  ;;  %v586_v21 = vld [vmem:[%s2517_s5 + $0x4f0] sm:$0xff] }
  0x5f   : > { %507 = vst [vmem:[%s2522_s6 + $0x138] sm:$0xff] %v506_v45  ;;  %v588_v22 = vld [vmem:[%s2517_s5 + $0x500] sm:$0xff]  ;;  %v590_v23 = vld [vmem:[%s2517_s5 + $0x510] sm:$0xff] }
  0x60   : > { %509 = vst [vmem:[%s2522_s6 + $0x140] sm:$0xff] %v508_v46  ;;  %v592_v24 = vld [vmem:[%s2517_s5 + $0x520] sm:$0xff]  ;;  %v594_v25 = vld [vmem:[%s2517_s5 + $0x530] sm:$0xff] }
  0x61   : > { %511 = vst [vmem:[%s2522_s6 + $0x148] sm:$0xff] %v510_v47  ;;  %v596_v26 = vld [vmem:[%s2517_s5 + $0x540] sm:$0xff]  ;;  %v598_v27 = vld [vmem:[%s2517_s5 + $0x550] sm:$0xff] }
  0x62   : > { %513 = vst [vmem:[%s2522_s6 + $0x150] sm:$0xff] %v512_v48  ;;  %v600_v28 = vld [vmem:[%s2517_s5 + $0x560] sm:$0xff]  ;;  %v602_v29 = vld [vmem:[%s2517_s5 + $0x570] sm:$0xff] }
  0x63   : > { %515 = vst [vmem:[%s2522_s6 + $0x158] sm:$0xff] %v514_v49  ;;  %v604_v30 = vld [vmem:[%s2517_s5 + $0x580] sm:$0xff]  ;;  %v606_v31 = vld [vmem:[%s2517_s5 + $0x590] sm:$0xff] }
  0x64   : > { %517 = vst [vmem:[%s2522_s6 + $0x160] sm:$0xff] %v516_v50  ;;  %v608_v32 = vld [vmem:[%s2517_s5 + $0x5a0] sm:$0xff]  ;;  %v610_v33 = vld [vmem:[%s2517_s5 + $0x5b0] sm:$0xff] }
  0x65   : > { %519 = vst [vmem:[%s2522_s6 + $0x168] sm:$0xff] %v518_v51  ;;  %v612_v34 = vld [vmem:[%s2517_s5 + $0x5c0] sm:$0xff]  ;;  %v614_v35 = vld [vmem:[%s2517_s5 + $0x5d0] sm:$0xff] }
  0x66   : > { %521 = vst [vmem:[%s2522_s6 + $0x170] sm:$0xff] %v520_v52  ;;  %v616_v36 = vld [vmem:[%s2517_s5 + $0x5e0] sm:$0xff]  ;;  %v618_v37 = vld [vmem:[%s2517_s5 + $0x5f0] sm:$0xff] }
  0x67   : > { %523 = vst [vmem:[%s2522_s6 + $0x178] sm:$0xff] %v522_v53 }
  0x68   : > { %525 = vst [vmem:[%s2522_s6 + $0x180] sm:$0xff] %v524_v54 }
  0x69   : > { %527 = vst [vmem:[%s2522_s6 + $0x188] sm:$0xff] %v526_v55 }
  0x6a   : > { %529 = vst [vmem:[%s2522_s6 + $0x190] sm:$0xff] %v528_v56 }
  0x6b   : > { %531 = vst [vmem:[%s2522_s6 + $0x198] sm:$0xff] %v530_v57 }
  0x6c   : > { %533 = vst [vmem:[%s2522_s6 + $0x1a0] sm:$0xff] %v532_v58 }
  0x6d   : > { %535 = vst [vmem:[%s2522_s6 + $0x1a8] sm:$0xff] %v534_v59 }
  0x6e   : > { %537 = vst [vmem:[%s2522_s6 + $0x1b0] sm:$0xff] %v536_v60 }
  0x6f   : > { %539 = vst [vmem:[%s2522_s6 + $0x1b8] sm:$0xff] %v538_v61 }
  0x70   : > { %541 = vst [vmem:[%s2522_s6 + $0x1c0] sm:$0xff] %v540_v62 }
  0x71   : > { %543 = vst [vmem:[%s2522_s6 + $0x1c8] sm:$0xff] %v542_v63 }
  0x72   : > { %545 = vst [vmem:[%s2522_s6 + $0x1d0] sm:$0xff] %v544_v0 }
  0x73   : > { %547 = vst [vmem:[%s2522_s6 + $0x1d8] sm:$0xff] %v546_v1 }
  0x74   : > { %549 = vst [vmem:[%s2522_s6 + $0x1e0] sm:$0xff] %v548_v2 }
  0x75   : > { %551 = vst [vmem:[%s2522_s6 + $0x1e8] sm:$0xff] %v550_v3 }
  0x76   : > { %553 = vst [vmem:[%s2522_s6 + $0x1f0] sm:$0xff] %v552_v4 }
  0x77   : > { %555 = vst [vmem:[%s2522_s6 + $0x1f8] sm:$0xff] %v554_v5 }
  0x78   : > { %557 = vst [vmem:[%s2522_s6 + $0x200] sm:$0xff] %v556_v6 }
  0x79   : > { %559 = vst [vmem:[%s2522_s6 + $0x208] sm:$0xff] %v558_v7 }
  0x7a   : > { %561 = vst [vmem:[%s2522_s6 + $0x210] sm:$0xff] %v560_v8 }
  0x7b   : > { %563 = vst [vmem:[%s2522_s6 + $0x218] sm:$0xff] %v562_v9 }
  0x7c   : > { %565 = vst [vmem:[%s2522_s6 + $0x220] sm:$0xff] %v564_v10 }
  0x7d   : > { %567 = vst [vmem:[%s2522_s6 + $0x228] sm:$0xff] %v566_v11 }
  0x7e   : > { %569 = vst [vmem:[%s2522_s6 + $0x230] sm:$0xff] %v568_v12 }
  0x7f   : > { %571 = vst [vmem:[%s2522_s6 + $0x238] sm:$0xff] %v570_v13 }
  0x80   : > { %573 = vst [vmem:[%s2522_s6 + $0x240] sm:$0xff] %v572_v14 }
  0x81   : > { %575 = vst [vmem:[%s2522_s6 + $0x248] sm:$0xff] %v574_v15 }
  0x82   : > { %577 = vst [vmem:[%s2522_s6 + $0x250] sm:$0xff] %v576_v16 }
  0x83   : > { %579 = vst [vmem:[%s2522_s6 + $0x258] sm:$0xff] %v578_v17 }
  0x84   : > { %581 = vst [vmem:[%s2522_s6 + $0x260] sm:$0xff] %v580_v18 }
  0x85   : > { %583 = vst [vmem:[%s2522_s6 + $0x268] sm:$0xff] %v582_v19 }
  0x86   : > { %585 = vst [vmem:[%s2522_s6 + $0x270] sm:$0xff] %v584_v20 }
  0x87   : > { %587 = vst [vmem:[%s2522_s6 + $0x278] sm:$0xff] %v586_v21 }
  0x88   : > { %589 = vst [vmem:[%s2522_s6 + $0x280] sm:$0xff] %v588_v22 }
  0x89   : > { %591 = vst [vmem:[%s2522_s6 + $0x288] sm:$0xff] %v590_v23 }
  0x8a   : > { %593 = vst [vmem:[%s2522_s6 + $0x290] sm:$0xff] %v592_v24 }
  0x8b   : > { %595 = vst [vmem:[%s2522_s6 + $0x298] sm:$0xff] %v594_v25 }
  0x8c   : > { %597 = vst [vmem:[%s2522_s6 + $0x2a0] sm:$0xff] %v596_v26 }
  0x8d   : > { %599 = vst [vmem:[%s2522_s6 + $0x2a8] sm:$0xff] %v598_v27 }
  0x8e   : > { %601 = vst [vmem:[%s2522_s6 + $0x2b0] sm:$0xff] %v600_v28 }
  0x8f   : > { %603 = vst [vmem:[%s2522_s6 + $0x2b8] sm:$0xff] %v602_v29 }
  0x90   : > { %605 = vst [vmem:[%s2522_s6 + $0x2c0] sm:$0xff] %v604_v30 }
  0x91   : > { %607 = vst [vmem:[%s2522_s6 + $0x2c8] sm:$0xff] %v606_v31 }
  0x92   : > { %609 = vst [vmem:[%s2522_s6 + $0x2d0] sm:$0xff] %v608_v32 }
  0x93   : > { %611 = vst [vmem:[%s2522_s6 + $0x2d8] sm:$0xff] %v610_v33 }
  0x94   : > { %613 = vst [vmem:[%s2522_s6 + $0x2e0] sm:$0xff] %v612_v34 }
  0x95   : > { %615 = vst [vmem:[%s2522_s6 + $0x2e8] sm:$0xff] %v614_v35 }
  0x96   : > { %617 = vst [vmem:[%s2522_s6 + $0x2f0] sm:$0xff] %v616_v36 }
  0x97   : > { %619 = vst [vmem:[%s2522_s6 + $0x2f8] sm:$0xff] %v618_v37 }
  0x98 PF: > { %p1678_p0 = scmp.ge.s32.totalorder %s2380_s22, 1  ;;  %p632_p1 = scmp.lt.s32.totalorder %s2380_s22, 7 }
  0x9a   : > { %p633_p2 = pnand %p1678_p0, %p632_p1 }
  0x9b   : > { %s639_s0 = sand.u32 (!%p633_p2), 1, %s2356_s16   ;;  %s646_s23 = sand.u32 (!%p633_p2), 1, %s2348_s14  }
  0x9c   : > { %636 = sbr.rel (%p633_p2) target bundleno = 442 (0x1ba), region = 85  ;;  %s673_s7 = sand.u32 (!%p633_p2), 1, %s2340_s12  }
  0x9d   : > { %s2203_s28 = smul.u32 (!%p633_p2), 48, %s639_s0  ;;  %s1679_s26 = sshll.u32 (!%p633_p2), %s673_s7, 4 }
  0x9e   : > { %s2204_s11 = smul.u32 (!%p633_p2), 768, %s646_s23  ;;  %s1680_s27 = sshll.u32 (!%p633_p2), %s2368_s19, 1 }
  0x9f   : > { %p681_p3 = scmp.lt.s32.totalorder (!%p633_p2), %s1680_s27, 3  ;;  %s2725_s6 = scalar_lea.vmem (!%p633_p2), [#allocation3], %s2203_s28 }
  0xa0   : > { %s2727_s1 = scalar_lea.vmem (!%p633_p2), [#allocation4], %s2204_s11  ;;  %s2729_s25 = scalar_lea.vmem (!%p633_p2), [#allocation5], %s1679_s26 }
  0xa1   : > { %s3040_s27 = smov (!%p681_p3, %s1680_s27), 3  ;;  %p1681_p4 = scmp.ne.s32.totalorder %s2364_s18, 0 }
  0xa2   : > { %s683_s5 = scalar_lea.vmem %s3011_s2, %s3040_s27 }
  0xa3   : > { %690 = sbr.rel (%p1681_p4) target bundleno = 173 (0xad), region = 97 }
  0xa8   : > { %v2382_v38 = vmov 0.0  }
  0xa9   : > { %691 = vst [vmem:[#allocation2 + $0x10] sm:$0xff] %v2382_v38 }
  0xaa   : > { %692 = vst [vmem:[#allocation2] sm:$0xff] %v2382_v38 }
  0xab   : > { %693 = vst [vmem:[#allocation2 + $0x18] sm:$0xff] %v2382_v38 }
  0xac   : > { %694 = vst [vmem:[#allocation2 + $0x8] sm:$0xff] %v2382_v38 }
  0xad PF: > { %v1764_v39 = vld [vmem:[%s2727_s1 + $0x70] sm:$0xf]  ;;  %v2119_v40 = vld [vmem:[%s2727_s1 + $0x74] sm:$0xf0]  ;;  %v1756_v50 = vld [vmem:[%s2727_s1 + $0x60] sm:$0xf] }
  0xae   : > { %v1828_v41 = vld [vmem:[%s2727_s1 + $0xf0] sm:$0xf]  ;;  %v1765_v42 = vor.u32 %v2119_v40, %v1764_v39  ;;  %v2135_v43 = vld [vmem:[%s2727_s1 + $0xf4] sm:$0xf0]  ;;  %v2117_v52 = vld [vmem:[%s2727_s1 + $0x64] sm:$0xf0] }
  0xaf   : > { %v1892_v44 = vld [vmem:[%s2727_s1 + $0x170] sm:$0xf]  ;;  %v2151_v45 = vld [vmem:[%s2727_s1 + $0x174] sm:$0xf0]  ;;  %v1829_v46 = vor.u32 %v2135_v43, %v1828_v41  ;;  %v1820_v53 = vld [vmem:[%s2727_s1 + $0xe0] sm:$0xf]  ;;  %v1757_v55 = vor.u32 %v2117_v52, %v1756_v50 }
  0xb0   : > { %v1893_v47 = vor.u32 %v2151_v45, %v1892_v44  ;;  %v1956_v48 = vld [vmem:[%s2727_s1 + $0x1f0] sm:$0xf]  ;;  %v2167_v49 = vld [vmem:[%s2727_s1 + $0x1f4] sm:$0xf0]  ;;  %1311 = vmatpush.bf16.msra.mxu0 %v1765_v42  ;;  %v2133_v54 = vld [vmem:[%s2727_s1 + $0xe4] sm:$0xf0] }
  0xb1   : > { %v1957_v51 = vor.u32 %v2167_v49, %v1956_v48  ;;  %1325 = vmatpush.bf16.msra.mxu1 %v1829_v46  ;;  %v1821_v56 = vor.u32 %v2133_v54, %v1820_v53  ;;  %v1884_v57 = vld [vmem:[%s2727_s1 + $0x160] sm:$0xf]  ;;  %v2149_v58 = vld [vmem:[%s2727_s1 + $0x164] sm:$0xf0]  ;;  %v1748_v62 = vld [vmem:[%s2727_s1 + $0x50] sm:$0xf] }
  0xb2   : > { %1339 = vmatpush.bf16.msra.mxu2 %v1893_v47  ;;  %v1948_v59 = vld [vmem:[%s2727_s1 + $0x1e0] sm:$0xf]  ;;  %v1885_v60 = vor.u32 %v2149_v58, %v1884_v57  ;;  %v2165_v61 = vld [vmem:[%s2727_s1 + $0x1e4] sm:$0xf0]  ;;  %v2115_v63 = vld [vmem:[%s2727_s1 + $0x54] sm:$0xf0] }
  0xb3   : > { %1353 = vmatpush.bf16.msra.mxu3 %v1957_v51  ;;  %v1949_v0 = vor.u32 %v2165_v61, %v1948_v59  ;;  %v1812_v1 = vld [vmem:[%s2727_s1 + $0xd0] sm:$0xf]  ;;  %v2131_v2 = vld [vmem:[%s2727_s1 + $0xd4] sm:$0xf0]  ;;  %v1749_v4 = vor.u32 %v2115_v63, %v1748_v62  ;;  %v1740_v10 = vld [vmem:[%s2727_s1 + $0x40] sm:$0xf] }
  0xb4   : > { %v1876_v3 = vld [vmem:[%s2727_s1 + $0x150] sm:$0xf]  ;;  %1312 = vmatpush.bf16.msra.mxu0 %v1757_v55  ;;  %v2147_v5 = vld [vmem:[%s2727_s1 + $0x154] sm:$0xf0]  ;;  %v1813_v8 = vor.u32 %v2131_v2, %v1812_v1  ;;  %v2113_v11 = vld [vmem:[%s2727_s1 + $0x44] sm:$0xf0] }
  0xb5   : > { %v1940_v6 = vld [vmem:[%s2727_s1 + $0x1d0] sm:$0xf]  ;;  %v2163_v7 = vld [vmem:[%s2727_s1 + $0x1d4] sm:$0xf0]  ;;  %1326 = vmatpush.bf16.msra.mxu1 %v1821_v56  ;;  %v1877_v9 = vor.u32 %v2147_v5, %v1876_v3  ;;  %v1804_v12 = vld [vmem:[%s2727_s1 + $0xc0] sm:$0xf]  ;;  %v1741_v19 = vor.u32 %v2113_v11, %v1740_v10 }
  0xb6   : > { %1340 = vmatpush.bf16.msra.mxu2 %v1885_v60  ;;  %v1941_v13 = vor.u32 %v2163_v7, %v1940_v6  ;;  %v2129_v14 = vld [vmem:[%s2727_s1 + $0xc4] sm:$0xf0]  ;;  %v1868_v15 = vld [vmem:[%s2727_s1 + $0x140] sm:$0xf]  ;;  %v1732_v22 = vld [vmem:[%s2727_s1 + $0x30] sm:$0xf] }
  0xb7   : > { %1354 = vmatpush.bf16.msra.mxu3 %v1949_v0  ;;  %v2145_v16 = vld [vmem:[%s2727_s1 + $0x144] sm:$0xf0]  ;;  %v1932_v17 = vld [vmem:[%s2727_s1 + $0x1c0] sm:$0xf]  ;;  %v1805_v20 = vor.u32 %v2129_v14, %v1804_v12  ;;  %v2111_v23 = vld [vmem:[%s2727_s1 + $0x34] sm:$0xf0] }
  0xb8   : > { %v2161_v18 = vld [vmem:[%s2727_s1 + $0x1c4] sm:$0xf0]  ;;  %1313 = vmatpush.bf16.msra.mxu0 %v1749_v4  ;;  %v1869_v21 = vor.u32 %v2145_v16, %v1868_v15  ;;  %v1796_v24 = vld [vmem:[%s2727_s1 + $0xb0] sm:$0xf]  ;;  %v2127_v26 = vld [vmem:[%s2727_s1 + $0xb4] sm:$0xf0]  ;;  %v1733_v31 = vor.u32 %v2111_v23, %v1732_v22 }
  0xb9   : > { %1327 = vmatpush.bf16.msra.mxu1 %v1813_v8  ;;  %v1933_v25 = vor.u32 %v2161_v18, %v1932_v17  ;;  %v1860_v27 = vld [vmem:[%s2727_s1 + $0x130] sm:$0xf]  ;;  %v2143_v28 = vld [vmem:[%s2727_s1 + $0x134] sm:$0xf0]  ;;  %v1797_v32 = vor.u32 %v2127_v26, %v1796_v24  ;;  %v1724_v34 = vld [vmem:[%s2727_s1 + $0x20] sm:$0xf] }
  0xba   : > { %1341 = vmatpush.bf16.msra.mxu2 %v1877_v9  ;;  %v1924_v29 = vld [vmem:[%s2727_s1 + $0x1b0] sm:$0xf]  ;;  %v2159_v30 = vld [vmem:[%s2727_s1 + $0x1b4] sm:$0xf0]  ;;  %v1861_v33 = vor.u32 %v2143_v28, %v1860_v27  ;;  %v2109_v35 = vld [vmem:[%s2727_s1 + $0x24] sm:$0xf0] }
  0xbb   : > { %1355 = vmatpush.bf16.msra.mxu3 %v1941_v13  ;;  %v1788_v36 = vld [vmem:[%s2727_s1 + $0xa0] sm:$0xf]  ;;  %v1925_v37 = vor.u32 %v2159_v30, %v1924_v29  ;;  %v2125_v38 = vld [vmem:[%s2727_s1 + $0xa4] sm:$0xf0]  ;;  %v1725_v43 = vor.u32 %v2109_v35, %v1724_v34  ;;  %v1716_v46 = vld [vmem:[%s2727_s1 + $0x10] sm:$0xf] }
  0xbc   : > { %1314 = vmatpush.bf16.msra.mxu0 %v1741_v19  ;;  %v1852_v39 = vld [vmem:[%s2727_s1 + $0x120] sm:$0xf]  ;;  %v2141_v40 = vld [vmem:[%s2727_s1 + $0x124] sm:$0xf0]  ;;  %v1789_v44 = vor.u32 %v2125_v38, %v1788_v36  ;;  %v2107_v47 = vld [vmem:[%s2727_s1 + $0x14] sm:$0xf0] }
  0xbd   : > { %1328 = vmatpush.bf16.msra.mxu1 %v1805_v20  ;;  %v1916_v41 = vld [vmem:[%s2727_s1 + $0x1a0] sm:$0xf]  ;;  %v2157_v42 = vld [vmem:[%s2727_s1 + $0x1a4] sm:$0xf0]  ;;  %v1853_v45 = vor.u32 %v2141_v40, %v1852_v39  ;;  %v1780_v48 = vld [vmem:[%s2727_s1 + $0x90] sm:$0xf]  ;;  %v1717_v55 = vor.u32 %v2107_v47, %v1716_v46 }
  0xbe   : > { %1342 = vmatpush.bf16.msra.mxu2 %v1869_v21  ;;  %v1917_v49 = vor.u32 %v2157_v42, %v1916_v41  ;;  %v2123_v50 = vld [vmem:[%s2727_s1 + $0x94] sm:$0xf0]  ;;  %v1844_v51 = vld [vmem:[%s2727_s1 + $0x110] sm:$0xf]  ;;  %v1708_v56 = vld [vmem:[%s2727_s1] sm:$0xf] }
  0xbf   : > { %1356 = vmatpush.bf16.msra.mxu3 %v1933_v25  ;;  %v2139_v52 = vld [vmem:[%s2727_s1 + $0x114] sm:$0xf0]  ;;  %v1908_v53 = vld [vmem:[%s2727_s1 + $0x190] sm:$0xf]  ;;  %v2105_v57 = vld [vmem:[%s2727_s1 + $0x4] sm:$0xf0]  ;;  %v1781_v58 = vor.u32 %v2123_v50, %v1780_v48 }
  0xc0   : > { %1315 = vmatpush.bf16.msra.mxu0 %v1733_v31  ;;  %v2155_v54 = vld [vmem:[%s2727_s1 + $0x194] sm:$0xf0]  ;;  %v1845_v59 = vor.u32 %v2139_v52, %v1844_v51  ;;  %v1772_v60 = vld [vmem:[%s2727_s1 + $0x80] sm:$0xf]  ;;  %v2121_v61 = vld [vmem:[%s2727_s1 + $0x84] sm:$0xf0]  ;;  %v1709_v6 = vor.u32 %v2105_v57, %v1708_v56 }
  0xc1   : > { %1329 = vmatpush.bf16.msra.mxu1 %v1797_v32  ;;  %v1836_v62 = vld [vmem:[%s2727_s1 + $0x100] sm:$0xf]  ;;  %v1909_v63 = vor.u32 %v2155_v54, %v1908_v53  ;;  %v2137_v0 = vld [vmem:[%s2727_s1 + $0x104] sm:$0xf0]  ;;  %v2020_v3 = vld [vmem:[%s2727_s1 + $0x270] sm:$0xf]  ;;  %v1773_v10 = vor.u32 %v2121_v61, %v1772_v60 }
  0xc2   : > { %1343 = vmatpush.bf16.msra.mxu2 %v1861_v33  ;;  %v1900_v1 = vld [vmem:[%s2727_s1 + $0x180] sm:$0xf]  ;;  %v2153_v2 = vld [vmem:[%s2727_s1 + $0x184] sm:$0xf0]  ;;  %v2183_v4 = vld [vmem:[%s2727_s1 + $0x274] sm:$0xf0]  ;;  %v1837_v11 = vor.u32 %v2137_v0, %v1836_v62 }
  0xc3   : > { %1357 = vmatpush.bf16.msra.mxu3 %v1925_v37  ;;  %v2084_v5 = vld [vmem:[%s2727_s1 + $0x2f0] sm:$0xf]  ;;  %v2199_v7 = vld [vmem:[%s2727_s1 + $0x2f4] sm:$0xf0]  ;;  %v2118_v8 = vld [vmem:[%s2727_s1 + $0x74] sm:$0xf]  ;;  %v1901_v14 = vor.u32 %v2153_v2, %v1900_v1  ;;  %v2021_v15 = vor.u32 %v2183_v4, %v2020_v3 }
  0xc4   : > { %1316 = vmatpush.bf16.msra.mxu0 %v1725_v43  ;;  %v1766_v9 = vld [vmem:[%s2727_s1 + $0x78] sm:$0xf0]  ;;  %v2134_v12 = vld [vmem:[%s2727_s1 + $0xf4] sm:$0xf]  ;;  %v2012_v16 = vld [vmem:[%s2727_s1 + $0x260] sm:$0xf]  ;;  %v2085_v18 = vor.u32 %v2199_v7, %v2084_v5 }
  0xc5   : > { %1330 = vmatpush.bf16.msra.mxu1 %v1789_v44  ;;  %v1830_v13 = vld [vmem:[%s2727_s1 + $0xf8] sm:$0xf0]  ;;  %v2181_v17 = vld [vmem:[%s2727_s1 + $0x264] sm:$0xf0]  ;;  %v1769_v19 = vor.u32 %v2118_v8, %v1766_v9  ;;  %v2076_v20 = vld [vmem:[%s2727_s1 + $0x2e0] sm:$0xf] }
  0xc6   : > { %1344 = vmatpush.bf16.msra.mxu2 %v1853_v45  ;;  %v2197_v21 = vld [vmem:[%s2727_s1 + $0x2e4] sm:$0xf0]  ;;  %v2116_v22 = vld [vmem:[%s2727_s1 + $0x64] sm:$0xf]  ;;  %v1833_v23 = vor.u32 %v2134_v12, %v1830_v13  ;;  %v1758_v24 = vld [vmem:[%s2727_s1 + $0x68] sm:$0xf0]  ;;  %v2013_v30 = vor.u32 %v2181_v17, %v2012_v16 }
  0xc7   : > { %1358 = vmatpush.bf16.msra.mxu3 %v1917_v49  ;;  %v2132_v25 = vld [vmem:[%s2727_s1 + $0xe4] sm:$0xf]  ;;  %v1822_v26 = vld [vmem:[%s2727_s1 + $0xe8] sm:$0xf0]  ;;  %v2004_v27 = vld [vmem:[%s2727_s1 + $0x250] sm:$0xf]  ;;  %v2077_v35 = vor.u32 %v2197_v21, %v2076_v20  ;;  %v1761_v36 = vor.u32 %v2116_v22, %v1758_v24 }
  0xc8   : > { %1317 = vmatpush.bf16.msra.mxu0 %v1717_v55  ;;  %v1684_v28 = vld [vmem:[%s2725_s6] sm:$0xf]  ;;  %v2101_v29 = vld [vmem:[%s2725_s6 + $0x14] sm:$0xf0]  ;;  %v2114_v37 = vld [vmem:[%s2727_s1 + $0x54] sm:$0xf]  ;;  %v1825_v40 = vor.u32 %v2132_v25, %v1822_v26 }
  0xc9   : > { %1331 = vmatpush.bf16.msra.mxu1 %v1781_v58  ;;  %v2179_v31 = vld [vmem:[%s2727_s1 + $0x254] sm:$0xf0]  ;;  %v2068_v32 = vld [vmem:[%s2727_s1 + $0x2d0] sm:$0xf]  ;;  %v2818_v34 = vor.u32 %v2101_v29, %v1684_v28  ;;  %v1750_v38 = vld [vmem:[%s2727_s1 + $0x58] sm:$0xf0] }
  0xca   : > { %1345 = vmatpush.bf16.msra.mxu2 %v1845_v59  ;;  %v2195_v33 = vld [vmem:[%s2727_s1 + $0x2d4] sm:$0xf0]  ;;  %v2130_v39 = vld [vmem:[%s2727_s1 + $0xd4] sm:$0xf]  ;;  %v1814_v41 = vld [vmem:[%s2727_s1 + $0xd8] sm:$0xf0]  ;;  %v2005_v48 = vor.u32 %v2179_v31, %v2004_v27  ;;  %v1753_v52 = vor.u32 %v2114_v37, %v1750_v38 }
  0xcb   : > { %1359 = vmatpush.bf16.msra.mxu3 %v1909_v63  ;;  %v2098_v42 = vld [vmem:[%s2725_s6 + $0x4] sm:$0xf]  ;;  %v1686_v43 = vld [vmem:[%s2725_s6 + $0x18] sm:$0xf0]  ;;  %v1692_v45 = vld [vmem:[%s2725_s6 + $0x8] sm:$0xf]  ;;  %v2069_v51 = vor.u32 %v2195_v33, %v2068_v32  ;;  %v1817_v57 = vor.u32 %v2130_v39, %v1814_v41 }
  0xcc   : > { %1318 = vmatpush.bf16.msra.mxu0 %v1709_v6  ;;  %v2827_v44 = vor.u32 %v2098_v42, %v1686_v43  ;;  %v2102_v46 = vld [vmem:[%s2725_s6 + $0x1c] sm:$0xf0]  ;;  %v2099_v47 = vld [vmem:[%s2725_s6 + $0xc] sm:$0xf]  ;;  %v1694_v50 = vld [vmem:[%s2725_s6 + $0x20] sm:$0xf0] }
  0xcd   : > { %1332 = vmatpush.bf16.msra.mxu1 %v1773_v10  ;;  %v2832_v49 = vor.u32 %v2102_v46, %v1692_v45  ;;  %v1996_v53 = vld [vmem:[%s2727_s1 + $0x240] sm:$0xf]  ;;  %v2177_v54 = vld [vmem:[%s2727_s1 + $0x244] sm:$0xf0]  ;;  %v2838_v56 = vor.u32 %v2099_v47, %v1694_v50  ;;  %v2112_v59 = vld [vmem:[%s2727_s1 + $0x44] sm:$0xf] }
  0xce   : > { %1346 = vmatpush.bf16.msra.mxu2 %v1837_v11  ;;  %v2060_v55 = vld [vmem:[%s2727_s1 + $0x2c0] sm:$0xf]  ;;  %v2193_v58 = vld [vmem:[%s2727_s1 + $0x2c4] sm:$0xf0]  ;;  %v1742_v60 = vld [vmem:[%s2727_s1 + $0x48] sm:$0xf0]  ;;  %v1997_v63 = vor.u32 %v2177_v54, %v1996_v53 }
  0xcf   : > { %1360 = vmatpush.bf16.msra.mxu3 %v1901_v14  ;;  %1319 = vmatmul.bf16.vlgmr.msra.gmra.mxu0 %v2818_v34  ;;  %v2128_v61 = vld [vmem:[%s2727_s1 + $0xc4] sm:$0xf]  ;;  %v1806_v62 = vld [vmem:[%s2727_s1 + $0xc8] sm:$0xf0]  ;;  %v2061_v0 = vor.u32 %v2193_v58, %v2060_v55  ;;  %v1745_v1 = vor.u32 %v2112_v59, %v1742_v60  ;;  %v1988_v2 = vld [vmem:[%s2727_s1 + $0x230] sm:$0xf] }
  0xd0   : > { %1367 = vmatpush.bf16.msrb.mxu0 %v2021_v15  ;;  %1333 = vmatmul.bf16.vlgmr.msra.gmra.mxu1 %v2827_v44  ;;  %v2175_v3 = vld [vmem:[%s2727_s1 + $0x234] sm:$0xf0]  ;;  %v2052_v4 = vld [vmem:[%s2727_s1 + $0x2b0] sm:$0xf]  ;;  %v1809_v5 = vor.u32 %v2128_v61, %v1806_v62  ;;  %v2110_v7 = vld [vmem:[%s2727_s1 + $0x34] sm:$0xf] }
  0xd1   : > { %1381 = vmatpush.bf16.msrb.mxu1 %v2085_v18  ;;  %1347 = vmatmul.bf16.vlgmr.msra.gmra.mxu2 %v2832_v49  ;;  %v2191_v6 = vld [vmem:[%s2727_s1 + $0x2b4] sm:$0xf0]  ;;  %v1734_v8 = vld [vmem:[%s2727_s1 + $0x38] sm:$0xf0]  ;;  %v2126_v9 = vld [vmem:[%s2727_s1 + $0xb4] sm:$0xf]  ;;  %v1989_v11 = vor.u32 %v2175_v3, %v1988_v2 }
  0xd2   : > { %1395 = vmatpush.bf16.msrb.mxu2 %v1769_v19  ;;  %1361 = vmatmul.bf16.vlgmr.msra.gmra.mxu3 %v2838_v56  ;;  %v1798_v10 = vld [vmem:[%s2727_s1 + $0xb8] sm:$0xf0]  ;;  %v2053_v12 = vor.u32 %v2191_v6, %v2052_v4  ;;  %v1737_v13 = vor.u32 %v2110_v7, %v1734_v8  ;;  %v1980_v14 = vld [vmem:[%s2727_s1 + $0x220] sm:$0xf]  ;;  %v2173_v15 = vld [vmem:[%s2727_s1 + $0x224] sm:$0xf0] }
  0xd3   : > { %1409 = vmatpush.bf16.msrb.mxu3 %v1833_v23  ;;  %v2044_v16 = vld [vmem:[%s2727_s1 + $0x2a0] sm:$0xf]  ;;  %v1801_v17 = vor.u32 %v2126_v9, %v1798_v10  ;;  %v2189_v18 = vld [vmem:[%s2727_s1 + $0x2a4] sm:$0xf0]  ;;  %v2108_v19 = vld [vmem:[%s2727_s1 + $0x24] sm:$0xf]  ;;  %v1981_v23 = vor.u32 %v2173_v15, %v1980_v14 }
  0xd4   : > { %1368 = vmatpush.bf16.msrb.mxu0 %v2013_v30  ;;  %v1726_v20 = vld [vmem:[%s2727_s1 + $0x28] sm:$0xf0]  ;;  %v2124_v21 = vld [vmem:[%s2727_s1 + $0xa4] sm:$0xf]  ;;  %v2045_v24 = vor.u32 %v2189_v18, %v2044_v16  ;;  %v1972_v26 = vld [vmem:[%s2727_s1 + $0x210] sm:$0xf] }
  0xd5   : > { %1382 = vmatpush.bf16.msrb.mxu1 %v2077_v35  ;;  %v1790_v22 = vld [vmem:[%s2727_s1 + $0xa8] sm:$0xf0]  ;;  %v1729_v25 = vor.u32 %v2108_v19, %v1726_v20  ;;  %v2171_v27 = vld [vmem:[%s2727_s1 + $0x214] sm:$0xf0]  ;;  %v2036_v28 = vld [vmem:[%s2727_s1 + $0x290] sm:$0xf] }
  0xd6   : > { %1396 = vmatpush.bf16.msrb.mxu2 %v1761_v36  ;;  %v1793_v29 = vor.u32 %v2124_v21, %v1790_v22  ;;  %v2187_v30 = vld [vmem:[%s2727_s1 + $0x294] sm:$0xf0]  ;;  %v2106_v31 = vld [vmem:[%s2727_s1 + $0x14] sm:$0xf]  ;;  %v1718_v32 = vld [vmem:[%s2727_s1 + $0x18] sm:$0xf0]  ;;  %v1973_v36 = vor.u32 %v2171_v27, %v1972_v26 }
  0xd7   : > { %1410 = vmatpush.bf16.msrb.mxu3 %v1825_v40  ;;  %v2122_v33 = vld [vmem:[%s2727_s1 + $0x94] sm:$0xf]  ;;  %v1782_v35 = vld [vmem:[%s2727_s1 + $0x98] sm:$0xf0]  ;;  %v1964_v37 = vld [vmem:[%s2727_s1 + $0x200] sm:$0xf]  ;;  %v2037_v40 = vor.u32 %v2187_v30, %v2036_v28  ;;  %v1721_v41 = vor.u32 %v2106_v31, %v1718_v32 }
  0xd8   : > { %1369 = vmatpush.bf16.msrb.mxu0 %v2005_v48  ;;  %v2169_v38 = vld [vmem:[%s2727_s1 + $0x204] sm:$0xf0]  ;;  %v2028_v39 = vld [vmem:[%s2727_s1 + $0x280] sm:$0xf]  ;;  %v2104_v43 = vld [vmem:[%s2727_s1 + $0x4] sm:$0xf]  ;;  %v1785_v46 = vor.u32 %v2122_v33, %v1782_v35 }
  0xd9   : > { %1383 = vmatpush.bf16.msrb.mxu1 %v2069_v51  ;;  %v2185_v42 = vld [vmem:[%s2727_s1 + $0x284] sm:$0xf0]  ;;  %v1710_v45 = vld [vmem:[%s2727_s1 + $0x8] sm:$0xf0]  ;;  %v2120_v47 = vld [vmem:[%s2727_s1 + $0x84] sm:$0xf]  ;;  %v1965_v54 = vor.u32 %v2169_v38, %v1964_v37 }
  0xda   : > { %1397 = vmatpush.bf16.msrb.mxu2 %v1753_v52  ;;  %v1774_v48 = vld [vmem:[%s2727_s1 + $0x88] sm:$0xf0]  ;;  %v2150_v50 = vld [vmem:[%s2727_s1 + $0x174] sm:$0xf]  ;;  %v1894_v51 = vld [vmem:[%s2727_s1 + $0x178] sm:$0xf0]  ;;  %v2029_v59 = vor.u32 %v2185_v42, %v2028_v39  ;;  %v1713_v60 = vor.u32 %v2104_v43, %v1710_v45 }
  0xdb   : > { %1411 = vmatpush.bf16.msrb.mxu3 %v1817_v57  ;;  %v2166_v52 = vld [vmem:[%s2727_s1 + $0x1f4] sm:$0xf]  ;;  %v1958_v53 = vld [vmem:[%s2727_s1 + $0x1f8] sm:$0xf0]  ;;  %v1700_v62 = vld [vmem:[%s2725_s6 + $0x10] sm:$0xf] }
  0xdc   : > { %1370 = vmatpush.bf16.msrb.mxu0 %v1997_v63  ;;  %v2182_v55 = vld [vmem:[%s2727_s1 + $0x274] sm:$0xf]  ;;  %v2022_v57 = vld [vmem:[%s2727_s1 + $0x278] sm:$0xf0]  ;;  %v2103_v63 = vld [vmem:[%s2725_s6 + $0x24] sm:$0xf0]  ;;  %v1961_v4 = vor.u32 %v2166_v52, %v1958_v53 }
  0xdd   : > { %1384 = vmatpush.bf16.msrb.mxu1 %v2061_v0  ;;  %v2198_v58 = vld [vmem:[%s2727_s1 + $0x2f4] sm:$0xf]  ;;  %v2086_v61 = vld [vmem:[%s2727_s1 + $0x2f8] sm:$0xf0]  ;;  %v1777_v0 = vor.u32 %v2120_v47, %v1774_v48  ;;  %v2148_v6 = vld [vmem:[%s2727_s1 + $0x164] sm:$0xf]  ;;  %v2895_v10 = vor.u32 %v2103_v63, %v1700_v62 }
  0xde   : > { %1398 = vmatpush.bf16.msrb.mxu2 %v1745_v1  ;;  %v1897_v1 = vor.u32 %v2150_v50, %v1894_v51  ;;  %v2100_v2 = vld [vmem:[%s2725_s6 + $0x14] sm:$0xf]  ;;  %v1702_v3 = vld [vmem:[%s2725_s6 + $0x28] sm:$0xf0]  ;;  %v2089_v9 = vor.u32 %v2198_v58, %v2086_v61  ;;  %p2090_p5 = scmp.ne.s32.totalorder %s2364_s18, 2 }
  0xdf   : > { %1412 = vmatpush.bf16.msrb.mxu3 %v1809_v5  ;;  %v2025_v5 = vor.u32 %v2182_v55, %v2022_v57  ;;  %v1886_v7 = vld [vmem:[%s2727_s1 + $0x168] sm:$0xf0]  ;;  %v2164_v8 = vld [vmem:[%s2727_s1 + $0x1e4] sm:$0xf]  ;;  %v2900_v14 = vor.u32 %v2100_v2, %v1702_v3  ;;  %v2146_v20 = vld [vmem:[%s2727_s1 + $0x154] sm:$0xf] }
  0xe0   : > { %1371 = vmatpush.bf16.msrb.mxu0 %v1989_v11  ;;  %v1950_v11 = vld [vmem:[%s2727_s1 + $0x1e8] sm:$0xf0]  ;;  %v2196_v15 = vld [vmem:[%s2727_s1 + $0x2e4] sm:$0xf]  ;;  %v1878_v21 = vld [vmem:[%s2727_s1 + $0x158] sm:$0xf0] }
  0xe1   : > { %1385 = vmatpush.bf16.msrb.mxu1 %v2053_v12  ;;  %v2180_v12 = vld [vmem:[%s2727_s1 + $0x264] sm:$0xf]  ;;  %v2078_v16 = vld [vmem:[%s2727_s1 + $0x2e8] sm:$0xf0]  ;;  %v1953_v18 = vor.u32 %v2164_v8, %v1950_v11  ;;  %v2162_v22 = vld [vmem:[%s2727_s1 + $0x1d4] sm:$0xf] }
  0xe2   : > { %1399 = vmatpush.bf16.msrb.mxu2 %v1737_v13  ;;  %v2014_v13 = vld [vmem:[%s2727_s1 + $0x268] sm:$0xf0]  ;;  %v2006_v26 = vld [vmem:[%s2727_s1 + $0x258] sm:$0xf0]  ;;  %v2194_v27 = vld [vmem:[%s2727_s1 + $0x2d4] sm:$0xf] }
  0xe3   : > { %1413 = vmatpush.bf16.msrb.mxu3 %v1801_v17  ;;  %v1889_v17 = vor.u32 %v2148_v6, %v1886_v7  ;;  %v2017_v19 = vor.u32 %v2180_v12, %v2014_v13  ;;  %v2070_v28 = vld [vmem:[%s2727_s1 + $0x2d8] sm:$0xf0]  ;;  %v2144_v32 = vld [vmem:[%s2727_s1 + $0x144] sm:$0xf]  ;;  %v1870_v33 = vld [vmem:[%s2727_s1 + $0x148] sm:$0xf0] }
  0xe4   : > { %1372 = vmatpush.bf16.msrb.mxu0 %v1981_v23  ;;  %v2081_v23 = vor.u32 %v2196_v15, %v2078_v16  ;;  %v2160_v35 = vld [vmem:[%s2727_s1 + $0x1c4] sm:$0xf]  ;;  %v1998_v38 = vld [vmem:[%s2727_s1 + $0x248] sm:$0xf0]  ;;  %v2142_v43 = vld [vmem:[%s2727_s1 + $0x134] sm:$0xf] }
  0xe5   : > { %1386 = vmatpush.bf16.msrb.mxu1 %v2045_v24  ;;  %v1942_v24 = vld [vmem:[%s2727_s1 + $0x1d8] sm:$0xf0]  ;;  %v2176_v37 = vld [vmem:[%s2727_s1 + $0x244] sm:$0xf]  ;;  %v2062_v39 = vld [vmem:[%s2727_s1 + $0x2c8] sm:$0xf0] }
  0xe6   : > { %1400 = vmatpush.bf16.msrb.mxu2 %v1729_v25  ;;  %v2178_v25 = vld [vmem:[%s2727_s1 + $0x254] sm:$0xf]  ;;  %v1945_v30 = vor.u32 %v2162_v22, %v1942_v24  ;;  %v2001_v42 = vor.u32 %v2176_v37, %v1998_v38  ;;  %v1862_v45 = vld [vmem:[%s2727_s1 + $0x138] sm:$0xf0]  ;;  %v2140_v58 = vld [vmem:[%s2727_s1 + $0x124] sm:$0xf] }
  0xe7   : > { %1414 = vmatpush.bf16.msrb.mxu3 %v1793_v29  ;;  %v1881_v29 = vor.u32 %v2146_v20, %v1878_v21  ;;  %v2009_v31 = vor.u32 %v2178_v25, %v2006_v26  ;;  %v1926_v48 = vld [vmem:[%s2727_s1 + $0x1b8] sm:$0xf0]  ;;  %v2174_v50 = vld [vmem:[%s2727_s1 + $0x234] sm:$0xf]  ;;  %v1918_v62 = vld [vmem:[%s2727_s1 + $0x1a8] sm:$0xf0] }
  0xe8   : > { %1373 = vmatpush.bf16.msrb.mxu0 %v1973_v36  ;;  %v1934_v36 = vld [vmem:[%s2727_s1 + $0x1c8] sm:$0xf0]  ;;  %v1990_v51 = vld [vmem:[%s2727_s1 + $0x238] sm:$0xf0]  ;;  %v2190_v52 = vld [vmem:[%s2727_s1 + $0x2b4] sm:$0xf] }
  0xe9   : > { %1387 = vmatpush.bf16.msrb.mxu1 %v2037_v40  ;;  %v1873_v40 = vor.u32 %v2144_v32, %v1870_v33  ;;  %v2054_v53 = vld [vmem:[%s2727_s1 + $0x2b8] sm:$0xf0]  ;;  %v1993_v57 = vor.u32 %v2174_v50, %v1990_v51  ;;  %v2172_v63 = vld [vmem:[%s2727_s1 + $0x224] sm:$0xf]  ;;  %v2046_v2 = vld [vmem:[%s2727_s1 + $0x2a8] sm:$0xf0] }
  0xea   : > { %1401 = vmatpush.bf16.msrb.mxu2 %v1721_v41  ;;  %v1937_v41 = vor.u32 %v2160_v35, %v1934_v36  ;;  %v2057_v61 = vor.u32 %v2190_v52, %v2054_v53  ;;  %v2138_v6 = vld [vmem:[%s2727_s1 + $0x114] sm:$0xf]  ;;  %v1846_v7 = vld [vmem:[%s2727_s1 + $0x118] sm:$0xf0]  ;;  %v2136_v20 = vld [vmem:[%s2727_s1 + $0x104] sm:$0xf] }
  0xeb   : > { %1415 = vmatpush.bf16.msrb.mxu3 %v1785_v46  ;;  %v2158_v46 = vld [vmem:[%s2727_s1 + $0x1b4] sm:$0xf]  ;;  %v1910_v11 = vld [vmem:[%s2727_s1 + $0x198] sm:$0xf0]  ;;  %v1838_v21 = vld [vmem:[%s2727_s1 + $0x108] sm:$0xf0] }
  0xec   : > { %1374 = vmatpush.bf16.msrb.mxu0 %v1965_v54  ;;  %v1865_v54 = vor.u32 %v2142_v43, %v1862_v45  ;;  %v1929_v55 = vor.u32 %v2158_v46, %v1926_v48  ;;  %v2154_v8 = vld [vmem:[%s2727_s1 + $0x194] sm:$0xf]  ;;  %v1974_v13 = vld [vmem:[%s2727_s1 + $0x218] sm:$0xf0]  ;;  %v2152_v22 = vld [vmem:[%s2727_s1 + $0x184] sm:$0xf] }
  0xed   : > { %1388 = vmatpush.bf16.msrb.mxu1 %v2029_v59  ;;  %v1854_v59 = vld [vmem:[%s2727_s1 + $0x128] sm:$0xf0]  ;;  %v2170_v12 = vld [vmem:[%s2727_s1 + $0x214] sm:$0xf]  ;;  %v2038_v16 = vld [vmem:[%s2727_s1 + $0x298] sm:$0xf0] }
  0xee   : > { %1402 = vmatpush.bf16.msrb.mxu2 %v1713_v60  ;;  %v2156_v60 = vld [vmem:[%s2727_s1 + $0x1a4] sm:$0xf]  ;;  %v1857_v3 = vor.u32 %v2140_v58, %v1854_v59  ;;  %v2186_v15 = vld [vmem:[%s2727_s1 + $0x294] sm:$0xf]  ;;  %v1902_v24 = vld [vmem:[%s2727_s1 + $0x188] sm:$0xf0] }
  0xef   : > { %1416 = vmatpush.bf16.msrb.mxu3 %v1777_v0  ;;  %1375 = vmatmul.bf16.vlgmr.msrb.gmra.mxu0 %v2895_v10  ;;  %v1982_v0 = vld [vmem:[%s2727_s1 + $0x228] sm:$0xf0]  ;;  %v2168_v25 = vld [vmem:[%s2727_s1 + $0x204] sm:$0xf]  ;;  %v695_v46 = vld [vmem:[#allocation2 + $0x10] sm:$0xff] }
  0xf0   : > { %1423 = vmatpush.bf16.msra.mxu0 %v1897_v1  ;;  %1389 = vmatmul.bf16.vlgmr.msrb.gmra.mxu1 %v2900_v14  ;;  %v2188_v1 = vld [vmem:[%s2727_s1 + $0x2a4] sm:$0xf]  ;;  %v1966_v26 = vld [vmem:[%s2727_s1 + $0x208] sm:$0xf0]  ;;  %v697_v53 = vld [vmem:[#allocation2 + $0x18] sm:$0xff] }
  0xf1   : > { %1437 = vmatpush.bf16.msra.mxu1 %v1961_v4  ;;  %1403 = vmatmul.bf16.vlgmr.msrb.gmra.mxu2 %v2818_v34  ;;  %v2073_v34 = vor.u32 %v2194_v27, %v2070_v28  ;;  %v1921_v4 = vor.u32 %v2156_v60, %v1918_v62  ;;  %v2184_v27 = vld [vmem:[%s2727_s1 + $0x284] sm:$0xf]  ;;  %v2030_v28 = vld [vmem:[%s2727_s1 + $0x288] sm:$0xf0] }
  0xf2   : > { %1451 = vmatpush.bf16.msra.mxu2 %v2025_v5  ;;  %1417 = vmatmul.bf16.vlgmr.msrb.gmra.mxu3 %v2827_v44  ;;  %v2192_v44 = vld [vmem:[%s2727_s1 + $0x2c4] sm:$0xf]  ;;  %v1985_v5 = vor.u32 %v2172_v63, %v1982_v0  ;;  %v2033_v32 = vor.u32 %v2184_v27, %v2030_v28 }
  0xf3   : > { %1465 = vmatpush.bf16.msra.mxu3 %v2089_v9  ;;  %v2065_v47 = vor.u32 %v2192_v44, %v2062_v39  ;;  %v2049_v9 = vor.u32 %v2188_v1, %v2046_v2 }
  0xf4   : > { %1424 = vmatpush.bf16.msra.mxu0 %v1889_v17  ;;  %v1849_v17 = vor.u32 %v2138_v6, %v1846_v7  ;;  %v696_v7 = vld [vmem:[#allocation2] sm:$0xff] }
  0xf5   : > { %1438 = vmatpush.bf16.msra.mxu1 %v1953_v18  ;;  %v1913_v18 = vor.u32 %v2154_v8, %v1910_v11 }
  0xf6   : > { %1452 = vmatpush.bf16.msra.mxu2 %v2017_v19  ;;  %v1977_v19 = vor.u32 %v2170_v12, %v1974_v13 }
  0xf7   : > { %1466 = vmatpush.bf16.msra.mxu3 %v2081_v23  ;;  %v2041_v23 = vor.u32 %v2186_v15, %v2038_v16 }
  0xf8   : > { %1425 = vmatpush.bf16.msra.mxu0 %v1881_v29  ;;  %v1841_v29 = vor.u32 %v2136_v20, %v1838_v21 }
  0xf9   : > { %1439 = vmatpush.bf16.msra.mxu1 %v1945_v30  ;;  %v1905_v30 = vor.u32 %v2152_v22, %v1902_v24 }
  0xfa   : > { %1453 = vmatpush.bf16.msra.mxu2 %v2009_v31  ;;  %v1969_v31 = vor.u32 %v2168_v25, %v1966_v26 }
  0xfb   : > { %1467 = vmatpush.bf16.msra.mxu3 %v2073_v34 }
  0xfc   : > { %1426 = vmatpush.bf16.msra.mxu0 %v1873_v40 }
  0xfd   : > { %1440 = vmatpush.bf16.msra.mxu1 %v1937_v41 }
  0xfe   : > { %1454 = vmatpush.bf16.msra.mxu2 %v2001_v42 }
  0xff   : > { %1468 = vmatpush.bf16.msra.mxu3 %v2065_v47 }
 0x100   : > { %1427 = vmatpush.bf16.msra.mxu0 %v1865_v54 }
 0x101   : > { %1441 = vmatpush.bf16.msra.mxu1 %v1929_v55 }
 0x102   : > { %1455 = vmatpush.bf16.msra.mxu2 %v1993_v57 }
 0x103   : > { %1469 = vmatpush.bf16.msra.mxu3 %v2057_v61 }
 0x104   : > { %1428 = vmatpush.bf16.msra.mxu0 %v1857_v3 }
 0x105   : > { %1442 = vmatpush.bf16.msra.mxu1 %v1921_v4 }
 0x106   : > { %1456 = vmatpush.bf16.msra.mxu2 %v1985_v5 }
 0x107   : > { %1470 = vmatpush.bf16.msra.mxu3 %v2049_v9 }
 0x108   : > { %1429 = vmatpush.bf16.msra.mxu0 %v1849_v17  ;;  %v698_v17 = vld [vmem:[#allocation2 + $0x8] sm:$0xff] }
 0x109   : > { %1443 = vmatpush.bf16.msra.mxu1 %v1913_v18 }
 0x10a   : > { %1457 = vmatpush.bf16.msra.mxu2 %v1977_v19 }
 0x10b   : > { %1471 = vmatpush.bf16.msra.mxu3 %v2041_v23 }
 0x10c   : > { %1430 = vmatpush.bf16.msra.mxu0 %v1841_v29 }
 0x10d   : > { %1444 = vmatpush.bf16.msra.mxu1 %v1905_v30 }
 0x10e   : > { %1458 = vmatpush.bf16.msra.mxu2 %v1969_v31 }
 0x10f   : > { %1472 = vmatpush.bf16.msra.mxu3 %v2033_v32  ;;  %1431 = vmatmul.bf16.vlgmr.msra.gmra.mxu0 %v2832_v49 }
 0x110   : > { %1445 = vmatmul.bf16.vlgmr.msra.gmra.mxu1 %v2838_v56 }
 0x111   : > { %1459 = vmatmul.bf16.vlgmr.msra.gmra.mxu2 %v2895_v10 }
 0x112   : > { %1473 = vmatmul.bf16.vlgmr.msra.gmra.mxu3 %v2900_v14 }
 0x14c   : > { %v1320_v33 = vpop.f32.mrf.mxu0 }
 0x14d   : > { %v1334_v35 = vpop.f32.mrf.mxu1 }
 0x14e   : > { %v1335_v34 = vadd.f32 %v1334_v35, %v1320_v33 }
 0x154   : > { %v1322_v36 = vpop.f32.mrf.mxu0  ;;  %v1348_v37 = vpop.f32.mrf.mxu2 }
 0x155   : > { %v1336_v38 = vpop.f32.mrf.mxu1  ;;  %v1349_v44 = vadd.f32 %v1348_v37, %v1335_v34  ;;  %v1362_v39 = vpop.f32.mrf.mxu3 }
 0x156   : > { %v1337_v41 = vadd.f32 %v1336_v38, %v1322_v36 }
 0x157   : > { %v1363_v40 = vadd.f32 %v1362_v39, %v1349_v44 }
 0x15c   : > { %v1350_v43 = vpop.f32.mrf.mxu2 }
 0x15d   : > { %v1351_v56 = vadd.f32 %v1350_v43, %v1337_v41  ;;  %v1364_v10 = vpop.f32.mrf.mxu3 }
 0x15f   : > { %v1365_v14 = vadd.f32 %v1364_v10, %v1351_v56 }
 0x16c   : > { %v1376_v42 = vpop.f32.mrf.mxu0 }
 0x16d   : > { %v1377_v45 = vadd.f32 %v1376_v42, %v1363_v40  ;;  %v1390_v49 = vpop.f32.mrf.mxu1 }
 0x16f   : > { %v1391_v47 = vadd.f32 %v1390_v49, %v1377_v45 }
 0x171   : > { %v1479_v48 = vadd.f32 %v1391_v47, %v695_v46 }
 0x173   : > { %1483 = vst [vmem:[#allocation2 + $0x10] sm:$0xff] %v1479_v48 }
 0x174   : > { %v1378_v50 = vpop.f32.mrf.mxu0  ;;  %v1404_v57 = vpop.f32.mrf.mxu2 }
 0x175   : > { %v1379_v51 = vadd.f32 %v1378_v50, %v1365_v14  ;;  %v1392_v52 = vpop.f32.mrf.mxu1  ;;  %v1418_v58 = vpop.f32.mrf.mxu3 }
 0x176   : > { %v1419_v60 = vadd.f32 %v1418_v58, %v1404_v57 }
 0x177   : > { %v1393_v54 = vadd.f32 %v1392_v52, %v1379_v51 }
 0x179   : > { %v1481_v55 = vadd.f32 %v1393_v54, %v697_v53 }
 0x17b   : > { %1485 = vst [vmem:[#allocation2 + $0x18] sm:$0xff] %v1481_v55 }
 0x17c   : > { %v1406_v59 = vpop.f32.mrf.mxu2 }
 0x17d   : > { %v1420_v61 = vpop.f32.mrf.mxu3 }
 0x17e   : > { %v1421_v3 = vadd.f32 %v1420_v61, %v1406_v59 }
 0x18c   : > { %v1432_v62 = vpop.f32.mrf.mxu0 }
 0x18d   : > { %v1433_v63 = vadd.f32 %v1432_v62, %v1419_v60  ;;  %v1446_v0 = vpop.f32.mrf.mxu1 }
 0x18f   : > { %v1447_v1 = vadd.f32 %v1446_v0, %v1433_v63 }
 0x194   : > { %v1460_v2 = vpop.f32.mrf.mxu2  ;;  %v1434_v6 = vpop.f32.mrf.mxu0 }
 0x195   : > { %v1461_v4 = vadd.f32 %v1460_v2, %v1447_v1  ;;  %v1474_v5 = vpop.f32.mrf.mxu3  ;;  %v1435_v9 = vadd.f32 %v1434_v6, %v1421_v3  ;;  %v1448_v12 = vpop.f32.mrf.mxu1 }
 0x197   : > { %v1475_v8 = vadd.f32 %v1474_v5, %v1461_v4  ;;  %v1449_v13 = vadd.f32 %v1448_v12, %v1435_v9 }
 0x199   : > { %v1480_v11 = vadd.f32 %v1475_v8, %v696_v7 }
 0x19b   : > { %1484 = vst [vmem:[#allocation2] sm:$0xff] %v1480_v11 }
 0x19c   : > { %v1462_v15 = vpop.f32.mrf.mxu2 }
 0x19d   : > { %v1463_v16 = vadd.f32 %v1462_v15, %v1449_v13  ;;  %v1476_v18 = vpop.f32.mrf.mxu3 }
 0x19f   : > { %v1477_v19 = vadd.f32 %v1476_v18, %v1463_v16  ;;  %1490 = sbr.rel (%p2090_p5) target bundleno = 434 (0x1b2), region = 101 }
 0x1a1   : > { %v1482_v20 = vadd.f32 %v1477_v19, %v698_v17 }
 0x1a3   : > { %1486 = vst [vmem:[#allocation2 + $0x8] sm:$0xff] %v1482_v20 }
 0x1a4   : > { %v1491_v21 = vld [vmem:[#allocation2 + $0x10] sm:$0xff]  ;;  %v1492_v22 = vld [vmem:[#allocation2] sm:$0xff]  ;;  %v1493_v26 = vld [vmem:[#allocation2 + $0x18] sm:$0xff] }
 0x1a5   : > { %v1495_v23 = vld [vmem:[%s683_s5] sm:$0x3] }
 0x1a6   : > { %v1497_v24 = vperm.slane %v1495_v23, 0  ;;  %v1498_v25 = vperm.slane %v1495_v23, 1 }
 0x1a8   : > { %v1501_v28 = vadd.f32 %v1497_v24, %v1491_v21  ;;  %v1502_v29 = vadd.f32 %v1498_v25, %v1492_v22  ;;  %v1503_v30 = vadd.f32 %v1497_v24, %v1493_v26 }
 0x1aa   : > { %v1494_v27 = vld [vmem:[#allocation2 + $0x8] sm:$0xff]  ;;  %v1505_v32 = vmax.f32 %v1501_v28, 0.0  ;;  %v1506_v33 = vmax.f32 %v1502_v29, 0.0  ;;  %v1507_v35 = vmax.f32 %v1503_v30, 0.0 }
 0x1ab   : > { %v1504_v31 = vadd.f32 %v1498_v25, %v1494_v27 }
 0x1ac   : > { %v1509_v36 = vpack.c.bf16 %v1506_v33, %v1505_v32 }
 0x1ad   : > { %v1508_v34 = vmax.f32 %v1504_v31, 0.0 }
 0x1ae   : > { %1511 = vst [vmem:[%s2729_s25] sm:$0xff] %v1509_v36 }
 0x1af   : > { %v1510_v37 = vpack.c.bf16 %v1508_v34, %v1507_v35 }
 0x1b1   : > { %1512 = vst [vmem:[%s2729_s25 + $0x8] sm:$0xff] %v1510_v37 }
 0x1b2 PF: > { %1519 = sbr.rel (!%p2497_p12) target bundleno = 442 (0x1ba), region = 105  ;;  %s2200_s14 = sshll.u32 (%p2497_p12), %s2368_s19, 3 }
 0x1b3   : > { %s1525_s0 = scalar_lea.vmem (%p2497_p12), %s3012_s3, %s2200_s14 }
 0x1b5   : > { %v1556_v38 = vld [vmem:[%s2729_s25] sm:$0xff] (%p2497_p12) }
 0x1b6   : > { %1557 = vst [vmem:[%s1525_s0] sm:$0xff] (%p2497_p12), %v1556_v38 }
 0x1b8   : > { %v1558_v44 = vld [vmem:[%s2729_s25 + $0x8] sm:$0xff] }
 0x1b9   : > { %1559 = vst [vmem:[%s1525_s0 + $0x10] sm:$0xff] %v1558_v44 }
 0x1ba PF: > { %s13_s22 = sadd.s32 1, %s2380_s22   ;;  %s3022_s25 = sld [smem:[#allocation6_spill]] }
 0x1bb   : > { %p10_p6 = scmp.ge.s32.totalorder %s13_s22, 8   ;;  %s3023_s12 = smov %s2344_s13 }
 0x1bc   : > { %s3024_s13 = smov %s2495_s9  ;;  %s3025_s14 = smov %s2352_s15 }
 0x1bd   : > { %s3026_s15 = smov %s2492_s8  ;;  %s3027_s16 = smov %s2360_s17 }
 0x1be   : > { %s3028_s17 = smov %s2478_s30  ;;  %s3029_s18 = smov %s2372_s20 }
 0x1bf   : > { %s3030_s19 = smov %s2376_s21  ;;  %s3031_s20 = smov %s3034_s24 }
 0x1c0   : > { %s3032_s21 = smov %s3022_s25  ;;  %12 = sbr.rel (!%p10_p6) target bundleno = 9 (0x9), region = 185 }

// kernel: _lambda_.67
= control target key start
LH: loop header
LB: loop body
LE: loop exit
PB: predicated region body
PF: predicated region fallthrough
CT: control target
= control target key end

     0   :  { %s1159_s12 = smov 0   ;;  %s1161_s13 = smov 0   ;;  %s1385_s0 = inlined_call_operand.vmem [shape: bf16[16,256], index: 0, kind: input, shape index: {}]   ;;  %s1386_s1 = inlined_call_operand.vmem [shape: bf16[256,512], index: 1, kind: input, shape index: {}]   ;;  %s1387_s2 = inlined_call_operand.vmem [shape: f32[1,512], index: 2, kind: input, shape index: {}]   ;;  %s1388_s3 = inlined_call_operand.vmem [shape: bf16[16,512], index: 3, kind: output, shape index: {}]  }
   0x1   :  { %s1163_s14 = smov 0   ;;  %s1165_s15 = smov 0  }
   0x2   :  { %s1167_s16 = smov 0  }
   0x3 LB: > { %s28_s17 = sadd.s32 1, %s1133_s15  ;;  %s870_s18 = sadd.s32 4294967295, %s1137_s16   ;;  %s1137_s16 = sphi %s1167_s16, %s13_s16   ;;  %s1133_s15 = sphi %s1165_s15, %s1393_s15   ;;  %s1129_s14 = sphi %s1163_s14, %s1392_s14   ;;  %s1125_s13 = sphi %s1161_s13, %s1391_s13   ;;  %s1121_s12 = sphi %s1159_s12, %s1390_s12  }
   0x4   : > { %p30_p0 = scmp.ge.s32.totalorder %s28_s17, 2  ;;  %p76_p1 = scmp.ne.s32.totalorder %s1125_s13, %s1121_s12 }
   0x5   : > { %p77_p2 = scmp.eq.s32.totalorder %s1137_s16, 0  ;;  %p134_p4 = scmp.eq.s32.totalorder %s870_s18, 1 }
   0x6   : > { %s1395_s17 = smov (%p30_p0, %s28_s17), 0  ;;  %s69_s20 = sadd.s32 1, %s1125_s13 }
   0x7   : > { %p78_p3 = por %p77_p2, %p76_p1  ;;  %s65_s19 = ssub.s32 %s1133_s15, %s1395_s17 }
   0x8   : > { %p67_p5 = scmp.eq.s32.totalorder %s65_s19, 0  ;;  %p1194_p6 = por %p134_p4, %p76_p1 }
   0x9   : > { %p874_p7 = scmp.ge.s32.totalorder %s1137_s16, 2 }
   0xa   : > { %s1199_s22 = scalar_select %p67_p5, %s1125_s13, %s69_s20  }
   0xb   : > { %171 = sbr.rel (%p874_p7) target bundleno = 52 (0x34), region = 20 }
  0x10   : > { %174 = sbr.rel (!%p78_p3) target bundleno = 52 (0x34), region = 24  ;;  %s176_s23 = sand.u32 (%p78_p3), 1, %s1125_s13  }
  0x11   : > { %s1023_s24 = sshll.u32 (%p78_p3), %s1133_s15, 3  ;;  %s875_s25 = sshll.u32 (%p78_p3), %s176_s23, 8 }
  0x12   : > { %s1207_s28 = scalar_lea.vmem (%p78_p3), %s1386_s1, %s1023_s24  ;;  %s1212_s29 = scalar_lea.vmem (%p78_p3), [#allocation3], %s875_s25 }
  0x13   : > { %v275_v0 = vld [vmem:[%s1207_s28] sm:$0xff] (%p78_p3)  ;;  %v277_v1 = vld [vmem:[%s1207_s28 + $0x10] sm:$0xff] (%p78_p3) }
  0x14   : > { %v279_v2 = vld [vmem:[%s1207_s28 + $0x20] sm:$0xff] (%p78_p3)  ;;  %276 = vst [vmem:[%s1212_s29] sm:$0xff] (%p78_p3), %v275_v0  ;;  %v281_v3 = vld [vmem:[%s1207_s28 + $0x30] sm:$0xff] (%p78_p3) }
  0x15   : > { %278 = vst [vmem:[%s1212_s29 + $0x8] sm:$0xff] %v277_v1  ;;  %v283_v4 = vld [vmem:[%s1207_s28 + $0x40] sm:$0xff]  ;;  %v285_v5 = vld [vmem:[%s1207_s28 + $0x50] sm:$0xff] }
  0x16   : > { %280 = vst [vmem:[%s1212_s29 + $0x10] sm:$0xff] %v279_v2  ;;  %v287_v6 = vld [vmem:[%s1207_s28 + $0x60] sm:$0xff]  ;;  %v289_v7 = vld [vmem:[%s1207_s28 + $0x70] sm:$0xff] }
  0x17   : > { %282 = vst [vmem:[%s1212_s29 + $0x18] sm:$0xff] %v281_v3  ;;  %v291_v8 = vld [vmem:[%s1207_s28 + $0x80] sm:$0xff]  ;;  %v293_v9 = vld [vmem:[%s1207_s28 + $0x90] sm:$0xff] }
  0x18   : > { %284 = vst [vmem:[%s1212_s29 + $0x20] sm:$0xff] %v283_v4  ;;  %v295_v10 = vld [vmem:[%s1207_s28 + $0xa0] sm:$0xff]  ;;  %v297_v11 = vld [vmem:[%s1207_s28 + $0xb0] sm:$0xff] }
  0x19   : > { %286 = vst [vmem:[%s1212_s29 + $0x28] sm:$0xff] %v285_v5  ;;  %v299_v12 = vld [vmem:[%s1207_s28 + $0xc0] sm:$0xff]  ;;  %v301_v13 = vld [vmem:[%s1207_s28 + $0xd0] sm:$0xff] }
  0x1a   : > { %288 = vst [vmem:[%s1212_s29 + $0x30] sm:$0xff] %v287_v6  ;;  %v303_v14 = vld [vmem:[%s1207_s28 + $0xe0] sm:$0xff]  ;;  %v305_v15 = vld [vmem:[%s1207_s28 + $0xf0] sm:$0xff] }
  0x1b   : > { %290 = vst [vmem:[%s1212_s29 + $0x38] sm:$0xff] %v289_v7  ;;  %v307_v16 = vld [vmem:[%s1207_s28 + $0x100] sm:$0xff]  ;;  %v309_v17 = vld [vmem:[%s1207_s28 + $0x110] sm:$0xff] }
  0x1c   : > { %292 = vst [vmem:[%s1212_s29 + $0x40] sm:$0xff] %v291_v8  ;;  %v311_v18 = vld [vmem:[%s1207_s28 + $0x120] sm:$0xff]  ;;  %v313_v19 = vld [vmem:[%s1207_s28 + $0x130] sm:$0xff] }
  0x1d   : > { %294 = vst [vmem:[%s1212_s29 + $0x48] sm:$0xff] %v293_v9  ;;  %v315_v20 = vld [vmem:[%s1207_s28 + $0x140] sm:$0xff]  ;;  %v317_v21 = vld [vmem:[%s1207_s28 + $0x150] sm:$0xff] }
  0x1e   : > { %296 = vst [vmem:[%s1212_s29 + $0x50] sm:$0xff] %v295_v10  ;;  %v319_v22 = vld [vmem:[%s1207_s28 + $0x160] sm:$0xff]  ;;  %v321_v23 = vld [vmem:[%s1207_s28 + $0x170] sm:$0xff] }
  0x1f   : > { %298 = vst [vmem:[%s1212_s29 + $0x58] sm:$0xff] %v297_v11  ;;  %v323_v24 = vld [vmem:[%s1207_s28 + $0x180] sm:$0xff]  ;;  %v325_v25 = vld [vmem:[%s1207_s28 + $0x190] sm:$0xff] }
  0x20   : > { %300 = vst [vmem:[%s1212_s29 + $0x60] sm:$0xff] %v299_v12  ;;  %v327_v26 = vld [vmem:[%s1207_s28 + $0x1a0] sm:$0xff]  ;;  %v329_v27 = vld [vmem:[%s1207_s28 + $0x1b0] sm:$0xff] }
  0x21   : > { %302 = vst [vmem:[%s1212_s29 + $0x68] sm:$0xff] %v301_v13  ;;  %v331_v28 = vld [vmem:[%s1207_s28 + $0x1c0] sm:$0xff]  ;;  %v333_v29 = vld [vmem:[%s1207_s28 + $0x1d0] sm:$0xff] }
  0x22   : > { %304 = vst [vmem:[%s1212_s29 + $0x70] sm:$0xff] %v303_v14  ;;  %v335_v30 = vld [vmem:[%s1207_s28 + $0x1e0] sm:$0xff]  ;;  %v337_v31 = vld [vmem:[%s1207_s28 + $0x1f0] sm:$0xff] }
  0x23   : > { %306 = vst [vmem:[%s1212_s29 + $0x78] sm:$0xff] %v305_v15 }
  0x24   : > { %308 = vst [vmem:[%s1212_s29 + $0x80] sm:$0xff] %v307_v16 }
  0x25   : > { %310 = vst [vmem:[%s1212_s29 + $0x88] sm:$0xff] %v309_v17 }
  0x26   : > { %312 = vst [vmem:[%s1212_s29 + $0x90] sm:$0xff] %v311_v18 }
  0x27   : > { %314 = vst [vmem:[%s1212_s29 + $0x98] sm:$0xff] %v313_v19 }
  0x28   : > { %316 = vst [vmem:[%s1212_s29 + $0xa0] sm:$0xff] %v315_v20 }
  0x29   : > { %318 = vst [vmem:[%s1212_s29 + $0xa8] sm:$0xff] %v317_v21 }
  0x2a   : > { %320 = vst [vmem:[%s1212_s29 + $0xb0] sm:$0xff] %v319_v22 }
  0x2b   : > { %322 = vst [vmem:[%s1212_s29 + $0xb8] sm:$0xff] %v321_v23 }
  0x2c   : > { %324 = vst [vmem:[%s1212_s29 + $0xc0] sm:$0xff] %v323_v24 }
  0x2d   : > { %326 = vst [vmem:[%s1212_s29 + $0xc8] sm:$0xff] %v325_v25 }
  0x2e   : > { %328 = vst [vmem:[%s1212_s29 + $0xd0] sm:$0xff] %v327_v26 }
  0x2f   : > { %330 = vst [vmem:[%s1212_s29 + $0xd8] sm:$0xff] %v329_v27 }
  0x30   : > { %332 = vst [vmem:[%s1212_s29 + $0xe0] sm:$0xff] %v331_v28 }
  0x31   : > { %334 = vst [vmem:[%s1212_s29 + $0xe8] sm:$0xff] %v333_v29 }
  0x32   : > { %336 = vst [vmem:[%s1212_s29 + $0xf0] sm:$0xff] %v335_v30 }
  0x33   : > { %338 = vst [vmem:[%s1212_s29 + $0xf8] sm:$0xff] %v337_v31 }
  0x34 PF: > { %p878_p8 = scmp.ge.s32.totalorder %s1137_s16, 1  ;;  %p351_p9 = scmp.lt.s32.totalorder %s1137_s16, 3 }
  0x36   : > { %p352_p10 = pnand %p878_p8, %p351_p9 }
  0x37   : > { %s358_s30 = sand.u32 (!%p352_p10), 1, %s1121_s12   ;;  %s881_s20 = sshll.u32 (!%p352_p10), %s1129_s14, 1 }
  0x38   : > { %355 = sbr.rel (%p352_p10) target bundleno = 252 (0xfc), region = 66  ;;  %s879_s4 = sshll.u32 (!%p352_p10), %s358_s30, 8 }
  0x39   : > { %s1280_s5 = scalar_lea.vmem (!%p352_p10), [#allocation3], %s879_s4  ;;  %p409_p11 = scmp.lt.s32.totalorder (!%p352_p10), %s881_s20, 3 }
  0x3a   : > { %s880_s26 = sshll.u32 (!%p352_p10), %s358_s30, 4 }
  0x3b   : > { %s393_s27 = scalar_lea.vmem (!%p352_p10), [#allocation4], %s880_s26 }
  0x3d   : > { %v948_v32 = vld [vmem:[%s1280_s5 + $0x70] sm:$0xf]  ;;  %v1041_v33 = vld [vmem:[%s1280_s5 + $0x74] sm:$0xf0]  ;;  %v1040_v37 = vld [vmem:[%s1280_s5 + $0x74] sm:$0xf] }
  0x3e   : > { %v1012_v34 = vld [vmem:[%s1280_s5 + $0xf0] sm:$0xf]  ;;  %v949_v35 = vor.u32 %v1041_v33, %v948_v32  ;;  %v1057_v36 = vld [vmem:[%s1280_s5 + $0xf4] sm:$0xf0]  ;;  %v950_v38 = vld [vmem:[%s1280_s5 + $0x78] sm:$0xf0] }
  0x3f   : > { %v1013_v39 = vor.u32 %v1057_v36, %v1012_v34  ;;  %v953_v40 = vor.u32 %v1040_v37, %v950_v38  ;;  %v1056_v41 = vld [vmem:[%s1280_s5 + $0xf4] sm:$0xf]  ;;  %v1014_v42 = vld [vmem:[%s1280_s5 + $0xf8] sm:$0xf0]  ;;  %v940_v43 = vld [vmem:[%s1280_s5 + $0x60] sm:$0xf] }
  0x40   : > { %631 = vmatpush.bf16.msra.mxu0 %v949_v35  ;;  %v1017_v44 = vor.u32 %v1056_v41, %v1014_v42  ;;  %v1039_v45 = vld [vmem:[%s1280_s5 + $0x64] sm:$0xf0]  ;;  %v1004_v46 = vld [vmem:[%s1280_s5 + $0xe0] sm:$0xf]  ;;  %v1038_v50 = vld [vmem:[%s1280_s5 + $0x64] sm:$0xf] }
  0x41   : > { %v1055_v47 = vld [vmem:[%s1280_s5 + $0xe4] sm:$0xf0]  ;;  %645 = vmatpush.bf16.msra.mxu1 %v1013_v39  ;;  %659 = vmatpush.bf16.msra.mxu2 %v953_v40  ;;  %v941_v48 = vor.u32 %v1039_v45, %v940_v43  ;;  %v942_v51 = vld [vmem:[%s1280_s5 + $0x68] sm:$0xf0]  ;;  %v1054_v52 = vld [vmem:[%s1280_s5 + $0xe4] sm:$0xf] }
  0x42   : > { %v1005_v49 = vor.u32 %v1055_v47, %v1004_v46  ;;  %673 = vmatpush.bf16.msra.mxu3 %v1017_v44  ;;  %v945_v53 = vor.u32 %v1038_v50, %v942_v51  ;;  %v1006_v54 = vld [vmem:[%s1280_s5 + $0xe8] sm:$0xf0]  ;;  %v932_v55 = vld [vmem:[%s1280_s5 + $0x50] sm:$0xf]  ;;  %v1037_v56 = vld [vmem:[%s1280_s5 + $0x54] sm:$0xf0] }
  0x43   : > { %v1009_v57 = vor.u32 %v1054_v52, %v1006_v54  ;;  %v996_v58 = vld [vmem:[%s1280_s5 + $0xd0] sm:$0xf]  ;;  %v1053_v59 = vld [vmem:[%s1280_s5 + $0xd4] sm:$0xf0]  ;;  %v1036_v60 = vld [vmem:[%s1280_s5 + $0x54] sm:$0xf]  ;;  %v933_v61 = vor.u32 %v1037_v56, %v932_v55 }
  0x44   : > { %632 = vmatpush.bf16.msra.mxu0 %v941_v48  ;;  %v934_v62 = vld [vmem:[%s1280_s5 + $0x58] sm:$0xf0]  ;;  %v1052_v63 = vld [vmem:[%s1280_s5 + $0xd4] sm:$0xf]  ;;  %v997_v1 = vor.u32 %v1053_v59, %v996_v58  ;;  %v924_v3 = vld [vmem:[%s1280_s5 + $0x40] sm:$0xf] }
  0x45   : > { %v998_v0 = vld [vmem:[%s1280_s5 + $0xd8] sm:$0xf0]  ;;  %646 = vmatpush.bf16.msra.mxu1 %v1005_v49  ;;  %660 = vmatpush.bf16.msra.mxu2 %v945_v53  ;;  %v937_v2 = vor.u32 %v1036_v60, %v934_v62  ;;  %v1035_v4 = vld [vmem:[%s1280_s5 + $0x44] sm:$0xf0]  ;;  %v988_v5 = vld [vmem:[%s1280_s5 + $0xc0] sm:$0xf] }
  0x46   : > { %674 = vmatpush.bf16.msra.mxu3 %v1009_v57  ;;  %v1001_v6 = vor.u32 %v1052_v63, %v998_v0  ;;  %v1051_v7 = vld [vmem:[%s1280_s5 + $0xc4] sm:$0xf0]  ;;  %v1034_v8 = vld [vmem:[%s1280_s5 + $0x44] sm:$0xf]  ;;  %v926_v9 = vld [vmem:[%s1280_s5 + $0x48] sm:$0xf0]  ;;  %v925_v12 = vor.u32 %v1035_v4, %v924_v3 }
  0x47   : > { %v1050_v10 = vld [vmem:[%s1280_s5 + $0xc4] sm:$0xf]  ;;  %v990_v11 = vld [vmem:[%s1280_s5 + $0xc8] sm:$0xf0]  ;;  %v989_v13 = vor.u32 %v1051_v7, %v988_v5  ;;  %v929_v14 = vor.u32 %v1034_v8, %v926_v9  ;;  %v916_v15 = vld [vmem:[%s1280_s5 + $0x30] sm:$0xf] }
  0x48   : > { %633 = vmatpush.bf16.msra.mxu0 %v933_v61  ;;  %v1033_v16 = vld [vmem:[%s1280_s5 + $0x34] sm:$0xf0]  ;;  %v980_v17 = vld [vmem:[%s1280_s5 + $0xb0] sm:$0xf]  ;;  %v993_v18 = vor.u32 %v1050_v10, %v990_v11  ;;  %v1032_v20 = vld [vmem:[%s1280_s5 + $0x34] sm:$0xf] }
  0x49   : > { %647 = vmatpush.bf16.msra.mxu1 %v997_v1  ;;  %661 = vmatpush.bf16.msra.mxu2 %v937_v2  ;;  %v1049_v19 = vld [vmem:[%s1280_s5 + $0xb4] sm:$0xf0]  ;;  %v918_v21 = vld [vmem:[%s1280_s5 + $0x38] sm:$0xf0]  ;;  %v1048_v22 = vld [vmem:[%s1280_s5 + $0xb4] sm:$0xf]  ;;  %v917_v24 = vor.u32 %v1033_v16, %v916_v15 }
  0x4a   : > { %675 = vmatpush.bf16.msra.mxu3 %v1001_v6  ;;  %v982_v23 = vld [vmem:[%s1280_s5 + $0xb8] sm:$0xf0]  ;;  %v981_v25 = vor.u32 %v1049_v19, %v980_v17  ;;  %v921_v26 = vor.u32 %v1032_v20, %v918_v21  ;;  %v908_v27 = vld [vmem:[%s1280_s5 + $0x20] sm:$0xf]  ;;  %v1031_v28 = vld [vmem:[%s1280_s5 + $0x24] sm:$0xf0] }
  0x4b   : > { %v972_v29 = vld [vmem:[%s1280_s5 + $0xa0] sm:$0xf]  ;;  %v985_v30 = vor.u32 %v1048_v22, %v982_v23  ;;  %v1047_v31 = vld [vmem:[%s1280_s5 + $0xa4] sm:$0xf0]  ;;  %v1030_v32 = vld [vmem:[%s1280_s5 + $0x24] sm:$0xf]  ;;  %v909_v36 = vor.u32 %v1031_v28, %v908_v27 }
  0x4c   : > { %634 = vmatpush.bf16.msra.mxu0 %v925_v12  ;;  %v910_v33 = vld [vmem:[%s1280_s5 + $0x28] sm:$0xf0]  ;;  %v1046_v34 = vld [vmem:[%s1280_s5 + $0xa4] sm:$0xf]  ;;  %v973_v37 = vor.u32 %v1047_v31, %v972_v29  ;;  %v900_v39 = vld [vmem:[%s1280_s5 + $0x10] sm:$0xf] }
  0x4d   : > { %648 = vmatpush.bf16.msra.mxu1 %v989_v13  ;;  %662 = vmatpush.bf16.msra.mxu2 %v929_v14  ;;  %v974_v35 = vld [vmem:[%s1280_s5 + $0xa8] sm:$0xf0]  ;;  %v913_v38 = vor.u32 %v1030_v32, %v910_v33  ;;  %v1029_v40 = vld [vmem:[%s1280_s5 + $0x14] sm:$0xf0]  ;;  %v964_v41 = vld [vmem:[%s1280_s5 + $0x90] sm:$0xf] }
  0x4e   : > { %676 = vmatpush.bf16.msra.mxu3 %v993_v18  ;;  %v977_v42 = vor.u32 %v1046_v34, %v974_v35  ;;  %v1045_v43 = vld [vmem:[%s1280_s5 + $0x94] sm:$0xf0]  ;;  %v1028_v44 = vld [vmem:[%s1280_s5 + $0x14] sm:$0xf]  ;;  %v902_v45 = vld [vmem:[%s1280_s5 + $0x18] sm:$0xf0]  ;;  %v901_v48 = vor.u32 %v1029_v40, %v900_v39 }
  0x4f   : > { %v1044_v46 = vld [vmem:[%s1280_s5 + $0x94] sm:$0xf]  ;;  %v966_v47 = vld [vmem:[%s1280_s5 + $0x98] sm:$0xf0]  ;;  %v965_v49 = vor.u32 %v1045_v43, %v964_v41  ;;  %v905_v50 = vor.u32 %v1028_v44, %v902_v45  ;;  %v892_v51 = vld [vmem:[%s1280_s5] sm:$0xf] }
  0x50   : > { %635 = vmatpush.bf16.msra.mxu0 %v917_v24  ;;  %v1027_v52 = vld [vmem:[%s1280_s5 + $0x4] sm:$0xf0]  ;;  %v956_v53 = vld [vmem:[%s1280_s5 + $0x80] sm:$0xf]  ;;  %v969_v54 = vor.u32 %v1044_v46, %v966_v47  ;;  %v1026_v56 = vld [vmem:[%s1280_s5 + $0x4] sm:$0xf] }
  0x51   : > { %649 = vmatpush.bf16.msra.mxu1 %v981_v25  ;;  %663 = vmatpush.bf16.msra.mxu2 %v921_v26  ;;  %v1043_v55 = vld [vmem:[%s1280_s5 + $0x84] sm:$0xf0]  ;;  %v894_v57 = vld [vmem:[%s1280_s5 + $0x8] sm:$0xf0]  ;;  %v1042_v58 = vld [vmem:[%s1280_s5 + $0x84] sm:$0xf]  ;;  %v893_v60 = vor.u32 %v1027_v52, %v892_v51 }
  0x52   : > { %677 = vmatpush.bf16.msra.mxu3 %v985_v30  ;;  %v958_v59 = vld [vmem:[%s1280_s5 + $0x88] sm:$0xf0]  ;;  %v884_v61 = vld [vmem:[%s1385_s0] sm:$0xf]  ;;  %v1025_v62 = vld [vmem:[%s1385_s0 + $0x4] sm:$0xf0]  ;;  %v957_v63 = vor.u32 %v1043_v55, %v956_v53  ;;  %v897_v0 = vor.u32 %v1026_v56, %v894_v57 }
  0x53   : > { %v1024_v1 = vld [vmem:[%s1385_s0 + $0x4] sm:$0xf]  ;;  %v886_v2 = vld [vmem:[%s1385_s0 + $0x8] sm:$0xf0]  ;;  %v961_v3 = vor.u32 %v1042_v58, %v958_v59  ;;  %v885_v4 = vor.u32 %v1025_v62, %v884_v61  ;;  %s1397_s20 = smov (!%p409_p11, %s881_s20), 3  ;;  %s1058_s12 = sshll.u32 (%p1194_p6), %s1129_s14, 3 }
  0x54   : > { %636 = vmatpush.bf16.msra.mxu0 %v909_v36  ;;  %v889_v5 = vor.u32 %v1024_v1, %v886_v2  ;;  %s411_s25 = scalar_lea.vmem %s1387_s2, %s1397_s20  ;;  %s728_s30 = scalar_lea.vmem (%p1194_p6), %s1388_s3, %s1058_s12 }
  0x55   : > { %650 = vmatpush.bf16.msra.mxu1 %v973_v37  ;;  %664 = vmatpush.bf16.msra.mxu2 %v913_v38  ;;  %v702_v8 = vld [vmem:[%s411_s25] sm:$0x3] }
  0x56   : > { %678 = vmatpush.bf16.msra.mxu3 %v977_v42  ;;  %v704_v10 = vperm.slane %v702_v8, 0  ;;  %v705_v12 = vperm.slane %v702_v8, 1 }
  0x58   : > { %637 = vmatpush.bf16.msra.mxu0 %v901_v48 }
  0x59   : > { %651 = vmatpush.bf16.msra.mxu1 %v965_v49  ;;  %665 = vmatpush.bf16.msra.mxu2 %v905_v50 }
  0x5a   : > { %679 = vmatpush.bf16.msra.mxu3 %v969_v54 }
  0x5c   : > { %638 = vmatpush.bf16.msra.mxu0 %v893_v60 }
  0x5d   : > { %652 = vmatpush.bf16.msra.mxu1 %v957_v63  ;;  %666 = vmatpush.bf16.msra.mxu2 %v897_v0 }
  0x5e   : > { %680 = vmatpush.bf16.msra.mxu3 %v961_v3 }
  0x5f   : > { %639 = vmatmul.bf16.vlgmr.msra.gmra.mxu0 %v885_v4 }
  0x60   : > { %653 = vmatmul.bf16.vlgmr.msra.gmra.mxu1 %v889_v5  ;;  %667 = vmatmul.bf16.vlgmr.msra.gmra.mxu2 %v885_v4 }
  0x61   : > { %681 = vmatmul.bf16.vlgmr.msra.gmra.mxu3 %v889_v5 }
  0xdc   : > { %v640_v6 = vpop.f32.mrf.mxu0 }
  0xdd   : > { %v654_v7 = vpop.f32.mrf.mxu1 }
  0xde   : > { %v655_v9 = vadd.f32 %v654_v7, %v640_v6 }
  0xe0   : > { %v708_v14 = vadd.f32 %v704_v10, %v655_v9 }
  0xe3   : > { %v668_v11 = vpop.f32.mrf.mxu2 }
  0xe4   : > { %v682_v13 = vpop.f32.mrf.mxu3  ;;  %v642_v17 = vpop.f32.mrf.mxu0 }
  0xe5   : > { %v683_v15 = vadd.f32 %v682_v13, %v668_v11  ;;  %v656_v18 = vpop.f32.mrf.mxu1 }
  0xe6   : > { %v657_v20 = vadd.f32 %v656_v18, %v642_v17 }
  0xe7   : > { %v709_v16 = vadd.f32 %v705_v12, %v683_v15 }
  0xe8   : > { %v710_v24 = vadd.f32 %v704_v10, %v657_v20 }
  0xe9   : > { %v712_v19 = vpack.c.bf16 %v709_v16, %v708_v14 }
  0xeb   : > { %714 = vst [vmem:[%s393_s27] sm:$0xff] %v712_v19  ;;  %v670_v21 = vpop.f32.mrf.mxu2 }
  0xec   : > { %v684_v22 = vpop.f32.mrf.mxu3 }
  0xed   : > { %v685_v23 = vadd.f32 %v684_v22, %v670_v21 }
  0xef   : > { %v711_v25 = vadd.f32 %v705_v12, %v685_v23  ;;  %722 = sbr.rel (!%p1194_p6) target bundleno = 252 (0xfc), region = 82 }
  0xf1   : > { %v713_v26 = vpack.c.bf16 %v711_v25, %v710_v24 }
  0xf2   : > { %v759_v27 = vld [vmem:[%s393_s27] sm:$0xff] (%p1194_p6) }
  0xf3   : > { %715 = vst [vmem:[%s393_s27 + $0x8] sm:$0xff] %v713_v26 }
  0xf4   : > { %760 = vst [vmem:[%s728_s30] sm:$0xff] %v759_v27 }
  0xfa   : > { %v761_v28 = vld [vmem:[%s393_s27 + $0x8] sm:$0xff] }
  0xfb   : > { %762 = vst [vmem:[%s728_s30 + $0x10] sm:$0xff] %v761_v28 }
  0xfc PF: > { %s13_s16 = sadd.s32 1, %s1137_s16   ;;  %s1390_s12 = smov %s1125_s13 }
  0xfd   : > { %p10_p12 = scmp.ge.s32.totalorder %s13_s16, 4   ;;  %s1391_s13 = smov %s1199_s22 }
  0xfe   : > { %s1392_s14 = smov %s1133_s15  ;;  %s1393_s15 = smov %s1395_s17 }
  0xff   :  { %12 = sbr.rel (!%p10_p12) target bundleno = 3 (0x3), region = 157 }

// kernel: _lambda_.69
= control target key start
LH: loop header
LB: loop body
LE: loop exit
PB: predicated region body
PF: predicated region fallthrough
CT: control target
= control target key end

     0   :  { %s3009_s0 = inlined_call_operand.vmem [shape: bf16[16,4608], index: 0, kind: input, shape index: {}]   ;;  %s3010_s1 = inlined_call_operand.vmem [shape: bf16[4608,512], index: 1, kind: input, shape index: {}]   ;;  %s3011_s2 = inlined_call_operand.vmem [shape: f32[1,512], index: 2, kind: input, shape index: {}]   ;;  %s3012_s3 = inlined_call_operand.vmem [shape: bf16[16,512], index: 3, kind: output, shape index: {}]  }
   0x1   :  { %3014 = sst [smem:[#allocation7_spill]] %s3009_s0 }
   0x2   :  { %3015 = sst [smem:[#allocation8_spill]] %s3010_s1 }
   0x3   :  { %s2403_s12 = smov 0   ;;  %s2405_s13 = smov 0  }
   0x4   :  { %s2407_s14 = smov 0   ;;  %s2409_s15 = smov 0  }
   0x5   :  { %s2411_s16 = smov 0   ;;  %s2413_s17 = smov 0  }
   0x6   :  { %s2415_s18 = smov 0   ;;  %s2417_s19 = smov 0  }
   0x7   :  { %s2419_s20 = smov 0   ;;  %s2421_s21 = smov 0  }
   0x8   :  { %s2423_s22 = smov 0  }
   0x9 LB: > { %s1670_s23 = sadd.s32 4294967295, %s2380_s22   ;;  %s25_s24 = sadd.s32 1, %s2372_s20  ;;  %s2380_s22 = sphi %s2423_s22, %s13_s22   ;;  %s2376_s21 = sphi %s2421_s21, %s3032_s21   ;;  %s2372_s20 = sphi %s2419_s20, %s3031_s20   ;;  %s2368_s19 = sphi %s2417_s19, %s3030_s19   ;;  %s2364_s18 = sphi %s2415_s18, %s3029_s18   ;;  %s2360_s17 = sphi %s2413_s17, %s3028_s17   ;;  %s2356_s16 = sphi %s2411_s16, %s3027_s16   ;;  %s2352_s15 = sphi %s2409_s15, %s3026_s15   ;;  %s2348_s14 = sphi %s2407_s14, %s3025_s14   ;;  %s2344_s13 = sphi %s2405_s13, %s3024_s13   ;;  %s2340_s12 = sphi %s2403_s12, %s3023_s12  }
   0xa   : > { %p26_p0 = scmp.ge.s32.totalorder %s25_s24, 6  ;;  %s28_s25 = sadd.s32 1, %s2376_s21 }
   0xb   : > { %s41_s26 = sadd.s32 1, %s2360_s17  ;;  %p48_p1 = scmp.ne.s32.totalorder %s2360_s17, %s2356_s16 }
   0xc   : > { %s3034_s24 = smov (%p26_p0, %s25_s24), 0  ;;  %s3036_s25 = smov (!%p26_p0, %s28_s25), %s2376_s21 }
   0xd   : > { %s37_s27 = ssub.s32 %s2372_s20, %s3034_s24  ;;  %p49_p2 = scmp.eq.s32.totalorder %s2380_s22, 0 }
   0xe   : > { %p30_p3 = scmp.ge.s32.totalorder %s3036_s25, 2  ;;  %p39_p4 = scmp.eq.s32.totalorder %s37_s27, 0 }
   0xf   : > { %p2470_p5 = por %p49_p2, %p48_p1  ;;  %s69_s29 = sadd.s32 1, %s2352_s15 }
  0x10   : > { %s3038_s25 = smov (%p30_p3, %s3036_s25), 0  ;;  %p76_p6 = scmp.ne.s32.totalorder %s2352_s15, %s2348_s14 }
  0x11   : > { %3017 = sst [smem:[#allocation6_spill]] %s3038_s25  ;;  %s65_s4 = ssub.s32 %s2376_s21, %s3038_s25 }
  0x12   : > { %s2478_s30 = scalar_select %p39_p4, %s2360_s17, %s41_s26  }
  0x13   : > { %s66_s5 = sor.u32 %s65_s4, %s37_s27  ;;  %p121_p7 = scmp.eq.s32.totalorder %s65_s4, 0 }
  0x14   : > { %p67_p8 = scmp.eq.s32.totalorder %s66_s5, 0  ;;  %p2484_p9 = por %p76_p6, %p49_p2 }
  0x15   : > { %s123_s7 = sadd.s32 1, %s2344_s13  ;;  %p133_p10 = scmp.ne.s32.totalorder %s2344_s13, %s2340_s12 }
  0x16   : > { %s2492_s8 = scalar_select %p67_p8, %s2352_s15, %s69_s29  }
  0x17   : > { %s2495_s9 = scalar_select %p121_p7, %s2344_s13, %s123_s7  }
  0x18   : > { %p134_p11 = scmp.eq.s32.totalorder %s1670_s23, 11  ;;  %p1673_p13 = scmp.ge.s32.totalorder %s2380_s22, 12 }
  0x1a   : > { %p2497_p12 = por %p134_p11, %p133_p10  ;;  %156 = sbr.rel (%p1673_p13) target bundleno = 152 (0x98), region = 16 }
  0x1f   : > { %159 = sbr.rel (!%p2470_p5) target bundleno = 46 (0x2e), region = 20  ;;  %s161_s11 = sand.u32 (%p2470_p5), 1, %s2360_s17  }
  0x20   : > { %s2096_s26 = smul.u32 (%p2470_p5), 24, %s2372_s20  ;;  %s3020_s0 = sld [smem:[#allocation7_spill]] (%p2470_p5) }
  0x21   : > { %s2201_s27 = smul.u32 (%p2470_p5), 48, %s161_s11 }
  0x23   : > { %s163_s23 = scalar_lea.vmem (%p2470_p5), [#allocation3], %s2201_s27 }
  0x26   : > { %s169_s5 = scalar_lea.vmem %s3020_s0, %s2096_s26 }
  0x27   : > { %v182_v0 = vld [vmem:[%s169_s5] sm:$0xff]  ;;  %v184_v1 = vld [vmem:[%s169_s5 + $0x8] sm:$0xff]  ;;  %v186_v2 = vld [vmem:[%s169_s5 + $0x10] sm:$0xff] }
  0x28   : > { %183 = vst [vmem:[%s163_s23] sm:$0xff] %v182_v0  ;;  %v188_v3 = vld [vmem:[%s169_s5 + $0x90] sm:$0xff]  ;;  %v190_v4 = vld [vmem:[%s169_s5 + $0x98] sm:$0xff]  ;;  %v192_v5 = vld [vmem:[%s169_s5 + $0xa0] sm:$0xff] }
  0x29   : > { %185 = vst [vmem:[%s163_s23 + $0x8] sm:$0xff] %v184_v1 }
  0x2a   : > { %187 = vst [vmem:[%s163_s23 + $0x10] sm:$0xff] %v186_v2 }
  0x2b   : > { %189 = vst [vmem:[%s163_s23 + $0x18] sm:$0xff] %v188_v3 }
  0x2c   : > { %191 = vst [vmem:[%s163_s23 + $0x20] sm:$0xff] %v190_v4 }
  0x2d   : > { %193 = vst [vmem:[%s163_s23 + $0x28] sm:$0xff] %v192_v5 }
  0x2e PF: > { %199 = sbr.rel (!%p2484_p9) target bundleno = 152 (0x98), region = 43  ;;  %s201_s28 = sand.u32 (%p2484_p9), 1, %s2352_s15  }
  0x2f   : > { %s2202_s7 = smul.u32 (%p2484_p9), 768, %s201_s28  ;;  %s1675_s11 = sshll.u32 (%p2484_p9), %s2376_s21, 1 }
  0x30   : > { %s2097_s26 = smul.u32 (%p2484_p9), 384, %s2372_s20  ;;  %s3021_s1 = sld [smem:[#allocation8_spill]] (%p2484_p9) }
  0x31   : > { %s2522_s6 = scalar_lea.vmem (%p2484_p9), [#allocation4], %s2202_s7 }
  0x32   : > { %s207_s27 = sadd.s32 (%p2484_p9), %s2097_s26, %s1675_s11 }
  0x33   : > { %s1677_s29 = sshll.u32 %s207_s27, 2 }
  0x36   : > { %s2517_s5 = scalar_lea.vmem %s3021_s1, %s1677_s29 }
  0x37   : > { %v428_v6 = vld [vmem:[%s2517_s5] sm:$0xff]  ;;  %v430_v7 = vld [vmem:[%s2517_s5 + $0x10] sm:$0xff] }
  0x38   : > { %v432_v8 = vld [vmem:[%s2517_s5 + $0x20] sm:$0xff]  ;;  %429 = vst [vmem:[%s2522_s6] sm:$0xff] %v428_v6  ;;  %v434_v9 = vld [vmem:[%s2517_s5 + $0x30] sm:$0xff] }
  0x39   : > { %431 = vst [vmem:[%s2522_s6 + $0x8] sm:$0xff] %v430_v7  ;;  %v436_v10 = vld [vmem:[%s2517_s5 + $0x40] sm:$0xff]  ;;  %v438_v11 = vld [vmem:[%s2517_s5 + $0x50] sm:$0xff] }
  0x3a   : > { %433 = vst [vmem:[%s2522_s6 + $0x10] sm:$0xff] %v432_v8  ;;  %v440_v12 = vld [vmem:[%s2517_s5 + $0x60] sm:$0xff]  ;;  %v442_v13 = vld [vmem:[%s2517_s5 + $0x70] sm:$0xff] }
  0x3b   : > { %435 = vst [vmem:[%s2522_s6 + $0x18] sm:$0xff] %v434_v9  ;;  %v444_v14 = vld [vmem:[%s2517_s5 + $0x80] sm:$0xff]  ;;  %v446_v15 = vld [vmem:[%s2517_s5 + $0x90] sm:$0xff] }
  0x3c   : > { %437 = vst [vmem:[%s2522_s6 + $0x20] sm:$0xff] %v436_v10  ;;  %v448_v16 = vld [vmem:[%s2517_s5 + $0xa0] sm:$0xff]  ;;  %v450_v17 = vld [vmem:[%s2517_s5 + $0xb0] sm:$0xff] }
  0x3d   : > { %439 = vst [vmem:[%s2522_s6 + $0x28] sm:$0xff] %v438_v11  ;;  %v452_v18 = vld [vmem:[%s2517_s5 + $0xc0] sm:$0xff]  ;;  %v454_v19 = vld [vmem:[%s2517_s5 + $0xd0] sm:$0xff] }
  0x3e   : > { %441 = vst [vmem:[%s2522_s6 + $0x30] sm:$0xff] %v440_v12  ;;  %v456_v20 = vld [vmem:[%s2517_s5 + $0xe0] sm:$0xff]  ;;  %v458_v21 = vld [vmem:[%s2517_s5 + $0xf0] sm:$0xff] }
  0x3f   : > { %443 = vst [vmem:[%s2522_s6 + $0x38] sm:$0xff] %v442_v13  ;;  %v460_v22 = vld [vmem:[%s2517_s5 + $0x100] sm:$0xff]  ;;  %v462_v23 = vld [vmem:[%s2517_s5 + $0x110] sm:$0xff] }
  0x40   : > { %445 = vst [vmem:[%s2522_s6 + $0x40] sm:$0xff] %v444_v14  ;;  %v464_v24 = vld [vmem:[%s2517_s5 + $0x120] sm:$0xff]  ;;  %v466_v25 = vld [vmem:[%s2517_s5 + $0x130] sm:$0xff] }
  0x41   : > { %447 = vst [vmem:[%s2522_s6 + $0x48] sm:$0xff] %v446_v15  ;;  %v468_v26 = vld [vmem:[%s2517_s5 + $0x140] sm:$0xff]  ;;  %v470_v27 = vld [vmem:[%s2517_s5 + $0x150] sm:$0xff] }
  0x42   : > { %449 = vst [vmem:[%s2522_s6 + $0x50] sm:$0xff] %v448_v16  ;;  %v472_v28 = vld [vmem:[%s2517_s5 + $0x160] sm:$0xff]  ;;  %v474_v29 = vld [vmem:[%s2517_s5 + $0x170] sm:$0xff] }
  0x43   : > { %451 = vst [vmem:[%s2522_s6 + $0x58] sm:$0xff] %v450_v17  ;;  %v476_v30 = vld [vmem:[%s2517_s5 + $0x180] sm:$0xff]  ;;  %v478_v31 = vld [vmem:[%s2517_s5 + $0x190] sm:$0xff] }
  0x44   : > { %453 = vst [vmem:[%s2522_s6 + $0x60] sm:$0xff] %v452_v18  ;;  %v480_v32 = vld [vmem:[%s2517_s5 + $0x1a0] sm:$0xff]  ;;  %v482_v33 = vld [vmem:[%s2517_s5 + $0x1b0] sm:$0xff] }
  0x45   : > { %455 = vst [vmem:[%s2522_s6 + $0x68] sm:$0xff] %v454_v19  ;;  %v484_v34 = vld [vmem:[%s2517_s5 + $0x1c0] sm:$0xff]  ;;  %v486_v35 = vld [vmem:[%s2517_s5 + $0x1d0] sm:$0xff] }
  0x46   : > { %457 = vst [vmem:[%s2522_s6 + $0x70] sm:$0xff] %v456_v20  ;;  %v488_v36 = vld [vmem:[%s2517_s5 + $0x1e0] sm:$0xff]  ;;  %v490_v37 = vld [vmem:[%s2517_s5 + $0x1f0] sm:$0xff] }
  0x47   : > { %459 = vst [vmem:[%s2522_s6 + $0x78] sm:$0xff] %v458_v21  ;;  %v492_v38 = vld [vmem:[%s2517_s5 + $0x200] sm:$0xff]  ;;  %v494_v39 = vld [vmem:[%s2517_s5 + $0x210] sm:$0xff] }
  0x48   : > { %461 = vst [vmem:[%s2522_s6 + $0x80] sm:$0xff] %v460_v22  ;;  %v496_v40 = vld [vmem:[%s2517_s5 + $0x220] sm:$0xff]  ;;  %v498_v41 = vld [vmem:[%s2517_s5 + $0x230] sm:$0xff] }
  0x49   : > { %463 = vst [vmem:[%s2522_s6 + $0x88] sm:$0xff] %v462_v23  ;;  %v500_v42 = vld [vmem:[%s2517_s5 + $0x240] sm:$0xff]  ;;  %v502_v43 = vld [vmem:[%s2517_s5 + $0x250] sm:$0xff] }
  0x4a   : > { %465 = vst [vmem:[%s2522_s6 + $0x90] sm:$0xff] %v464_v24  ;;  %v504_v44 = vld [vmem:[%s2517_s5 + $0x260] sm:$0xff]  ;;  %v506_v45 = vld [vmem:[%s2517_s5 + $0x270] sm:$0xff] }
  0x4b   : > { %467 = vst [vmem:[%s2522_s6 + $0x98] sm:$0xff] %v466_v25  ;;  %v508_v46 = vld [vmem:[%s2517_s5 + $0x280] sm:$0xff]  ;;  %v510_v47 = vld [vmem:[%s2517_s5 + $0x290] sm:$0xff] }
  0x4c   : > { %469 = vst [vmem:[%s2522_s6 + $0xa0] sm:$0xff] %v468_v26  ;;  %v512_v48 = vld [vmem:[%s2517_s5 + $0x2a0] sm:$0xff]  ;;  %v514_v49 = vld [vmem:[%s2517_s5 + $0x2b0] sm:$0xff] }
  0x4d   : > { %471 = vst [vmem:[%s2522_s6 + $0xa8] sm:$0xff] %v470_v27  ;;  %v516_v50 = vld [vmem:[%s2517_s5 + $0x2c0] sm:$0xff]  ;;  %v518_v51 = vld [vmem:[%s2517_s5 + $0x2d0] sm:$0xff] }
  0x4e   : > { %473 = vst [vmem:[%s2522_s6 + $0xb0] sm:$0xff] %v472_v28  ;;  %v520_v52 = vld [vmem:[%s2517_s5 + $0x2e0] sm:$0xff]  ;;  %v522_v53 = vld [vmem:[%s2517_s5 + $0x2f0] sm:$0xff] }
  0x4f   : > { %475 = vst [vmem:[%s2522_s6 + $0xb8] sm:$0xff] %v474_v29  ;;  %v524_v54 = vld [vmem:[%s2517_s5 + $0x300] sm:$0xff]  ;;  %v526_v55 = vld [vmem:[%s2517_s5 + $0x310] sm:$0xff] }
  0x50   : > { %477 = vst [vmem:[%s2522_s6 + $0xc0] sm:$0xff] %v476_v30  ;;  %v528_v56 = vld [vmem:[%s2517_s5 + $0x320] sm:$0xff]  ;;  %v530_v57 = vld [vmem:[%s2517_s5 + $0x330] sm:$0xff] }
  0x51   : > { %479 = vst [vmem:[%s2522_s6 + $0xc8] sm:$0xff] %v478_v31  ;;  %v532_v58 = vld [vmem:[%s2517_s5 + $0x340] sm:$0xff]  ;;  %v534_v59 = vld [vmem:[%s2517_s5 + $0x350] sm:$0xff] }
  0x52   : > { %481 = vst [vmem:[%s2522_s6 + $0xd0] sm:$0xff] %v480_v32  ;;  %v536_v60 = vld [vmem:[%s2517_s5 + $0x360] sm:$0xff]  ;;  %v538_v61 = vld [vmem:[%s2517_s5 + $0x370] sm:$0xff] }
  0x53   : > { %483 = vst [vmem:[%s2522_s6 + $0xd8] sm:$0xff] %v482_v33  ;;  %v540_v62 = vld [vmem:[%s2517_s5 + $0x380] sm:$0xff]  ;;  %v542_v63 = vld [vmem:[%s2517_s5 + $0x390] sm:$0xff] }
  0x54   : > { %485 = vst [vmem:[%s2522_s6 + $0xe0] sm:$0xff] %v484_v34  ;;  %v544_v0 = vld [vmem:[%s2517_s5 + $0x3a0] sm:$0xff]  ;;  %v546_v1 = vld [vmem:[%s2517_s5 + $0x3b0] sm:$0xff] }
  0x55   : > { %487 = vst [vmem:[%s2522_s6 + $0xe8] sm:$0xff] %v486_v35  ;;  %v548_v2 = vld [vmem:[%s2517_s5 + $0x3c0] sm:$0xff]  ;;  %v550_v3 = vld [vmem:[%s2517_s5 + $0x3d0] sm:$0xff] }
  0x56   : > { %489 = vst [vmem:[%s2522_s6 + $0xf0] sm:$0xff] %v488_v36  ;;  %v552_v4 = vld [vmem:[%s2517_s5 + $0x3e0] sm:$0xff]  ;;  %v554_v5 = vld [vmem:[%s2517_s5 + $0x3f0] sm:$0xff] }
  0x57   : > { %491 = vst [vmem:[%s2522_s6 + $0xf8] sm:$0xff] %v490_v37  ;;  %v556_v6 = vld [vmem:[%s2517_s5 + $0x400] sm:$0xff]  ;;  %v558_v7 = vld [vmem:[%s2517_s5 + $0x410] sm:$0xff] }
  0x58   : > { %493 = vst [vmem:[%s2522_s6 + $0x100] sm:$0xff] %v492_v38  ;;  %v560_v8 = vld [vmem:[%s2517_s5 + $0x420] sm:$0xff]  ;;  %v562_v9 = vld [vmem:[%s2517_s5 + $0x430] sm:$0xff] }
  0x59   : > { %495 = vst [vmem:[%s2522_s6 + $0x108] sm:$0xff] %v494_v39  ;;  %v564_v10 = vld [vmem:[%s2517_s5 + $0x440] sm:$0xff]  ;;  %v566_v11 = vld [vmem:[%s2517_s5 + $0x450] sm:$0xff] }
  0x5a   : > { %497 = vst [vmem:[%s2522_s6 + $0x110] sm:$0xff] %v496_v40  ;;  %v568_v12 = vld [vmem:[%s2517_s5 + $0x460] sm:$0xff]  ;;  %v570_v13 = vld [vmem:[%s2517_s5 + $0x470] sm:$0xff] }
  0x5b   : > { %499 = vst [vmem:[%s2522_s6 + $0x118] sm:$0xff] %v498_v41  ;;  %v572_v14 = vld [vmem:[%s2517_s5 + $0x480] sm:$0xff]  ;;  %v574_v15 = vld [vmem:[%s2517_s5 + $0x490] sm:$0xff] }
  0x5c   : > { %501 = vst [vmem:[%s2522_s6 + $0x120] sm:$0xff] %v500_v42  ;;  %v576_v16 = vld [vmem:[%s2517_s5 + $0x4a0] sm:$0xff]  ;;  %v578_v17 = vld [vmem:[%s2517_s5 + $0x4b0] sm:$0xff] }
  0x5d   : > { %503 = vst [vmem:[%s2522_s6 + $0x128] sm:$0xff] %v502_v43  ;;  %v580_v18 = vld [vmem:[%s2517_s5 + $0x4c0] sm:$0xff]  ;;  %v582_v19 = vld [vmem:[%s2517_s5 + $0x4d0] sm:$0xff] }
  0x5e   : > { %505 = vst [vmem:[%s2522_s6 + $0x130] sm:$0xff] %v504_v44  ;;  %v584_v20 = vld [vmem:[%s2517_s5 + $0x4e0] sm:$0xff]  ;;  %v586_v21 = vld [vmem:[%s2517_s5 + $0x4f0] sm:$0xff] }
  0x5f   : > { %507 = vst [vmem:[%s2522_s6 + $0x138] sm:$0xff] %v506_v45  ;;  %v588_v22 = vld [vmem:[%s2517_s5 + $0x500] sm:$0xff]  ;;  %v590_v23 = vld [vmem:[%s2517_s5 + $0x510] sm:$0xff] }
  0x60   : > { %509 = vst [vmem:[%s2522_s6 + $0x140] sm:$0xff] %v508_v46  ;;  %v592_v24 = vld [vmem:[%s2517_s5 + $0x520] sm:$0xff]  ;;  %v594_v25 = vld [vmem:[%s2517_s5 + $0x530] sm:$0xff] }
  0x61   : > { %511 = vst [vmem:[%s2522_s6 + $0x148] sm:$0xff] %v510_v47  ;;  %v596_v26 = vld [vmem:[%s2517_s5 + $0x540] sm:$0xff]  ;;  %v598_v27 = vld [vmem:[%s2517_s5 + $0x550] sm:$0xff] }
  0x62   : > { %513 = vst [vmem:[%s2522_s6 + $0x150] sm:$0xff] %v512_v48  ;;  %v600_v28 = vld [vmem:[%s2517_s5 + $0x560] sm:$0xff]  ;;  %v602_v29 = vld [vmem:[%s2517_s5 + $0x570] sm:$0xff] }
  0x63   : > { %515 = vst [vmem:[%s2522_s6 + $0x158] sm:$0xff] %v514_v49  ;;  %v604_v30 = vld [vmem:[%s2517_s5 + $0x580] sm:$0xff]  ;;  %v606_v31 = vld [vmem:[%s2517_s5 + $0x590] sm:$0xff] }
  0x64   : > { %517 = vst [vmem:[%s2522_s6 + $0x160] sm:$0xff] %v516_v50  ;;  %v608_v32 = vld [vmem:[%s2517_s5 + $0x5a0] sm:$0xff]  ;;  %v610_v33 = vld [vmem:[%s2517_s5 + $0x5b0] sm:$0xff] }
  0x65   : > { %519 = vst [vmem:[%s2522_s6 + $0x168] sm:$0xff] %v518_v51  ;;  %v612_v34 = vld [vmem:[%s2517_s5 + $0x5c0] sm:$0xff]  ;;  %v614_v35 = vld [vmem:[%s2517_s5 + $0x5d0] sm:$0xff] }
  0x66   : > { %521 = vst [vmem:[%s2522_s6 + $0x170] sm:$0xff] %v520_v52  ;;  %v616_v36 = vld [vmem:[%s2517_s5 + $0x5e0] sm:$0xff]  ;;  %v618_v37 = vld [vmem:[%s2517_s5 + $0x5f0] sm:$0xff] }
  0x67   : > { %523 = vst [vmem:[%s2522_s6 + $0x178] sm:$0xff] %v522_v53 }
  0x68   : > { %525 = vst [vmem:[%s2522_s6 + $0x180] sm:$0xff] %v524_v54 }
  0x69   : > { %527 = vst [vmem:[%s2522_s6 + $0x188] sm:$0xff] %v526_v55 }
  0x6a   : > { %529 = vst [vmem:[%s2522_s6 + $0x190] sm:$0xff] %v528_v56 }
  0x6b   : > { %531 = vst [vmem:[%s2522_s6 + $0x198] sm:$0xff] %v530_v57 }
  0x6c   : > { %533 = vst [vmem:[%s2522_s6 + $0x1a0] sm:$0xff] %v532_v58 }
  0x6d   : > { %535 = vst [vmem:[%s2522_s6 + $0x1a8] sm:$0xff] %v534_v59 }
  0x6e   : > { %537 = vst [vmem:[%s2522_s6 + $0x1b0] sm:$0xff] %v536_v60 }
  0x6f   : > { %539 = vst [vmem:[%s2522_s6 + $0x1b8] sm:$0xff] %v538_v61 }
  0x70   : > { %541 = vst [vmem:[%s2522_s6 + $0x1c0] sm:$0xff] %v540_v62 }
  0x71   : > { %543 = vst [vmem:[%s2522_s6 + $0x1c8] sm:$0xff] %v542_v63 }
  0x72   : > { %545 = vst [vmem:[%s2522_s6 + $0x1d0] sm:$0xff] %v544_v0 }
  0x73   : > { %547 = vst [vmem:[%s2522_s6 + $0x1d8] sm:$0xff] %v546_v1 }
  0x74   : > { %549 = vst [vmem:[%s2522_s6 + $0x1e0] sm:$0xff] %v548_v2 }
  0x75   : > { %551 = vst [vmem:[%s2522_s6 + $0x1e8] sm:$0xff] %v550_v3 }
  0x76   : > { %553 = vst [vmem:[%s2522_s6 + $0x1f0] sm:$0xff] %v552_v4 }
  0x77   : > { %555 = vst [vmem:[%s2522_s6 + $0x1f8] sm:$0xff] %v554_v5 }
  0x78   : > { %557 = vst [vmem:[%s2522_s6 + $0x200] sm:$0xff] %v556_v6 }
  0x79   : > { %559 = vst [vmem:[%s2522_s6 + $0x208] sm:$0xff] %v558_v7 }
  0x7a   : > { %561 = vst [vmem:[%s2522_s6 + $0x210] sm:$0xff] %v560_v8 }
  0x7b   : > { %563 = vst [vmem:[%s2522_s6 + $0x218] sm:$0xff] %v562_v9 }
  0x7c   : > { %565 = vst [vmem:[%s2522_s6 + $0x220] sm:$0xff] %v564_v10 }
  0x7d   : > { %567 = vst [vmem:[%s2522_s6 + $0x228] sm:$0xff] %v566_v11 }
  0x7e   : > { %569 = vst [vmem:[%s2522_s6 + $0x230] sm:$0xff] %v568_v12 }
  0x7f   : > { %571 = vst [vmem:[%s2522_s6 + $0x238] sm:$0xff] %v570_v13 }
  0x80   : > { %573 = vst [vmem:[%s2522_s6 + $0x240] sm:$0xff] %v572_v14 }
  0x81   : > { %575 = vst [vmem:[%s2522_s6 + $0x248] sm:$0xff] %v574_v15 }
  0x82   : > { %577 = vst [vmem:[%s2522_s6 + $0x250] sm:$0xff] %v576_v16 }
  0x83   : > { %579 = vst [vmem:[%s2522_s6 + $0x258] sm:$0xff] %v578_v17 }
  0x84   : > { %581 = vst [vmem:[%s2522_s6 + $0x260] sm:$0xff] %v580_v18 }
  0x85   : > { %583 = vst [vmem:[%s2522_s6 + $0x268] sm:$0xff] %v582_v19 }
  0x86   : > { %585 = vst [vmem:[%s2522_s6 + $0x270] sm:$0xff] %v584_v20 }
  0x87   : > { %587 = vst [vmem:[%s2522_s6 + $0x278] sm:$0xff] %v586_v21 }
  0x88   : > { %589 = vst [vmem:[%s2522_s6 + $0x280] sm:$0xff] %v588_v22 }
  0x89   : > { %591 = vst [vmem:[%s2522_s6 + $0x288] sm:$0xff] %v590_v23 }
  0x8a   : > { %593 = vst [vmem:[%s2522_s6 + $0x290] sm:$0xff] %v592_v24 }
  0x8b   : > { %595 = vst [vmem:[%s2522_s6 + $0x298] sm:$0xff] %v594_v25 }
  0x8c   : > { %597 = vst [vmem:[%s2522_s6 + $0x2a0] sm:$0xff] %v596_v26 }
  0x8d   : > { %599 = vst [vmem:[%s2522_s6 + $0x2a8] sm:$0xff] %v598_v27 }
  0x8e   : > { %601 = vst [vmem:[%s2522_s6 + $0x2b0] sm:$0xff] %v600_v28 }
  0x8f   : > { %603 = vst [vmem:[%s2522_s6 + $0x2b8] sm:$0xff] %v602_v29 }
  0x90   : > { %605 = vst [vmem:[%s2522_s6 + $0x2c0] sm:$0xff] %v604_v30 }
  0x91   : > { %607 = vst [vmem:[%s2522_s6 + $0x2c8] sm:$0xff] %v606_v31 }
  0x92   : > { %609 = vst [vmem:[%s2522_s6 + $0x2d0] sm:$0xff] %v608_v32 }
  0x93   : > { %611 = vst [vmem:[%s2522_s6 + $0x2d8] sm:$0xff] %v610_v33 }
  0x94   : > { %613 = vst [vmem:[%s2522_s6 + $0x2e0] sm:$0xff] %v612_v34 }
  0x95   : > { %615 = vst [vmem:[%s2522_s6 + $0x2e8] sm:$0xff] %v614_v35 }
  0x96   : > { %617 = vst [vmem:[%s2522_s6 + $0x2f0] sm:$0xff] %v616_v36 }
  0x97   : > { %619 = vst [vmem:[%s2522_s6 + $0x2f8] sm:$0xff] %v618_v37 }
  0x98 PF: > { %p1678_p0 = scmp.ge.s32.totalorder %s2380_s22, 1  ;;  %p632_p1 = scmp.lt.s32.totalorder %s2380_s22, 13 }
  0x9a   : > { %p633_p2 = pnand %p1678_p0, %p632_p1 }
  0x9b   : > { %s639_s0 = sand.u32 (!%p633_p2), 1, %s2356_s16   ;;  %s646_s23 = sand.u32 (!%p633_p2), 1, %s2348_s14  }
  0x9c   : > { %636 = sbr.rel (%p633_p2) target bundleno = 442 (0x1ba), region = 85  ;;  %s673_s7 = sand.u32 (!%p633_p2), 1, %s2340_s12  }
  0x9d   : > { %s2203_s28 = smul.u32 (!%p633_p2), 48, %s639_s0  ;;  %s1679_s26 = sshll.u32 (!%p633_p2), %s673_s7, 4 }
  0x9e   : > { %s2204_s11 = smul.u32 (!%p633_p2), 768, %s646_s23  ;;  %s1680_s27 = sshll.u32 (!%p633_p2), %s2368_s19, 1 }
  0x9f   : > { %p681_p3 = scmp.lt.s32.totalorder (!%p633_p2), %s1680_s27, 3  ;;  %s2725_s6 = scalar_lea.vmem (!%p633_p2), [#allocation3], %s2203_s28 }
  0xa0   : > { %s2727_s1 = scalar_lea.vmem (!%p633_p2), [#allocation4], %s2204_s11  ;;  %s2729_s25 = scalar_lea.vmem (!%p633_p2), [#allocation5], %s1679_s26 }
  0xa1   : > { %s3040_s27 = smov (!%p681_p3, %s1680_s27), 3  ;;  %p1681_p4 = scmp.ne.s32.totalorder %s2364_s18, 0 }
  0xa2   : > { %s683_s5 = scalar_lea.vmem %s3011_s2, %s3040_s27 }
  0xa3   : > { %690 = sbr.rel (%p1681_p4) target bundleno = 173 (0xad), region = 97 }
  0xa8   : > { %v2382_v38 = vmov 0.0  }
  0xa9   : > { %691 = vst [vmem:[#allocation2 + $0x10] sm:$0xff] %v2382_v38 }
  0xaa   : > { %692 = vst [vmem:[#allocation2] sm:$0xff] %v2382_v38 }
  0xab   : > { %693 = vst [vmem:[#allocation2 + $0x18] sm:$0xff] %v2382_v38 }
  0xac   : > { %694 = vst [vmem:[#allocation2 + $0x8] sm:$0xff] %v2382_v38 }
  0xad PF: > { %v1764_v39 = vld [vmem:[%s2727_s1 + $0x70] sm:$0xf]  ;;  %v2119_v40 = vld [vmem:[%s2727_s1 + $0x74] sm:$0xf0]  ;;  %v1756_v50 = vld [vmem:[%s2727_s1 + $0x60] sm:$0xf] }
  0xae   : > { %v1828_v41 = vld [vmem:[%s2727_s1 + $0xf0] sm:$0xf]  ;;  %v1765_v42 = vor.u32 %v2119_v40, %v1764_v39  ;;  %v2135_v43 = vld [vmem:[%s2727_s1 + $0xf4] sm:$0xf0]  ;;  %v2117_v52 = vld [vmem:[%s2727_s1 + $0x64] sm:$0xf0] }
  0xaf   : > { %v1892_v44 = vld [vmem:[%s2727_s1 + $0x170] sm:$0xf]  ;;  %v2151_v45 = vld [vmem:[%s2727_s1 + $0x174] sm:$0xf0]  ;;  %v1829_v46 = vor.u32 %v2135_v43, %v1828_v41  ;;  %v1820_v53 = vld [vmem:[%s2727_s1 + $0xe0] sm:$0xf]  ;;  %v1757_v55 = vor.u32 %v2117_v52, %v1756_v50 }
  0xb0   : > { %v1893_v47 = vor.u32 %v2151_v45, %v1892_v44  ;;  %v1956_v48 = vld [vmem:[%s2727_s1 + $0x1f0] sm:$0xf]  ;;  %v2167_v49 = vld [vmem:[%s2727_s1 + $0x1f4] sm:$0xf0]  ;;  %1311 = vmatpush.bf16.msra.mxu0 %v1765_v42  ;;  %v2133_v54 = vld [vmem:[%s2727_s1 + $0xe4] sm:$0xf0] }
  0xb1   : > { %v1957_v51 = vor.u32 %v2167_v49, %v1956_v48  ;;  %1325 = vmatpush.bf16.msra.mxu1 %v1829_v46  ;;  %v1821_v56 = vor.u32 %v2133_v54, %v1820_v53  ;;  %v1884_v57 = vld [vmem:[%s2727_s1 + $0x160] sm:$0xf]  ;;  %v2149_v58 = vld [vmem:[%s2727_s1 + $0x164] sm:$0xf0]  ;;  %v1748_v62 = vld [vmem:[%s2727_s1 + $0x50] sm:$0xf] }
  0xb2   : > { %1339 = vmatpush.bf16.msra.mxu2 %v1893_v47  ;;  %v1948_v59 = vld [vmem:[%s2727_s1 + $0x1e0] sm:$0xf]  ;;  %v1885_v60 = vor.u32 %v2149_v58, %v1884_v57  ;;  %v2165_v61 = vld [vmem:[%s2727_s1 + $0x1e4] sm:$0xf0]  ;;  %v2115_v63 = vld [vmem:[%s2727_s1 + $0x54] sm:$0xf0] }
  0xb3   : > { %1353 = vmatpush.bf16.msra.mxu3 %v1957_v51  ;;  %v1949_v0 = vor.u32 %v2165_v61, %v1948_v59  ;;  %v1812_v1 = vld [vmem:[%s2727_s1 + $0xd0] sm:$0xf]  ;;  %v2131_v2 = vld [vmem:[%s2727_s1 + $0xd4] sm:$0xf0]  ;;  %v1749_v4 = vor.u32 %v2115_v63, %v1748_v62  ;;  %v1740_v10 = vld [vmem:[%s2727_s1 + $0x40] sm:$0xf] }
  0xb4   : > { %v1876_v3 = vld [vmem:[%s2727_s1 + $0x150] sm:$0xf]  ;;  %1312 = vmatpush.bf16.msra.mxu0 %v1757_v55  ;;  %v2147_v5 = vld [vmem:[%s2727_s1 + $0x154] sm:$0xf0]  ;;  %v1813_v8 = vor.u32 %v2131_v2, %v1812_v1  ;;  %v2113_v11 = vld [vmem:[%s2727_s1 + $0x44] sm:$0xf0] }
  0xb5   : > { %v1940_v6 = vld [vmem:[%s2727_s1 + $0x1d0] sm:$0xf]  ;;  %v2163_v7 = vld [vmem:[%s2727_s1 + $0x1d4] sm:$0xf0]  ;;  %1326 = vmatpush.bf16.msra.mxu1 %v1821_v56  ;;  %v1877_v9 = vor.u32 %v2147_v5, %v1876_v3  ;;  %v1804_v12 = vld [vmem:[%s2727_s1 + $0xc0] sm:$0xf]  ;;  %v1741_v19 = vor.u32 %v2113_v11, %v1740_v10 }
  0xb6   : > { %1340 = vmatpush.bf16.msra.mxu2 %v1885_v60  ;;  %v1941_v13 = vor.u32 %v2163_v7, %v1940_v6  ;;  %v2129_v14 = vld [vmem:[%s2727_s1 + $0xc4] sm:$0xf0]  ;;  %v1868_v15 = vld [vmem:[%s2727_s1 + $0x140] sm:$0xf]  ;;  %v1732_v22 = vld [vmem:[%s2727_s1 + $0x30] sm:$0xf] }
  0xb7   : > { %1354 = vmatpush.bf16.msra.mxu3 %v1949_v0  ;;  %v2145_v16 = vld [vmem:[%s2727_s1 + $0x144] sm:$0xf0]  ;;  %v1932_v17 = vld [vmem:[%s2727_s1 + $0x1c0] sm:$0xf]  ;;  %v1805_v20 = vor.u32 %v2129_v14, %v1804_v12  ;;  %v2111_v23 = vld [vmem:[%s2727_s1 + $0x34] sm:$0xf0] }
  0xb8   : > { %v2161_v18 = vld [vmem:[%s2727_s1 + $0x1c4] sm:$0xf0]  ;;  %1313 = vmatpush.bf16.msra.mxu0 %v1749_v4  ;;  %v1869_v21 = vor.u32 %v2145_v16, %v1868_v15  ;;  %v1796_v24 = vld [vmem:[%s2727_s1 + $0xb0] sm:$0xf]  ;;  %v2127_v26 = vld [vmem:[%s2727_s1 + $0xb4] sm:$0xf0]  ;;  %v1733_v31 = vor.u32 %v2111_v23, %v1732_v22 }
  0xb9   : > { %1327 = vmatpush.bf16.msra.mxu1 %v1813_v8  ;;  %v1933_v25 = vor.u32 %v2161_v18, %v1932_v17  ;;  %v1860_v27 = vld [vmem:[%s2727_s1 + $0x130] sm:$0xf]  ;;  %v2143_v28 = vld [vmem:[%s2727_s1 + $0x134] sm:$0xf0]  ;;  %v1797_v32 = vor.u32 %v2127_v26, %v1796_v24  ;;  %v1724_v34 = vld [vmem:[%s2727_s1 + $0x20] sm:$0xf] }
  0xba   : > { %1341 = vmatpush.bf16.msra.mxu2 %v1877_v9  ;;  %v1924_v29 = vld [vmem:[%s2727_s1 + $0x1b0] sm:$0xf]  ;;  %v2159_v30 = vld [vmem:[%s2727_s1 + $0x1b4] sm:$0xf0]  ;;  %v1861_v33 = vor.u32 %v2143_v28, %v1860_v27  ;;  %v2109_v35 = vld [vmem:[%s2727_s1 + $0x24] sm:$0xf0] }
  0xbb   : > { %1355 = vmatpush.bf16.msra.mxu3 %v1941_v13  ;;  %v1788_v36 = vld [vmem:[%s2727_s1 + $0xa0] sm:$0xf]  ;;  %v1925_v37 = vor.u32 %v2159_v30, %v1924_v29  ;;  %v2125_v38 = vld [vmem:[%s2727_s1 + $0xa4] sm:$0xf0]  ;;  %v1725_v43 = vor.u32 %v2109_v35, %v1724_v34  ;;  %v1716_v46 = vld [vmem:[%s2727_s1 + $0x10] sm:$0xf] }
  0xbc   : > { %1314 = vmatpush.bf16.msra.mxu0 %v1741_v19  ;;  %v1852_v39 = vld [vmem:[%s2727_s1 + $0x120] sm:$0xf]  ;;  %v2141_v40 = vld [vmem:[%s2727_s1 + $0x124] sm:$0xf0]  ;;  %v1789_v44 = vor.u32 %v2125_v38, %v1788_v36  ;;  %v2107_v47 = vld [vmem:[%s2727_s1 + $0x14] sm:$0xf0] }
  0xbd   : > { %1328 = vmatpush.bf16.msra.mxu1 %v1805_v20  ;;  %v1916_v41 = vld [vmem:[%s2727_s1 + $0x1a0] sm:$0xf]  ;;  %v2157_v42 = vld [vmem:[%s2727_s1 + $0x1a4] sm:$0xf0]  ;;  %v1853_v45 = vor.u32 %v2141_v40, %v1852_v39  ;;  %v1780_v48 = vld [vmem:[%s2727_s1 + $0x90] sm:$0xf]  ;;  %v1717_v55 = vor.u32 %v2107_v47, %v1716_v46 }
  0xbe   : > { %1342 = vmatpush.bf16.msra.mxu2 %v1869_v21  ;;  %v1917_v49 = vor.u32 %v2157_v42, %v1916_v41  ;;  %v2123_v50 = vld [vmem:[%s2727_s1 + $0x94] sm:$0xf0]  ;;  %v1844_v51 = vld [vmem:[%s2727_s1 + $0x110] sm:$0xf]  ;;  %v1708_v56 = vld [vmem:[%s2727_s1] sm:$0xf] }
  0xbf   : > { %1356 = vmatpush.bf16.msra.mxu3 %v1933_v25  ;;  %v2139_v52 = vld [vmem:[%s2727_s1 + $0x114] sm:$0xf0]  ;;  %v1908_v53 = vld [vmem:[%s2727_s1 + $0x190] sm:$0xf]  ;;  %v2105_v57 = vld [vmem:[%s2727_s1 + $0x4] sm:$0xf0]  ;;  %v1781_v58 = vor.u32 %v2123_v50, %v1780_v48 }
  0xc0   : > { %1315 = vmatpush.bf16.msra.mxu0 %v1733_v31  ;;  %v2155_v54 = vld [vmem:[%s2727_s1 + $0x194] sm:$0xf0]  ;;  %v1845_v59 = vor.u32 %v2139_v52, %v1844_v51  ;;  %v1772_v60 = vld [vmem:[%s2727_s1 + $0x80] sm:$0xf]  ;;  %v2121_v61 = vld [vmem:[%s2727_s1 + $0x84] sm:$0xf0]  ;;  %v1709_v6 = vor.u32 %v2105_v57, %v1708_v56 }
  0xc1   : > { %1329 = vmatpush.bf16.msra.mxu1 %v1797_v32  ;;  %v1836_v62 = vld [vmem:[%s2727_s1 + $0x100] sm:$0xf]  ;;  %v1909_v63 = vor.u32 %v2155_v54, %v1908_v53  ;;  %v2137_v0 = vld [vmem:[%s2727_s1 + $0x104] sm:$0xf0]  ;;  %v2020_v3 = vld [vmem:[%s2727_s1 + $0x270] sm:$0xf]  ;;  %v1773_v10 = vor.u32 %v2121_v61, %v1772_v60 }
  0xc2   : > { %1343 = vmatpush.bf16.msra.mxu2 %v1861_v33  ;;  %v1900_v1 = vld [vmem:[%s2727_s1 + $0x180] sm:$0xf]  ;;  %v2153_v2 = vld [vmem:[%s2727_s1 + $0x184] sm:$0xf0]  ;;  %v2183_v4 = vld [vmem:[%s2727_s1 + $0x274] sm:$0xf0]  ;;  %v1837_v11 = vor.u32 %v2137_v0, %v1836_v62 }
  0xc3   : > { %1357 = vmatpush.bf16.msra.mxu3 %v1925_v37  ;;  %v2084_v5 = vld [vmem:[%s2727_s1 + $0x2f0] sm:$0xf]  ;;  %v2199_v7 = vld [vmem:[%s2727_s1 + $0x2f4] sm:$0xf0]  ;;  %v2118_v8 = vld [vmem:[%s2727_s1 + $0x74] sm:$0xf]  ;;  %v1901_v14 = vor.u32 %v2153_v2, %v1900_v1  ;;  %v2021_v15 = vor.u32 %v2183_v4, %v2020_v3 }
  0xc4   : > { %1316 = vmatpush.bf16.msra.mxu0 %v1725_v43  ;;  %v1766_v9 = vld [vmem:[%s2727_s1 + $0x78] sm:$0xf0]  ;;  %v2134_v12 = vld [vmem:[%s2727_s1 + $0xf4] sm:$0xf]  ;;  %v2012_v16 = vld [vmem:[%s2727_s1 + $0x260] sm:$0xf]  ;;  %v2085_v18 = vor.u32 %v2199_v7, %v2084_v5 }
  0xc5   : > { %1330 = vmatpush.bf16.msra.mxu1 %v1789_v44  ;;  %v1830_v13 = vld [vmem:[%s2727_s1 + $0xf8] sm:$0xf0]  ;;  %v2181_v17 = vld [vmem:[%s2727_s1 + $0x264] sm:$0xf0]  ;;  %v1769_v19 = vor.u32 %v2118_v8, %v1766_v9  ;;  %v2076_v20 = vld [vmem:[%s2727_s1 + $0x2e0] sm:$0xf] }
  0xc6   : > { %1344 = vmatpush.bf16.msra.mxu2 %v1853_v45  ;;  %v2197_v21 = vld [vmem:[%s2727_s1 + $0x2e4] sm:$0xf0]  ;;  %v2116_v22 = vld [vmem:[%s2727_s1 + $0x64] sm:$0xf]  ;;  %v1833_v23 = vor.u32 %v2134_v12, %v1830_v13  ;;  %v1758_v24 = vld [vmem:[%s2727_s1 + $0x68] sm:$0xf0]  ;;  %v2013_v30 = vor.u32 %v2181_v17, %v2012_v16 }
  0xc7   : > { %1358 = vmatpush.bf16.msra.mxu3 %v1917_v49  ;;  %v2132_v25 = vld [vmem:[%s2727_s1 + $0xe4] sm:$0xf]  ;;  %v1822_v26 = vld [vmem:[%s2727_s1 + $0xe8] sm:$0xf0]  ;;  %v2004_v27 = vld [vmem:[%s2727_s1 + $0x250] sm:$0xf]  ;;  %v2077_v35 = vor.u32 %v2197_v21, %v2076_v20  ;;  %v1761_v36 = vor.u32 %v2116_v22, %v1758_v24 }
  0xc8   : > { %1317 = vmatpush.bf16.msra.mxu0 %v1717_v55  ;;  %v1684_v28 = vld [vmem:[%s2725_s6] sm:$0xf]  ;;  %v2101_v29 = vld [vmem:[%s2725_s6 + $0x14] sm:$0xf0]  ;;  %v2114_v37 = vld [vmem:[%s2727_s1 + $0x54] sm:$0xf]  ;;  %v1825_v40 = vor.u32 %v2132_v25, %v1822_v26 }
  0xc9   : > { %1331 = vmatpush.bf16.msra.mxu1 %v1781_v58  ;;  %v2179_v31 = vld [vmem:[%s2727_s1 + $0x254] sm:$0xf0]  ;;  %v2068_v32 = vld [vmem:[%s2727_s1 + $0x2d0] sm:$0xf]  ;;  %v2818_v34 = vor.u32 %v2101_v29, %v1684_v28  ;;  %v1750_v38 = vld [vmem:[%s2727_s1 + $0x58] sm:$0xf0] }
  0xca   : > { %1345 = vmatpush.bf16.msra.mxu2 %v1845_v59  ;;  %v2195_v33 = vld [vmem:[%s2727_s1 + $0x2d4] sm:$0xf0]  ;;  %v2130_v39 = vld [vmem:[%s2727_s1 + $0xd4] sm:$0xf]  ;;  %v1814_v41 = vld [vmem:[%s2727_s1 + $0xd8] sm:$0xf0]  ;;  %v2005_v48 = vor.u32 %v2179_v31, %v2004_v27  ;;  %v1753_v52 = vor.u32 %v2114_v37, %v1750_v38 }
  0xcb   : > { %1359 = vmatpush.bf16.msra.mxu3 %v1909_v63  ;;  %v2098_v42 = vld [vmem:[%s2725_s6 + $0x4] sm:$0xf]  ;;  %v1686_v43 = vld [vmem:[%s2725_s6 + $0x18] sm:$0xf0]  ;;  %v1692_v45 = vld [vmem:[%s2725_s6 + $0x8] sm:$0xf]  ;;  %v2069_v51 = vor.u32 %v2195_v33, %v2068_v32  ;;  %v1817_v57 = vor.u32 %v2130_v39, %v1814_v41 }
  0xcc   : > { %1318 = vmatpush.bf16.msra.mxu0 %v1709_v6  ;;  %v2827_v44 = vor.u32 %v2098_v42, %v1686_v43  ;;  %v2102_v46 = vld [vmem:[%s2725_s6 + $0x1c] sm:$0xf0]  ;;  %v2099_v47 = vld [vmem:[%s2725_s6 + $0xc] sm:$0xf]  ;;  %v1694_v50 = vld [vmem:[%s2725_s6 + $0x20] sm:$0xf0] }
  0xcd   : > { %1332 = vmatpush.bf16.msra.mxu1 %v1773_v10  ;;  %v2832_v49 = vor.u32 %v2102_v46, %v1692_v45  ;;  %v1996_v53 = vld [vmem:[%s2727_s1 + $0x240] sm:$0xf]  ;;  %v2177_v54 = vld [vmem:[%s2727_s1 + $0x244] sm:$0xf0]  ;;  %v2838_v56 = vor.u32 %v2099_v47, %v1694_v50  ;;  %v2112_v59 = vld [vmem:[%s2727_s1 + $0x44] sm:$0xf] }
  0xce   : > { %1346 = vmatpush.bf16.msra.mxu2 %v1837_v11  ;;  %v2060_v55 = vld [vmem:[%s2727_s1 + $0x2c0] sm:$0xf]  ;;  %v2193_v58 = vld [vmem:[%s2727_s1 + $0x2c4] sm:$0xf0]  ;;  %v1742_v60 = vld [vmem:[%s2727_s1 + $0x48] sm:$0xf0]  ;;  %v1997_v63 = vor.u32 %v2177_v54, %v1996_v53 }
  0xcf   : > { %1360 = vmatpush.bf16.msra.mxu3 %v1901_v14  ;;  %1319 = vmatmul.bf16.vlgmr.msra.gmra.mxu0 %v2818_v34  ;;  %v2128_v61 = vld [vmem:[%s2727_s1 + $0xc4] sm:$0xf]  ;;  %v1806_v62 = vld [vmem:[%s2727_s1 + $0xc8] sm:$0xf0]  ;;  %v2061_v0 = vor.u32 %v2193_v58, %v2060_v55  ;;  %v1745_v1 = vor.u32 %v2112_v59, %v1742_v60  ;;  %v1988_v2 = vld [vmem:[%s2727_s1 + $0x230] sm:$0xf] }
  0xd0   : > { %1367 = vmatpush.bf16.msrb.mxu0 %v2021_v15  ;;  %1333 = vmatmul.bf16.vlgmr.msra.gmra.mxu1 %v2827_v44  ;;  %v2175_v3 = vld [vmem:[%s2727_s1 + $0x234] sm:$0xf0]  ;;  %v2052_v4 = vld [vmem:[%s2727_s1 + $0x2b0] sm:$0xf]  ;;  %v1809_v5 = vor.u32 %v2128_v61, %v1806_v62  ;;  %v2110_v7 = vld [vmem:[%s2727_s1 + $0x34] sm:$0xf] }
  0xd1   : > { %1381 = vmatpush.bf16.msrb.mxu1 %v2085_v18  ;;  %1347 = vmatmul.bf16.vlgmr.msra.gmra.mxu2 %v2832_v49  ;;  %v2191_v6 = vld [vmem:[%s2727_s1 + $0x2b4] sm:$0xf0]  ;;  %v1734_v8 = vld [vmem:[%s2727_s1 + $0x38] sm:$0xf0]  ;;  %v2126_v9 = vld [vmem:[%s2727_s1 + $0xb4] sm:$0xf]  ;;  %v1989_v11 = vor.u32 %v2175_v3, %v1988_v2 }
  0xd2   : > { %1395 = vmatpush.bf16.msrb.mxu2 %v1769_v19  ;;  %1361 = vmatmul.bf16.vlgmr.msra.gmra.mxu3 %v2838_v56  ;;  %v1798_v10 = vld [vmem:[%s2727_s1 + $0xb8] sm:$0xf0]  ;;  %v2053_v12 = vor.u32 %v2191_v6, %v2052_v4  ;;  %v1737_v13 = vor.u32 %v2110_v7, %v1734_v8  ;;  %v1980_v14 = vld [vmem:[%s2727_s1 + $0x220] sm:$0xf]  ;;  %v2173_v15 = vld [vmem:[%s2727_s1 + $0x224] sm:$0xf0] }
  0xd3   : > { %1409 = vmatpush.bf16.msrb.mxu3 %v1833_v23  ;;  %v2044_v16 = vld [vmem:[%s2727_s1 + $0x2a0] sm:$0xf]  ;;  %v1801_v17 = vor.u32 %v2126_v9, %v1798_v10  ;;  %v2189_v18 = vld [vmem:[%s2727_s1 + $0x2a4] sm:$0xf0]  ;;  %v2108_v19 = vld [vmem:[%s2727_s1 + $0x24] sm:$0xf]  ;;  %v1981_v23 = vor.u32 %v2173_v15, %v1980_v14 }
  0xd4   : > { %1368 = vmatpush.bf16.msrb.mxu0 %v2013_v30  ;;  %v1726_v20 = vld [vmem:[%s2727_s1 + $0x28] sm:$0xf0]  ;;  %v2124_v21 = vld [vmem:[%s2727_s1 + $0xa4] sm:$0xf]  ;;  %v2045_v24 = vor.u32 %v2189_v18, %v2044_v16  ;;  %v1972_v26 = vld [vmem:[%s2727_s1 + $0x210] sm:$0xf] }
  0xd5   : > { %1382 = vmatpush.bf16.msrb.mxu1 %v2077_v35  ;;  %v1790_v22 = vld [vmem:[%s2727_s1 + $0xa8] sm:$0xf0]  ;;  %v1729_v25 = vor.u32 %v2108_v19, %v1726_v20  ;;  %v2171_v27 = vld [vmem:[%s2727_s1 + $0x214] sm:$0xf0]  ;;  %v2036_v28 = vld [vmem:[%s2727_s1 + $0x290] sm:$0xf] }
  0xd6   : > { %1396 = vmatpush.bf16.msrb.mxu2 %v1761_v36  ;;  %v1793_v29 = vor.u32 %v2124_v21, %v1790_v22  ;;  %v2187_v30 = vld [vmem:[%s2727_s1 + $0x294] sm:$0xf0]  ;;  %v2106_v31 = vld [vmem:[%s2727_s1 + $0x14] sm:$0xf]  ;;  %v1718_v32 = vld [vmem:[%s2727_s1 + $0x18] sm:$0xf0]  ;;  %v1973_v36 = vor.u32 %v2171_v27, %v1972_v26 }
  0xd7   : > { %1410 = vmatpush.bf16.msrb.mxu3 %v1825_v40  ;;  %v2122_v33 = vld [vmem:[%s2727_s1 + $0x94] sm:$0xf]  ;;  %v1782_v35 = vld [vmem:[%s2727_s1 + $0x98] sm:$0xf0]  ;;  %v1964_v37 = vld [vmem:[%s2727_s1 + $0x200] sm:$0xf]  ;;  %v2037_v40 = vor.u32 %v2187_v30, %v2036_v28  ;;  %v1721_v41 = vor.u32 %v2106_v31, %v1718_v32 }
  0xd8   : > { %1369 = vmatpush.bf16.msrb.mxu0 %v2005_v48  ;;  %v2169_v38 = vld [vmem:[%s2727_s1 + $0x204] sm:$0xf0]  ;;  %v2028_v39 = vld [vmem:[%s2727_s1 + $0x280] sm:$0xf]  ;;  %v2104_v43 = vld [vmem:[%s2727_s1 + $0x4] sm:$0xf]  ;;  %v1785_v46 = vor.u32 %v2122_v33, %v1782_v35 }
  0xd9   : > { %1383 = vmatpush.bf16.msrb.mxu1 %v2069_v51  ;;  %v2185_v42 = vld [vmem:[%s2727_s1 + $0x284] sm:$0xf0]  ;;  %v1710_v45 = vld [vmem:[%s2727_s1 + $0x8] sm:$0xf0]  ;;  %v2120_v47 = vld [vmem:[%s2727_s1 + $0x84] sm:$0xf]  ;;  %v1965_v54 = vor.u32 %v2169_v38, %v1964_v37 }
  0xda   : > { %1397 = vmatpush.bf16.msrb.mxu2 %v1753_v52  ;;  %v1774_v48 = vld [vmem:[%s2727_s1 + $0x88] sm:$0xf0]  ;;  %v2150_v50 = vld [vmem:[%s2727_s1 + $0x174] sm:$0xf]  ;;  %v1894_v51 = vld [vmem:[%s2727_s1 + $0x178] sm:$0xf0]  ;;  %v2029_v59 = vor.u32 %v2185_v42, %v2028_v39  ;;  %v1713_v60 = vor.u32 %v2104_v43, %v1710_v45 }
  0xdb   : > { %1411 = vmatpush.bf16.msrb.mxu3 %v1817_v57  ;;  %v2166_v52 = vld [vmem:[%s2727_s1 + $0x1f4] sm:$0xf]  ;;  %v1958_v53 = vld [vmem:[%s2727_s1 + $0x1f8] sm:$0xf0]  ;;  %v1700_v62 = vld [vmem:[%s2725_s6 + $0x10] sm:$0xf] }
  0xdc   : > { %1370 = vmatpush.bf16.msrb.mxu0 %v1997_v63  ;;  %v2182_v55 = vld [vmem:[%s2727_s1 + $0x274] sm:$0xf]  ;;  %v2022_v57 = vld [vmem:[%s2727_s1 + $0x278] sm:$0xf0]  ;;  %v2103_v63 = vld [vmem:[%s2725_s6 + $0x24] sm:$0xf0]  ;;  %v1961_v4 = vor.u32 %v2166_v52, %v1958_v53 }
  0xdd   : > { %1384 = vmatpush.bf16.msrb.mxu1 %v2061_v0  ;;  %v2198_v58 = vld [vmem:[%s2727_s1 + $0x2f4] sm:$0xf]  ;;  %v2086_v61 = vld [vmem:[%s2727_s1 + $0x2f8] sm:$0xf0]  ;;  %v1777_v0 = vor.u32 %v2120_v47, %v1774_v48  ;;  %v2148_v6 = vld [vmem:[%s2727_s1 + $0x164] sm:$0xf]  ;;  %v2895_v10 = vor.u32 %v2103_v63, %v1700_v62 }
  0xde   : > { %1398 = vmatpush.bf16.msrb.mxu2 %v1745_v1  ;;  %v1897_v1 = vor.u32 %v2150_v50, %v1894_v51  ;;  %v2100_v2 = vld [vmem:[%s2725_s6 + $0x14] sm:$0xf]  ;;  %v1702_v3 = vld [vmem:[%s2725_s6 + $0x28] sm:$0xf0]  ;;  %v2089_v9 = vor.u32 %v2198_v58, %v2086_v61  ;;  %p2090_p5 = scmp.ne.s32.totalorder %s2364_s18, 5 }
  0xdf   : > { %1412 = vmatpush.bf16.msrb.mxu3 %v1809_v5  ;;  %v2025_v5 = vor.u32 %v2182_v55, %v2022_v57  ;;  %v1886_v7 = vld [vmem:[%s2727_s1 + $0x168] sm:$0xf0]  ;;  %v2164_v8 = vld [vmem:[%s2727_s1 + $0x1e4] sm:$0xf]  ;;  %v2900_v14 = vor.u32 %v2100_v2, %v1702_v3  ;;  %v2146_v20 = vld [vmem:[%s2727_s1 + $0x154] sm:$0xf] }
  0xe0   : > { %1371 = vmatpush.bf16.msrb.mxu0 %v1989_v11  ;;  %v1950_v11 = vld [vmem:[%s2727_s1 + $0x1e8] sm:$0xf0]  ;;  %v2196_v15 = vld [vmem:[%s2727_s1 + $0x2e4] sm:$0xf]  ;;  %v1878_v21 = vld [vmem:[%s2727_s1 + $0x158] sm:$0xf0] }
  0xe1   : > { %1385 = vmatpush.bf16.msrb.mxu1 %v2053_v12  ;;  %v2180_v12 = vld [vmem:[%s2727_s1 + $0x264] sm:$0xf]  ;;  %v2078_v16 = vld [vmem:[%s2727_s1 + $0x2e8] sm:$0xf0]  ;;  %v1953_v18 = vor.u32 %v2164_v8, %v1950_v11  ;;  %v2162_v22 = vld [vmem:[%s2727_s1 + $0x1d4] sm:$0xf] }
  0xe2   : > { %1399 = vmatpush.bf16.msrb.mxu2 %v1737_v13  ;;  %v2014_v13 = vld [vmem:[%s2727_s1 + $0x268] sm:$0xf0]  ;;  %v2006_v26 = vld [vmem:[%s2727_s1 + $0x258] sm:$0xf0]  ;;  %v2194_v27 = vld [vmem:[%s2727_s1 + $0x2d4] sm:$0xf] }
  0xe3   : > { %1413 = vmatpush.bf16.msrb.mxu3 %v1801_v17  ;;  %v1889_v17 = vor.u32 %v2148_v6, %v1886_v7  ;;  %v2017_v19 = vor.u32 %v2180_v12, %v2014_v13  ;;  %v2070_v28 = vld [vmem:[%s2727_s1 + $0x2d8] sm:$0xf0]  ;;  %v2144_v32 = vld [vmem:[%s2727_s1 + $0x144] sm:$0xf]  ;;  %v1870_v33 = vld [vmem:[%s2727_s1 + $0x148] sm:$0xf0] }
  0xe4   : > { %1372 = vmatpush.bf16.msrb.mxu0 %v1981_v23  ;;  %v2081_v23 = vor.u32 %v2196_v15, %v2078_v16  ;;  %v2160_v35 = vld [vmem:[%s2727_s1 + $0x1c4] sm:$0xf]  ;;  %v1998_v38 = vld [vmem:[%s2727_s1 + $0x248] sm:$0xf0]  ;;  %v2142_v43 = vld [vmem:[%s2727_s1 + $0x134] sm:$0xf] }
  0xe5   : > { %1386 = vmatpush.bf16.msrb.mxu1 %v2045_v24  ;;  %v1942_v24 = vld [vmem:[%s2727_s1 + $0x1d8] sm:$0xf0]  ;;  %v2176_v37 = vld [vmem:[%s2727_s1 + $0x244] sm:$0xf]  ;;  %v2062_v39 = vld [vmem:[%s2727_s1 + $0x2c8] sm:$0xf0] }
  0xe6   : > { %1400 = vmatpush.bf16.msrb.mxu2 %v1729_v25  ;;  %v2178_v25 = vld [vmem:[%s2727_s1 + $0x254] sm:$0xf]  ;;  %v1945_v30 = vor.u32 %v2162_v22, %v1942_v24  ;;  %v2001_v42 = vor.u32 %v2176_v37, %v1998_v38  ;;  %v1862_v45 = vld [vmem:[%s2727_s1 + $0x138] sm:$0xf0]  ;;  %v2140_v58 = vld [vmem:[%s2727_s1 + $0x124] sm:$0xf] }
  0xe7   : > { %1414 = vmatpush.bf16.msrb.mxu3 %v1793_v29  ;;  %v1881_v29 = vor.u32 %v2146_v20, %v1878_v21  ;;  %v2009_v31 = vor.u32 %v2178_v25, %v2006_v26  ;;  %v1926_v48 = vld [vmem:[%s2727_s1 + $0x1b8] sm:$0xf0]  ;;  %v2174_v50 = vld [vmem:[%s2727_s1 + $0x234] sm:$0xf]  ;;  %v1918_v62 = vld [vmem:[%s2727_s1 + $0x1a8] sm:$0xf0] }
  0xe8   : > { %1373 = vmatpush.bf16.msrb.mxu0 %v1973_v36  ;;  %v1934_v36 = vld [vmem:[%s2727_s1 + $0x1c8] sm:$0xf0]  ;;  %v1990_v51 = vld [vmem:[%s2727_s1 + $0x238] sm:$0xf0]  ;;  %v2190_v52 = vld [vmem:[%s2727_s1 + $0x2b4] sm:$0xf] }
  0xe9   : > { %1387 = vmatpush.bf16.msrb.mxu1 %v2037_v40  ;;  %v1873_v40 = vor.u32 %v2144_v32, %v1870_v33  ;;  %v2054_v53 = vld [vmem:[%s2727_s1 + $0x2b8] sm:$0xf0]  ;;  %v1993_v57 = vor.u32 %v2174_v50, %v1990_v51  ;;  %v2172_v63 = vld [vmem:[%s2727_s1 + $0x224] sm:$0xf]  ;;  %v2046_v2 = vld [vmem:[%s2727_s1 + $0x2a8] sm:$0xf0] }
  0xea   : > { %1401 = vmatpush.bf16.msrb.mxu2 %v1721_v41  ;;  %v1937_v41 = vor.u32 %v2160_v35, %v1934_v36  ;;  %v2057_v61 = vor.u32 %v2190_v52, %v2054_v53  ;;  %v2138_v6 = vld [vmem:[%s2727_s1 + $0x114] sm:$0xf]  ;;  %v1846_v7 = vld [vmem:[%s2727_s1 + $0x118] sm:$0xf0]  ;;  %v2136_v20 = vld [vmem:[%s2727_s1 + $0x104] sm:$0xf] }
  0xeb   : > { %1415 = vmatpush.bf16.msrb.mxu3 %v1785_v46  ;;  %v2158_v46 = vld [vmem:[%s2727_s1 + $0x1b4] sm:$0xf]  ;;  %v1910_v11 = vld [vmem:[%s2727_s1 + $0x198] sm:$0xf0]  ;;  %v1838_v21 = vld [vmem:[%s2727_s1 + $0x108] sm:$0xf0] }
  0xec   : > { %1374 = vmatpush.bf16.msrb.mxu0 %v1965_v54  ;;  %v1865_v54 = vor.u32 %v2142_v43, %v1862_v45  ;;  %v1929_v55 = vor.u32 %v2158_v46, %v1926_v48  ;;  %v2154_v8 = vld [vmem:[%s2727_s1 + $0x194] sm:$0xf]  ;;  %v1974_v13 = vld [vmem:[%s2727_s1 + $0x218] sm:$0xf0]  ;;  %v2152_v22 = vld [vmem:[%s2727_s1 + $0x184] sm:$0xf] }
  0xed   : > { %1388 = vmatpush.bf16.msrb.mxu1 %v2029_v59  ;;  %v1854_v59 = vld [vmem:[%s2727_s1 + $0x128] sm:$0xf0]  ;;  %v2170_v12 = vld [vmem:[%s2727_s1 + $0x214] sm:$0xf]  ;;  %v2038_v16 = vld [vmem:[%s2727_s1 + $0x298] sm:$0xf0] }
  0xee   : > { %1402 = vmatpush.bf16.msrb.mxu2 %v1713_v60  ;;  %v2156_v60 = vld [vmem:[%s2727_s1 + $0x1a4] sm:$0xf]  ;;  %v1857_v3 = vor.u32 %v2140_v58, %v1854_v59  ;;  %v2186_v15 = vld [vmem:[%s2727_s1 + $0x294] sm:$0xf]  ;;  %v1902_v24 = vld [vmem:[%s2727_s1 + $0x188] sm:$0xf0] }
  0xef   : > { %1416 = vmatpush.bf16.msrb.mxu3 %v1777_v0  ;;  %1375 = vmatmul.bf16.vlgmr.msrb.gmra.mxu0 %v2895_v10  ;;  %v1982_v0 = vld [vmem:[%s2727_s1 + $0x228] sm:$0xf0]  ;;  %v2168_v25 = vld [vmem:[%s2727_s1 + $0x204] sm:$0xf]  ;;  %v695_v46 = vld [vmem:[#allocation2 + $0x10] sm:$0xff] }
  0xf0   : > { %1423 = vmatpush.bf16.msra.mxu0 %v1897_v1  ;;  %1389 = vmatmul.bf16.vlgmr.msrb.gmra.mxu1 %v2900_v14  ;;  %v2188_v1 = vld [vmem:[%s2727_s1 + $0x2a4] sm:$0xf]  ;;  %v1966_v26 = vld [vmem:[%s2727_s1 + $0x208] sm:$0xf0]  ;;  %v697_v53 = vld [vmem:[#allocation2 + $0x18] sm:$0xff] }
  0xf1   : > { %1437 = vmatpush.bf16.msra.mxu1 %v1961_v4  ;;  %1403 = vmatmul.bf16.vlgmr.msrb.gmra.mxu2 %v2818_v34  ;;  %v2073_v34 = vor.u32 %v2194_v27, %v2070_v28  ;;  %v1921_v4 = vor.u32 %v2156_v60, %v1918_v62  ;;  %v2184_v27 = vld [vmem:[%s2727_s1 + $0x284] sm:$0xf]  ;;  %v2030_v28 = vld [vmem:[%s2727_s1 + $0x288] sm:$0xf0] }
  0xf2   : > { %1451 = vmatpush.bf16.msra.mxu2 %v2025_v5  ;;  %1417 = vmatmul.bf16.vlgmr.msrb.gmra.mxu3 %v2827_v44  ;;  %v2192_v44 = vld [vmem:[%s2727_s1 + $0x2c4] sm:$0xf]  ;;  %v1985_v5 = vor.u32 %v2172_v63, %v1982_v0  ;;  %v2033_v32 = vor.u32 %v2184_v27, %v2030_v28 }
  0xf3   : > { %1465 = vmatpush.bf16.msra.mxu3 %v2089_v9  ;;  %v2065_v47 = vor.u32 %v2192_v44, %v2062_v39  ;;  %v2049_v9 = vor.u32 %v2188_v1, %v2046_v2 }
  0xf4   : > { %1424 = vmatpush.bf16.msra.mxu0 %v1889_v17  ;;  %v1849_v17 = vor.u32 %v2138_v6, %v1846_v7  ;;  %v696_v7 = vld [vmem:[#allocation2] sm:$0xff] }
  0xf5   : > { %1438 = vmatpush.bf16.msra.mxu1 %v1953_v18  ;;  %v1913_v18 = vor.u32 %v2154_v8, %v1910_v11 }
  0xf6   : > { %1452 = vmatpush.bf16.msra.mxu2 %v2017_v19  ;;  %v1977_v19 = vor.u32 %v2170_v12, %v1974_v13 }
  0xf7   : > { %1466 = vmatpush.bf16.msra.mxu3 %v2081_v23  ;;  %v2041_v23 = vor.u32 %v2186_v15, %v2038_v16 }
  0xf8   : > { %1425 = vmatpush.bf16.msra.mxu0 %v1881_v29  ;;  %v1841_v29 = vor.u32 %v2136_v20, %v1838_v21 }
  0xf9   : > { %1439 = vmatpush.bf16.msra.mxu1 %v1945_v30  ;;  %v1905_v30 = vor.u32 %v2152_v22, %v1902_v24 }
  0xfa   : > { %1453 = vmatpush.bf16.msra.mxu2 %v2009_v31  ;;  %v1969_v31 = vor.u32 %v2168_v25, %v1966_v26 }
  0xfb   : > { %1467 = vmatpush.bf16.msra.mxu3 %v2073_v34 }
  0xfc   : > { %1426 = vmatpush.bf16.msra.mxu0 %v1873_v40 }
  0xfd   : > { %1440 = vmatpush.bf16.msra.mxu1 %v1937_v41 }
  0xfe   : > { %1454 = vmatpush.bf16.msra.mxu2 %v2001_v42 }
  0xff   : > { %1468 = vmatpush.bf16.msra.mxu3 %v2065_v47 }
 0x100   : > { %1427 = vmatpush.bf16.msra.mxu0 %v1865_v54 }
 0x101   : > { %1441 = vmatpush.bf16.msra.mxu1 %v1929_v55 }
 0x102   : > { %1455 = vmatpush.bf16.msra.mxu2 %v1993_v57 }
 0x103   : > { %1469 = vmatpush.bf16.msra.mxu3 %v2057_v61 }
 0x104   : > { %1428 = vmatpush.bf16.msra.mxu0 %v1857_v3 }
 0x105   : > { %1442 = vmatpush.bf16.msra.mxu1 %v1921_v4 }
 0x106   : > { %1456 = vmatpush.bf16.msra.mxu2 %v1985_v5 }
 0x107   : > { %1470 = vmatpush.bf16.msra.mxu3 %v2049_v9 }
 0x108   : > { %1429 = vmatpush.bf16.msra.mxu0 %v1849_v17  ;;  %v698_v17 = vld [vmem:[#allocation2 + $0x8] sm:$0xff] }
 0x109   : > { %1443 = vmatpush.bf16.msra.mxu1 %v1913_v18 }
 0x10a   : > { %1457 = vmatpush.bf16.msra.mxu2 %v1977_v19 }
 0x10b   : > { %1471 = vmatpush.bf16.msra.mxu3 %v2041_v23 }
 0x10c   : > { %1430 = vmatpush.bf16.msra.mxu0 %v1841_v29 }
 0x10d   : > { %1444 = vmatpush.bf16.msra.mxu1 %v1905_v30 }
 0x10e   : > { %1458 = vmatpush.bf16.msra.mxu2 %v1969_v31 }
 0x10f   : > { %1472 = vmatpush.bf16.msra.mxu3 %v2033_v32  ;;  %1431 = vmatmul.bf16.vlgmr.msra.gmra.mxu0 %v2832_v49 }
 0x110   : > { %1445 = vmatmul.bf16.vlgmr.msra.gmra.mxu1 %v2838_v56 }
 0x111   : > { %1459 = vmatmul.bf16.vlgmr.msra.gmra.mxu2 %v2895_v10 }
 0x112   : > { %1473 = vmatmul.bf16.vlgmr.msra.gmra.mxu3 %v2900_v14 }
 0x14c   : > { %v1320_v33 = vpop.f32.mrf.mxu0 }
 0x14d   : > { %v1334_v35 = vpop.f32.mrf.mxu1 }
 0x14e   : > { %v1335_v34 = vadd.f32 %v1334_v35, %v1320_v33 }
 0x154   : > { %v1322_v36 = vpop.f32.mrf.mxu0  ;;  %v1348_v37 = vpop.f32.mrf.mxu2 }
 0x155   : > { %v1336_v38 = vpop.f32.mrf.mxu1  ;;  %v1349_v44 = vadd.f32 %v1348_v37, %v1335_v34  ;;  %v1362_v39 = vpop.f32.mrf.mxu3 }
 0x156   : > { %v1337_v41 = vadd.f32 %v1336_v38, %v1322_v36 }
 0x157   : > { %v1363_v40 = vadd.f32 %v1362_v39, %v1349_v44 }
 0x15c   : > { %v1350_v43 = vpop.f32.mrf.mxu2 }
 0x15d   : > { %v1351_v56 = vadd.f32 %v1350_v43, %v1337_v41  ;;  %v1364_v10 = vpop.f32.mrf.mxu3 }
 0x15f   : > { %v1365_v14 = vadd.f32 %v1364_v10, %v1351_v56 }
 0x16c   : > { %v1376_v42 = vpop.f32.mrf.mxu0 }
 0x16d   : > { %v1377_v45 = vadd.f32 %v1376_v42, %v1363_v40  ;;  %v1390_v49 = vpop.f32.mrf.mxu1 }
 0x16f   : > { %v1391_v47 = vadd.f32 %v1390_v49, %v1377_v45 }
 0x171   : > { %v1479_v48 = vadd.f32 %v1391_v47, %v695_v46 }
 0x173   : > { %1483 = vst [vmem:[#allocation2 + $0x10] sm:$0xff] %v1479_v48 }
 0x174   : > { %v1378_v50 = vpop.f32.mrf.mxu0  ;;  %v1404_v57 = vpop.f32.mrf.mxu2 }
 0x175   : > { %v1379_v51 = vadd.f32 %v1378_v50, %v1365_v14  ;;  %v1392_v52 = vpop.f32.mrf.mxu1  ;;  %v1418_v58 = vpop.f32.mrf.mxu3 }
 0x176   : > { %v1419_v60 = vadd.f32 %v1418_v58, %v1404_v57 }
 0x177   : > { %v1393_v54 = vadd.f32 %v1392_v52, %v1379_v51 }
 0x179   : > { %v1481_v55 = vadd.f32 %v1393_v54, %v697_v53 }
 0x17b   : > { %1485 = vst [vmem:[#allocation2 + $0x18] sm:$0xff] %v1481_v55 }
 0x17c   : > { %v1406_v59 = vpop.f32.mrf.mxu2 }
 0x17d   : > { %v1420_v61 = vpop.f32.mrf.mxu3 }
 0x17e   : > { %v1421_v3 = vadd.f32 %v1420_v61, %v1406_v59 }
 0x18c   : > { %v1432_v62 = vpop.f32.mrf.mxu0 }
 0x18d   : > { %v1433_v63 = vadd.f32 %v1432_v62, %v1419_v60  ;;  %v1446_v0 = vpop.f32.mrf.mxu1 }
 0x18f   : > { %v1447_v1 = vadd.f32 %v1446_v0, %v1433_v63 }
 0x194   : > { %v1460_v2 = vpop.f32.mrf.mxu2  ;;  %v1434_v6 = vpop.f32.mrf.mxu0 }
 0x195   : > { %v1461_v4 = vadd.f32 %v1460_v2, %v1447_v1  ;;  %v1474_v5 = vpop.f32.mrf.mxu3  ;;  %v1435_v9 = vadd.f32 %v1434_v6, %v1421_v3  ;;  %v1448_v12 = vpop.f32.mrf.mxu1 }
 0x197   : > { %v1475_v8 = vadd.f32 %v1474_v5, %v1461_v4  ;;  %v1449_v13 = vadd.f32 %v1448_v12, %v1435_v9 }
 0x199   : > { %v1480_v11 = vadd.f32 %v1475_v8, %v696_v7 }
 0x19b   : > { %1484 = vst [vmem:[#allocation2] sm:$0xff] %v1480_v11 }
 0x19c   : > { %v1462_v15 = vpop.f32.mrf.mxu2 }
 0x19d   : > { %v1463_v16 = vadd.f32 %v1462_v15, %v1449_v13  ;;  %v1476_v18 = vpop.f32.mrf.mxu3 }
 0x19f   : > { %v1477_v19 = vadd.f32 %v1476_v18, %v1463_v16  ;;  %1490 = sbr.rel (%p2090_p5) target bundleno = 434 (0x1b2), region = 101 }
 0x1a1   : > { %v1482_v20 = vadd.f32 %v1477_v19, %v698_v17 }
 0x1a3   : > { %1486 = vst [vmem:[#allocation2 + $0x8] sm:$0xff] %v1482_v20 }
 0x1a4   : > { %v1491_v21 = vld [vmem:[#allocation2 + $0x10] sm:$0xff]  ;;  %v1492_v22 = vld [vmem:[#allocation2] sm:$0xff]  ;;  %v1493_v26 = vld [vmem:[#allocation2 + $0x18] sm:$0xff] }
 0x1a5   : > { %v1495_v23 = vld [vmem:[%s683_s5] sm:$0x3] }
 0x1a6   : > { %v1497_v24 = vperm.slane %v1495_v23, 0  ;;  %v1498_v25 = vperm.slane %v1495_v23, 1 }
 0x1a8   : > { %v1501_v28 = vadd.f32 %v1497_v24, %v1491_v21  ;;  %v1502_v29 = vadd.f32 %v1498_v25, %v1492_v22  ;;  %v1503_v30 = vadd.f32 %v1497_v24, %v1493_v26 }
 0x1aa   : > { %v1494_v27 = vld [vmem:[#allocation2 + $0x8] sm:$0xff]  ;;  %v1505_v32 = vmax.f32 %v1501_v28, 0.0  ;;  %v1506_v33 = vmax.f32 %v1502_v29, 0.0  ;;  %v1507_v35 = vmax.f32 %v1503_v30, 0.0 }
 0x1ab   : > { %v1504_v31 = vadd.f32 %v1498_v25, %v1494_v27 }
 0x1ac   : > { %v1509_v36 = vpack.c.bf16 %v1506_v33, %v1505_v32 }
 0x1ad   : > { %v1508_v34 = vmax.f32 %v1504_v31, 0.0 }
 0x1ae   : > { %1511 = vst [vmem:[%s2729_s25] sm:$0xff] %v1509_v36 }
 0x1af   : > { %v1510_v37 = vpack.c.bf16 %v1508_v34, %v1507_v35 }
 0x1b1   : > { %1512 = vst [vmem:[%s2729_s25 + $0x8] sm:$0xff] %v1510_v37 }
 0x1b2 PF: > { %1519 = sbr.rel (!%p2497_p12) target bundleno = 442 (0x1ba), region = 105  ;;  %s2200_s14 = sshll.u32 (%p2497_p12), %s2368_s19, 3 }
 0x1b3   : > { %s1525_s0 = scalar_lea.vmem (%p2497_p12), %s3012_s3, %s2200_s14 }
 0x1b5   : > { %v1556_v38 = vld [vmem:[%s2729_s25] sm:$0xff] (%p2497_p12) }
 0x1b6   : > { %1557 = vst [vmem:[%s1525_s0] sm:$0xff] (%p2497_p12), %v1556_v38 }
 0x1b8   : > { %v1558_v44 = vld [vmem:[%s2729_s25 + $0x8] sm:$0xff] }
 0x1b9   : > { %1559 = vst [vmem:[%s1525_s0 + $0x10] sm:$0xff] %v1558_v44 }
 0x1ba PF: > { %s13_s22 = sadd.s32 1, %s2380_s22   ;;  %s3022_s25 = sld [smem:[#allocation6_spill]] }
 0x1bb   : > { %p10_p6 = scmp.ge.s32.totalorder %s13_s22, 14   ;;  %s3023_s12 = smov %s2344_s13 }
 0x1bc   : > { %s3024_s13 = smov %s2495_s9  ;;  %s3025_s14 = smov %s2352_s15 }
 0x1bd   : > { %s3026_s15 = smov %s2492_s8  ;;  %s3027_s16 = smov %s2360_s17 }
 0x1be   : > { %s3028_s17 = smov %s2478_s30  ;;  %s3029_s18 = smov %s2372_s20 }
 0x1bf   : > { %s3030_s19 = smov %s2376_s21  ;;  %s3031_s20 = smov %s3034_s24 }
 0x1c0   : > { %s3032_s21 = smov %s3022_s25  ;;  %12 = sbr.rel (!%p10_p6) target bundleno = 9 (0x9), region = 185 }

// kernel: _lambda_.68
= control target key start
LH: loop header
LB: loop body
LE: loop exit
PB: predicated region body
PF: predicated region fallthrough
CT: control target
= control target key end

     0   :  { %s3169_s0 = inlined_call_operand.vmem [shape: bf16[16,4608], index: 0, kind: input, shape index: {}]   ;;  %s3170_s1 = inlined_call_operand.vmem [shape: bf16[4608,512], index: 1, kind: input, shape index: {}]   ;;  %s3171_s2 = inlined_call_operand.vmem [shape: f32[1,512], index: 2, kind: input, shape index: {}]   ;;  %s3172_s3 = inlined_call_operand.vmem [shape: bf16[16,512], index: 3, kind: input, shape index: {}]   ;;  %s3173_s4 = inlined_call_operand.vmem [shape: bf16[16,512], index: 4, kind: output, shape index: {}]  }
   0x1   :  { %3176 = sst [smem:[#allocation9_spill]] %s3169_s0 }
   0x2   :  { %s2538_s15 = smov 0   ;;  %s2540_s16 = smov 0  }
   0x3   :  { %s2542_s17 = smov 0   ;;  %s2544_s18 = smov 0  }
   0x4   :  { %s2546_s19 = smov 0   ;;  %s2548_s20 = smov 0  }
   0x5   :  { %s2550_s21 = smov 0   ;;  %s2552_s22 = smov 0  }
   0x6   :  { %s2554_s23 = smov 0   ;;  %s2556_s24 = smov 0  }
   0x7   :  { %s2558_s25 = smov 0  }
   0x8 LB: > { %s1795_s26 = sadd.s32 4294967295, %s2510_s25   ;;  %s26_s27 = sadd.s32 1, %s2502_s23  ;;  %s2510_s25 = sphi %s2558_s25, %s14_s25   ;;  %s2506_s24 = sphi %s2556_s24, %s3195_s24   ;;  %s2502_s23 = sphi %s2554_s23, %s3194_s23   ;;  %s2498_s22 = sphi %s2552_s22, %s3193_s22   ;;  %s2494_s21 = sphi %s2550_s21, %s3192_s21   ;;  %s2490_s20 = sphi %s2548_s20, %s3191_s20   ;;  %s2486_s19 = sphi %s2546_s19, %s3190_s19   ;;  %s2482_s18 = sphi %s2544_s18, %s3189_s18   ;;  %s2478_s17 = sphi %s2542_s17, %s3188_s17   ;;  %s2474_s16 = sphi %s2540_s16, %s3187_s16   ;;  %s2470_s15 = sphi %s2538_s15, %s3186_s15  }
   0x9   : > { %p27_p0 = scmp.ge.s32.totalorder %s26_s27, 6  ;;  %s29_s28 = sadd.s32 1, %s2506_s24 }
   0xa   : > { %s42_s29 = sadd.s32 1, %s2490_s20  ;;  %p49_p1 = scmp.ne.s32.totalorder %s2490_s20, %s2486_s19 }
   0xb   : > { %s3197_s27 = smov (%p27_p0, %s26_s27), 0  ;;  %s3199_s28 = smov (!%p27_p0, %s29_s28), %s2506_s24 }
   0xc   : > { %3177 = sst [smem:[#allocation7_spill]] %s3197_s27  ;;  %s38_s30 = ssub.s32 %s2502_s23, %s3197_s27 }
   0xd   : > { %p50_p2 = scmp.eq.s32.totalorder %s2510_s25, 0  ;;  %p31_p3 = scmp.ge.s32.totalorder %s3199_s28, 2 }
   0xe   : > { %p40_p4 = scmp.eq.s32.totalorder %s38_s30, 0  ;;  %s70_s6 = sadd.s32 1, %s2482_s18 }
   0xf   : > { %p2607_p5 = por %p50_p2, %p49_p1  ;;  %s3201_s28 = smov (%p31_p3, %s3199_s28), 0 }
  0x10   : > { %3179 = sst [smem:[#allocation8_spill]] %s3201_s28  ;;  %s66_s8 = ssub.s32 %s2506_s24, %s3201_s28 }
  0x11   : > { %s2615_s7 = scalar_select %p40_p4, %s2490_s20, %s42_s29  }
  0x12   : > { %p77_p6 = scmp.ne.s32.totalorder %s2482_s18, %s2478_s17  ;;  %s67_s9 = sor.u32 %s66_s8, %s38_s30 }
  0x13   : > { %p122_p7 = scmp.eq.s32.totalorder %s66_s8, 0  ;;  %p68_p8 = scmp.eq.s32.totalorder %s67_s9, 0 }
  0x14   : > { %p2623_p9 = por %p77_p6, %p50_p2  ;;  %s124_s11 = sadd.s32 1, %s2474_s16 }
  0x15   : > { %p131_p10 = scmp.ne.s32.totalorder %s2474_s16, %s2470_s15  ;;  %p163_p12 = scmp.eq.s32.totalorder %s1795_s26, 11 }
  0x16   : > { %s2631_s12 = scalar_select %p68_p8, %s2482_s18, %s70_s6  }
  0x17   : > { %s2634_s13 = scalar_select %p122_p7, %s2474_s16, %s124_s11  }
  0x18   : > { %p2638_p11 = por %p131_p10, %p50_p2  ;;  %p2642_p13 = por %p163_p12, %p131_p10 }
  0x19   : > { %p1798_p0 = scmp.ge.s32.totalorder %s2510_s25, 12 }
  0x1b   : > { %185 = sbr.rel (%p1798_p0) target bundleno = 157 (0x9d), region = 16 }
  0x20   : > { %188 = sbr.rel (!%p2607_p5) target bundleno = 47 (0x2f), region = 20  ;;  %s190_s30 = sand.u32 (%p2607_p5), 1, %s2490_s20  }
  0x21   : > { %s2225_s6 = smul.u32 (%p2607_p5), 24, %s2502_s23  ;;  %s3183_s0 = sld [smem:[#allocation9_spill]] (%p2607_p5) }
  0x22   : > { %s2331_s8 = smul.u32 (%p2607_p5), 48, %s190_s30 }
  0x24   : > { %s192_s26 = scalar_lea.vmem (%p2607_p5), [#allocation3], %s2331_s8 }
  0x27   : > { %s198_s28 = scalar_lea.vmem %s3183_s0, %s2225_s6 }
  0x28   : > { %v211_v0 = vld [vmem:[%s198_s28] sm:$0xff]  ;;  %v213_v1 = vld [vmem:[%s198_s28 + $0x8] sm:$0xff]  ;;  %v215_v2 = vld [vmem:[%s198_s28 + $0x10] sm:$0xff] }
  0x29   : > { %212 = vst [vmem:[%s192_s26] sm:$0xff] %v211_v0  ;;  %v217_v3 = vld [vmem:[%s198_s28 + $0x90] sm:$0xff]  ;;  %v219_v4 = vld [vmem:[%s198_s28 + $0x98] sm:$0xff]  ;;  %v221_v5 = vld [vmem:[%s198_s28 + $0xa0] sm:$0xff] }
  0x2a   : > { %214 = vst [vmem:[%s192_s26 + $0x8] sm:$0xff] %v213_v1 }
  0x2b   : > { %216 = vst [vmem:[%s192_s26 + $0x10] sm:$0xff] %v215_v2 }
  0x2c   : > { %218 = vst [vmem:[%s192_s26 + $0x18] sm:$0xff] %v217_v3 }
  0x2d   : > { %220 = vst [vmem:[%s192_s26 + $0x20] sm:$0xff] %v219_v4 }
  0x2e   : > { %222 = vst [vmem:[%s192_s26 + $0x28] sm:$0xff] %v221_v5 }
  0x2f PF: > { %228 = sbr.rel (!%p2623_p9) target bundleno = 151 (0x97), region = 43  ;;  %s230_s5 = sand.u32 (%p2623_p9), 1, %s2482_s18  }
  0x30   : > { %s2332_s30 = smul.u32 (%p2623_p9), 768, %s230_s5  ;;  %s1800_s6 = sshll.u32 (%p2623_p9), %s2506_s24, 1 }
  0x31   : > { %s2226_s8 = smul.u32 (%p2623_p9), 384, %s2502_s23 }
  0x32   : > { %s2667_s10 = scalar_lea.vmem (%p2623_p9), [#allocation4], %s2332_s30 }
  0x33   : > { %s236_s9 = sadd.s32 (%p2623_p9), %s2226_s8, %s1800_s6 }
  0x34   : > { %s1802_s11 = sshll.u32 %s236_s9, 2 }
  0x35   : > { %s2662_s28 = scalar_lea.vmem %s3170_s1, %s1802_s11 }
  0x36   : > { %v457_v6 = vld [vmem:[%s2662_s28] sm:$0xff]  ;;  %v459_v7 = vld [vmem:[%s2662_s28 + $0x10] sm:$0xff] }
  0x37   : > { %v461_v8 = vld [vmem:[%s2662_s28 + $0x20] sm:$0xff]  ;;  %458 = vst [vmem:[%s2667_s10] sm:$0xff] %v457_v6  ;;  %v463_v9 = vld [vmem:[%s2662_s28 + $0x30] sm:$0xff] }
  0x38   : > { %460 = vst [vmem:[%s2667_s10 + $0x8] sm:$0xff] %v459_v7  ;;  %v465_v10 = vld [vmem:[%s2662_s28 + $0x40] sm:$0xff]  ;;  %v467_v11 = vld [vmem:[%s2662_s28 + $0x50] sm:$0xff] }
  0x39   : > { %462 = vst [vmem:[%s2667_s10 + $0x10] sm:$0xff] %v461_v8  ;;  %v469_v12 = vld [vmem:[%s2662_s28 + $0x60] sm:$0xff]  ;;  %v471_v13 = vld [vmem:[%s2662_s28 + $0x70] sm:$0xff] }
  0x3a   : > { %464 = vst [vmem:[%s2667_s10 + $0x18] sm:$0xff] %v463_v9  ;;  %v473_v14 = vld [vmem:[%s2662_s28 + $0x80] sm:$0xff]  ;;  %v475_v15 = vld [vmem:[%s2662_s28 + $0x90] sm:$0xff] }
  0x3b   : > { %466 = vst [vmem:[%s2667_s10 + $0x20] sm:$0xff] %v465_v10  ;;  %v477_v16 = vld [vmem:[%s2662_s28 + $0xa0] sm:$0xff]  ;;  %v479_v17 = vld [vmem:[%s2662_s28 + $0xb0] sm:$0xff] }
  0x3c   : > { %468 = vst [vmem:[%s2667_s10 + $0x28] sm:$0xff] %v467_v11  ;;  %v481_v18 = vld [vmem:[%s2662_s28 + $0xc0] sm:$0xff]  ;;  %v483_v19 = vld [vmem:[%s2662_s28 + $0xd0] sm:$0xff] }
  0x3d   : > { %470 = vst [vmem:[%s2667_s10 + $0x30] sm:$0xff] %v469_v12  ;;  %v485_v20 = vld [vmem:[%s2662_s28 + $0xe0] sm:$0xff]  ;;  %v487_v21 = vld [vmem:[%s2662_s28 + $0xf0] sm:$0xff] }
  0x3e   : > { %472 = vst [vmem:[%s2667_s10 + $0x38] sm:$0xff] %v471_v13  ;;  %v489_v22 = vld [vmem:[%s2662_s28 + $0x100] sm:$0xff]  ;;  %v491_v23 = vld [vmem:[%s2662_s28 + $0x110] sm:$0xff] }
  0x3f   : > { %474 = vst [vmem:[%s2667_s10 + $0x40] sm:$0xff] %v473_v14  ;;  %v493_v24 = vld [vmem:[%s2662_s28 + $0x120] sm:$0xff]  ;;  %v495_v25 = vld [vmem:[%s2662_s28 + $0x130] sm:$0xff] }
  0x40   : > { %476 = vst [vmem:[%s2667_s10 + $0x48] sm:$0xff] %v475_v15  ;;  %v497_v26 = vld [vmem:[%s2662_s28 + $0x140] sm:$0xff]  ;;  %v499_v27 = vld [vmem:[%s2662_s28 + $0x150] sm:$0xff] }
  0x41   : > { %478 = vst [vmem:[%s2667_s10 + $0x50] sm:$0xff] %v477_v16  ;;  %v501_v28 = vld [vmem:[%s2662_s28 + $0x160] sm:$0xff]  ;;  %v503_v29 = vld [vmem:[%s2662_s28 + $0x170] sm:$0xff] }
  0x42   : > { %480 = vst [vmem:[%s2667_s10 + $0x58] sm:$0xff] %v479_v17  ;;  %v505_v30 = vld [vmem:[%s2662_s28 + $0x180] sm:$0xff]  ;;  %v507_v31 = vld [vmem:[%s2662_s28 + $0x190] sm:$0xff] }
  0x43   : > { %482 = vst [vmem:[%s2667_s10 + $0x60] sm:$0xff] %v481_v18  ;;  %v509_v32 = vld [vmem:[%s2662_s28 + $0x1a0] sm:$0xff]  ;;  %v511_v33 = vld [vmem:[%s2662_s28 + $0x1b0] sm:$0xff] }
  0x44   : > { %484 = vst [vmem:[%s2667_s10 + $0x68] sm:$0xff] %v483_v19  ;;  %v513_v34 = vld [vmem:[%s2662_s28 + $0x1c0] sm:$0xff]  ;;  %v515_v35 = vld [vmem:[%s2662_s28 + $0x1d0] sm:$0xff] }
  0x45   : > { %486 = vst [vmem:[%s2667_s10 + $0x70] sm:$0xff] %v485_v20  ;;  %v517_v36 = vld [vmem:[%s2662_s28 + $0x1e0] sm:$0xff]  ;;  %v519_v37 = vld [vmem:[%s2662_s28 + $0x1f0] sm:$0xff] }
  0x46   : > { %488 = vst [vmem:[%s2667_s10 + $0x78] sm:$0xff] %v487_v21  ;;  %v521_v38 = vld [vmem:[%s2662_s28 + $0x200] sm:$0xff]  ;;  %v523_v39 = vld [vmem:[%s2662_s28 + $0x210] sm:$0xff] }
  0x47   : > { %490 = vst [vmem:[%s2667_s10 + $0x80] sm:$0xff] %v489_v22  ;;  %v525_v40 = vld [vmem:[%s2662_s28 + $0x220] sm:$0xff]  ;;  %v527_v41 = vld [vmem:[%s2662_s28 + $0x230] sm:$0xff] }
  0x48   : > { %492 = vst [vmem:[%s2667_s10 + $0x88] sm:$0xff] %v491_v23  ;;  %v529_v42 = vld [vmem:[%s2662_s28 + $0x240] sm:$0xff]  ;;  %v531_v43 = vld [vmem:[%s2662_s28 + $0x250] sm:$0xff] }
  0x49   : > { %494 = vst [vmem:[%s2667_s10 + $0x90] sm:$0xff] %v493_v24  ;;  %v533_v44 = vld [vmem:[%s2662_s28 + $0x260] sm:$0xff]  ;;  %v535_v45 = vld [vmem:[%s2662_s28 + $0x270] sm:$0xff] }
  0x4a   : > { %496 = vst [vmem:[%s2667_s10 + $0x98] sm:$0xff] %v495_v25  ;;  %v537_v46 = vld [vmem:[%s2662_s28 + $0x280] sm:$0xff]  ;;  %v539_v47 = vld [vmem:[%s2662_s28 + $0x290] sm:$0xff] }
  0x4b   : > { %498 = vst [vmem:[%s2667_s10 + $0xa0] sm:$0xff] %v497_v26  ;;  %v541_v48 = vld [vmem:[%s2662_s28 + $0x2a0] sm:$0xff]  ;;  %v543_v49 = vld [vmem:[%s2662_s28 + $0x2b0] sm:$0xff] }
  0x4c   : > { %500 = vst [vmem:[%s2667_s10 + $0xa8] sm:$0xff] %v499_v27  ;;  %v545_v50 = vld [vmem:[%s2662_s28 + $0x2c0] sm:$0xff]  ;;  %v547_v51 = vld [vmem:[%s2662_s28 + $0x2d0] sm:$0xff] }
  0x4d   : > { %502 = vst [vmem:[%s2667_s10 + $0xb0] sm:$0xff] %v501_v28  ;;  %v549_v52 = vld [vmem:[%s2662_s28 + $0x2e0] sm:$0xff]  ;;  %v551_v53 = vld [vmem:[%s2662_s28 + $0x2f0] sm:$0xff] }
  0x4e   : > { %504 = vst [vmem:[%s2667_s10 + $0xb8] sm:$0xff] %v503_v29  ;;  %v553_v54 = vld [vmem:[%s2662_s28 + $0x300] sm:$0xff]  ;;  %v555_v55 = vld [vmem:[%s2662_s28 + $0x310] sm:$0xff] }
  0x4f   : > { %506 = vst [vmem:[%s2667_s10 + $0xc0] sm:$0xff] %v505_v30  ;;  %v557_v56 = vld [vmem:[%s2662_s28 + $0x320] sm:$0xff]  ;;  %v559_v57 = vld [vmem:[%s2662_s28 + $0x330] sm:$0xff] }
  0x50   : > { %508 = vst [vmem:[%s2667_s10 + $0xc8] sm:$0xff] %v507_v31  ;;  %v561_v58 = vld [vmem:[%s2662_s28 + $0x340] sm:$0xff]  ;;  %v563_v59 = vld [vmem:[%s2662_s28 + $0x350] sm:$0xff] }
  0x51   : > { %510 = vst [vmem:[%s2667_s10 + $0xd0] sm:$0xff] %v509_v32  ;;  %v565_v60 = vld [vmem:[%s2662_s28 + $0x360] sm:$0xff]  ;;  %v567_v61 = vld [vmem:[%s2662_s28 + $0x370] sm:$0xff] }
  0x52   : > { %512 = vst [vmem:[%s2667_s10 + $0xd8] sm:$0xff] %v511_v33  ;;  %v569_v62 = vld [vmem:[%s2662_s28 + $0x380] sm:$0xff]  ;;  %v571_v63 = vld [vmem:[%s2662_s28 + $0x390] sm:$0xff] }
  0x53   : > { %514 = vst [vmem:[%s2667_s10 + $0xe0] sm:$0xff] %v513_v34  ;;  %v573_v0 = vld [vmem:[%s2662_s28 + $0x3a0] sm:$0xff]  ;;  %v575_v1 = vld [vmem:[%s2662_s28 + $0x3b0] sm:$0xff] }
  0x54   : > { %516 = vst [vmem:[%s2667_s10 + $0xe8] sm:$0xff] %v515_v35  ;;  %v577_v2 = vld [vmem:[%s2662_s28 + $0x3c0] sm:$0xff]  ;;  %v579_v3 = vld [vmem:[%s2662_s28 + $0x3d0] sm:$0xff] }
  0x55   : > { %518 = vst [vmem:[%s2667_s10 + $0xf0] sm:$0xff] %v517_v36  ;;  %v581_v4 = vld [vmem:[%s2662_s28 + $0x3e0] sm:$0xff]  ;;  %v583_v5 = vld [vmem:[%s2662_s28 + $0x3f0] sm:$0xff] }
  0x56   : > { %520 = vst [vmem:[%s2667_s10 + $0xf8] sm:$0xff] %v519_v37  ;;  %v585_v6 = vld [vmem:[%s2662_s28 + $0x400] sm:$0xff]  ;;  %v587_v7 = vld [vmem:[%s2662_s28 + $0x410] sm:$0xff] }
  0x57   : > { %522 = vst [vmem:[%s2667_s10 + $0x100] sm:$0xff] %v521_v38  ;;  %v589_v8 = vld [vmem:[%s2662_s28 + $0x420] sm:$0xff]  ;;  %v591_v9 = vld [vmem:[%s2662_s28 + $0x430] sm:$0xff] }
  0x58   : > { %524 = vst [vmem:[%s2667_s10 + $0x108] sm:$0xff] %v523_v39  ;;  %v593_v10 = vld [vmem:[%s2662_s28 + $0x440] sm:$0xff]  ;;  %v595_v11 = vld [vmem:[%s2662_s28 + $0x450] sm:$0xff] }
  0x59   : > { %526 = vst [vmem:[%s2667_s10 + $0x110] sm:$0xff] %v525_v40  ;;  %v597_v12 = vld [vmem:[%s2662_s28 + $0x460] sm:$0xff]  ;;  %v599_v13 = vld [vmem:[%s2662_s28 + $0x470] sm:$0xff] }
  0x5a   : > { %528 = vst [vmem:[%s2667_s10 + $0x118] sm:$0xff] %v527_v41  ;;  %v601_v14 = vld [vmem:[%s2662_s28 + $0x480] sm:$0xff]  ;;  %v603_v15 = vld [vmem:[%s2662_s28 + $0x490] sm:$0xff] }
  0x5b   : > { %530 = vst [vmem:[%s2667_s10 + $0x120] sm:$0xff] %v529_v42  ;;  %v605_v16 = vld [vmem:[%s2662_s28 + $0x4a0] sm:$0xff]  ;;  %v607_v17 = vld [vmem:[%s2662_s28 + $0x4b0] sm:$0xff] }
  0x5c   : > { %532 = vst [vmem:[%s2667_s10 + $0x128] sm:$0xff] %v531_v43  ;;  %v609_v18 = vld [vmem:[%s2662_s28 + $0x4c0] sm:$0xff]  ;;  %v611_v19 = vld [vmem:[%s2662_s28 + $0x4d0] sm:$0xff] }
  0x5d   : > { %534 = vst [vmem:[%s2667_s10 + $0x130] sm:$0xff] %v533_v44  ;;  %v613_v20 = vld [vmem:[%s2662_s28 + $0x4e0] sm:$0xff]  ;;  %v615_v21 = vld [vmem:[%s2662_s28 + $0x4f0] sm:$0xff] }
  0x5e   : > { %536 = vst [vmem:[%s2667_s10 + $0x138] sm:$0xff] %v535_v45  ;;  %v617_v22 = vld [vmem:[%s2662_s28 + $0x500] sm:$0xff]  ;;  %v619_v23 = vld [vmem:[%s2662_s28 + $0x510] sm:$0xff] }
  0x5f   : > { %538 = vst [vmem:[%s2667_s10 + $0x140] sm:$0xff] %v537_v46  ;;  %v621_v24 = vld [vmem:[%s2662_s28 + $0x520] sm:$0xff]  ;;  %v623_v25 = vld [vmem:[%s2662_s28 + $0x530] sm:$0xff] }
  0x60   : > { %540 = vst [vmem:[%s2667_s10 + $0x148] sm:$0xff] %v539_v47  ;;  %v625_v26 = vld [vmem:[%s2662_s28 + $0x540] sm:$0xff]  ;;  %v627_v27 = vld [vmem:[%s2662_s28 + $0x550] sm:$0xff] }
  0x61   : > { %542 = vst [vmem:[%s2667_s10 + $0x150] sm:$0xff] %v541_v48  ;;  %v629_v28 = vld [vmem:[%s2662_s28 + $0x560] sm:$0xff]  ;;  %v631_v29 = vld [vmem:[%s2662_s28 + $0x570] sm:$0xff] }
  0x62   : > { %544 = vst [vmem:[%s2667_s10 + $0x158] sm:$0xff] %v543_v49  ;;  %v633_v30 = vld [vmem:[%s2662_s28 + $0x580] sm:$0xff]  ;;  %v635_v31 = vld [vmem:[%s2662_s28 + $0x590] sm:$0xff] }
  0x63   : > { %546 = vst [vmem:[%s2667_s10 + $0x160] sm:$0xff] %v545_v50  ;;  %v637_v32 = vld [vmem:[%s2662_s28 + $0x5a0] sm:$0xff]  ;;  %v639_v33 = vld [vmem:[%s2662_s28 + $0x5b0] sm:$0xff] }
  0x64   : > { %548 = vst [vmem:[%s2667_s10 + $0x168] sm:$0xff] %v547_v51  ;;  %v641_v34 = vld [vmem:[%s2662_s28 + $0x5c0] sm:$0xff]  ;;  %v643_v35 = vld [vmem:[%s2662_s28 + $0x5d0] sm:$0xff] }
  0x65   : > { %550 = vst [vmem:[%s2667_s10 + $0x170] sm:$0xff] %v549_v52  ;;  %v645_v36 = vld [vmem:[%s2662_s28 + $0x5e0] sm:$0xff]  ;;  %v647_v37 = vld [vmem:[%s2662_s28 + $0x5f0] sm:$0xff] }
  0x66   : > { %552 = vst [vmem:[%s2667_s10 + $0x178] sm:$0xff] %v551_v53 }
  0x67   : > { %554 = vst [vmem:[%s2667_s10 + $0x180] sm:$0xff] %v553_v54 }
  0x68   : > { %556 = vst [vmem:[%s2667_s10 + $0x188] sm:$0xff] %v555_v55 }
  0x69   : > { %558 = vst [vmem:[%s2667_s10 + $0x190] sm:$0xff] %v557_v56 }
  0x6a   : > { %560 = vst [vmem:[%s2667_s10 + $0x198] sm:$0xff] %v559_v57 }
  0x6b   : > { %562 = vst [vmem:[%s2667_s10 + $0x1a0] sm:$0xff] %v561_v58 }
  0x6c   : > { %564 = vst [vmem:[%s2667_s10 + $0x1a8] sm:$0xff] %v563_v59 }
  0x6d   : > { %566 = vst [vmem:[%s2667_s10 + $0x1b0] sm:$0xff] %v565_v60 }
  0x6e   : > { %568 = vst [vmem:[%s2667_s10 + $0x1b8] sm:$0xff] %v567_v61 }
  0x6f   : > { %570 = vst [vmem:[%s2667_s10 + $0x1c0] sm:$0xff] %v569_v62 }
  0x70   : > { %572 = vst [vmem:[%s2667_s10 + $0x1c8] sm:$0xff] %v571_v63 }
  0x71   : > { %574 = vst [vmem:[%s2667_s10 + $0x1d0] sm:$0xff] %v573_v0 }
  0x72   : > { %576 = vst [vmem:[%s2667_s10 + $0x1d8] sm:$0xff] %v575_v1 }
  0x73   : > { %578 = vst [vmem:[%s2667_s10 + $0x1e0] sm:$0xff] %v577_v2 }
  0x74   : > { %580 = vst [vmem:[%s2667_s10 + $0x1e8] sm:$0xff] %v579_v3 }
  0x75   : > { %582 = vst [vmem:[%s2667_s10 + $0x1f0] sm:$0xff] %v581_v4 }
  0x76   : > { %584 = vst [vmem:[%s2667_s10 + $0x1f8] sm:$0xff] %v583_v5 }
  0x77   : > { %586 = vst [vmem:[%s2667_s10 + $0x200] sm:$0xff] %v585_v6 }
  0x78   : > { %588 = vst [vmem:[%s2667_s10 + $0x208] sm:$0xff] %v587_v7 }
  0x79   : > { %590 = vst [vmem:[%s2667_s10 + $0x210] sm:$0xff] %v589_v8 }
  0x7a   : > { %592 = vst [vmem:[%s2667_s10 + $0x218] sm:$0xff] %v591_v9 }
  0x7b   : > { %594 = vst [vmem:[%s2667_s10 + $0x220] sm:$0xff] %v593_v10 }
  0x7c   : > { %596 = vst [vmem:[%s2667_s10 + $0x228] sm:$0xff] %v595_v11 }
  0x7d   : > { %598 = vst [vmem:[%s2667_s10 + $0x230] sm:$0xff] %v597_v12 }
  0x7e   : > { %600 = vst [vmem:[%s2667_s10 + $0x238] sm:$0xff] %v599_v13 }
  0x7f   : > { %602 = vst [vmem:[%s2667_s10 + $0x240] sm:$0xff] %v601_v14 }
  0x80   : > { %604 = vst [vmem:[%s2667_s10 + $0x248] sm:$0xff] %v603_v15 }
  0x81   : > { %606 = vst [vmem:[%s2667_s10 + $0x250] sm:$0xff] %v605_v16 }
  0x82   : > { %608 = vst [vmem:[%s2667_s10 + $0x258] sm:$0xff] %v607_v17 }
  0x83   : > { %610 = vst [vmem:[%s2667_s10 + $0x260] sm:$0xff] %v609_v18 }
  0x84   : > { %612 = vst [vmem:[%s2667_s10 + $0x268] sm:$0xff] %v611_v19 }
  0x85   : > { %614 = vst [vmem:[%s2667_s10 + $0x270] sm:$0xff] %v613_v20 }
  0x86   : > { %616 = vst [vmem:[%s2667_s10 + $0x278] sm:$0xff] %v615_v21 }
  0x87   : > { %618 = vst [vmem:[%s2667_s10 + $0x280] sm:$0xff] %v617_v22 }
  0x88   : > { %620 = vst [vmem:[%s2667_s10 + $0x288] sm:$0xff] %v619_v23 }
  0x89   : > { %622 = vst [vmem:[%s2667_s10 + $0x290] sm:$0xff] %v621_v24 }
  0x8a   : > { %624 = vst [vmem:[%s2667_s10 + $0x298] sm:$0xff] %v623_v25 }
  0x8b   : > { %626 = vst [vmem:[%s2667_s10 + $0x2a0] sm:$0xff] %v625_v26 }
  0x8c   : > { %628 = vst [vmem:[%s2667_s10 + $0x2a8] sm:$0xff] %v627_v27 }
  0x8d   : > { %630 = vst [vmem:[%s2667_s10 + $0x2b0] sm:$0xff] %v629_v28 }
  0x8e   : > { %632 = vst [vmem:[%s2667_s10 + $0x2b8] sm:$0xff] %v631_v29 }
  0x8f   : > { %634 = vst [vmem:[%s2667_s10 + $0x2c0] sm:$0xff] %v633_v30 }
  0x90   : > { %636 = vst [vmem:[%s2667_s10 + $0x2c8] sm:$0xff] %v635_v31 }
  0x91   : > { %638 = vst [vmem:[%s2667_s10 + $0x2d0] sm:$0xff] %v637_v32 }
  0x92   : > { %640 = vst [vmem:[%s2667_s10 + $0x2d8] sm:$0xff] %v639_v33 }
  0x93   : > { %642 = vst [vmem:[%s2667_s10 + $0x2e0] sm:$0xff] %v641_v34 }
  0x94   : > { %644 = vst [vmem:[%s2667_s10 + $0x2e8] sm:$0xff] %v643_v35 }
  0x95   : > { %646 = vst [vmem:[%s2667_s10 + $0x2f0] sm:$0xff] %v645_v36 }
  0x96   : > { %648 = vst [vmem:[%s2667_s10 + $0x2f8] sm:$0xff] %v647_v37 }
  0x97 PF: > { %662 = sbr.rel (!%p2638_p11) target bundleno = 157 (0x9d), region = 85  ;;  %s664_s0 = sand.u32 (%p2638_p11), 1, %s2474_s16  }
  0x98   : > { %s2227_s27 = sshll.u32 (%p2638_p11), %s2506_s24, 3  ;;  %s1803_s26 = sshll.u32 (%p2638_p11), %s664_s0, 4 }
  0x99   : > { %s672_s6 = scalar_lea.vmem (%p2638_p11), %s3172_s3, %s2227_s27  ;;  %s666_s8 = scalar_lea.vmem (%p2638_p11), [#allocation5], %s1803_s26 }
  0x9a   : > { %v703_v38 = vld [vmem:[%s672_s6] sm:$0xff] (%p2638_p11)  ;;  %v705_v39 = vld [vmem:[%s672_s6 + $0x10] sm:$0xff] (%p2638_p11) }
  0x9b   : > { %704 = vst [vmem:[%s666_s8] sm:$0xff] (%p2638_p11), %v703_v38 }
  0x9c   : > { %706 = vst [vmem:[%s666_s8 + $0x8] sm:$0xff] %v705_v39 }
  0x9d PF: > { %p1806_p1 = scmp.ge.s32.totalorder %s2510_s25, 1  ;;  %p711_p2 = scmp.lt.s32.totalorder %s2510_s25, 13 }
  0x9f   : > { %p712_p3 = pnand %p1806_p1, %p711_p2 }
  0xa0   : > { %s718_s14 = sand.u32 (!%p712_p3), 1, %s2486_s19   ;;  %s725_s9 = sand.u32 (!%p712_p3), 1, %s2478_s17  }
  0xa1   : > { %715 = sbr.rel (%p712_p3) target bundleno = 450 (0x1c2), region = 123  ;;  %s732_s28 = sand.u32 (!%p712_p3), 1, %s2470_s15  }
  0xa2   : > { %s2333_s11 = smul.u32 (!%p712_p3), 48, %s718_s14  ;;  %s2870_s0 = sshll.u32 (!%p712_p3), %s732_s28, 4 }
  0xa3   : > { %s2334_s10 = smul.u32 (!%p712_p3), 768, %s725_s9  ;;  %s1809_s27 = sshll.u32 (!%p712_p3), %s2498_s22, 1 }
  0xa4   : > { %p773_p4 = scmp.lt.s32.totalorder (!%p712_p3), %s1809_s27, 3  ;;  %s2879_s6 = scalar_lea.vmem (!%p712_p3), [#allocation3], %s2333_s11 }
  0xa5   : > { %s2881_s19 = scalar_lea.vmem (!%p712_p3), [#allocation4], %s2334_s10  ;;  %s734_s17 = scalar_lea.vmem (!%p712_p3), [#allocation5], %s2870_s0 }
  0xa6   : > { %s3203_s27 = smov (!%p773_p4, %s1809_s27), 3  ;;  %s2885_s15 = scalar_lea.vmem [#allocation6], %s2870_s0 }
  0xa7   : > { %s775_s30 = scalar_lea.vmem %s3171_s2, %s3203_s27  ;;  %p1810_p5 = scmp.ne.s32.totalorder %s2494_s21, 0 }
  0xa9   : > { %784 = sbr.rel (%p1810_p5) target bundleno = 179 (0xb3), region = 139 }
  0xae   : > { %v2512_v40 = vmov 0.0  }
  0xaf   : > { %785 = vst [vmem:[#allocation2 + $0x10] sm:$0xff] %v2512_v40 }
  0xb0   : > { %786 = vst [vmem:[#allocation2] sm:$0xff] %v2512_v40 }
  0xb1   : > { %787 = vst [vmem:[#allocation2 + $0x18] sm:$0xff] %v2512_v40 }
  0xb2   : > { %788 = vst [vmem:[#allocation2 + $0x8] sm:$0xff] %v2512_v40 }
  0xb3 PF: > { %v1893_v41 = vld [vmem:[%s2881_s19 + $0x70] sm:$0xf]  ;;  %v2249_v42 = vld [vmem:[%s2881_s19 + $0x74] sm:$0xf0]  ;;  %v1885_v52 = vld [vmem:[%s2881_s19 + $0x60] sm:$0xf] }
  0xb4   : > { %v1957_v43 = vld [vmem:[%s2881_s19 + $0xf0] sm:$0xf]  ;;  %v1894_v44 = vor.u32 %v2249_v42, %v1893_v41  ;;  %v2265_v45 = vld [vmem:[%s2881_s19 + $0xf4] sm:$0xf0]  ;;  %v2247_v54 = vld [vmem:[%s2881_s19 + $0x64] sm:$0xf0] }
  0xb5   : > { %v2021_v46 = vld [vmem:[%s2881_s19 + $0x170] sm:$0xf]  ;;  %v2281_v47 = vld [vmem:[%s2881_s19 + $0x174] sm:$0xf0]  ;;  %v1958_v48 = vor.u32 %v2265_v45, %v1957_v43  ;;  %v1949_v55 = vld [vmem:[%s2881_s19 + $0xe0] sm:$0xf]  ;;  %v1886_v57 = vor.u32 %v2247_v54, %v1885_v52 }
  0xb6   : > { %v2022_v49 = vor.u32 %v2281_v47, %v2021_v46  ;;  %v2085_v50 = vld [vmem:[%s2881_s19 + $0x1f0] sm:$0xf]  ;;  %v2297_v51 = vld [vmem:[%s2881_s19 + $0x1f4] sm:$0xf0]  ;;  %1405 = vmatpush.bf16.msra.mxu0 %v1894_v44  ;;  %v2263_v56 = vld [vmem:[%s2881_s19 + $0xe4] sm:$0xf0] }
  0xb7   : > { %v2086_v53 = vor.u32 %v2297_v51, %v2085_v50  ;;  %1419 = vmatpush.bf16.msra.mxu1 %v1958_v48  ;;  %v1950_v58 = vor.u32 %v2263_v56, %v1949_v55  ;;  %v2013_v59 = vld [vmem:[%s2881_s19 + $0x160] sm:$0xf]  ;;  %v2279_v60 = vld [vmem:[%s2881_s19 + $0x164] sm:$0xf0]  ;;  %v1877_v0 = vld [vmem:[%s2881_s19 + $0x50] sm:$0xf] }
  0xb8   : > { %1433 = vmatpush.bf16.msra.mxu2 %v2022_v49  ;;  %v2077_v61 = vld [vmem:[%s2881_s19 + $0x1e0] sm:$0xf]  ;;  %v2014_v62 = vor.u32 %v2279_v60, %v2013_v59  ;;  %v2295_v63 = vld [vmem:[%s2881_s19 + $0x1e4] sm:$0xf0]  ;;  %v2245_v1 = vld [vmem:[%s2881_s19 + $0x54] sm:$0xf0] }
  0xb9   : > { %1447 = vmatpush.bf16.msra.mxu3 %v2086_v53  ;;  %v2078_v2 = vor.u32 %v2295_v63, %v2077_v61  ;;  %v1941_v3 = vld [vmem:[%s2881_s19 + $0xd0] sm:$0xf]  ;;  %v2261_v4 = vld [vmem:[%s2881_s19 + $0xd4] sm:$0xf0]  ;;  %v1878_v6 = vor.u32 %v2245_v1, %v1877_v0  ;;  %v1869_v12 = vld [vmem:[%s2881_s19 + $0x40] sm:$0xf] }
  0xba   : > { %v2005_v5 = vld [vmem:[%s2881_s19 + $0x150] sm:$0xf]  ;;  %1406 = vmatpush.bf16.msra.mxu0 %v1886_v57  ;;  %v2277_v7 = vld [vmem:[%s2881_s19 + $0x154] sm:$0xf0]  ;;  %v1942_v10 = vor.u32 %v2261_v4, %v1941_v3  ;;  %v2243_v13 = vld [vmem:[%s2881_s19 + $0x44] sm:$0xf0] }
  0xbb   : > { %v2069_v8 = vld [vmem:[%s2881_s19 + $0x1d0] sm:$0xf]  ;;  %v2293_v9 = vld [vmem:[%s2881_s19 + $0x1d4] sm:$0xf0]  ;;  %1420 = vmatpush.bf16.msra.mxu1 %v1950_v58  ;;  %v2006_v11 = vor.u32 %v2277_v7, %v2005_v5  ;;  %v1933_v14 = vld [vmem:[%s2881_s19 + $0xc0] sm:$0xf]  ;;  %v1870_v21 = vor.u32 %v2243_v13, %v1869_v12 }
  0xbc   : > { %1434 = vmatpush.bf16.msra.mxu2 %v2014_v62  ;;  %v2070_v15 = vor.u32 %v2293_v9, %v2069_v8  ;;  %v2259_v16 = vld [vmem:[%s2881_s19 + $0xc4] sm:$0xf0]  ;;  %v1997_v17 = vld [vmem:[%s2881_s19 + $0x140] sm:$0xf]  ;;  %v1861_v24 = vld [vmem:[%s2881_s19 + $0x30] sm:$0xf] }
  0xbd   : > { %1448 = vmatpush.bf16.msra.mxu3 %v2078_v2  ;;  %v2275_v18 = vld [vmem:[%s2881_s19 + $0x144] sm:$0xf0]  ;;  %v2061_v19 = vld [vmem:[%s2881_s19 + $0x1c0] sm:$0xf]  ;;  %v1934_v22 = vor.u32 %v2259_v16, %v1933_v14  ;;  %v2241_v25 = vld [vmem:[%s2881_s19 + $0x34] sm:$0xf0] }
  0xbe   : > { %v2291_v20 = vld [vmem:[%s2881_s19 + $0x1c4] sm:$0xf0]  ;;  %1407 = vmatpush.bf16.msra.mxu0 %v1878_v6  ;;  %v1998_v23 = vor.u32 %v2275_v18, %v1997_v17  ;;  %v1925_v26 = vld [vmem:[%s2881_s19 + $0xb0] sm:$0xf]  ;;  %v2257_v28 = vld [vmem:[%s2881_s19 + $0xb4] sm:$0xf0]  ;;  %v1862_v33 = vor.u32 %v2241_v25, %v1861_v24 }
  0xbf   : > { %1421 = vmatpush.bf16.msra.mxu1 %v1942_v10  ;;  %v2062_v27 = vor.u32 %v2291_v20, %v2061_v19  ;;  %v1989_v29 = vld [vmem:[%s2881_s19 + $0x130] sm:$0xf]  ;;  %v2273_v30 = vld [vmem:[%s2881_s19 + $0x134] sm:$0xf0]  ;;  %v1926_v34 = vor.u32 %v2257_v28, %v1925_v26  ;;  %v1853_v36 = vld [vmem:[%s2881_s19 + $0x20] sm:$0xf] }
  0xc0   : > { %1435 = vmatpush.bf16.msra.mxu2 %v2006_v11  ;;  %v2053_v31 = vld [vmem:[%s2881_s19 + $0x1b0] sm:$0xf]  ;;  %v2289_v32 = vld [vmem:[%s2881_s19 + $0x1b4] sm:$0xf0]  ;;  %v1990_v35 = vor.u32 %v2273_v30, %v1989_v29  ;;  %v2239_v37 = vld [vmem:[%s2881_s19 + $0x24] sm:$0xf0] }
  0xc1   : > { %1449 = vmatpush.bf16.msra.mxu3 %v2070_v15  ;;  %v1917_v38 = vld [vmem:[%s2881_s19 + $0xa0] sm:$0xf]  ;;  %v2054_v39 = vor.u32 %v2289_v32, %v2053_v31  ;;  %v2255_v40 = vld [vmem:[%s2881_s19 + $0xa4] sm:$0xf0]  ;;  %v1854_v45 = vor.u32 %v2239_v37, %v1853_v36  ;;  %v1845_v48 = vld [vmem:[%s2881_s19 + $0x10] sm:$0xf] }
  0xc2   : > { %1408 = vmatpush.bf16.msra.mxu0 %v1870_v21  ;;  %v1981_v41 = vld [vmem:[%s2881_s19 + $0x120] sm:$0xf]  ;;  %v2271_v42 = vld [vmem:[%s2881_s19 + $0x124] sm:$0xf0]  ;;  %v1918_v46 = vor.u32 %v2255_v40, %v1917_v38  ;;  %v2237_v49 = vld [vmem:[%s2881_s19 + $0x14] sm:$0xf0] }
  0xc3   : > { %1422 = vmatpush.bf16.msra.mxu1 %v1934_v22  ;;  %v2045_v43 = vld [vmem:[%s2881_s19 + $0x1a0] sm:$0xf]  ;;  %v2287_v44 = vld [vmem:[%s2881_s19 + $0x1a4] sm:$0xf0]  ;;  %v1982_v47 = vor.u32 %v2271_v42, %v1981_v41  ;;  %v1909_v50 = vld [vmem:[%s2881_s19 + $0x90] sm:$0xf]  ;;  %v1846_v57 = vor.u32 %v2237_v49, %v1845_v48 }
  0xc4   : > { %1436 = vmatpush.bf16.msra.mxu2 %v1998_v23  ;;  %v2046_v51 = vor.u32 %v2287_v44, %v2045_v43  ;;  %v2253_v52 = vld [vmem:[%s2881_s19 + $0x94] sm:$0xf0]  ;;  %v1973_v53 = vld [vmem:[%s2881_s19 + $0x110] sm:$0xf]  ;;  %v1837_v58 = vld [vmem:[%s2881_s19] sm:$0xf] }
  0xc5   : > { %1450 = vmatpush.bf16.msra.mxu3 %v2062_v27  ;;  %v2269_v54 = vld [vmem:[%s2881_s19 + $0x114] sm:$0xf0]  ;;  %v2037_v55 = vld [vmem:[%s2881_s19 + $0x190] sm:$0xf]  ;;  %v2235_v59 = vld [vmem:[%s2881_s19 + $0x4] sm:$0xf0]  ;;  %v1910_v60 = vor.u32 %v2253_v52, %v1909_v50 }
  0xc6   : > { %1409 = vmatpush.bf16.msra.mxu0 %v1862_v33  ;;  %v2285_v56 = vld [vmem:[%s2881_s19 + $0x194] sm:$0xf0]  ;;  %v1974_v61 = vor.u32 %v2269_v54, %v1973_v53  ;;  %v1901_v62 = vld [vmem:[%s2881_s19 + $0x80] sm:$0xf]  ;;  %v2251_v63 = vld [vmem:[%s2881_s19 + $0x84] sm:$0xf0]  ;;  %v1838_v8 = vor.u32 %v2235_v59, %v1837_v58 }
  0xc7   : > { %1423 = vmatpush.bf16.msra.mxu1 %v1926_v34  ;;  %v1965_v0 = vld [vmem:[%s2881_s19 + $0x100] sm:$0xf]  ;;  %v2038_v1 = vor.u32 %v2285_v56, %v2037_v55  ;;  %v2267_v2 = vld [vmem:[%s2881_s19 + $0x104] sm:$0xf0]  ;;  %v2149_v5 = vld [vmem:[%s2881_s19 + $0x270] sm:$0xf]  ;;  %v1902_v12 = vor.u32 %v2251_v63, %v1901_v62 }
  0xc8   : > { %1437 = vmatpush.bf16.msra.mxu2 %v1990_v35  ;;  %v2029_v3 = vld [vmem:[%s2881_s19 + $0x180] sm:$0xf]  ;;  %v2283_v4 = vld [vmem:[%s2881_s19 + $0x184] sm:$0xf0]  ;;  %v2313_v6 = vld [vmem:[%s2881_s19 + $0x274] sm:$0xf0]  ;;  %v1966_v13 = vor.u32 %v2267_v2, %v1965_v0 }
  0xc9   : > { %1451 = vmatpush.bf16.msra.mxu3 %v2054_v39  ;;  %v2213_v7 = vld [vmem:[%s2881_s19 + $0x2f0] sm:$0xf]  ;;  %v2329_v9 = vld [vmem:[%s2881_s19 + $0x2f4] sm:$0xf0]  ;;  %v2248_v10 = vld [vmem:[%s2881_s19 + $0x74] sm:$0xf]  ;;  %v2030_v16 = vor.u32 %v2283_v4, %v2029_v3  ;;  %v2150_v17 = vor.u32 %v2313_v6, %v2149_v5 }
  0xca   : > { %1410 = vmatpush.bf16.msra.mxu0 %v1854_v45  ;;  %v1895_v11 = vld [vmem:[%s2881_s19 + $0x78] sm:$0xf0]  ;;  %v2264_v14 = vld [vmem:[%s2881_s19 + $0xf4] sm:$0xf]  ;;  %v2141_v18 = vld [vmem:[%s2881_s19 + $0x260] sm:$0xf]  ;;  %v2214_v20 = vor.u32 %v2329_v9, %v2213_v7 }
  0xcb   : > { %1424 = vmatpush.bf16.msra.mxu1 %v1918_v46  ;;  %v1959_v15 = vld [vmem:[%s2881_s19 + $0xf8] sm:$0xf0]  ;;  %v2311_v19 = vld [vmem:[%s2881_s19 + $0x264] sm:$0xf0]  ;;  %v1898_v21 = vor.u32 %v2248_v10, %v1895_v11  ;;  %v2205_v22 = vld [vmem:[%s2881_s19 + $0x2e0] sm:$0xf] }
  0xcc   : > { %1438 = vmatpush.bf16.msra.mxu2 %v1982_v47  ;;  %v2327_v23 = vld [vmem:[%s2881_s19 + $0x2e4] sm:$0xf0]  ;;  %v2246_v24 = vld [vmem:[%s2881_s19 + $0x64] sm:$0xf]  ;;  %v1962_v25 = vor.u32 %v2264_v14, %v1959_v15  ;;  %v1887_v26 = vld [vmem:[%s2881_s19 + $0x68] sm:$0xf0]  ;;  %v2142_v32 = vor.u32 %v2311_v19, %v2141_v18 }
  0xcd   : > { %1452 = vmatpush.bf16.msra.mxu3 %v2046_v51  ;;  %v2262_v27 = vld [vmem:[%s2881_s19 + $0xe4] sm:$0xf]  ;;  %v1951_v28 = vld [vmem:[%s2881_s19 + $0xe8] sm:$0xf0]  ;;  %v2133_v29 = vld [vmem:[%s2881_s19 + $0x250] sm:$0xf]  ;;  %v2206_v37 = vor.u32 %v2327_v23, %v2205_v22  ;;  %v1890_v38 = vor.u32 %v2246_v24, %v1887_v26 }
  0xce   : > { %1411 = vmatpush.bf16.msra.mxu0 %v1846_v57  ;;  %v1813_v30 = vld [vmem:[%s2879_s6] sm:$0xf]  ;;  %v2231_v31 = vld [vmem:[%s2879_s6 + $0x14] sm:$0xf0]  ;;  %v2244_v39 = vld [vmem:[%s2881_s19 + $0x54] sm:$0xf]  ;;  %v1954_v42 = vor.u32 %v2262_v27, %v1951_v28 }
  0xcf   : > { %1425 = vmatpush.bf16.msra.mxu1 %v1910_v60  ;;  %v2309_v33 = vld [vmem:[%s2881_s19 + $0x254] sm:$0xf0]  ;;  %v2197_v34 = vld [vmem:[%s2881_s19 + $0x2d0] sm:$0xf]  ;;  %v2974_v36 = vor.u32 %v2231_v31, %v1813_v30  ;;  %v1879_v40 = vld [vmem:[%s2881_s19 + $0x58] sm:$0xf0] }
  0xd0   : > { %1439 = vmatpush.bf16.msra.mxu2 %v1974_v61  ;;  %v2325_v35 = vld [vmem:[%s2881_s19 + $0x2d4] sm:$0xf0]  ;;  %v2260_v41 = vld [vmem:[%s2881_s19 + $0xd4] sm:$0xf]  ;;  %v1943_v43 = vld [vmem:[%s2881_s19 + $0xd8] sm:$0xf0]  ;;  %v2134_v50 = vor.u32 %v2309_v33, %v2133_v29  ;;  %v1882_v54 = vor.u32 %v2244_v39, %v1879_v40 }
  0xd1   : > { %1453 = vmatpush.bf16.msra.mxu3 %v2038_v1  ;;  %v2228_v44 = vld [vmem:[%s2879_s6 + $0x4] sm:$0xf]  ;;  %v1815_v45 = vld [vmem:[%s2879_s6 + $0x18] sm:$0xf0]  ;;  %v1821_v47 = vld [vmem:[%s2879_s6 + $0x8] sm:$0xf]  ;;  %v2198_v53 = vor.u32 %v2325_v35, %v2197_v34  ;;  %v1946_v59 = vor.u32 %v2260_v41, %v1943_v43 }
  0xd2   : > { %1412 = vmatpush.bf16.msra.mxu0 %v1838_v8  ;;  %v2983_v46 = vor.u32 %v2228_v44, %v1815_v45  ;;  %v2232_v48 = vld [vmem:[%s2879_s6 + $0x1c] sm:$0xf0]  ;;  %v2229_v49 = vld [vmem:[%s2879_s6 + $0xc] sm:$0xf]  ;;  %v1823_v52 = vld [vmem:[%s2879_s6 + $0x20] sm:$0xf0] }
  0xd3   : > { %1426 = vmatpush.bf16.msra.mxu1 %v1902_v12  ;;  %v2988_v51 = vor.u32 %v2232_v48, %v1821_v47  ;;  %v2125_v55 = vld [vmem:[%s2881_s19 + $0x240] sm:$0xf]  ;;  %v2307_v56 = vld [vmem:[%s2881_s19 + $0x244] sm:$0xf0]  ;;  %v2994_v58 = vor.u32 %v2229_v49, %v1823_v52  ;;  %v2242_v61 = vld [vmem:[%s2881_s19 + $0x44] sm:$0xf] }
  0xd4   : > { %1440 = vmatpush.bf16.msra.mxu2 %v1966_v13  ;;  %v2189_v57 = vld [vmem:[%s2881_s19 + $0x2c0] sm:$0xf]  ;;  %v2323_v60 = vld [vmem:[%s2881_s19 + $0x2c4] sm:$0xf0]  ;;  %v1871_v62 = vld [vmem:[%s2881_s19 + $0x48] sm:$0xf0]  ;;  %v2126_v1 = vor.u32 %v2307_v56, %v2125_v55 }
  0xd5   : > { %1454 = vmatpush.bf16.msra.mxu3 %v2030_v16  ;;  %1413 = vmatmul.bf16.vlgmr.msra.gmra.mxu0 %v2974_v36  ;;  %v2258_v63 = vld [vmem:[%s2881_s19 + $0xc4] sm:$0xf]  ;;  %v1935_v0 = vld [vmem:[%s2881_s19 + $0xc8] sm:$0xf0]  ;;  %v2190_v2 = vor.u32 %v2323_v60, %v2189_v57  ;;  %v1874_v3 = vor.u32 %v2242_v61, %v1871_v62  ;;  %v2117_v4 = vld [vmem:[%s2881_s19 + $0x230] sm:$0xf] }
  0xd6   : > { %1461 = vmatpush.bf16.msrb.mxu0 %v2150_v17  ;;  %1427 = vmatmul.bf16.vlgmr.msra.gmra.mxu1 %v2983_v46  ;;  %v2305_v5 = vld [vmem:[%s2881_s19 + $0x234] sm:$0xf0]  ;;  %v2181_v6 = vld [vmem:[%s2881_s19 + $0x2b0] sm:$0xf]  ;;  %v1938_v7 = vor.u32 %v2258_v63, %v1935_v0  ;;  %v2240_v9 = vld [vmem:[%s2881_s19 + $0x34] sm:$0xf] }
  0xd7   : > { %1475 = vmatpush.bf16.msrb.mxu1 %v2214_v20  ;;  %1441 = vmatmul.bf16.vlgmr.msra.gmra.mxu2 %v2988_v51  ;;  %v2321_v8 = vld [vmem:[%s2881_s19 + $0x2b4] sm:$0xf0]  ;;  %v1863_v10 = vld [vmem:[%s2881_s19 + $0x38] sm:$0xf0]  ;;  %v2256_v11 = vld [vmem:[%s2881_s19 + $0xb4] sm:$0xf]  ;;  %v2118_v13 = vor.u32 %v2305_v5, %v2117_v4 }
  0xd8   : > { %1489 = vmatpush.bf16.msrb.mxu2 %v1898_v21  ;;  %1455 = vmatmul.bf16.vlgmr.msra.gmra.mxu3 %v2994_v58  ;;  %v1927_v12 = vld [vmem:[%s2881_s19 + $0xb8] sm:$0xf0]  ;;  %v2182_v14 = vor.u32 %v2321_v8, %v2181_v6  ;;  %v1866_v15 = vor.u32 %v2240_v9, %v1863_v10  ;;  %v2109_v16 = vld [vmem:[%s2881_s19 + $0x220] sm:$0xf]  ;;  %v2303_v17 = vld [vmem:[%s2881_s19 + $0x224] sm:$0xf0] }
  0xd9   : > { %1503 = vmatpush.bf16.msrb.mxu3 %v1962_v25  ;;  %v2173_v18 = vld [vmem:[%s2881_s19 + $0x2a0] sm:$0xf]  ;;  %v1930_v19 = vor.u32 %v2256_v11, %v1927_v12  ;;  %v2319_v20 = vld [vmem:[%s2881_s19 + $0x2a4] sm:$0xf0]  ;;  %v2238_v21 = vld [vmem:[%s2881_s19 + $0x24] sm:$0xf]  ;;  %v2110_v25 = vor.u32 %v2303_v17, %v2109_v16 }
  0xda   : > { %1462 = vmatpush.bf16.msrb.mxu0 %v2142_v32  ;;  %v1855_v22 = vld [vmem:[%s2881_s19 + $0x28] sm:$0xf0]  ;;  %v2254_v23 = vld [vmem:[%s2881_s19 + $0xa4] sm:$0xf]  ;;  %v2174_v26 = vor.u32 %v2319_v20, %v2173_v18  ;;  %v2101_v28 = vld [vmem:[%s2881_s19 + $0x210] sm:$0xf] }
  0xdb   : > { %1476 = vmatpush.bf16.msrb.mxu1 %v2206_v37  ;;  %v1919_v24 = vld [vmem:[%s2881_s19 + $0xa8] sm:$0xf0]  ;;  %v1858_v27 = vor.u32 %v2238_v21, %v1855_v22  ;;  %v2301_v29 = vld [vmem:[%s2881_s19 + $0x214] sm:$0xf0]  ;;  %v2165_v30 = vld [vmem:[%s2881_s19 + $0x290] sm:$0xf] }
  0xdc   : > { %1490 = vmatpush.bf16.msrb.mxu2 %v1890_v38  ;;  %v1922_v31 = vor.u32 %v2254_v23, %v1919_v24  ;;  %v2317_v32 = vld [vmem:[%s2881_s19 + $0x294] sm:$0xf0]  ;;  %v2236_v33 = vld [vmem:[%s2881_s19 + $0x14] sm:$0xf]  ;;  %v1847_v34 = vld [vmem:[%s2881_s19 + $0x18] sm:$0xf0]  ;;  %v2102_v38 = vor.u32 %v2301_v29, %v2101_v28 }
  0xdd   : > { %1504 = vmatpush.bf16.msrb.mxu3 %v1954_v42  ;;  %v2252_v35 = vld [vmem:[%s2881_s19 + $0x94] sm:$0xf]  ;;  %v1911_v37 = vld [vmem:[%s2881_s19 + $0x98] sm:$0xf0]  ;;  %v2093_v39 = vld [vmem:[%s2881_s19 + $0x200] sm:$0xf]  ;;  %v2166_v42 = vor.u32 %v2317_v32, %v2165_v30  ;;  %v1850_v43 = vor.u32 %v2236_v33, %v1847_v34 }
  0xde   : > { %1463 = vmatpush.bf16.msrb.mxu0 %v2134_v50  ;;  %v2299_v40 = vld [vmem:[%s2881_s19 + $0x204] sm:$0xf0]  ;;  %v2157_v41 = vld [vmem:[%s2881_s19 + $0x280] sm:$0xf]  ;;  %v2234_v45 = vld [vmem:[%s2881_s19 + $0x4] sm:$0xf]  ;;  %v1914_v48 = vor.u32 %v2252_v35, %v1911_v37 }
  0xdf   : > { %1477 = vmatpush.bf16.msrb.mxu1 %v2198_v53  ;;  %v2315_v44 = vld [vmem:[%s2881_s19 + $0x284] sm:$0xf0]  ;;  %v1839_v47 = vld [vmem:[%s2881_s19 + $0x8] sm:$0xf0]  ;;  %v2250_v49 = vld [vmem:[%s2881_s19 + $0x84] sm:$0xf]  ;;  %v2094_v56 = vor.u32 %v2299_v40, %v2093_v39 }
  0xe0   : > { %1491 = vmatpush.bf16.msrb.mxu2 %v1882_v54  ;;  %v1903_v50 = vld [vmem:[%s2881_s19 + $0x88] sm:$0xf0]  ;;  %v2280_v52 = vld [vmem:[%s2881_s19 + $0x174] sm:$0xf]  ;;  %v2023_v53 = vld [vmem:[%s2881_s19 + $0x178] sm:$0xf0]  ;;  %v2158_v61 = vor.u32 %v2315_v44, %v2157_v41  ;;  %v1842_v62 = vor.u32 %v2234_v45, %v1839_v47 }
  0xe1   : > { %1505 = vmatpush.bf16.msrb.mxu3 %v1946_v59  ;;  %v2296_v54 = vld [vmem:[%s2881_s19 + $0x1f4] sm:$0xf]  ;;  %v2087_v55 = vld [vmem:[%s2881_s19 + $0x1f8] sm:$0xf0]  ;;  %v1829_v0 = vld [vmem:[%s2879_s6 + $0x10] sm:$0xf] }
  0xe2   : > { %1464 = vmatpush.bf16.msrb.mxu0 %v2126_v1  ;;  %v2312_v57 = vld [vmem:[%s2881_s19 + $0x274] sm:$0xf]  ;;  %v2151_v59 = vld [vmem:[%s2881_s19 + $0x278] sm:$0xf0]  ;;  %v2233_v1 = vld [vmem:[%s2879_s6 + $0x24] sm:$0xf0]  ;;  %v2090_v6 = vor.u32 %v2296_v54, %v2087_v55 }
  0xe3   : > { %1478 = vmatpush.bf16.msrb.mxu1 %v2190_v2  ;;  %v2328_v60 = vld [vmem:[%s2881_s19 + $0x2f4] sm:$0xf]  ;;  %v2215_v63 = vld [vmem:[%s2881_s19 + $0x2f8] sm:$0xf0]  ;;  %v1906_v2 = vor.u32 %v2250_v49, %v1903_v50  ;;  %v2278_v8 = vld [vmem:[%s2881_s19 + $0x164] sm:$0xf]  ;;  %v3051_v12 = vor.u32 %v2233_v1, %v1829_v0 }
  0xe4   : > { %1492 = vmatpush.bf16.msrb.mxu2 %v1874_v3  ;;  %v2026_v3 = vor.u32 %v2280_v52, %v2023_v53  ;;  %v2230_v4 = vld [vmem:[%s2879_s6 + $0x14] sm:$0xf]  ;;  %v1831_v5 = vld [vmem:[%s2879_s6 + $0x28] sm:$0xf0]  ;;  %v2218_v11 = vor.u32 %v2328_v60, %v2215_v63  ;;  %p2219_p6 = scmp.ne.s32.totalorder %s2494_s21, 5 }
  0xe5   : > { %1506 = vmatpush.bf16.msrb.mxu3 %v1938_v7  ;;  %v2154_v7 = vor.u32 %v2312_v57, %v2151_v59  ;;  %v2015_v9 = vld [vmem:[%s2881_s19 + $0x168] sm:$0xf0]  ;;  %v2294_v10 = vld [vmem:[%s2881_s19 + $0x1e4] sm:$0xf]  ;;  %v3056_v16 = vor.u32 %v2230_v4, %v1831_v5  ;;  %v2276_v22 = vld [vmem:[%s2881_s19 + $0x154] sm:$0xf] }
  0xe6   : > { %1465 = vmatpush.bf16.msrb.mxu0 %v2118_v13  ;;  %v2079_v13 = vld [vmem:[%s2881_s19 + $0x1e8] sm:$0xf0]  ;;  %v2326_v17 = vld [vmem:[%s2881_s19 + $0x2e4] sm:$0xf]  ;;  %v2007_v23 = vld [vmem:[%s2881_s19 + $0x158] sm:$0xf0] }
  0xe7   : > { %1479 = vmatpush.bf16.msrb.mxu1 %v2182_v14  ;;  %v2310_v14 = vld [vmem:[%s2881_s19 + $0x264] sm:$0xf]  ;;  %v2207_v18 = vld [vmem:[%s2881_s19 + $0x2e8] sm:$0xf0]  ;;  %v2082_v20 = vor.u32 %v2294_v10, %v2079_v13  ;;  %v2292_v24 = vld [vmem:[%s2881_s19 + $0x1d4] sm:$0xf] }
  0xe8   : > { %1493 = vmatpush.bf16.msrb.mxu2 %v1866_v15  ;;  %v2143_v15 = vld [vmem:[%s2881_s19 + $0x268] sm:$0xf0]  ;;  %v2135_v28 = vld [vmem:[%s2881_s19 + $0x258] sm:$0xf0]  ;;  %v2324_v29 = vld [vmem:[%s2881_s19 + $0x2d4] sm:$0xf] }
  0xe9   : > { %1507 = vmatpush.bf16.msrb.mxu3 %v1930_v19  ;;  %v2018_v19 = vor.u32 %v2278_v8, %v2015_v9  ;;  %v2146_v21 = vor.u32 %v2310_v14, %v2143_v15  ;;  %v2199_v30 = vld [vmem:[%s2881_s19 + $0x2d8] sm:$0xf0]  ;;  %v2274_v34 = vld [vmem:[%s2881_s19 + $0x144] sm:$0xf]  ;;  %v1999_v35 = vld [vmem:[%s2881_s19 + $0x148] sm:$0xf0] }
  0xea   : > { %1466 = vmatpush.bf16.msrb.mxu0 %v2110_v25  ;;  %v2210_v25 = vor.u32 %v2326_v17, %v2207_v18  ;;  %v2290_v37 = vld [vmem:[%s2881_s19 + $0x1c4] sm:$0xf]  ;;  %v2127_v40 = vld [vmem:[%s2881_s19 + $0x248] sm:$0xf0]  ;;  %v2272_v45 = vld [vmem:[%s2881_s19 + $0x134] sm:$0xf] }
  0xeb   : > { %1480 = vmatpush.bf16.msrb.mxu1 %v2174_v26  ;;  %v2071_v26 = vld [vmem:[%s2881_s19 + $0x1d8] sm:$0xf0]  ;;  %v2306_v39 = vld [vmem:[%s2881_s19 + $0x244] sm:$0xf]  ;;  %v2191_v41 = vld [vmem:[%s2881_s19 + $0x2c8] sm:$0xf0] }
  0xec   : > { %1494 = vmatpush.bf16.msrb.mxu2 %v1858_v27  ;;  %v2308_v27 = vld [vmem:[%s2881_s19 + $0x254] sm:$0xf]  ;;  %v2074_v32 = vor.u32 %v2292_v24, %v2071_v26  ;;  %v2130_v44 = vor.u32 %v2306_v39, %v2127_v40  ;;  %v1991_v47 = vld [vmem:[%s2881_s19 + $0x138] sm:$0xf0]  ;;  %v2270_v60 = vld [vmem:[%s2881_s19 + $0x124] sm:$0xf] }
  0xed   : > { %1508 = vmatpush.bf16.msrb.mxu3 %v1922_v31  ;;  %v2010_v31 = vor.u32 %v2276_v22, %v2007_v23  ;;  %v2138_v33 = vor.u32 %v2308_v27, %v2135_v28  ;;  %v2055_v50 = vld [vmem:[%s2881_s19 + $0x1b8] sm:$0xf0]  ;;  %v2304_v52 = vld [vmem:[%s2881_s19 + $0x234] sm:$0xf]  ;;  %v2047_v0 = vld [vmem:[%s2881_s19 + $0x1a8] sm:$0xf0] }
  0xee   : > { %1467 = vmatpush.bf16.msrb.mxu0 %v2102_v38  ;;  %v2063_v38 = vld [vmem:[%s2881_s19 + $0x1c8] sm:$0xf0]  ;;  %v2119_v53 = vld [vmem:[%s2881_s19 + $0x238] sm:$0xf0]  ;;  %v2320_v54 = vld [vmem:[%s2881_s19 + $0x2b4] sm:$0xf] }
  0xef   : > { %1481 = vmatpush.bf16.msrb.mxu1 %v2166_v42  ;;  %v2002_v42 = vor.u32 %v2274_v34, %v1999_v35  ;;  %v2183_v55 = vld [vmem:[%s2881_s19 + $0x2b8] sm:$0xf0]  ;;  %v2122_v59 = vor.u32 %v2304_v52, %v2119_v53  ;;  %v2302_v1 = vld [vmem:[%s2881_s19 + $0x224] sm:$0xf]  ;;  %v2175_v4 = vld [vmem:[%s2881_s19 + $0x2a8] sm:$0xf0] }
  0xf0   : > { %1495 = vmatpush.bf16.msrb.mxu2 %v1850_v43  ;;  %v2066_v43 = vor.u32 %v2290_v37, %v2063_v38  ;;  %v2186_v63 = vor.u32 %v2320_v54, %v2183_v55  ;;  %v2268_v8 = vld [vmem:[%s2881_s19 + $0x114] sm:$0xf]  ;;  %v1975_v9 = vld [vmem:[%s2881_s19 + $0x118] sm:$0xf0]  ;;  %v2266_v22 = vld [vmem:[%s2881_s19 + $0x104] sm:$0xf] }
  0xf1   : > { %1509 = vmatpush.bf16.msrb.mxu3 %v1914_v48  ;;  %v2288_v48 = vld [vmem:[%s2881_s19 + $0x1b4] sm:$0xf]  ;;  %v2039_v13 = vld [vmem:[%s2881_s19 + $0x198] sm:$0xf0]  ;;  %v1967_v23 = vld [vmem:[%s2881_s19 + $0x108] sm:$0xf0] }
  0xf2   : > { %1468 = vmatpush.bf16.msrb.mxu0 %v2094_v56  ;;  %v1994_v56 = vor.u32 %v2272_v45, %v1991_v47  ;;  %v2058_v57 = vor.u32 %v2288_v48, %v2055_v50  ;;  %v2284_v10 = vld [vmem:[%s2881_s19 + $0x194] sm:$0xf]  ;;  %v2103_v15 = vld [vmem:[%s2881_s19 + $0x218] sm:$0xf0]  ;;  %v2282_v24 = vld [vmem:[%s2881_s19 + $0x184] sm:$0xf] }
  0xf3   : > { %1482 = vmatpush.bf16.msrb.mxu1 %v2158_v61  ;;  %v1983_v61 = vld [vmem:[%s2881_s19 + $0x128] sm:$0xf0]  ;;  %v2300_v14 = vld [vmem:[%s2881_s19 + $0x214] sm:$0xf]  ;;  %v2167_v18 = vld [vmem:[%s2881_s19 + $0x298] sm:$0xf0] }
  0xf4   : > { %1496 = vmatpush.bf16.msrb.mxu2 %v1842_v62  ;;  %v2286_v62 = vld [vmem:[%s2881_s19 + $0x1a4] sm:$0xf]  ;;  %v1986_v5 = vor.u32 %v2270_v60, %v1983_v61  ;;  %v2316_v17 = vld [vmem:[%s2881_s19 + $0x294] sm:$0xf]  ;;  %v2031_v26 = vld [vmem:[%s2881_s19 + $0x188] sm:$0xf0] }
  0xf5   : > { %1510 = vmatpush.bf16.msrb.mxu3 %v1906_v2  ;;  %1469 = vmatmul.bf16.vlgmr.msrb.gmra.mxu0 %v3051_v12  ;;  %v2111_v2 = vld [vmem:[%s2881_s19 + $0x228] sm:$0xf0]  ;;  %v2298_v27 = vld [vmem:[%s2881_s19 + $0x204] sm:$0xf]  ;;  %v789_v48 = vld [vmem:[#allocation2 + $0x10] sm:$0xff] }
  0xf6   : > { %1517 = vmatpush.bf16.msra.mxu0 %v2026_v3  ;;  %1483 = vmatmul.bf16.vlgmr.msrb.gmra.mxu1 %v3056_v16  ;;  %v2318_v3 = vld [vmem:[%s2881_s19 + $0x2a4] sm:$0xf]  ;;  %v2095_v28 = vld [vmem:[%s2881_s19 + $0x208] sm:$0xf0]  ;;  %v791_v55 = vld [vmem:[#allocation2 + $0x18] sm:$0xff] }
  0xf7   : > { %1531 = vmatpush.bf16.msra.mxu1 %v2090_v6  ;;  %1497 = vmatmul.bf16.vlgmr.msrb.gmra.mxu2 %v2974_v36  ;;  %v2202_v36 = vor.u32 %v2324_v29, %v2199_v30  ;;  %v2050_v6 = vor.u32 %v2286_v62, %v2047_v0  ;;  %v2314_v29 = vld [vmem:[%s2881_s19 + $0x284] sm:$0xf]  ;;  %v2159_v30 = vld [vmem:[%s2881_s19 + $0x288] sm:$0xf0] }
  0xf8   : > { %1545 = vmatpush.bf16.msra.mxu2 %v2154_v7  ;;  %1511 = vmatmul.bf16.vlgmr.msrb.gmra.mxu3 %v2983_v46  ;;  %v2322_v46 = vld [vmem:[%s2881_s19 + $0x2c4] sm:$0xf]  ;;  %v2114_v7 = vor.u32 %v2302_v1, %v2111_v2  ;;  %v2162_v34 = vor.u32 %v2314_v29, %v2159_v30 }
  0xf9   : > { %1559 = vmatpush.bf16.msra.mxu3 %v2218_v11  ;;  %v2194_v49 = vor.u32 %v2322_v46, %v2191_v41  ;;  %v2178_v11 = vor.u32 %v2318_v3, %v2175_v4 }
  0xfa   : > { %1518 = vmatpush.bf16.msra.mxu0 %v2018_v19  ;;  %v1978_v19 = vor.u32 %v2268_v8, %v1975_v9  ;;  %v790_v9 = vld [vmem:[#allocation2] sm:$0xff] }
  0xfb   : > { %1532 = vmatpush.bf16.msra.mxu1 %v2082_v20  ;;  %v2042_v20 = vor.u32 %v2284_v10, %v2039_v13 }
  0xfc   : > { %1546 = vmatpush.bf16.msra.mxu2 %v2146_v21  ;;  %v2106_v21 = vor.u32 %v2300_v14, %v2103_v15 }
  0xfd   : > { %1560 = vmatpush.bf16.msra.mxu3 %v2210_v25  ;;  %v2170_v25 = vor.u32 %v2316_v17, %v2167_v18 }
  0xfe   : > { %1519 = vmatpush.bf16.msra.mxu0 %v2010_v31  ;;  %v1970_v31 = vor.u32 %v2266_v22, %v1967_v23 }
  0xff   : > { %1533 = vmatpush.bf16.msra.mxu1 %v2074_v32  ;;  %v2034_v32 = vor.u32 %v2282_v24, %v2031_v26 }
 0x100   : > { %1547 = vmatpush.bf16.msra.mxu2 %v2138_v33  ;;  %v2098_v33 = vor.u32 %v2298_v27, %v2095_v28 }
 0x101   : > { %1561 = vmatpush.bf16.msra.mxu3 %v2202_v36 }
 0x102   : > { %1520 = vmatpush.bf16.msra.mxu0 %v2002_v42 }
 0x103   : > { %1534 = vmatpush.bf16.msra.mxu1 %v2066_v43 }
 0x104   : > { %1548 = vmatpush.bf16.msra.mxu2 %v2130_v44 }
 0x105   : > { %1562 = vmatpush.bf16.msra.mxu3 %v2194_v49 }
 0x106   : > { %1521 = vmatpush.bf16.msra.mxu0 %v1994_v56 }
 0x107   : > { %1535 = vmatpush.bf16.msra.mxu1 %v2058_v57 }
 0x108   : > { %1549 = vmatpush.bf16.msra.mxu2 %v2122_v59 }
 0x109   : > { %1563 = vmatpush.bf16.msra.mxu3 %v2186_v63 }
 0x10a   : > { %1522 = vmatpush.bf16.msra.mxu0 %v1986_v5 }
 0x10b   : > { %1536 = vmatpush.bf16.msra.mxu1 %v2050_v6 }
 0x10c   : > { %1550 = vmatpush.bf16.msra.mxu2 %v2114_v7 }
 0x10d   : > { %1564 = vmatpush.bf16.msra.mxu3 %v2178_v11 }
 0x10e   : > { %1523 = vmatpush.bf16.msra.mxu0 %v1978_v19  ;;  %v792_v19 = vld [vmem:[#allocation2 + $0x8] sm:$0xff] }
 0x10f   : > { %1537 = vmatpush.bf16.msra.mxu1 %v2042_v20 }
 0x110   : > { %1551 = vmatpush.bf16.msra.mxu2 %v2106_v21 }
 0x111   : > { %1565 = vmatpush.bf16.msra.mxu3 %v2170_v25 }
 0x112   : > { %1524 = vmatpush.bf16.msra.mxu0 %v1970_v31 }
 0x113   : > { %1538 = vmatpush.bf16.msra.mxu1 %v2034_v32 }
 0x114   : > { %1552 = vmatpush.bf16.msra.mxu2 %v2098_v33 }
 0x115   : > { %1566 = vmatpush.bf16.msra.mxu3 %v2162_v34  ;;  %1525 = vmatmul.bf16.vlgmr.msra.gmra.mxu0 %v2988_v51 }
 0x116   : > { %1539 = vmatmul.bf16.vlgmr.msra.gmra.mxu1 %v2994_v58 }
 0x117   : > { %1553 = vmatmul.bf16.vlgmr.msra.gmra.mxu2 %v3051_v12 }
 0x118   : > { %1567 = vmatmul.bf16.vlgmr.msra.gmra.mxu3 %v3056_v16 }
 0x152   : > { %v1414_v35 = vpop.f32.mrf.mxu0 }
 0x153   : > { %v1428_v37 = vpop.f32.mrf.mxu1 }
 0x154   : > { %v1429_v36 = vadd.f32 %v1428_v37, %v1414_v35 }
 0x15a   : > { %v1416_v38 = vpop.f32.mrf.mxu0  ;;  %v1442_v39 = vpop.f32.mrf.mxu2 }
 0x15b   : > { %v1430_v40 = vpop.f32.mrf.mxu1  ;;  %v1443_v46 = vadd.f32 %v1442_v39, %v1429_v36  ;;  %v1456_v41 = vpop.f32.mrf.mxu3 }
 0x15c   : > { %v1431_v43 = vadd.f32 %v1430_v40, %v1416_v38 }
 0x15d   : > { %v1457_v42 = vadd.f32 %v1456_v41, %v1443_v46 }
 0x162   : > { %v1444_v45 = vpop.f32.mrf.mxu2 }
 0x163   : > { %v1445_v58 = vadd.f32 %v1444_v45, %v1431_v43  ;;  %v1458_v12 = vpop.f32.mrf.mxu3 }
 0x165   : > { %v1459_v16 = vadd.f32 %v1458_v12, %v1445_v58 }
 0x172   : > { %v1470_v44 = vpop.f32.mrf.mxu0 }
 0x173   : > { %v1471_v47 = vadd.f32 %v1470_v44, %v1457_v42  ;;  %v1484_v51 = vpop.f32.mrf.mxu1 }
 0x175   : > { %v1485_v49 = vadd.f32 %v1484_v51, %v1471_v47 }
 0x177   : > { %v1573_v50 = vadd.f32 %v1485_v49, %v789_v48 }
 0x179   : > { %1577 = vst [vmem:[#allocation2 + $0x10] sm:$0xff] %v1573_v50 }
 0x17a   : > { %v1472_v52 = vpop.f32.mrf.mxu0  ;;  %v1498_v59 = vpop.f32.mrf.mxu2 }
 0x17b   : > { %v1473_v53 = vadd.f32 %v1472_v52, %v1459_v16  ;;  %v1486_v54 = vpop.f32.mrf.mxu1  ;;  %v1512_v60 = vpop.f32.mrf.mxu3 }
 0x17c   : > { %v1513_v62 = vadd.f32 %v1512_v60, %v1498_v59 }
 0x17d   : > { %v1487_v56 = vadd.f32 %v1486_v54, %v1473_v53 }
 0x17f   : > { %v1575_v57 = vadd.f32 %v1487_v56, %v791_v55 }
 0x181   : > { %1579 = vst [vmem:[#allocation2 + $0x18] sm:$0xff] %v1575_v57 }
 0x182   : > { %v1500_v61 = vpop.f32.mrf.mxu2 }
 0x183   : > { %v1514_v63 = vpop.f32.mrf.mxu3 }
 0x184   : > { %v1515_v5 = vadd.f32 %v1514_v63, %v1500_v61 }
 0x192   : > { %v1526_v0 = vpop.f32.mrf.mxu0 }
 0x193   : > { %v1527_v1 = vadd.f32 %v1526_v0, %v1513_v62  ;;  %v1540_v2 = vpop.f32.mrf.mxu1 }
 0x195   : > { %v1541_v3 = vadd.f32 %v1540_v2, %v1527_v1 }
 0x19a   : > { %v1554_v4 = vpop.f32.mrf.mxu2  ;;  %v1528_v8 = vpop.f32.mrf.mxu0 }
 0x19b   : > { %v1555_v6 = vadd.f32 %v1554_v4, %v1541_v3  ;;  %v1568_v7 = vpop.f32.mrf.mxu3  ;;  %v1529_v11 = vadd.f32 %v1528_v8, %v1515_v5  ;;  %v1542_v14 = vpop.f32.mrf.mxu1 }
 0x19d   : > { %v1569_v10 = vadd.f32 %v1568_v7, %v1555_v6  ;;  %v1543_v15 = vadd.f32 %v1542_v14, %v1529_v11 }
 0x19f   : > { %v1574_v13 = vadd.f32 %v1569_v10, %v790_v9 }
 0x1a1   : > { %1578 = vst [vmem:[#allocation2] sm:$0xff] %v1574_v13 }
 0x1a2   : > { %v1556_v17 = vpop.f32.mrf.mxu2 }
 0x1a3   : > { %v1557_v18 = vadd.f32 %v1556_v17, %v1543_v15  ;;  %v1570_v20 = vpop.f32.mrf.mxu3 }
 0x1a5   : > { %v1571_v21 = vadd.f32 %v1570_v20, %v1557_v18  ;;  %1584 = sbr.rel (%p2219_p6) target bundleno = 442 (0x1ba), region = 143 }
 0x1a7   : > { %v1576_v22 = vadd.f32 %v1571_v21, %v792_v19 }
 0x1a9   : > { %1580 = vst [vmem:[#allocation2 + $0x8] sm:$0xff] %v1576_v22 }
 0x1aa   : > { %v1585_v23 = vld [vmem:[#allocation2 + $0x10] sm:$0xff]  ;;  %v1586_v24 = vld [vmem:[#allocation2] sm:$0xff]  ;;  %v1587_v29 = vld [vmem:[#allocation2 + $0x18] sm:$0xff] }
 0x1ab   : > { %v1589_v25 = vld [vmem:[%s775_s30] sm:$0x3]  ;;  %v1600_v33 = vld [vmem:[%s734_s17 + $0x8] sm:$0xff] }
 0x1ac   : > { %v1591_v26 = vperm.slane %v1589_v25, 0  ;;  %v1592_v27 = vperm.slane %v1589_v25, 1  ;;  %v1599_v28 = vld [vmem:[%s734_s17] sm:$0xff]  ;;  %v1603_v38 = vunpack.c.l.bf16 %v1600_v33  ;;  %v1604_v39 = vunpack.c.h.bf16 %v1600_v33 }
 0x1ad   : > { %v1601_v31 = vunpack.c.l.bf16 %v1599_v28  ;;  %v1602_v32 = vunpack.c.h.bf16 %v1599_v28 }
 0x1ae   : > { %v1595_v34 = vadd.f32 %v1591_v26, %v1585_v23  ;;  %v1596_v35 = vadd.f32 %v1592_v27, %v1586_v24  ;;  %v1597_v37 = vadd.f32 %v1591_v26, %v1587_v29 }
 0x1b0   : > { %v1588_v30 = vld [vmem:[#allocation2 + $0x8] sm:$0xff]  ;;  %v1605_v40 = vadd.f32 %v1601_v31, %v1595_v34  ;;  %v1606_v46 = vadd.f32 %v1602_v32, %v1596_v35  ;;  %v1607_v41 = vadd.f32 %v1603_v38, %v1597_v37 }
 0x1b1   : > { %v1598_v36 = vadd.f32 %v1592_v27, %v1588_v30 }
 0x1b2   : > { %v1609_v43 = vmax.f32 %v1605_v40, 0.0  ;;  %v1610_v44 = vmax.f32 %v1606_v46, 0.0  ;;  %v1611_v45 = vmax.f32 %v1607_v41, 0.0 }
 0x1b3   : > { %v1608_v42 = vadd.f32 %v1604_v39, %v1598_v36 }
 0x1b4   : > { %v1613_v51 = vpack.c.bf16 %v1610_v44, %v1609_v43 }
 0x1b5   : > { %v1612_v47 = vmax.f32 %v1608_v42, 0.0 }
 0x1b6   : > { %1615 = vst [vmem:[%s2885_s15] sm:$0xff] %v1613_v51 }
 0x1b7   : > { %v1614_v48 = vpack.c.bf16 %v1612_v47, %v1611_v45 }
 0x1b9   : > { %1616 = vst [vmem:[%s2885_s15 + $0x8] sm:$0xff] %v1614_v48 }
 0x1ba PF: > { %1623 = sbr.rel (!%p2642_p13) target bundleno = 450 (0x1c2), region = 147  ;;  %s2330_s21 = sshll.u32 (%p2642_p13), %s2498_s22, 3 }
 0x1bb   : > { %s1629_s28 = scalar_lea.vmem (%p2642_p13), %s3173_s4, %s2330_s21 }
 0x1bd   : > { %v1660_v58 = vld [vmem:[%s2885_s15] sm:$0xff] (%p2642_p13) }
 0x1be   : > { %1661 = vst [vmem:[%s1629_s28] sm:$0xff] (%p2642_p13), %v1660_v58 }
 0x1c0   : > { %v1662_v49 = vld [vmem:[%s2885_s15 + $0x8] sm:$0xff] }
 0x1c1   : > { %1663 = vst [vmem:[%s1629_s28 + $0x10] sm:$0xff] %v1662_v49 }
 0x1c2 PF: > { %s14_s25 = sadd.s32 1, %s2510_s25   ;;  %s3184_s29 = sld [smem:[#allocation7_spill]] }
 0x1c3   : > { %p11_p7 = scmp.ge.s32.totalorder %s14_s25, 14   ;;  %s3185_s10 = sld [smem:[#allocation8_spill]] }
 0x1c4   : > { %s3186_s15 = smov %s2474_s16  ;;  %s3187_s16 = smov %s2634_s13 }
 0x1c5   : > { %s3188_s17 = smov %s2482_s18  ;;  %s3189_s18 = smov %s2631_s12 }
 0x1c6   : > { %s3190_s19 = smov %s2490_s20  ;;  %s3191_s20 = smov %s2615_s7 }
 0x1c7   : > { %s3192_s21 = smov %s2502_s23  ;;  %s3193_s22 = smov %s2506_s24 }
 0x1c8   : > { %s3194_s23 = smov %s3184_s29  ;;  %13 = sbr.rel (!%p11_p7) target bundleno = 8 (0x8), region = 235 }
 0x1c9   : > { %s3195_s24 = smov %s3185_s10 }

// kernel: _lambda_.73
= control target key start
LH: loop header
LB: loop body
LE: loop exit
PB: predicated region body
PF: predicated region fallthrough
CT: control target
= control target key end

     0   :  { %13 = vsyncpa [#allocation3], 0  ;;  %s2975_s0 = inlined_call_operand.vmem [shape: f32[8,1024], index: 0, kind: input, shape index: {}]   ;;  %s2976_s1 = inlined_call_operand.vmem [shape: bf16[1024,256], index: 1, kind: input, shape index: {}]   ;;  %s2977_s2 = inlined_call_operand.vmem [shape: f32[1,256], index: 2, kind: input, shape index: {}]   ;;  %s2978_s3 = inlined_call_operand.vmem [shape: bf16[256,128], index: 3, kind: input, shape index: {}]   ;;  %s2979_s4 = inlined_call_operand.vmem [shape: f32[1,128], index: 4, kind: input, shape index: {}]   ;;  %s2980_s5 = inlined_call_operand.hbm [shape: f32[8,256], index: 5, kind: output, shape index: {0}]   ;;  %s2981_s6 = inlined_call_operand.hbm [shape: f32[8,128], index: 6, kind: output, shape index: {1}]   ;;  %s2982_s7 = inlined_call_operand.hbm [shape: f32[8,128], index: 7, kind: output, shape index: {2}]  }
   0x1   :  { %v1299_v0 = vld [vmem:[%s2976_s1 + $0x70] sm:$0xf]  ;;  %v1832_v1 = vld [vmem:[%s2976_s1 + $0x74] sm:$0xf0]  ;;  %v1291_v11 = vld [vmem:[%s2976_s1 + $0x60] sm:$0xf] }
   0x2   :  { %v1363_v2 = vld [vmem:[%s2976_s1 + $0xf0] sm:$0xf]  ;;  %v1300_v3 = vor.u32 %v1832_v1, %v1299_v0  ;;  %v1848_v4 = vld [vmem:[%s2976_s1 + $0xf4] sm:$0xf0]  ;;  %v1830_v13 = vld [vmem:[%s2976_s1 + $0x64] sm:$0xf0] }
   0x3   :  { %v1427_v5 = vld [vmem:[%s2976_s1 + $0x170] sm:$0xf]  ;;  %v1864_v6 = vld [vmem:[%s2976_s1 + $0x174] sm:$0xf0]  ;;  %v1364_v7 = vor.u32 %v1848_v4, %v1363_v2  ;;  %v1355_v14 = vld [vmem:[%s2976_s1 + $0xe0] sm:$0xf]  ;;  %v1292_v16 = vor.u32 %v1830_v13, %v1291_v11 }
   0x4   :  { %v1428_v8 = vor.u32 %v1864_v6, %v1427_v5  ;;  %v1491_v9 = vld [vmem:[%s2976_s1 + $0x1f0] sm:$0xf]  ;;  %v1880_v10 = vld [vmem:[%s2976_s1 + $0x1f4] sm:$0xf0]  ;;  %815 = vmatpush.bf16.msra.mxu0 %v1300_v3  ;;  %v1846_v15 = vld [vmem:[%s2976_s1 + $0xe4] sm:$0xf0] }
   0x5   :  { %v1492_v12 = vor.u32 %v1880_v10, %v1491_v9  ;;  %828 = vmatpush.bf16.msra.mxu1 %v1364_v7  ;;  %v1356_v17 = vor.u32 %v1846_v15, %v1355_v14  ;;  %v1419_v18 = vld [vmem:[%s2976_s1 + $0x160] sm:$0xf]  ;;  %v1862_v19 = vld [vmem:[%s2976_s1 + $0x164] sm:$0xf0]  ;;  %v1283_v23 = vld [vmem:[%s2976_s1 + $0x50] sm:$0xf] }
   0x6   :  { %841 = vmatpush.bf16.msra.mxu2 %v1428_v8  ;;  %v1483_v20 = vld [vmem:[%s2976_s1 + $0x1e0] sm:$0xf]  ;;  %v1420_v21 = vor.u32 %v1862_v19, %v1419_v18  ;;  %v1878_v22 = vld [vmem:[%s2976_s1 + $0x1e4] sm:$0xf0]  ;;  %v1828_v24 = vld [vmem:[%s2976_s1 + $0x54] sm:$0xf0] }
   0x7   :  { %854 = vmatpush.bf16.msra.mxu3 %v1492_v12  ;;  %v1484_v25 = vor.u32 %v1878_v22, %v1483_v20  ;;  %v1347_v26 = vld [vmem:[%s2976_s1 + $0xd0] sm:$0xf]  ;;  %v1844_v27 = vld [vmem:[%s2976_s1 + $0xd4] sm:$0xf0]  ;;  %v1284_v29 = vor.u32 %v1828_v24, %v1283_v23  ;;  %v1275_v35 = vld [vmem:[%s2976_s1 + $0x40] sm:$0xf] }
   0x8   :  { %v1411_v28 = vld [vmem:[%s2976_s1 + $0x150] sm:$0xf]  ;;  %816 = vmatpush.bf16.msra.mxu0 %v1292_v16  ;;  %v1860_v30 = vld [vmem:[%s2976_s1 + $0x154] sm:$0xf0]  ;;  %v1348_v33 = vor.u32 %v1844_v27, %v1347_v26  ;;  %v1826_v36 = vld [vmem:[%s2976_s1 + $0x44] sm:$0xf0] }
   0x9   :  { %v1475_v31 = vld [vmem:[%s2976_s1 + $0x1d0] sm:$0xf]  ;;  %v1876_v32 = vld [vmem:[%s2976_s1 + $0x1d4] sm:$0xf0]  ;;  %829 = vmatpush.bf16.msra.mxu1 %v1356_v17  ;;  %v1412_v34 = vor.u32 %v1860_v30, %v1411_v28  ;;  %v1339_v37 = vld [vmem:[%s2976_s1 + $0xc0] sm:$0xf]  ;;  %v1276_v44 = vor.u32 %v1826_v36, %v1275_v35 }
   0xa   :  { %842 = vmatpush.bf16.msra.mxu2 %v1420_v21  ;;  %v1476_v38 = vor.u32 %v1876_v32, %v1475_v31  ;;  %v1842_v39 = vld [vmem:[%s2976_s1 + $0xc4] sm:$0xf0]  ;;  %v1403_v40 = vld [vmem:[%s2976_s1 + $0x140] sm:$0xf]  ;;  %v1267_v47 = vld [vmem:[%s2976_s1 + $0x30] sm:$0xf] }
   0xb   :  { %855 = vmatpush.bf16.msra.mxu3 %v1484_v25  ;;  %v1858_v41 = vld [vmem:[%s2976_s1 + $0x144] sm:$0xf0]  ;;  %v1467_v42 = vld [vmem:[%s2976_s1 + $0x1c0] sm:$0xf]  ;;  %v1340_v45 = vor.u32 %v1842_v39, %v1339_v37  ;;  %v1824_v48 = vld [vmem:[%s2976_s1 + $0x34] sm:$0xf0] }
   0xc   :  { %v1874_v43 = vld [vmem:[%s2976_s1 + $0x1c4] sm:$0xf0]  ;;  %817 = vmatpush.bf16.msra.mxu0 %v1284_v29  ;;  %v1404_v46 = vor.u32 %v1858_v41, %v1403_v40  ;;  %v1331_v49 = vld [vmem:[%s2976_s1 + $0xb0] sm:$0xf]  ;;  %v1840_v51 = vld [vmem:[%s2976_s1 + $0xb4] sm:$0xf0]  ;;  %v1268_v56 = vor.u32 %v1824_v48, %v1267_v47 }
   0xd   :  { %830 = vmatpush.bf16.msra.mxu1 %v1348_v33  ;;  %v1468_v50 = vor.u32 %v1874_v43, %v1467_v42  ;;  %v1395_v52 = vld [vmem:[%s2976_s1 + $0x130] sm:$0xf]  ;;  %v1856_v53 = vld [vmem:[%s2976_s1 + $0x134] sm:$0xf0]  ;;  %v1332_v57 = vor.u32 %v1840_v51, %v1331_v49  ;;  %v1259_v59 = vld [vmem:[%s2976_s1 + $0x20] sm:$0xf] }
   0xe   :  { %843 = vmatpush.bf16.msra.mxu2 %v1412_v34  ;;  %v1459_v54 = vld [vmem:[%s2976_s1 + $0x1b0] sm:$0xf]  ;;  %v1872_v55 = vld [vmem:[%s2976_s1 + $0x1b4] sm:$0xf0]  ;;  %v1396_v58 = vor.u32 %v1856_v53, %v1395_v52  ;;  %v1822_v60 = vld [vmem:[%s2976_s1 + $0x24] sm:$0xf0] }
   0xf   :  { %856 = vmatpush.bf16.msra.mxu3 %v1476_v38  ;;  %v1323_v61 = vld [vmem:[%s2976_s1 + $0xa0] sm:$0xf]  ;;  %v1460_v62 = vor.u32 %v1872_v55, %v1459_v54  ;;  %v1838_v63 = vld [vmem:[%s2976_s1 + $0xa4] sm:$0xf0]  ;;  %v1260_v4 = vor.u32 %v1822_v60, %v1259_v59  ;;  %v1251_v7 = vld [vmem:[%s2976_s1 + $0x10] sm:$0xf] }
  0x10   :  { %818 = vmatpush.bf16.msra.mxu0 %v1276_v44  ;;  %v1387_v0 = vld [vmem:[%s2976_s1 + $0x120] sm:$0xf]  ;;  %v1854_v1 = vld [vmem:[%s2976_s1 + $0x124] sm:$0xf0]  ;;  %v1324_v5 = vor.u32 %v1838_v63, %v1323_v61  ;;  %v1820_v8 = vld [vmem:[%s2976_s1 + $0x14] sm:$0xf0] }
  0x11   :  { %831 = vmatpush.bf16.msra.mxu1 %v1340_v45  ;;  %v1451_v2 = vld [vmem:[%s2976_s1 + $0x1a0] sm:$0xf]  ;;  %v1870_v3 = vld [vmem:[%s2976_s1 + $0x1a4] sm:$0xf0]  ;;  %v1388_v6 = vor.u32 %v1854_v1, %v1387_v0  ;;  %v1315_v9 = vld [vmem:[%s2976_s1 + $0x90] sm:$0xf]  ;;  %v1252_v16 = vor.u32 %v1820_v8, %v1251_v7 }
  0x12   :  { %844 = vmatpush.bf16.msra.mxu2 %v1404_v46  ;;  %v1452_v10 = vor.u32 %v1870_v3, %v1451_v2  ;;  %v1836_v11 = vld [vmem:[%s2976_s1 + $0x94] sm:$0xf0]  ;;  %v1379_v12 = vld [vmem:[%s2976_s1 + $0x110] sm:$0xf]  ;;  %v1243_v17 = vld [vmem:[%s2976_s1] sm:$0xf] }
  0x13   :  { %857 = vmatpush.bf16.msra.mxu3 %v1468_v50  ;;  %v1852_v13 = vld [vmem:[%s2976_s1 + $0x114] sm:$0xf0]  ;;  %v1443_v14 = vld [vmem:[%s2976_s1 + $0x190] sm:$0xf]  ;;  %v1818_v18 = vld [vmem:[%s2976_s1 + $0x4] sm:$0xf0]  ;;  %v1316_v19 = vor.u32 %v1836_v11, %v1315_v9 }
  0x14   :  { %819 = vmatpush.bf16.msra.mxu0 %v1268_v56  ;;  %v1868_v15 = vld [vmem:[%s2976_s1 + $0x194] sm:$0xf0]  ;;  %v1380_v20 = vor.u32 %v1852_v13, %v1379_v12  ;;  %v1307_v21 = vld [vmem:[%s2976_s1 + $0x80] sm:$0xf]  ;;  %v1834_v22 = vld [vmem:[%s2976_s1 + $0x84] sm:$0xf0]  ;;  %v1244_v31 = vor.u32 %v1818_v18, %v1243_v17 }
  0x15   :  { %832 = vmatpush.bf16.msra.mxu1 %v1332_v57  ;;  %v1371_v23 = vld [vmem:[%s2976_s1 + $0x100] sm:$0xf]  ;;  %v1444_v24 = vor.u32 %v1868_v15, %v1443_v14  ;;  %v1850_v25 = vld [vmem:[%s2976_s1 + $0x104] sm:$0xf0]  ;;  %v1555_v28 = vld [vmem:[%s2976_s1 + $0x270] sm:$0xf]  ;;  %v1308_v35 = vor.u32 %v1834_v22, %v1307_v21 }
  0x16   :  { %845 = vmatpush.bf16.msra.mxu2 %v1396_v58  ;;  %v1435_v26 = vld [vmem:[%s2976_s1 + $0x180] sm:$0xf]  ;;  %v1866_v27 = vld [vmem:[%s2976_s1 + $0x184] sm:$0xf0]  ;;  %v1896_v29 = vld [vmem:[%s2976_s1 + $0x274] sm:$0xf0]  ;;  %v1372_v36 = vor.u32 %v1850_v25, %v1371_v23 }
  0x17   :  { %858 = vmatpush.bf16.msra.mxu3 %v1460_v62  ;;  %v1619_v30 = vld [vmem:[%s2976_s1 + $0x2f0] sm:$0xf]  ;;  %v1912_v32 = vld [vmem:[%s2976_s1 + $0x2f4] sm:$0xf0]  ;;  %v1436_v39 = vor.u32 %v1866_v27, %v1435_v26  ;;  %v1556_v40 = vor.u32 %v1896_v29, %v1555_v28  ;;  %v1547_v43 = vld [vmem:[%s2976_s1 + $0x260] sm:$0xf] }
  0x18   :  { %820 = vmatpush.bf16.msra.mxu0 %v1260_v4  ;;  %v1683_v33 = vld [vmem:[%s2976_s1 + $0x370] sm:$0xf]  ;;  %v1928_v34 = vld [vmem:[%s2976_s1 + $0x374] sm:$0xf0]  ;;  %v1620_v41 = vor.u32 %v1912_v32, %v1619_v30  ;;  %v1894_v44 = vld [vmem:[%s2976_s1 + $0x264] sm:$0xf0] }
  0x19   :  { %833 = vmatpush.bf16.msra.mxu1 %v1324_v5  ;;  %v1747_v37 = vld [vmem:[%s2976_s1 + $0x3f0] sm:$0xf]  ;;  %v1944_v38 = vld [vmem:[%s2976_s1 + $0x3f4] sm:$0xf0]  ;;  %v1684_v42 = vor.u32 %v1928_v34, %v1683_v33  ;;  %v1611_v45 = vld [vmem:[%s2976_s1 + $0x2e0] sm:$0xf]  ;;  %v1548_v53 = vor.u32 %v1894_v44, %v1547_v43 }
  0x1a   :  { %846 = vmatpush.bf16.msra.mxu2 %v1388_v6  ;;  %v1748_v46 = vor.u32 %v1944_v38, %v1747_v37  ;;  %v1910_v47 = vld [vmem:[%s2976_s1 + $0x2e4] sm:$0xf0]  ;;  %v1675_v48 = vld [vmem:[%s2976_s1 + $0x360] sm:$0xf]  ;;  %v27_v52 = vld [vmem:[%s2975_s0 + $0x10] sm:$0xff] }
  0x1b   :  { %859 = vmatpush.bf16.msra.mxu3 %v1452_v10  ;;  %v1926_v49 = vld [vmem:[%s2976_s1 + $0x364] sm:$0xf0]  ;;  %v1739_v50 = vld [vmem:[%s2976_s1 + $0x3e0] sm:$0xf]  ;;  %v1539_v54 = vld [vmem:[%s2976_s1 + $0x250] sm:$0xf]  ;;  %v2340_v57 = vpack.c.bf16 %v27_v52, %v27_v52  ;;  %v1612_v58 = vor.u32 %v1910_v47, %v1611_v45 }
  0x1c   :  { %821 = vmatpush.bf16.msra.mxu0 %v1252_v16  ;;  %v1942_v51 = vld [vmem:[%s2976_s1 + $0x3e4] sm:$0xf0]  ;;  %v1892_v55 = vld [vmem:[%s2976_s1 + $0x254] sm:$0xf0]  ;;  %v1603_v56 = vld [vmem:[%s2976_s1 + $0x2d0] sm:$0xf]  ;;  %v1676_v59 = vor.u32 %v1926_v49, %v1675_v48 }
  0x1d   :  { %834 = vmatpush.bf16.msra.mxu1 %v1316_v19  ;;  %v1908_v60 = vld [vmem:[%s2976_s1 + $0x2d4] sm:$0xf0]  ;;  %v1667_v61 = vld [vmem:[%s2976_s1 + $0x350] sm:$0xf]  ;;  %v1740_v63 = vor.u32 %v1942_v51, %v1739_v50  ;;  %v25_v0 = vld [vmem:[%s2975_s0] sm:$0xff]  ;;  %v1540_v8 = vor.u32 %v1892_v55, %v1539_v54 }
  0x1e   :  { %847 = vmatpush.bf16.msra.mxu2 %v1380_v20  ;;  %v1924_v62 = vld [vmem:[%s2976_s1 + $0x354] sm:$0xf0]  ;;  %v26_v2 = vld [vmem:[%s2975_s0 + $0x8] sm:$0xff]  ;;  %v1731_v3 = vld [vmem:[%s2976_s1 + $0x3d0] sm:$0xf]  ;;  %v2367_v5 = vpack.c.bf16 %v25_v0, %v25_v0  ;;  %v1604_v9 = vor.u32 %v1908_v60, %v1603_v56 }
  0x1f   :  { %860 = vmatpush.bf16.msra.mxu3 %v1444_v24  ;;  %v28_v1 = vld [vmem:[%s2975_s0 + $0x18] sm:$0xff]  ;;  %v2371_v7 = vpack.c.bf16 %v26_v2, %v26_v2  ;;  %v1668_v10 = vor.u32 %v1924_v62, %v1667_v61  ;;  %v1531_v11 = vld [vmem:[%s2976_s1 + $0x240] sm:$0xf]  ;;  %v1890_v12 = vld [vmem:[%s2976_s1 + $0x244] sm:$0xf0] }
  0x20   :  { %822 = vmatpush.bf16.msra.mxu0 %v1244_v31  ;;  %v1940_v4 = vld [vmem:[%s2976_s1 + $0x3d4] sm:$0xf0]  ;;  %v2369_v6 = vpack.c.bf16 %v28_v1, %v28_v1  ;;  %v1595_v13 = vld [vmem:[%s2976_s1 + $0x2c0] sm:$0xf]  ;;  %v1906_v15 = vld [vmem:[%s2976_s1 + $0x2c4] sm:$0xf0]  ;;  %v1532_v20 = vor.u32 %v1890_v12, %v1531_v11 }
  0x21   :  { %835 = vmatpush.bf16.msra.mxu1 %v1308_v35  ;;  %v1732_v14 = vor.u32 %v1940_v4, %v1731_v3  ;;  %v1659_v16 = vld [vmem:[%s2976_s1 + $0x340] sm:$0xf]  ;;  %v1922_v17 = vld [vmem:[%s2976_s1 + $0x344] sm:$0xf0]  ;;  %v1596_v21 = vor.u32 %v1906_v15, %v1595_v13  ;;  %v1523_v23 = vld [vmem:[%s2976_s1 + $0x230] sm:$0xf] }
  0x22   :  { %848 = vmatpush.bf16.msra.mxu2 %v1372_v36  ;;  %v1723_v18 = vld [vmem:[%s2976_s1 + $0x3c0] sm:$0xf]  ;;  %v1938_v19 = vld [vmem:[%s2976_s1 + $0x3c4] sm:$0xf0]  ;;  %v1660_v22 = vor.u32 %v1922_v17, %v1659_v16  ;;  %v1888_v24 = vld [vmem:[%s2976_s1 + $0x234] sm:$0xf0] }
  0x23   :  { %861 = vmatpush.bf16.msra.mxu3 %v1436_v39  ;;  %823 = vmatmul.bf16.vlgmr.msra.gmra.mxu0 %v2367_v5  ;;  %v1587_v25 = vld [vmem:[%s2976_s1 + $0x2b0] sm:$0xf]  ;;  %v1724_v26 = vor.u32 %v1938_v19, %v1723_v18  ;;  %v1904_v27 = vld [vmem:[%s2976_s1 + $0x2b4] sm:$0xf0]  ;;  %v1524_v32 = vor.u32 %v1888_v24, %v1523_v23  ;;  %v1515_v35 = vld [vmem:[%s2976_s1 + $0x220] sm:$0xf] }
  0x24   :  { %867 = vmatpush.bf16.msrb.mxu0 %v1556_v40  ;;  %836 = vmatmul.bf16.vlgmr.msra.gmra.mxu1 %v2371_v7  ;;  %v1651_v28 = vld [vmem:[%s2976_s1 + $0x330] sm:$0xf]  ;;  %v1920_v29 = vld [vmem:[%s2976_s1 + $0x334] sm:$0xf0]  ;;  %v1588_v33 = vor.u32 %v1904_v27, %v1587_v25  ;;  %v1886_v36 = vld [vmem:[%s2976_s1 + $0x224] sm:$0xf0] }
  0x25   :  { %880 = vmatpush.bf16.msrb.mxu1 %v1620_v41  ;;  %849 = vmatmul.bf16.vlgmr.msra.gmra.mxu2 %v2340_v57  ;;  %v1715_v30 = vld [vmem:[%s2976_s1 + $0x3b0] sm:$0xf]  ;;  %v1936_v31 = vld [vmem:[%s2976_s1 + $0x3b4] sm:$0xf0]  ;;  %v1652_v34 = vor.u32 %v1920_v29, %v1651_v28  ;;  %v1579_v37 = vld [vmem:[%s2976_s1 + $0x2a0] sm:$0xf]  ;;  %v1516_v44 = vor.u32 %v1886_v36, %v1515_v35 }
  0x26   :  { %893 = vmatpush.bf16.msrb.mxu2 %v1684_v42  ;;  %862 = vmatmul.bf16.vlgmr.msra.gmra.mxu3 %v2369_v6  ;;  %v1716_v38 = vor.u32 %v1936_v31, %v1715_v30  ;;  %v1902_v39 = vld [vmem:[%s2976_s1 + $0x2a4] sm:$0xf0]  ;;  %v1643_v40 = vld [vmem:[%s2976_s1 + $0x320] sm:$0xf]  ;;  %v1507_v47 = vld [vmem:[%s2976_s1 + $0x210] sm:$0xf] }
  0x27   :  { %906 = vmatpush.bf16.msrb.mxu3 %v1748_v46  ;;  %v1918_v41 = vld [vmem:[%s2976_s1 + $0x324] sm:$0xf0]  ;;  %v1707_v42 = vld [vmem:[%s2976_s1 + $0x3a0] sm:$0xf]  ;;  %v1580_v45 = vor.u32 %v1902_v39, %v1579_v37  ;;  %v1884_v48 = vld [vmem:[%s2976_s1 + $0x214] sm:$0xf0] }
  0x28   :  { %868 = vmatpush.bf16.msrb.mxu0 %v1548_v53  ;;  %v1934_v43 = vld [vmem:[%s2976_s1 + $0x3a4] sm:$0xf0]  ;;  %v1644_v46 = vor.u32 %v1918_v41, %v1643_v40  ;;  %v1571_v49 = vld [vmem:[%s2976_s1 + $0x290] sm:$0xf]  ;;  %v1900_v51 = vld [vmem:[%s2976_s1 + $0x294] sm:$0xf0]  ;;  %v1508_v56 = vor.u32 %v1884_v48, %v1507_v47 }
  0x29   :  { %881 = vmatpush.bf16.msrb.mxu1 %v1612_v58  ;;  %v1708_v50 = vor.u32 %v1934_v43, %v1707_v42  ;;  %v1635_v52 = vld [vmem:[%s2976_s1 + $0x310] sm:$0xf]  ;;  %v1916_v53 = vld [vmem:[%s2976_s1 + $0x314] sm:$0xf0]  ;;  %v1499_v58 = vld [vmem:[%s2976_s1 + $0x200] sm:$0xf]  ;;  %v1572_v60 = vor.u32 %v1900_v51, %v1571_v49 }
  0x2a   :  { %894 = vmatpush.bf16.msrb.mxu2 %v1676_v59  ;;  %v1699_v54 = vld [vmem:[%s2976_s1 + $0x390] sm:$0xf]  ;;  %v1932_v55 = vld [vmem:[%s2976_s1 + $0x394] sm:$0xf0]  ;;  %v1882_v59 = vld [vmem:[%s2976_s1 + $0x204] sm:$0xf0]  ;;  %v1636_v61 = vor.u32 %v1916_v53, %v1635_v52 }
  0x2b   :  { %907 = vmatpush.bf16.msrb.mxu3 %v1740_v63  ;;  %v1563_v62 = vld [vmem:[%s2976_s1 + $0x280] sm:$0xf]  ;;  %v1898_v63 = vld [vmem:[%s2976_s1 + $0x284] sm:$0xf0]  ;;  %v1700_v1 = vor.u32 %v1932_v55, %v1699_v54  ;;  %v1500_v11 = vor.u32 %v1882_v59, %v1499_v58  ;;  %v1365_v12 = vld [vmem:[%s2976_s1 + $0xf8] sm:$0xf0] }
  0x2c   :  { %869 = vmatpush.bf16.msrb.mxu0 %v1540_v8  ;;  %v1627_v0 = vld [vmem:[%s2976_s1 + $0x300] sm:$0xf]  ;;  %v1914_v2 = vld [vmem:[%s2976_s1 + $0x304] sm:$0xf0]  ;;  %v1831_v8 = vld [vmem:[%s2976_s1 + $0x74] sm:$0xf]  ;;  %v1564_v15 = vor.u32 %v1898_v63, %v1563_v62 }
  0x2d   :  { %882 = vmatpush.bf16.msrb.mxu1 %v1604_v9  ;;  %v1691_v3 = vld [vmem:[%s2976_s1 + $0x380] sm:$0xf]  ;;  %v1930_v4 = vld [vmem:[%s2976_s1 + $0x384] sm:$0xf0]  ;;  %v1301_v9 = vld [vmem:[%s2976_s1 + $0x78] sm:$0xf0]  ;;  %v1628_v16 = vor.u32 %v1914_v2, %v1627_v0 }
  0x2e   :  { %895 = vmatpush.bf16.msrb.mxu2 %v1668_v10  ;;  %v1847_v10 = vld [vmem:[%s2976_s1 + $0xf4] sm:$0xf]  ;;  %v1493_v18 = vld [vmem:[%s2976_s1 + $0x1f8] sm:$0xf0]  ;;  %v1829_v24 = vld [vmem:[%s2976_s1 + $0x64] sm:$0xf] }
  0x2f   :  { %908 = vmatpush.bf16.msrb.mxu3 %v1732_v14  ;;  %v1863_v13 = vld [vmem:[%s2976_s1 + $0x174] sm:$0xf]  ;;  %v1429_v14 = vld [vmem:[%s2976_s1 + $0x178] sm:$0xf0]  ;;  %v1368_v25 = vor.u32 %v1847_v10, %v1365_v12  ;;  %v1293_v27 = vld [vmem:[%s2976_s1 + $0x68] sm:$0xf0] }
  0x30   :  { %870 = vmatpush.bf16.msrb.mxu0 %v1532_v20  ;;  %v1879_v17 = vld [vmem:[%s2976_s1 + $0x1f4] sm:$0xf]  ;;  %v1692_v20 = vor.u32 %v1930_v4, %v1691_v3  ;;  %v32_v23 = vld [vmem:[%s2975_s0 + $0x38] sm:$0xff]  ;;  %v1845_v28 = vld [vmem:[%s2976_s1 + $0xe4] sm:$0xf]  ;;  %v1296_v39 = vor.u32 %v1829_v24, %v1293_v27 }
  0x31   :  { %883 = vmatpush.bf16.msrb.mxu1 %v1596_v21  ;;  %v31_v19 = vld [vmem:[%s2975_s0 + $0x30] sm:$0xff]  ;;  %v1304_v21 = vor.u32 %v1831_v8, %v1301_v9  ;;  %v30_v29 = vld [vmem:[%s2975_s0 + $0x28] sm:$0xff]  ;;  %v1496_v30 = vor.u32 %v1879_v17, %v1493_v18  ;;  %v2554_v36 = vpack.c.bf16 %v32_v23, %v32_v23  ;;  %v1877_v37 = vld [vmem:[%s2976_s1 + $0x1e4] sm:$0xf] }
  0x32   :  { %896 = vmatpush.bf16.msrb.mxu2 %v1660_v22  ;;  %v29_v22 = vld [vmem:[%s2975_s0 + $0x20] sm:$0xff]  ;;  %v2541_v31 = vpack.c.bf16 %v31_v19, %v31_v19  ;;  %v2562_v40 = vpack.c.bf16 %v30_v29, %v30_v29  ;;  %v1827_v43 = vld [vmem:[%s2976_s1 + $0x54] sm:$0xf]  ;;  %v1349_v47 = vld [vmem:[%s2976_s1 + $0xd8] sm:$0xf0] }
  0x33   :  { %909 = vmatpush.bf16.msrb.mxu3 %v1724_v26  ;;  %v1432_v26 = vor.u32 %v1863_v13, %v1429_v14  ;;  %v2552_v35 = vpack.c.bf16 %v29_v22, %v29_v22  ;;  %v1859_v48 = vld [vmem:[%s2976_s1 + $0x154] sm:$0xf]  ;;  %v1413_v49 = vld [vmem:[%s2976_s1 + $0x158] sm:$0xf0]  ;;  %v1825_v55 = vld [vmem:[%s2976_s1 + $0x44] sm:$0xf] }
  0x34   :  { %871 = vmatpush.bf16.msrb.mxu0 %v1524_v32  ;;  %v1357_v32 = vld [vmem:[%s2976_s1 + $0xe8] sm:$0xf0]  ;;  %v1477_v51 = vld [vmem:[%s2976_s1 + $0x1d8] sm:$0xf0]  ;;  %v1416_v54 = vor.u32 %v1859_v48, %v1413_v49  ;;  %v1841_v58 = vld [vmem:[%s2976_s1 + $0xc4] sm:$0xf] }
  0x35   :  { %884 = vmatpush.bf16.msrb.mxu1 %v1588_v33  ;;  %v1861_v33 = vld [vmem:[%s2976_s1 + $0x164] sm:$0xf]  ;;  %v1360_v41 = vor.u32 %v1845_v28, %v1357_v32  ;;  %v1405_v62 = vld [vmem:[%s2976_s1 + $0x148] sm:$0xf0]  ;;  %v1823_v4 = vld [vmem:[%s2976_s1 + $0x34] sm:$0xf] }
  0x36   :  { %897 = vmatpush.bf16.msrb.mxu2 %v1652_v34  ;;  %v1421_v34 = vld [vmem:[%s2976_s1 + $0x168] sm:$0xf0]  ;;  %v1873_v63 = vld [vmem:[%s2976_s1 + $0x1c4] sm:$0xf]  ;;  %v1269_v8 = vld [vmem:[%s2976_s1 + $0x38] sm:$0xf0] }
  0x37   :  { %910 = vmatpush.bf16.msrb.mxu3 %v1716_v38  ;;  %v1485_v38 = vld [vmem:[%s2976_s1 + $0x1e8] sm:$0xf0]  ;;  %v1424_v42 = vor.u32 %v1861_v33, %v1421_v34  ;;  %v1839_v9 = vld [vmem:[%s2976_s1 + $0xb4] sm:$0xf]  ;;  %v1397_v13 = vld [vmem:[%s2976_s1 + $0x138] sm:$0xf0] }
  0x38   :  { %872 = vmatpush.bf16.msrb.mxu0 %v1516_v44  ;;  %v1285_v44 = vld [vmem:[%s2976_s1 + $0x58] sm:$0xf0]  ;;  %v1469_v0 = vld [vmem:[%s2976_s1 + $0x1c8] sm:$0xf0]  ;;  %v1855_v12 = vld [vmem:[%s2976_s1 + $0x134] sm:$0xf] }
  0x39   :  { %885 = vmatpush.bf16.msrb.mxu1 %v1580_v45  ;;  %v1843_v45 = vld [vmem:[%s2976_s1 + $0xd4] sm:$0xf]  ;;  %v1288_v52 = vor.u32 %v1827_v43, %v1285_v44  ;;  %v1472_v10 = vor.u32 %v1873_v63, %v1469_v0  ;;  %v1400_v18 = vor.u32 %v1855_v12, %v1397_v13  ;;  %v1821_v19 = vld [vmem:[%s2976_s1 + $0x24] sm:$0xf]  ;;  %v1325_v23 = vld [vmem:[%s2976_s1 + $0xa8] sm:$0xf0] }
  0x3a   :  { %898 = vmatpush.bf16.msrb.mxu2 %v1644_v46  ;;  %v1488_v46 = vor.u32 %v1877_v37, %v1485_v38  ;;  %v1352_v53 = vor.u32 %v1843_v45, %v1349_v47  ;;  %v1871_v14 = vld [vmem:[%s2976_s1 + $0x1b4] sm:$0xf]  ;;  %v1853_v24 = vld [vmem:[%s2976_s1 + $0x124] sm:$0xf]  ;;  %v1453_v27 = vld [vmem:[%s2976_s1 + $0x1a8] sm:$0xf0] }
  0x3b   :  { %911 = vmatpush.bf16.msrb.mxu3 %v1708_v50  ;;  %v1875_v50 = vld [vmem:[%s2976_s1 + $0x1d4] sm:$0xf]  ;;  %v1253_v33 = vld [vmem:[%s2976_s1 + $0x18] sm:$0xf0]  ;;  %v1817_v45 = vld [vmem:[%s2976_s1 + $0x4] sm:$0xf] }
  0x3c   :  { %873 = vmatpush.bf16.msrb.mxu0 %v1508_v56  ;;  %v1277_v56 = vld [vmem:[%s2976_s1 + $0x48] sm:$0xf0]  ;;  %v1480_v59 = vor.u32 %v1875_v50, %v1477_v51  ;;  %v1819_v32 = vld [vmem:[%s2976_s1 + $0x14] sm:$0xf]  ;;  %v1317_v38 = vld [vmem:[%s2976_s1 + $0x98] sm:$0xf0] }
  0x3d   :  { %886 = vmatpush.bf16.msrb.mxu1 %v1572_v60  ;;  %v1341_v60 = vld [vmem:[%s2976_s1 + $0xc8] sm:$0xf0]  ;;  %v1835_v34 = vld [vmem:[%s2976_s1 + $0x94] sm:$0xf]  ;;  %v1445_v43 = vld [vmem:[%s2976_s1 + $0x198] sm:$0xf0]  ;;  %v1256_v44 = vor.u32 %v1819_v32, %v1253_v33 }
  0x3e   :  { %899 = vmatpush.bf16.msrb.mxu2 %v1636_v61  ;;  %v1857_v61 = vld [vmem:[%s2976_s1 + $0x144] sm:$0xf]  ;;  %v1344_v2 = vor.u32 %v1841_v58, %v1341_v60 }
  0x3f   :  { %912 = vmatpush.bf16.msrb.mxu3 %v1700_v1  ;;  %v1280_v1 = vor.u32 %v1825_v55, %v1277_v56  ;;  %v1408_v3 = vor.u32 %v1857_v61, %v1405_v62 }
  0x40   :  { %874 = vmatpush.bf16.msrb.mxu0 %v1500_v11  ;;  %v1333_v11 = vld [vmem:[%s2976_s1 + $0xb8] sm:$0xf0] }
  0x41   :  { %887 = vmatpush.bf16.msrb.mxu1 %v1564_v15  ;;  %v1461_v15 = vld [vmem:[%s2976_s1 + $0x1b8] sm:$0xf0]  ;;  %v1336_v17 = vor.u32 %v1839_v9, %v1333_v11 }
  0x42   :  { %900 = vmatpush.bf16.msrb.mxu2 %v1628_v16  ;;  %v1272_v16 = vor.u32 %v1823_v4, %v1269_v8  ;;  %v1464_v22 = vor.u32 %v1871_v14, %v1461_v15 }
  0x43   :  { %913 = vmatpush.bf16.msrb.mxu3 %v1692_v20  ;;  %875 = vmatmul.bf16.vlgmr.msrb.gmra.mxu0 %v2552_v35  ;;  %v1261_v20 = vld [vmem:[%s2976_s1 + $0x28] sm:$0xf0] }
  0x44   :  { %919 = vmatpush.bf16.msra.mxu0 %v1304_v21  ;;  %888 = vmatmul.bf16.vlgmr.msrb.gmra.mxu1 %v2562_v40  ;;  %v1837_v21 = vld [vmem:[%s2976_s1 + $0xa4] sm:$0xf]  ;;  %v1264_v28 = vor.u32 %v1821_v19, %v1261_v20 }
  0x45   :  { %932 = vmatpush.bf16.msra.mxu1 %v1368_v25  ;;  %901 = vmatmul.bf16.vlgmr.msrb.gmra.mxu2 %v2541_v31  ;;  %v1389_v25 = vld [vmem:[%s2976_s1 + $0x128] sm:$0xf0]  ;;  %v1328_v29 = vor.u32 %v1837_v21, %v1325_v23 }
  0x46   :  { %945 = vmatpush.bf16.msra.mxu2 %v1432_v26  ;;  %914 = vmatmul.bf16.vlgmr.msrb.gmra.mxu3 %v2554_v36  ;;  %v1869_v26 = vld [vmem:[%s2976_s1 + $0x1a4] sm:$0xf] }
  0x47   :  { %958 = vmatpush.bf16.msra.mxu3 %v1496_v30  ;;  %v1392_v30 = vor.u32 %v1853_v24, %v1389_v25  ;;  %v1456_v37 = vor.u32 %v1869_v26, %v1453_v27 }
  0x48   :  { %920 = vmatpush.bf16.msra.mxu0 %v1296_v39  ;;  %v1851_v39 = vld [vmem:[%s2976_s1 + $0x114] sm:$0xf] }
  0x49   :  { %933 = vmatpush.bf16.msra.mxu1 %v1360_v41  ;;  %v1381_v41 = vld [vmem:[%s2976_s1 + $0x118] sm:$0xf0] }
  0x4a   :  { %946 = vmatpush.bf16.msra.mxu2 %v1424_v42  ;;  %v1867_v42 = vld [vmem:[%s2976_s1 + $0x194] sm:$0xf] }
  0x4b   :  { %959 = vmatpush.bf16.msra.mxu3 %v1488_v46  ;;  %v1245_v46 = vld [vmem:[%s2976_s1 + $0x8] sm:$0xf0] }
  0x4c   :  { %921 = vmatpush.bf16.msra.mxu0 %v1288_v52 }
  0x4d   :  { %934 = vmatpush.bf16.msra.mxu1 %v1352_v53 }
  0x4e   :  { %947 = vmatpush.bf16.msra.mxu2 %v1416_v54 }
  0x4f   :  { %960 = vmatpush.bf16.msra.mxu3 %v1480_v59 }
  0x50   :  { %922 = vmatpush.bf16.msra.mxu0 %v1280_v1 }
  0x51   :  { %935 = vmatpush.bf16.msra.mxu1 %v1344_v2 }
  0x52   :  { %948 = vmatpush.bf16.msra.mxu2 %v1408_v3 }
  0x53   :  { %961 = vmatpush.bf16.msra.mxu3 %v1472_v10 }
  0x54   :  { %923 = vmatpush.bf16.msra.mxu0 %v1272_v16 }
  0x55   :  { %936 = vmatpush.bf16.msra.mxu1 %v1336_v17 }
  0x56   :  { %949 = vmatpush.bf16.msra.mxu2 %v1400_v18 }
  0x57   :  { %962 = vmatpush.bf16.msra.mxu3 %v1464_v22 }
  0x58   :  { %924 = vmatpush.bf16.msra.mxu0 %v1264_v28 }
  0x59   :  { %14 = vsyncpa [#allocation5], 0  ;;  %937 = vmatpush.bf16.msra.mxu1 %v1328_v29  ;;  %v1320_v47 = vor.u32 %v1835_v34, %v1317_v38  ;;  %v1384_v48 = vor.u32 %v1851_v39, %v1381_v41  ;;  %v1833_v49 = vld [vmem:[%s2976_s1 + $0x84] sm:$0xf]  ;;  %v1309_v50 = vld [vmem:[%s2976_s1 + $0x88] sm:$0xf0]  ;;  %v1448_v52 = vor.u32 %v1867_v42, %v1445_v43  ;;  %v1248_v60 = vor.u32 %v1817_v45, %v1245_v46 }
  0x5a   :  { %950 = vmatpush.bf16.msra.mxu2 %v1392_v30  ;;  %v1849_v51 = vld [vmem:[%s2976_s1 + $0x104] sm:$0xf]  ;;  %v1373_v53 = vld [vmem:[%s2976_s1 + $0x108] sm:$0xf0]  ;;  %v1895_v56 = vld [vmem:[%s2976_s1 + $0x274] sm:$0xf]  ;;  %v1312_v0 = vor.u32 %v1833_v49, %v1309_v50 }
  0x5b   :  { %963 = vmatpush.bf16.msra.mxu3 %v1456_v37  ;;  %v1865_v54 = vld [vmem:[%s2976_s1 + $0x184] sm:$0xf]  ;;  %v1437_v55 = vld [vmem:[%s2976_s1 + $0x188] sm:$0xf0]  ;;  %v1557_v58 = vld [vmem:[%s2976_s1 + $0x278] sm:$0xf0]  ;;  %v1376_v1 = vor.u32 %v1849_v51, %v1373_v53 }
  0x5c   :  { %v1911_v59 = vld [vmem:[%s2976_s1 + $0x2f4] sm:$0xf]  ;;  %925 = vmatpush.bf16.msra.mxu0 %v1256_v44  ;;  %v1621_v61 = vld [vmem:[%s2976_s1 + $0x2f8] sm:$0xf0]  ;;  %v1440_v4 = vor.u32 %v1865_v54, %v1437_v55  ;;  %v1560_v8 = vor.u32 %v1895_v56, %v1557_v58  ;;  %v1893_v11 = vld [vmem:[%s2976_s1 + $0x264] sm:$0xf] }
  0x5d   :  { %v1927_v62 = vld [vmem:[%s2976_s1 + $0x374] sm:$0xf]  ;;  %v1685_v63 = vld [vmem:[%s2976_s1 + $0x378] sm:$0xf0]  ;;  %938 = vmatpush.bf16.msra.mxu1 %v1320_v47  ;;  %v1624_v9 = vor.u32 %v1911_v59, %v1621_v61  ;;  %v1549_v12 = vld [vmem:[%s2976_s1 + $0x268] sm:$0xf0] }
  0x5e   :  { %951 = vmatpush.bf16.msra.mxu2 %v1384_v48  ;;  %v1943_v2 = vld [vmem:[%s2976_s1 + $0x3f4] sm:$0xf]  ;;  %v1749_v3 = vld [vmem:[%s2976_s1 + $0x3f8] sm:$0xf0]  ;;  %v1688_v10 = vor.u32 %v1927_v62, %v1685_v63  ;;  %v1909_v13 = vld [vmem:[%s2976_s1 + $0x2e4] sm:$0xf]  ;;  %v1552_v20 = vor.u32 %v1893_v11, %v1549_v12 }
  0x5f   :  { %964 = vmatpush.bf16.msra.mxu3 %v1448_v52  ;;  %v1752_v14 = vor.u32 %v1943_v2, %v1749_v3  ;;  %v1613_v15 = vld [vmem:[%s2976_s1 + $0x2e8] sm:$0xf0]  ;;  %v1925_v16 = vld [vmem:[%s2976_s1 + $0x364] sm:$0xf]  ;;  %v1891_v23 = vld [vmem:[%s2976_s1 + $0x254] sm:$0xf] }
  0x60   :  { %926 = vmatpush.bf16.msra.mxu0 %v1248_v60  ;;  %v1677_v17 = vld [vmem:[%s2976_s1 + $0x368] sm:$0xf0]  ;;  %v1941_v18 = vld [vmem:[%s2976_s1 + $0x3e4] sm:$0xf]  ;;  %v1616_v21 = vor.u32 %v1909_v13, %v1613_v15  ;;  %v1541_v24 = vld [vmem:[%s2976_s1 + $0x258] sm:$0xf0] }
  0x61   :  { %939 = vmatpush.bf16.msra.mxu1 %v1312_v0  ;;  %v1741_v19 = vld [vmem:[%s2976_s1 + $0x3e8] sm:$0xf0]  ;;  %v1680_v22 = vor.u32 %v1925_v16, %v1677_v17  ;;  %v1907_v25 = vld [vmem:[%s2976_s1 + $0x2d4] sm:$0xf]  ;;  %v1605_v27 = vld [vmem:[%s2976_s1 + $0x2d8] sm:$0xf0]  ;;  %v1544_v32 = vor.u32 %v1891_v23, %v1541_v24 }
  0x62   :  { %952 = vmatpush.bf16.msra.mxu2 %v1376_v1  ;;  %v1744_v26 = vor.u32 %v1941_v18, %v1741_v19  ;;  %v1923_v28 = vld [vmem:[%s2976_s1 + $0x354] sm:$0xf]  ;;  %v1669_v29 = vld [vmem:[%s2976_s1 + $0x358] sm:$0xf0]  ;;  %v1608_v33 = vor.u32 %v1907_v25, %v1605_v27  ;;  %v1889_v37 = vld [vmem:[%s2976_s1 + $0x244] sm:$0xf] }
  0x63   :  { %965 = vmatpush.bf16.msra.mxu3 %v1440_v4  ;;  %v1939_v30 = vld [vmem:[%s2976_s1 + $0x3d4] sm:$0xf]  ;;  %927 = vmatmul.bf16.vlgmr.msra.gmra.mxu0 %v2367_v5  ;;  %v1672_v34 = vor.u32 %v1923_v28, %v1669_v29  ;;  %v1533_v38 = vld [vmem:[%s2976_s1 + $0x248] sm:$0xf0]  ;;  %v1905_v5 = vld [vmem:[%s2976_s1 + $0x2c4] sm:$0xf] }
  0x64   :  { %971 = vmatpush.bf16.msrb.mxu0 %v1560_v8  ;;  %940 = vmatmul.bf16.vlgmr.msra.gmra.mxu1 %v2371_v7  ;;  %v1597_v7 = vld [vmem:[%s2976_s1 + $0x2c8] sm:$0xf0]  ;;  %v1921_v39 = vld [vmem:[%s2976_s1 + $0x344] sm:$0xf]  ;;  %v1536_v44 = vor.u32 %v1889_v37, %v1533_v38  ;;  %v1887_v47 = vld [vmem:[%s2976_s1 + $0x234] sm:$0xf] }
  0x65   :  { %984 = vmatpush.bf16.msrb.mxu1 %v1624_v9  ;;  %953 = vmatmul.bf16.vlgmr.msra.gmra.mxu2 %v2340_v57  ;;  %v1733_v57 = vld [vmem:[%s2976_s1 + $0x3d8] sm:$0xf0]  ;;  %v1661_v41 = vld [vmem:[%s2976_s1 + $0x348] sm:$0xf0]  ;;  %v1937_v42 = vld [vmem:[%s2976_s1 + $0x3c4] sm:$0xf]  ;;  %v1600_v45 = vor.u32 %v1905_v5, %v1597_v7 }
  0x66   :  { %997 = vmatpush.bf16.msrb.mxu2 %v1688_v10  ;;  %966 = vmatmul.bf16.vlgmr.msra.gmra.mxu3 %v2369_v6  ;;  %v1736_v6 = vor.u32 %v1939_v30, %v1733_v57  ;;  %v1725_v43 = vld [vmem:[%s2976_s1 + $0x3c8] sm:$0xf0]  ;;  %v1664_v46 = vor.u32 %v1921_v39, %v1661_v41  ;;  %v1525_v48 = vld [vmem:[%s2976_s1 + $0x238] sm:$0xf0]  ;;  %v1903_v49 = vld [vmem:[%s2976_s1 + $0x2b4] sm:$0xf] }
  0x67   :  { %1010 = vmatpush.bf16.msrb.mxu3 %v1752_v14  ;;  %v1728_v50 = vor.u32 %v1937_v42, %v1725_v43  ;;  %v1589_v51 = vld [vmem:[%s2976_s1 + $0x2b8] sm:$0xf0]  ;;  %v1919_v52 = vld [vmem:[%s2976_s1 + $0x334] sm:$0xf]  ;;  %v1528_v56 = vor.u32 %v1887_v47, %v1525_v48  ;;  %v1885_v60 = vld [vmem:[%s2976_s1 + $0x224] sm:$0xf] }
  0x68   :  { %972 = vmatpush.bf16.msrb.mxu0 %v1552_v20  ;;  %v1653_v53 = vld [vmem:[%s2976_s1 + $0x338] sm:$0xf0]  ;;  %v1935_v54 = vld [vmem:[%s2976_s1 + $0x3b4] sm:$0xf]  ;;  %v1592_v58 = vor.u32 %v1903_v49, %v1589_v51  ;;  %v1517_v61 = vld [vmem:[%s2976_s1 + $0x228] sm:$0xf0] }
  0x69   :  { %985 = vmatpush.bf16.msrb.mxu1 %v1616_v21  ;;  %v1717_v55 = vld [vmem:[%s2976_s1 + $0x3b8] sm:$0xf0]  ;;  %v1656_v59 = vor.u32 %v1919_v52, %v1653_v53  ;;  %v1901_v62 = vld [vmem:[%s2976_s1 + $0x2a4] sm:$0xf]  ;;  %v1581_v0 = vld [vmem:[%s2976_s1 + $0x2a8] sm:$0xf0]  ;;  %v1520_v8 = vor.u32 %v1885_v60, %v1517_v61 }
  0x6a   :  { %998 = vmatpush.bf16.msrb.mxu2 %v1680_v22  ;;  %v1720_v63 = vor.u32 %v1935_v54, %v1717_v55  ;;  %v1917_v1 = vld [vmem:[%s2976_s1 + $0x324] sm:$0xf]  ;;  %v1645_v2 = vld [vmem:[%s2976_s1 + $0x328] sm:$0xf0]  ;;  %v1584_v9 = vor.u32 %v1901_v62, %v1581_v0  ;;  %v1883_v11 = vld [vmem:[%s2976_s1 + $0x214] sm:$0xf] }
  0x6b   :  { %1011 = vmatpush.bf16.msrb.mxu3 %v1744_v26  ;;  %v1933_v3 = vld [vmem:[%s2976_s1 + $0x3a4] sm:$0xf]  ;;  %v1709_v4 = vld [vmem:[%s2976_s1 + $0x3a8] sm:$0xf0]  ;;  %v1648_v10 = vor.u32 %v1917_v1, %v1645_v2  ;;  %v1509_v12 = vld [vmem:[%s2976_s1 + $0x218] sm:$0xf0] }
  0x6c   :  { %973 = vmatpush.bf16.msrb.mxu0 %v1544_v32  ;;  %v1899_v13 = vld [vmem:[%s2976_s1 + $0x294] sm:$0xf]  ;;  %v1712_v14 = vor.u32 %v1933_v3, %v1709_v4  ;;  %v1573_v15 = vld [vmem:[%s2976_s1 + $0x298] sm:$0xf0]  ;;  %v1512_v20 = vor.u32 %v1883_v11, %v1509_v12  ;;  %v1881_v23 = vld [vmem:[%s2976_s1 + $0x204] sm:$0xf] }
  0x6d   :  { %986 = vmatpush.bf16.msrb.mxu1 %v1608_v33  ;;  %v1915_v16 = vld [vmem:[%s2976_s1 + $0x314] sm:$0xf]  ;;  %v1637_v17 = vld [vmem:[%s2976_s1 + $0x318] sm:$0xf0]  ;;  %v1576_v21 = vor.u32 %v1899_v13, %v1573_v15  ;;  %v1501_v24 = vld [vmem:[%s2976_s1 + $0x208] sm:$0xf0] }
  0x6e   :  { %999 = vmatpush.bf16.msrb.mxu2 %v1672_v34  ;;  %v1931_v18 = vld [vmem:[%s2976_s1 + $0x394] sm:$0xf]  ;;  %v1701_v19 = vld [vmem:[%s2976_s1 + $0x398] sm:$0xf0]  ;;  %v1640_v22 = vor.u32 %v1915_v16, %v1637_v17  ;;  %v1897_v25 = vld [vmem:[%s2976_s1 + $0x284] sm:$0xf]  ;;  %v1504_v32 = vor.u32 %v1881_v23, %v1501_v24 }
  0x6f   :  { %1012 = vmatpush.bf16.msrb.mxu3 %v1736_v6  ;;  %v1704_v26 = vor.u32 %v1931_v18, %v1701_v19  ;;  %v1565_v27 = vld [vmem:[%s2976_s1 + $0x288] sm:$0xf0]  ;;  %v1913_v28 = vld [vmem:[%s2976_s1 + $0x304] sm:$0xf]  ;;  %v1952_v38 = vld [vmem:[%s2978_s3 + $0x38] sm:$0xff]  ;;  %s1201_s23 = sshll.u32 %s2980_s5, 4  ;;  %s1202_s23 = int_to_ptr.hbm [resolvable:$true] %s1201_s23 }
  0x70   :  { %974 = vmatpush.bf16.msrb.mxu0 %v1536_v44  ;;  %v1629_v29 = vld [vmem:[%s2976_s1 + $0x308] sm:$0xf0]  ;;  %v1929_v30 = vld [vmem:[%s2976_s1 + $0x384] sm:$0xf]  ;;  %v1568_v33 = vor.u32 %v1897_v25, %v1565_v27  ;;  %v1951_v5 = vld [vmem:[%s2978_s3 + $0x30] sm:$0xff]  ;;  %s2046_s25 = smov [#allocation4]  }
  0x71   :  { %987 = vmatpush.bf16.msrb.mxu1 %v1600_v45  ;;  %v1693_v57 = vld [vmem:[%s2976_s1 + $0x388] sm:$0xf0]  ;;  %v1632_v34 = vor.u32 %v1913_v28, %v1629_v29  ;;  %v169_v42 = vld [vmem:[%s2977_s2] sm:$0x3]  ;;  %v1956_v11 = vld [vmem:[%s2978_s3 + $0x58] sm:$0xff]  ;;  %s1210_s26 = sshll.u32 %s2046_s25, 4  ;;  %s1211_s26 = int_to_ptr.vmem [resolvable:$true] %s1210_s26 }
  0x72   :  { %1000 = vmatpush.bf16.msrb.mxu2 %v1664_v46  ;;  %v1696_v37 = vor.u32 %v1929_v30, %v1693_v57  ;;  %v1950_v6 = vld [vmem:[%s2978_s3 + $0x28] sm:$0xff]  ;;  %v1945_v43 = vld [vmem:[%s2978_s3] sm:$0xff]  ;;  %v171_v45 = vperm.slane %v169_v42, 0  ;;  %v1955_v12 = vld [vmem:[%s2978_s3 + $0x50] sm:$0xff]  ;;  %s1212_s2 = sshll.u32 %s2981_s6, 4  ;;  %s1223_s6 = sshll.u32 %s2982_s7, 4  ;;  %s1213_s2 = int_to_ptr.hbm [resolvable:$true] %s1212_s2  ;;  %s1224_s6 = int_to_ptr.hbm [resolvable:$true] %s1223_s6 }
  0x73   :  { %1013 = vmatpush.bf16.msrb.mxu3 %v1728_v50  ;;  %v1946_v39 = vld [vmem:[%s2978_s3 + $0x8] sm:$0xff]  ;;  %v1953_v18 = vld [vmem:[%s2978_s3 + $0x40] sm:$0xff] }
  0x74   :  { %975 = vmatpush.bf16.msrb.mxu0 %v1528_v56  ;;  %v1958_v4 = vld [vmem:[%s2978_s3 + $0x68] sm:$0xff] }
  0x75   :  { %988 = vmatpush.bf16.msrb.mxu1 %v1592_v58  ;;  %v1954_v15 = vld [vmem:[%s2978_s3 + $0x48] sm:$0xff] }
  0x76   :  { %1001 = vmatpush.bf16.msrb.mxu2 %v1656_v59  ;;  %v1960_v59 = vld [vmem:[%s2978_s3 + $0x78] sm:$0xff] }
  0x77   :  { %1014 = vmatpush.bf16.msrb.mxu3 %v1720_v63  ;;  %v1959_v63 = vld [vmem:[%s2978_s3 + $0x70] sm:$0xff] }
  0x78   :  { %976 = vmatpush.bf16.msrb.mxu0 %v1520_v8 }
  0x79   :  { %989 = vmatpush.bf16.msrb.mxu1 %v1584_v9 }
  0x7a   :  { %1002 = vmatpush.bf16.msrb.mxu2 %v1648_v10  ;;  %v1957_v10 = vld [vmem:[%s2978_s3 + $0x60] sm:$0xff] }
  0x7b   :  { %1015 = vmatpush.bf16.msrb.mxu3 %v1712_v14 }
  0x7c   :  { %977 = vmatpush.bf16.msrb.mxu0 %v1512_v20 }
  0x7d   :  { %990 = vmatpush.bf16.msrb.mxu1 %v1576_v21  ;;  %v172_v21 = vperm.slane %v169_v42, 1 }
  0x7e   :  { %1003 = vmatpush.bf16.msrb.mxu2 %v1640_v22 }
  0x7f   :  { %1016 = vmatpush.bf16.msrb.mxu3 %v1704_v26 }
  0x80   :  { %978 = vmatpush.bf16.msrb.mxu0 %v1504_v32 }
  0x81   :  { %991 = vmatpush.bf16.msrb.mxu1 %v1568_v33 }
  0x82   :  { %1004 = vmatpush.bf16.msrb.mxu2 %v1632_v34 }
  0x83   :  { %1017 = vmatpush.bf16.msrb.mxu3 %v1696_v37  ;;  %979 = vmatmul.bf16.vlgmr.msrb.gmra.mxu0 %v2552_v35  ;;  %v1949_v35 = vld [vmem:[%s2978_s3 + $0x20] sm:$0xff] }
  0x84   :  { %1159 = vmatpush.bf16.msra.mxu0 %v1952_v38  ;;  %992 = vmatmul.bf16.vlgmr.msrb.gmra.mxu1 %v2562_v40 }
  0x85   :  { %1005 = vmatmul.bf16.vlgmr.msrb.gmra.mxu2 %v2541_v31  ;;  %v1948_v31 = vld [vmem:[%s2978_s3 + $0x18] sm:$0xff]  ;;  %1172 = vmatpush.bf16.msra.mxu1 %v1960_v59 }
  0x86   :  { %1018 = vmatmul.bf16.vlgmr.msrb.gmra.mxu3 %v2554_v36  ;;  %v1947_v36 = vld [vmem:[%s2978_s3 + $0x10] sm:$0xff]  ;;  %s2045_s3 = smov [#allocation2]  }
  0x87   :  { %s1199_s20 = sshll.u32 %s2045_s3, 4  ;;  %s1200_s20 = int_to_ptr.vmem [resolvable:$true] %s1199_s20 }
  0x88   :  { %1160 = vmatpush.bf16.msra.mxu0 %v1951_v5 }
  0x89   :  { %1173 = vmatpush.bf16.msra.mxu1 %v1959_v63 }
  0x8c   :  { %1161 = vmatpush.bf16.msra.mxu0 %v1950_v6 }
  0x8d   :  { %1174 = vmatpush.bf16.msra.mxu1 %v1958_v4 }
  0x90   :  { %1162 = vmatpush.bf16.msra.mxu0 %v1949_v35 }
  0x91   :  { %1175 = vmatpush.bf16.msra.mxu1 %v1957_v10 }
  0x94   :  { %1163 = vmatpush.bf16.msra.mxu0 %v1948_v31 }
  0x95   :  { %1176 = vmatpush.bf16.msra.mxu1 %v1956_v11 }
  0x98   :  { %1164 = vmatpush.bf16.msra.mxu0 %v1947_v36 }
  0x99   :  { %1177 = vmatpush.bf16.msra.mxu1 %v1955_v12 }
  0x9c   :  { %1165 = vmatpush.bf16.msra.mxu0 %v1946_v39 }
  0x9d   :  { %1178 = vmatpush.bf16.msra.mxu1 %v1954_v15 }
  0xa0   :  { %v824_v40 = vpop.f32.mrf.mxu0  ;;  %1166 = vmatpush.bf16.msra.mxu0 %v1945_v43 }
  0xa1   :  { %v837_v7 = vpop.f32.mrf.mxu1  ;;  %v825_v49 = vadd.f32 %v824_v40, %v171_v45  ;;  %1179 = vmatpush.bf16.msra.mxu1 %v1953_v18 }
  0xa3   :  { %v838_v51 = vadd.f32 %v837_v7, %v825_v49  ;;  %v1964_v7 = vld [vmem:[%s2979_s4] ss:$0 sm:$0xff]  ;;  %s2047_s4 = smov [#allocation6]  }
  0xa4   :  { %s1221_s5 = sshll.u32 %s2047_s4, 4  ;;  %s1222_s5 = int_to_ptr.vmem [resolvable:$true] %s1221_s5 }
  0xa8   :  { %v850_v41 = vpop.f32.mrf.mxu2  ;;  %v826_v46 = vpop.f32.mrf.mxu0 }
  0xa9   :  { %v863_v44 = vpop.f32.mrf.mxu3  ;;  %v839_v47 = vpop.f32.mrf.mxu1  ;;  %v851_v52 = vadd.f32 %v850_v41, %v838_v51 }
  0xab   :  { %v864_v53 = vadd.f32 %v863_v44, %v851_v52 }
  0xb0   :  { %v852_v48 = vpop.f32.mrf.mxu2 }
  0xb1   :  { %v865_v50 = vpop.f32.mrf.mxu3 }
  0xc0   :  { %v876_v54 = vpop.f32.mrf.mxu0 }
  0xc1   :  { %v877_v55 = vadd.f32 %v876_v54, %v864_v53  ;;  %v889_v56 = vpop.f32.mrf.mxu1 }
  0xc3   :  { %v890_v58 = vadd.f32 %v889_v56, %v877_v55 }
  0xc8   :  { %v902_v60 = vpop.f32.mrf.mxu2  ;;  %v878_v1 = vpop.f32.mrf.mxu0 }
  0xc9   :  { %v903_v61 = vadd.f32 %v902_v60, %v890_v58  ;;  %v915_v62 = vpop.f32.mrf.mxu3  ;;  %v891_v2 = vpop.f32.mrf.mxu1 }
  0xcb   :  { %v916_v0 = vadd.f32 %v915_v62, %v903_v61 }
  0xcd   :  { %1023 = vst [vmem:[#allocation2] sm:$0xff] %v916_v0  ;;  %v1025_v3 = vpack.c.bf16 %v916_v0, %v916_v0 }
  0xcf   :  { %1167 = vmatmul.bf16.vlgmr.msra.gmra.mxu0 %v1025_v3 }
  0xd0   :  { %v904_v8 = vpop.f32.mrf.mxu2 }
  0xd1   :  { %v917_v9 = vpop.f32.mrf.mxu3 }
  0xe0   :  { %v928_v13 = vpop.f32.mrf.mxu0 }
  0xe1   :  { %v941_v14 = vpop.f32.mrf.mxu1  ;;  %v929_v24 = vadd.f32 %v928_v13, %v172_v21 }
  0xe3   :  { %v942_v25 = vadd.f32 %v941_v14, %v929_v24 }
  0xe8   :  { %v954_v16 = vpop.f32.mrf.mxu2  ;;  %v930_v19 = vpop.f32.mrf.mxu0 }
  0xe9   :  { %v967_v17 = vpop.f32.mrf.mxu3  ;;  %v943_v20 = vpop.f32.mrf.mxu1  ;;  %v955_v26 = vadd.f32 %v954_v16, %v942_v25 }
  0xeb   :  { %v968_v27 = vadd.f32 %v967_v17, %v955_v26 }
  0xf0   :  { %v956_v22 = vpop.f32.mrf.mxu2 }
  0xf1   :  { %v969_v23 = vpop.f32.mrf.mxu3 }
 0x100   :  { %v980_v28 = vpop.f32.mrf.mxu0 }
 0x101   :  { %v993_v29 = vpop.f32.mrf.mxu1  ;;  %v981_v30 = vadd.f32 %v980_v28, %v968_v27 }
 0x103   :  { %v994_v57 = vadd.f32 %v993_v29, %v981_v30 }
 0x108   :  { %v1006_v32 = vpop.f32.mrf.mxu2  ;;  %v982_v37 = vpop.f32.mrf.mxu0 }
 0x109   :  { %v1007_v33 = vadd.f32 %v1006_v32, %v994_v57  ;;  %v1019_v34 = vpop.f32.mrf.mxu3  ;;  %v995_v38 = vpop.f32.mrf.mxu1 }
 0x10b   :  { %v1020_v5 = vadd.f32 %v1019_v34, %v1007_v33 }
 0x10d   :  { %1024 = vst [vmem:[#allocation2 + $0x8] sm:$0xff] %v1020_v5  ;;  %v1026_v6 = vpack.c.bf16 %v1020_v5, %v1020_v5 }
 0x10e   :  { %1204 = dma.vmem_to_hbm [thread:$0]  %s1200_s20, 256, %s1202_s23, [#allocation3]  }
 0x10f   :  { %1180 = vmatmul.bf16.vlgmr.msra.gmra.mxu1 %v1026_v6 }
 0x110   :  { %v1008_v35 = vpop.f32.mrf.mxu2 }
 0x111   :  { %v1021_v31 = vpop.f32.mrf.mxu3 }
 0x14c   :  { %v1168_v36 = vpop.f32.mrf.mxu0 }
 0x14d   :  { %v1169_v39 = vadd.f32 %v1964_v7, %v1168_v36 }
 0x154   :  { %v1170_v40 = vpop.f32.mrf.mxu0 }
 0x18c   :  { %v1181_v41 = vpop.f32.mrf.mxu1 }
 0x18d   :  { %v1182_v42 = vadd.f32 %v1181_v41, %v1169_v39 }
 0x18f   :  { %1185 = vst [vmem:[#allocation4] sm:$0xff] %v1182_v42  ;;  %v1186_v43 = vsub.f32 0.0, %v1182_v42 }
 0x190   :  { %1215 = dma.vmem_to_hbm [thread:$0]  %s1211_s26, 128, %s1213_s2, [#allocation5]  }
 0x191   :  { %v1187_v44 = vmul.f32 1.442695, %v1186_v43 }
 0x193   :  { %1965 = vpow2.f32 %v1187_v44 }
 0x194   :  { %v1183_v45 = vpop.f32.mrf.mxu1 }
 0x199   :  { %v1966_v46 = vpop.eup %1965 }
 0x19a   :  { %v1189_v47 = vadd.f32 1.0, %v1966_v46 }
 0x19c   :  { %1967 = vrcp.f32 %v1189_v47 }
 0x1a2   :  { %v1968_v48 = vpop.eup %1967 }
 0x1a3   :  { %v1191_v49 = vmax.f32 %v1968_v48, 0.0 }
 0x1a5   :  { %v1192_v50 = vmin.f32 %v1191_v49, 1.0 }
 0x1a7   :  { %1193 = vst [vmem:[#allocation6] sm:$0xff] %v1192_v50 }
 0x1a8   :  { %1226 = dma.vmem_to_hbm [thread:$0]  %s1222_s5, 128, %s1224_s6, [#allocation5]  }
 0x1a9   :  { %2041 = dma.done.wait [#allocation3], 256  }
 0x1aa   :  { %2042 = vsyncadd [#allocation3], 4294967040 }
 0x1ab   :  { %2043 = dma.done.wait [#allocation5], 256  }
 0x1ac   :  { %2044 = vsyncadd [#allocation5], 4294967040 }
 0x1ad   :  { %1239 = vsyncpa [#allocation3], 1 }
 0x1ae   :  { %1240 = vsyncpa [#allocation5], 1 }

</bundles_post_ra>
